<compile_context>
chip_gen: v5e
topology: v5e:2x2
jax: 0.10.0
libtpu: 0.0.40
codegen_flags: <defaults>
</compile_context>

<pallas_src>
import jax
import jax.numpy as jnp
from jax import lax
from jax.experimental import pallas as pl
from jax.experimental.pallas import tpu as pltpu


# conv2 tap lane-offsets on the 16-stride padded feature-map grid (ky*16+kx).
_CONV2_OFFS = tuple(ky * 16 + kx for ky in range(3) for kx in range(3))
_FMAP_W = 256   # 16x16 zero-padded 14x14 pooled map, flattened (exactly 2 vregs)
_Z_W = 222      # conv2 output lanes kept (positions h2*16+w2, max valid = 221)
_ZV_W = 205     # pooled-conv2 lanes kept (lattice 32*oh2+2*ow2, max valid = 204)


# ------------------------------ fused kernel --------------------------------

def _cnn_kernel(p1_ref, mask_ref, w1_ref, b1_ref, w2_ref, b2_ref,
                wfc1_ref, bfc1_ref, wfc2_ref, bfc2_ref,
                out_ref, zv_ref):
    f32, bf16 = jnp.float32, jnp.bfloat16
    bt = out_ref.shape[0]

    # ---- per-image conv pipeline: channels on sublanes, 16-stride flat grid on
    #      lanes.  pl.loop keeps code size independent of the batch tile.
    @pl.loop(0, bt)
    def _(b):
        w1 = w1_ref[...]                       # (32, 9)  f32
        b1 = b1_ref[...]                       # (32, 1)  f32
        mask = mask_ref[...]                   # (1, 256) 0/1 border mask
        p = p1_ref[b]                          # (36, 256) f32, row g*9+k

        # conv1 (1->32, 3x3, pad 1): K=9 is far too small for the MXU, so it is
        # 9 VPU broadcast-FMAs per pool-parity group; k-outer so each
        # lane-broadcast of w1[:, k] is materialized once and reused 4x.
        accs = [jnp.zeros((32, _FMAP_W), f32) for _ in range(4)]
        for k in range(9):
            wk = jnp.broadcast_to(w1[:, k:k + 1], (32, _FMAP_W))
            for g in range(4):
                r = g * 9 + k
                accs[g] = accs[g] + wk * p[r:r + 1, :]
        # bias + ReLU + 2x2/2 max-pool (max over the 4 parity groups), then zero
        # the padding ring so fmap is a correctly zero-padded 16x16 map.
        ys = [jnp.maximum(a + b1, 0.0) for a in accs]
        pooled = jnp.maximum(jnp.maximum(ys[0], ys[1]), jnp.maximum(ys[2], ys[3]))
        fmap = (pooled * mask).astype(bf16)    # (32, 256), single bf16 cast

        # conv2 (32->32, 3x3, pad 1): 9 taps fused into one K=288 contraction.
        # slab rows are tap-major (tap*32 + ci), matching the host-side w2 repack.
        slab = jnp.concatenate(
            [fmap[:, o:o + _Z_W] for o in _CONV2_OFFS], axis=0)    # (288, 222) bf16
        z = jnp.dot(w2_ref[...], slab, preferred_element_type=f32) # (32, 222)
        z = jnp.maximum(z + b2_ref[...], 0.0)

        # 2x2/2 max-pool as two shifted VPU maxes on the 16-stride grid; valid
        # pooled values land at lanes 32*oh2 + 2*ow2 (garbage lanes are matched
        # by zero rows of the padded fc1 weight).
        zh = jnp.maximum(z[:, 0:_Z_W - 1], z[:, 1:_Z_W])           # (32, 221)
        zv = jnp.maximum(zh[:, 0:_ZV_W], zh[:, 16:16 + _ZV_W])     # (32, 205)
        zv_ref[b] = zv

    # ---- fc1 (1568->120) + Tanh + fc2 (120->10), batch as the MXU M dimension.
    h = jnp.zeros((bt, 120), jnp.float32)
    for c in range(32):
        zc = zv_ref[:, c, :].astype(jnp.bfloat16)                  # (bt, 205)
        h = h + jnp.dot(zc, wfc1_ref[c], preferred_element_type=jnp.float32)
    h = jnp.tanh(h + bfc1_ref[...])                                # f32 epilogue
    out = jnp.dot(h.astype(jnp.bfloat16), wfc2_ref[...],
                  preferred_element_type=jnp.float32) + bfc2_ref[...]
    out_ref[...] = out


# ------------------------------- host glue ----------------------------------

def _round_up(n, m):
    return (n + m - 1) // m * m


def conv1_pool_patches(x):
    """(B,28,28) -> (B,36,256) conv1 im2col patches on the 16-stride padded grid.

    Row g*9+k (g = dy*2+dx pool parity, k = ky*3+kx), lane q = (oh+1)*16+(ow+1)
    holds x_pad[2*oh+dy+ky, 2*ow+dx+kx]; all other lanes are zero.
    """
    B = x.shape[0]
    xp = jnp.pad(x, ((0, 0), (1, 1), (1, 1)))                      # (B, 30, 30)
    taps = []
    for dy in range(2):
        for dx in range(2):
            for ky in range(3):
                for kx in range(3):
                    s0, s1 = dy + ky, dx + kx
                    taps.append(xp[:, s0:s0 + 27:2, s1:s1 + 27:2])  # (B, 14, 14)
    pat = jnp.stack(taps, axis=1)                                   # (B, 36, 14, 14)
    grid = jnp.zeros((B, 36, 16, 16), x.dtype).at[:, :, 1:15, 1:15].set(pat)
    return grid.reshape(B, 36, 256)


def _border_mask():
    m = jnp.zeros((16, 16), jnp.float32).at[1:15, 1:15].set(1.0)
    return m.reshape(1, 256)


def prepare_params(p):
    """One-time host-side repack of torch-layout params into kernel layouts."""
    f32, bf16 = jnp.float32, jnp.bfloat16
    w1 = p["conv1_w"].reshape(32, 9).astype(f32)                    # (cout, ky*3+kx)
    b1 = p["conv1_b"].reshape(32, 1).astype(f32)
    # conv2 (co,ci,ky,kx) -> (co, tap*32+ci) so a single K=288 matmul matches
    # the in-kernel tap-major im2col slab.
    w2 = jnp.transpose(p["conv2_w"], (0, 2, 3, 1)).reshape(32, 288).astype(bf16)
    b2 = p["conv2_b"].reshape(32, 1).astype(f32)
    # fc1 (120,1568) with torch flatten index c*49+oh2*7+ow2: fold the NCHW
    # flatten order AND the pool-lattice lanes (q = 32*oh2+2*ow2) into a
    # zero-padded (32, 205, 120) weight; garbage lanes hit zero rows.
    wf1 = jnp.transpose(p["fc1_w"].reshape(120, 32, 7, 7), (1, 2, 3, 0))
    q0 = 32 * jnp.arange(7)[:, None] + 2 * jnp.arange(7)[None, :]   # (7, 7)
    wfc1 = jnp.zeros((32, _ZV_W, 120), f32).at[:, q0, :].set(wf1).astype(bf16)
    bfc1 = p["fc1_b"].reshape(1, 120).astype(f32)
    wfc2 = jnp.transpose(p["fc2_w"], (1, 0)).astype(bf16)           # (120, 10)
    bfc2 = p["fc2_b"].reshape(1, 10).astype(f32)
    return dict(w1=w1, b1=b1, w2=w2, b2=b2, wfc1=wfc1, bfc1=bfc1,
                wfc2=wfc2, bfc2=bfc2, mask=_border_mask())


def cnn_small_forward(x_nchw, kp, block_b=128):
    # TODO(synk): x.register_hook(activations_hook) captures gradients during the
    # backward pass; it has no forward-pass equivalent and is omitted.
    B = x_nchw.shape[0]
    bt = min(block_b, _round_up(B, 8))          # batch tile (128-256 is the sweet spot)
    Bp = _round_up(B, bt)
    x = x_nchw[:, 0, :, :]                      # (B, 28, 28), Cin = 1
    p1 = conv1_pool_patches(x)                  # (B, 36, 256)
    if Bp != B:
        p1 = jnp.pad(p1, ((0, Bp - B), (0, 0), (0, 0)))
    out = pl.pallas_call(
        _cnn_kernel,
        out_shape=jax.ShapeDtypeStruct((Bp, 10), jnp.float32),
        grid=(Bp // bt,),
        in_specs=[
            pl.BlockSpec((bt, 36, 256), lambda i: (i, 0, 0)),   # conv1 patches
            pl.BlockSpec((1, 256), lambda i: (0, 0)),           # border mask
            pl.BlockSpec((32, 9), lambda i: (0, 0)),            # conv1 w
            pl.BlockSpec((32, 1), lambda i: (0, 0)),            # conv1 b
            pl.BlockSpec((32, 288), lambda i: (0, 0)),          # conv2 w (bf16)
            pl.BlockSpec((32, 1), lambda i: (0, 0)),            # conv2 b
            pl.BlockSpec((32, _ZV_W, 120), lambda i: (0, 0, 0)),# fc1 w (padded, bf16)
            pl.BlockSpec((1, 120), lambda i: (0, 0)),           # fc1 b
            pl.BlockSpec((120, 10), lambda i: (0, 0)),          # fc2 w (bf16)
            pl.BlockSpec((1, 10), lambda i: (0, 0)),            # fc2 b
        ],
        out_specs=pl.BlockSpec((bt, 10), lambda i: (i, 0)),
        scratch_shapes=[pltpu.VMEM((bt, 32, _ZV_W), jnp.float32)],  # pooled conv2 acts
        compiler_params=pltpu.CompilerParams(
            dimension_semantics=("parallel",),
            vmem_limit_bytes=32 * 1024 * 1024),
    )(p1, kp["mask"], kp["w1"], kp["b1"], kp["w2"], kp["b2"],
      kp["wfc1"], kp["bfc1"], kp["wfc2"], kp["bfc2"])
    return out[:B]


# --------------------------- params & reference -----------------------------

def init_params(key):
    ks = jax.random.split(key, 8)

    def unif(k, shape, fan_in):
        bound = 1.0 / (fan_in ** 0.5)
        return jax.random.uniform(k, shape, jnp.float32, -bound, bound)

    return {
        "conv1_w": unif(ks[0], (32, 1, 3, 3), 9),      # Conv2d(1, 32, 3, padding=1)
        "conv1_b": unif(ks[1], (32,), 9),
        "conv2_w": unif(ks[2], (32, 32, 3, 3), 288),   # Conv2d(32, 32, 3, padding=1)
        "conv2_b": unif(ks[3], (32,), 288),
        "fc1_w": unif(ks[4], (120, 1568), 1568),       # Linear(1568, 120)
        "fc1_b": unif(ks[5], (120,), 1568),
        "fc2_w": unif(ks[6], (10, 120), 120),          # Linear(120, 10)
        "fc2_b": unif(ks[7], (10,), 120),
    }


def reference_forward(x_nchw, params):
    hp = lax.Precision.HIGHEST
    x = jnp.transpose(x_nchw, (0, 2, 3, 1))                        # NHWC

    def block(x, w, b):
        wh = jnp.transpose(w, (2, 3, 1, 0))                        # HWIO
        y = lax.conv_general_dilated(x, wh, (1, 1), "SAME",
                                     dimension_numbers=("NHWC", "HWIO", "NHWC"),
                                     precision=hp) + b.reshape(1, 1, 1, -1)
        y = jnp.maximum(y, 0.0)
        B, H, W, C = y.shape
        return y.reshape(B, H // 2, 2, W // 2, 2, C).max(axis=(2, 4))

    f1 = block(x, params["conv1_w"], params["conv1_b"])
    f2 = block(f1, params["conv2_w"], params["conv2_b"])
    flat = jnp.transpose(f2, (0, 3, 1, 2)).reshape(f2.shape[0], -1)   # torch x.view order
    h = jnp.tanh(jnp.dot(flat, params["fc1_w"].T, precision=hp) + params["fc1_b"])
    return jnp.dot(h, params["fc2_w"].T, precision=hp) + params["fc2_b"]


if __name__ == "__main__":
    key = jax.random.PRNGKey(0)
    kx, kparam = jax.random.split(key)
    # fc_model expects 1568 = 32 * 7 * 7 features => 28x28 single-channel input.
    x = jax.random.normal(kx, (2, 1, 28, 28), jnp.float32)          # NCHW, like PyTorch
    params = init_params(kparam)
    kparams = prepare_params(params)

    fwd = jax.jit(cnn_small_forward)
    out = jax.block_until_ready(fwd(x, kparams))

    ref = reference_forward(x, params)
    assert out.shape == (2, 10), out.shape
    assert jnp.allclose(out, ref, rtol=2e-2, atol=2e-2), (out, ref)
    print("KERNEL_OK")
</pallas_src>

<mosaic_0001>
module attributes {stable_mosaic.version = 11 : i64} {
  func.func @_cnn_kernel(%arg0: i32, %arg1: memref<8x36x256xf32, #tpu.memory_space<vmem>>, %arg2: memref<1x256xf32, #tpu.memory_space<vmem>>, %arg3: memref<32x9xf32, #tpu.memory_space<vmem>>, %arg4: memref<32x1xf32, #tpu.memory_space<vmem>>, %arg5: memref<32x288xbf16, #tpu.memory_space<vmem>>, %arg6: memref<32x1xf32, #tpu.memory_space<vmem>>, %arg7: memref<32x205x120xbf16, #tpu.memory_space<vmem>>, %arg8: memref<1x120xf32, #tpu.memory_space<vmem>>, %arg9: memref<120x10xbf16, #tpu.memory_space<vmem>>, %arg10: memref<1x10xf32, #tpu.memory_space<vmem>>, %arg11: memref<8x10xf32, #tpu.memory_space<vmem>>, %arg12: memref<8x32x205xf32, #tpu.memory_space<vmem>>) attributes {dimension_semantics = [#tpu.dimension_semantics<parallel>], iteration_bounds = array<i64: 1>, scalar_prefetch = 0 : i64, scratch_operands = 1 : i64, tpu.core_type = #tpu.core_type<tc>, window_params = [{transform_indices = @transform_0, window_bounds = array<i64: 8, 36, 256>}, {pipeline_mode = #tpu.pipeline_mode<synchronous>, transform_indices = @transform_1, window_bounds = array<i64: 1, 256>}, {pipeline_mode = #tpu.pipeline_mode<synchronous>, transform_indices = @transform_2, window_bounds = array<i64: 32, 9>}, {pipeline_mode = #tpu.pipeline_mode<synchronous>, transform_indices = @transform_3, window_bounds = array<i64: 32, 1>}, {pipeline_mode = #tpu.pipeline_mode<synchronous>, transform_indices = @transform_4, window_bounds = array<i64: 32, 288>}, {pipeline_mode = #tpu.pipeline_mode<synchronous>, transform_indices = @transform_5, window_bounds = array<i64: 32, 1>}, {pipeline_mode = #tpu.pipeline_mode<synchronous>, transform_indices = @transform_6, window_bounds = array<i64: 32, 205, 120>}, {pipeline_mode = #tpu.pipeline_mode<synchronous>, transform_indices = @transform_7, window_bounds = array<i64: 1, 120>}, {pipeline_mode = #tpu.pipeline_mode<synchronous>, transform_indices = @transform_8, window_bounds = array<i64: 120, 10>}, {pipeline_mode = #tpu.pipeline_mode<synchronous>, transform_indices = @transform_9, window_bounds = array<i64: 1, 10>}, {transform_indices = @transform_10, window_bounds = array<i64: 8, 10>}]} {
    %c0_i32 = arith.constant 0 : i32
    %c8_i32 = arith.constant 8 : i32
    %0 = arith.addi %c0_i32, %c8_i32 : i32
    %c1_i32 = arith.constant 1 : i32
    scf.for %arg13 = %c0_i32 to %0 step %c1_i32  : i32 {
      %c1_i32_202 = arith.constant 1 : i32
      %237 = arith.muli %arg13, %c1_i32_202 : i32
      %c0_i32_203 = arith.constant 0 : i32
      %238 = arith.addi %c0_i32_203, %237 : i32
      %c0_204 = arith.constant 0 : index
      %c0_205 = arith.constant 0 : index
      %239 = vector.load %arg3[%c0_204, %c0_205] : memref<32x9xf32, #tpu.memory_space<vmem>>, vector<32x9xf32>
      %c0_206 = arith.constant 0 : index
      %c0_207 = arith.constant 0 : index
      %240 = vector.load %arg4[%c0_206, %c0_207] : memref<32x1xf32, #tpu.memory_space<vmem>>, vector<32x1xf32>
      %c0_208 = arith.constant 0 : index
      %c0_209 = arith.constant 0 : index
      %241 = vector.load %arg2[%c0_208, %c0_209] : memref<1x256xf32, #tpu.memory_space<vmem>>, vector<1x256xf32>
      %242 = arith.index_cast %238 : i32 to index
      %c0_210 = arith.constant 0 : index
      %c0_211 = arith.constant 0 : index
      %243 = vector.load %arg1[%242, %c0_210, %c0_211] : memref<8x36x256xf32, #tpu.memory_space<vmem>>, vector<1x36x256xf32>
      %244 = vector.shape_cast %243 : vector<1x36x256xf32> to vector<36x256xf32>
      %cst_212 = arith.constant 0.000000e+00 : f32
      %245 = vector.broadcast %cst_212 : f32 to vector<32x256xf32>
      %cst_213 = arith.constant 0.000000e+00 : f32
      %246 = vector.broadcast %cst_213 : f32 to vector<32x256xf32>
      %cst_214 = arith.constant 0.000000e+00 : f32
      %247 = vector.broadcast %cst_214 : f32 to vector<32x256xf32>
      %cst_215 = arith.constant 0.000000e+00 : f32
      %248 = vector.broadcast %cst_215 : f32 to vector<32x256xf32>
      %249 = vector.extract_strided_slice %239 {offsets = [0, 0], sizes = [32, 1], strides = [1, 1]} : vector<32x9xf32> to vector<32x1xf32>
      %250 = vector.shape_cast %249 : vector<32x1xf32> to vector<32x1xf32>
      %251 = vector.broadcast %250 : vector<32x1xf32> to vector<32x256xf32>
      %252 = vector.extract_strided_slice %244 {offsets = [0, 0], sizes = [1, 256], strides = [1, 1]} : vector<36x256xf32> to vector<1x256xf32>
      %253 = vector.broadcast %252 : vector<1x256xf32> to vector<32x256xf32>
      %254 = arith.mulf %251, %253 : vector<32x256xf32>
      %255 = arith.addf %245, %254 : vector<32x256xf32>
      %256 = vector.extract_strided_slice %244 {offsets = [9, 0], sizes = [1, 256], strides = [1, 1]} : vector<36x256xf32> to vector<1x256xf32>
      %257 = vector.broadcast %256 : vector<1x256xf32> to vector<32x256xf32>
      %258 = arith.mulf %251, %257 : vector<32x256xf32>
      %259 = arith.addf %246, %258 : vector<32x256xf32>
      %260 = vector.extract_strided_slice %244 {offsets = [18, 0], sizes = [1, 256], strides = [1, 1]} : vector<36x256xf32> to vector<1x256xf32>
      %261 = vector.broadcast %260 : vector<1x256xf32> to vector<32x256xf32>
      %262 = arith.mulf %251, %261 : vector<32x256xf32>
      %263 = arith.addf %247, %262 : vector<32x256xf32>
      %264 = vector.extract_strided_slice %244 {offsets = [27, 0], sizes = [1, 256], strides = [1, 1]} : vector<36x256xf32> to vector<1x256xf32>
      %265 = vector.broadcast %264 : vector<1x256xf32> to vector<32x256xf32>
      %266 = arith.mulf %251, %265 : vector<32x256xf32>
      %267 = arith.addf %248, %266 : vector<32x256xf32>
      %268 = vector.extract_strided_slice %239 {offsets = [0, 1], sizes = [32, 1], strides = [1, 1]} : vector<32x9xf32> to vector<32x1xf32>
      %269 = vector.shape_cast %268 : vector<32x1xf32> to vector<32x1xf32>
      %270 = vector.broadcast %269 : vector<32x1xf32> to vector<32x256xf32>
      %271 = vector.extract_strided_slice %244 {offsets = [1, 0], sizes = [1, 256], strides = [1, 1]} : vector<36x256xf32> to vector<1x256xf32>
      %272 = vector.broadcast %271 : vector<1x256xf32> to vector<32x256xf32>
      %273 = arith.mulf %270, %272 : vector<32x256xf32>
      %274 = arith.addf %255, %273 : vector<32x256xf32>
      %275 = vector.extract_strided_slice %244 {offsets = [10, 0], sizes = [1, 256], strides = [1, 1]} : vector<36x256xf32> to vector<1x256xf32>
      %276 = vector.broadcast %275 : vector<1x256xf32> to vector<32x256xf32>
      %277 = arith.mulf %270, %276 : vector<32x256xf32>
      %278 = arith.addf %259, %277 : vector<32x256xf32>
      %279 = vector.extract_strided_slice %244 {offsets = [19, 0], sizes = [1, 256], strides = [1, 1]} : vector<36x256xf32> to vector<1x256xf32>
      %280 = vector.broadcast %279 : vector<1x256xf32> to vector<32x256xf32>
      %281 = arith.mulf %270, %280 : vector<32x256xf32>
      %282 = arith.addf %263, %281 : vector<32x256xf32>
      %283 = vector.extract_strided_slice %244 {offsets = [28, 0], sizes = [1, 256], strides = [1, 1]} : vector<36x256xf32> to vector<1x256xf32>
      %284 = vector.broadcast %283 : vector<1x256xf32> to vector<32x256xf32>
      %285 = arith.mulf %270, %284 : vector<32x256xf32>
      %286 = arith.addf %267, %285 : vector<32x256xf32>
      %287 = vector.extract_strided_slice %239 {offsets = [0, 2], sizes = [32, 1], strides = [1, 1]} : vector<32x9xf32> to vector<32x1xf32>
      %288 = vector.shape_cast %287 : vector<32x1xf32> to vector<32x1xf32>
      %289 = vector.broadcast %288 : vector<32x1xf32> to vector<32x256xf32>
      %290 = vector.extract_strided_slice %244 {offsets = [2, 0], sizes = [1, 256], strides = [1, 1]} : vector<36x256xf32> to vector<1x256xf32>
      %291 = vector.broadcast %290 : vector<1x256xf32> to vector<32x256xf32>
      %292 = arith.mulf %289, %291 : vector<32x256xf32>
      %293 = arith.addf %274, %292 : vector<32x256xf32>
      %294 = vector.extract_strided_slice %244 {offsets = [11, 0], sizes = [1, 256], strides = [1, 1]} : vector<36x256xf32> to vector<1x256xf32>
      %295 = vector.broadcast %294 : vector<1x256xf32> to vector<32x256xf32>
      %296 = arith.mulf %289, %295 : vector<32x256xf32>
      %297 = arith.addf %278, %296 : vector<32x256xf32>
      %298 = vector.extract_strided_slice %244 {offsets = [20, 0], sizes = [1, 256], strides = [1, 1]} : vector<36x256xf32> to vector<1x256xf32>
      %299 = vector.broadcast %298 : vector<1x256xf32> to vector<32x256xf32>
      %300 = arith.mulf %289, %299 : vector<32x256xf32>
      %301 = arith.addf %282, %300 : vector<32x256xf32>
      %302 = vector.extract_strided_slice %244 {offsets = [29, 0], sizes = [1, 256], strides = [1, 1]} : vector<36x256xf32> to vector<1x256xf32>
      %303 = vector.broadcast %302 : vector<1x256xf32> to vector<32x256xf32>
      %304 = arith.mulf %289, %303 : vector<32x256xf32>
      %305 = arith.addf %286, %304 : vector<32x256xf32>
      %306 = vector.extract_strided_slice %239 {offsets = [0, 3], sizes = [32, 1], strides = [1, 1]} : vector<32x9xf32> to vector<32x1xf32>
      %307 = vector.shape_cast %306 : vector<32x1xf32> to vector<32x1xf32>
      %308 = vector.broadcast %307 : vector<32x1xf32> to vector<32x256xf32>
      %309 = vector.extract_strided_slice %244 {offsets = [3, 0], sizes = [1, 256], strides = [1, 1]} : vector<36x256xf32> to vector<1x256xf32>
      %310 = vector.broadcast %309 : vector<1x256xf32> to vector<32x256xf32>
      %311 = arith.mulf %308, %310 : vector<32x256xf32>
      %312 = arith.addf %293, %311 : vector<32x256xf32>
      %313 = vector.extract_strided_slice %244 {offsets = [12, 0], sizes = [1, 256], strides = [1, 1]} : vector<36x256xf32> to vector<1x256xf32>
      %314 = vector.broadcast %313 : vector<1x256xf32> to vector<32x256xf32>
      %315 = arith.mulf %308, %314 : vector<32x256xf32>
      %316 = arith.addf %297, %315 : vector<32x256xf32>
      %317 = vector.extract_strided_slice %244 {offsets = [21, 0], sizes = [1, 256], strides = [1, 1]} : vector<36x256xf32> to vector<1x256xf32>
      %318 = vector.broadcast %317 : vector<1x256xf32> to vector<32x256xf32>
      %319 = arith.mulf %308, %318 : vector<32x256xf32>
      %320 = arith.addf %301, %319 : vector<32x256xf32>
      %321 = vector.extract_strided_slice %244 {offsets = [30, 0], sizes = [1, 256], strides = [1, 1]} : vector<36x256xf32> to vector<1x256xf32>
      %322 = vector.broadcast %321 : vector<1x256xf32> to vector<32x256xf32>
      %323 = arith.mulf %308, %322 : vector<32x256xf32>
      %324 = arith.addf %305, %323 : vector<32x256xf32>
      %325 = vector.extract_strided_slice %239 {offsets = [0, 4], sizes = [32, 1], strides = [1, 1]} : vector<32x9xf32> to vector<32x1xf32>
      %326 = vector.shape_cast %325 : vector<32x1xf32> to vector<32x1xf32>
      %327 = vector.broadcast %326 : vector<32x1xf32> to vector<32x256xf32>
      %328 = vector.extract_strided_slice %244 {offsets = [4, 0], sizes = [1, 256], strides = [1, 1]} : vector<36x256xf32> to vector<1x256xf32>
      %329 = vector.broadcast %328 : vector<1x256xf32> to vector<32x256xf32>
      %330 = arith.mulf %327, %329 : vector<32x256xf32>
      %331 = arith.addf %312, %330 : vector<32x256xf32>
      %332 = vector.extract_strided_slice %244 {offsets = [13, 0], sizes = [1, 256], strides = [1, 1]} : vector<36x256xf32> to vector<1x256xf32>
      %333 = vector.broadcast %332 : vector<1x256xf32> to vector<32x256xf32>
      %334 = arith.mulf %327, %333 : vector<32x256xf32>
      %335 = arith.addf %316, %334 : vector<32x256xf32>
      %336 = vector.extract_strided_slice %244 {offsets = [22, 0], sizes = [1, 256], strides = [1, 1]} : vector<36x256xf32> to vector<1x256xf32>
      %337 = vector.broadcast %336 : vector<1x256xf32> to vector<32x256xf32>
      %338 = arith.mulf %327, %337 : vector<32x256xf32>
      %339 = arith.addf %320, %338 : vector<32x256xf32>
      %340 = vector.extract_strided_slice %244 {offsets = [31, 0], sizes = [1, 256], strides = [1, 1]} : vector<36x256xf32> to vector<1x256xf32>
      %341 = vector.broadcast %340 : vector<1x256xf32> to vector<32x256xf32>
      %342 = arith.mulf %327, %341 : vector<32x256xf32>
      %343 = arith.addf %324, %342 : vector<32x256xf32>
      %344 = vector.extract_strided_slice %239 {offsets = [0, 5], sizes = [32, 1], strides = [1, 1]} : vector<32x9xf32> to vector<32x1xf32>
      %345 = vector.shape_cast %344 : vector<32x1xf32> to vector<32x1xf32>
      %346 = vector.broadcast %345 : vector<32x1xf32> to vector<32x256xf32>
      %347 = vector.extract_strided_slice %244 {offsets = [5, 0], sizes = [1, 256], strides = [1, 1]} : vector<36x256xf32> to vector<1x256xf32>
      %348 = vector.broadcast %347 : vector<1x256xf32> to vector<32x256xf32>
      %349 = arith.mulf %346, %348 : vector<32x256xf32>
      %350 = arith.addf %331, %349 : vector<32x256xf32>
      %351 = vector.extract_strided_slice %244 {offsets = [14, 0], sizes = [1, 256], strides = [1, 1]} : vector<36x256xf32> to vector<1x256xf32>
      %352 = vector.broadcast %351 : vector<1x256xf32> to vector<32x256xf32>
      %353 = arith.mulf %346, %352 : vector<32x256xf32>
      %354 = arith.addf %335, %353 : vector<32x256xf32>
      %355 = vector.extract_strided_slice %244 {offsets = [23, 0], sizes = [1, 256], strides = [1, 1]} : vector<36x256xf32> to vector<1x256xf32>
      %356 = vector.broadcast %355 : vector<1x256xf32> to vector<32x256xf32>
      %357 = arith.mulf %346, %356 : vector<32x256xf32>
      %358 = arith.addf %339, %357 : vector<32x256xf32>
      %359 = vector.extract_strided_slice %244 {offsets = [32, 0], sizes = [1, 256], strides = [1, 1]} : vector<36x256xf32> to vector<1x256xf32>
      %360 = vector.broadcast %359 : vector<1x256xf32> to vector<32x256xf32>
      %361 = arith.mulf %346, %360 : vector<32x256xf32>
      %362 = arith.addf %343, %361 : vector<32x256xf32>
      %363 = vector.extract_strided_slice %239 {offsets = [0, 6], sizes = [32, 1], strides = [1, 1]} : vector<32x9xf32> to vector<32x1xf32>
      %364 = vector.shape_cast %363 : vector<32x1xf32> to vector<32x1xf32>
      %365 = vector.broadcast %364 : vector<32x1xf32> to vector<32x256xf32>
      %366 = vector.extract_strided_slice %244 {offsets = [6, 0], sizes = [1, 256], strides = [1, 1]} : vector<36x256xf32> to vector<1x256xf32>
      %367 = vector.broadcast %366 : vector<1x256xf32> to vector<32x256xf32>
      %368 = arith.mulf %365, %367 : vector<32x256xf32>
      %369 = arith.addf %350, %368 : vector<32x256xf32>
      %370 = vector.extract_strided_slice %244 {offsets = [15, 0], sizes = [1, 256], strides = [1, 1]} : vector<36x256xf32> to vector<1x256xf32>
      %371 = vector.broadcast %370 : vector<1x256xf32> to vector<32x256xf32>
      %372 = arith.mulf %365, %371 : vector<32x256xf32>
      %373 = arith.addf %354, %372 : vector<32x256xf32>
      %374 = vector.extract_strided_slice %244 {offsets = [24, 0], sizes = [1, 256], strides = [1, 1]} : vector<36x256xf32> to vector<1x256xf32>
      %375 = vector.broadcast %374 : vector<1x256xf32> to vector<32x256xf32>
      %376 = arith.mulf %365, %375 : vector<32x256xf32>
      %377 = arith.addf %358, %376 : vector<32x256xf32>
      %378 = vector.extract_strided_slice %244 {offsets = [33, 0], sizes = [1, 256], strides = [1, 1]} : vector<36x256xf32> to vector<1x256xf32>
      %379 = vector.broadcast %378 : vector<1x256xf32> to vector<32x256xf32>
      %380 = arith.mulf %365, %379 : vector<32x256xf32>
      %381 = arith.addf %362, %380 : vector<32x256xf32>
      %382 = vector.extract_strided_slice %239 {offsets = [0, 7], sizes = [32, 1], strides = [1, 1]} : vector<32x9xf32> to vector<32x1xf32>
      %383 = vector.shape_cast %382 : vector<32x1xf32> to vector<32x1xf32>
      %384 = vector.broadcast %383 : vector<32x1xf32> to vector<32x256xf32>
      %385 = vector.extract_strided_slice %244 {offsets = [7, 0], sizes = [1, 256], strides = [1, 1]} : vector<36x256xf32> to vector<1x256xf32>
      %386 = vector.broadcast %385 : vector<1x256xf32> to vector<32x256xf32>
      %387 = arith.mulf %384, %386 : vector<32x256xf32>
      %388 = arith.addf %369, %387 : vector<32x256xf32>
      %389 = vector.extract_strided_slice %244 {offsets = [16, 0], sizes = [1, 256], strides = [1, 1]} : vector<36x256xf32> to vector<1x256xf32>
      %390 = vector.broadcast %389 : vector<1x256xf32> to vector<32x256xf32>
      %391 = arith.mulf %384, %390 : vector<32x256xf32>
      %392 = arith.addf %373, %391 : vector<32x256xf32>
      %393 = vector.extract_strided_slice %244 {offsets = [25, 0], sizes = [1, 256], strides = [1, 1]} : vector<36x256xf32> to vector<1x256xf32>
      %394 = vector.broadcast %393 : vector<1x256xf32> to vector<32x256xf32>
      %395 = arith.mulf %384, %394 : vector<32x256xf32>
      %396 = arith.addf %377, %395 : vector<32x256xf32>
      %397 = vector.extract_strided_slice %244 {offsets = [34, 0], sizes = [1, 256], strides = [1, 1]} : vector<36x256xf32> to vector<1x256xf32>
      %398 = vector.broadcast %397 : vector<1x256xf32> to vector<32x256xf32>
      %399 = arith.mulf %384, %398 : vector<32x256xf32>
      %400 = arith.addf %381, %399 : vector<32x256xf32>
      %401 = vector.extract_strided_slice %239 {offsets = [0, 8], sizes = [32, 1], strides = [1, 1]} : vector<32x9xf32> to vector<32x1xf32>
      %402 = vector.shape_cast %401 : vector<32x1xf32> to vector<32x1xf32>
      %403 = vector.broadcast %402 : vector<32x1xf32> to vector<32x256xf32>
      %404 = vector.extract_strided_slice %244 {offsets = [8, 0], sizes = [1, 256], strides = [1, 1]} : vector<36x256xf32> to vector<1x256xf32>
      %405 = vector.broadcast %404 : vector<1x256xf32> to vector<32x256xf32>
      %406 = arith.mulf %403, %405 : vector<32x256xf32>
      %407 = arith.addf %388, %406 : vector<32x256xf32>
      %408 = vector.extract_strided_slice %244 {offsets = [17, 0], sizes = [1, 256], strides = [1, 1]} : vector<36x256xf32> to vector<1x256xf32>
      %409 = vector.broadcast %408 : vector<1x256xf32> to vector<32x256xf32>
      %410 = arith.mulf %403, %409 : vector<32x256xf32>
      %411 = arith.addf %392, %410 : vector<32x256xf32>
      %412 = vector.extract_strided_slice %244 {offsets = [26, 0], sizes = [1, 256], strides = [1, 1]} : vector<36x256xf32> to vector<1x256xf32>
      %413 = vector.broadcast %412 : vector<1x256xf32> to vector<32x256xf32>
      %414 = arith.mulf %403, %413 : vector<32x256xf32>
      %415 = arith.addf %396, %414 : vector<32x256xf32>
      %416 = vector.extract_strided_slice %244 {offsets = [35, 0], sizes = [1, 256], strides = [1, 1]} : vector<36x256xf32> to vector<1x256xf32>
      %417 = vector.broadcast %416 : vector<1x256xf32> to vector<32x256xf32>
      %418 = arith.mulf %403, %417 : vector<32x256xf32>
      %419 = arith.addf %400, %418 : vector<32x256xf32>
      %420 = vector.broadcast %240 : vector<32x1xf32> to vector<32x256xf32>
      %421 = arith.addf %407, %420 : vector<32x256xf32>
      %cst_216 = arith.constant 0.000000e+00 : f32
      %422 = vector.broadcast %cst_216 : f32 to vector<32x256xf32>
      %423 = arith.maximumf %421, %422 : vector<32x256xf32>
      %424 = vector.broadcast %240 : vector<32x1xf32> to vector<32x256xf32>
      %425 = arith.addf %411, %424 : vector<32x256xf32>
      %cst_217 = arith.constant 0.000000e+00 : f32
      %426 = vector.broadcast %cst_217 : f32 to vector<32x256xf32>
      %427 = arith.maximumf %425, %426 : vector<32x256xf32>
      %428 = vector.broadcast %240 : vector<32x1xf32> to vector<32x256xf32>
      %429 = arith.addf %415, %428 : vector<32x256xf32>
      %cst_218 = arith.constant 0.000000e+00 : f32
      %430 = vector.broadcast %cst_218 : f32 to vector<32x256xf32>
      %431 = arith.maximumf %429, %430 : vector<32x256xf32>
      %432 = vector.broadcast %240 : vector<32x1xf32> to vector<32x256xf32>
      %433 = arith.addf %419, %432 : vector<32x256xf32>
      %cst_219 = arith.constant 0.000000e+00 : f32
      %434 = vector.broadcast %cst_219 : f32 to vector<32x256xf32>
      %435 = arith.maximumf %433, %434 : vector<32x256xf32>
      %436 = arith.maximumf %423, %427 : vector<32x256xf32>
      %437 = arith.maximumf %431, %435 : vector<32x256xf32>
      %438 = arith.maximumf %436, %437 : vector<32x256xf32>
      %439 = vector.broadcast %241 : vector<1x256xf32> to vector<32x256xf32>
      %440 = arith.mulf %438, %439 : vector<32x256xf32>
      %441 = arith.truncf %440 : vector<32x256xf32> to vector<32x256xbf16>
      %442 = vector.extract_strided_slice %441 {offsets = [0, 0], sizes = [32, 222], strides = [1, 1]} : vector<32x256xbf16> to vector<32x222xbf16>
      %443 = vector.extract_strided_slice %441 {offsets = [0, 1], sizes = [32, 222], strides = [1, 1]} : vector<32x256xbf16> to vector<32x222xbf16>
      %444 = vector.extract_strided_slice %441 {offsets = [0, 2], sizes = [32, 222], strides = [1, 1]} : vector<32x256xbf16> to vector<32x222xbf16>
      %445 = vector.extract_strided_slice %441 {offsets = [0, 16], sizes = [32, 222], strides = [1, 1]} : vector<32x256xbf16> to vector<32x222xbf16>
      %446 = vector.extract_strided_slice %441 {offsets = [0, 17], sizes = [32, 222], strides = [1, 1]} : vector<32x256xbf16> to vector<32x222xbf16>
      %447 = vector.extract_strided_slice %441 {offsets = [0, 18], sizes = [32, 222], strides = [1, 1]} : vector<32x256xbf16> to vector<32x222xbf16>
      %448 = vector.extract_strided_slice %441 {offsets = [0, 32], sizes = [32, 222], strides = [1, 1]} : vector<32x256xbf16> to vector<32x222xbf16>
      %449 = vector.extract_strided_slice %441 {offsets = [0, 33], sizes = [32, 222], strides = [1, 1]} : vector<32x256xbf16> to vector<32x222xbf16>
      %450 = vector.extract_strided_slice %441 {offsets = [0, 34], sizes = [32, 222], strides = [1, 1]} : vector<32x256xbf16> to vector<32x222xbf16>
      %451 = tpu.concatenate %442, %443, %444, %445, %446, %447, %448, %449, %450 in 0 : vector<32x222xbf16>, vector<32x222xbf16>, vector<32x222xbf16>, vector<32x222xbf16>, vector<32x222xbf16>, vector<32x222xbf16>, vector<32x222xbf16>, vector<32x222xbf16>, vector<32x222xbf16> -> vector<288x222xbf16>
      %c0_220 = arith.constant 0 : index
      %c0_221 = arith.constant 0 : index
      %452 = vector.load %arg5[%c0_220, %c0_221] : memref<32x288xbf16, #tpu.memory_space<vmem>>, vector<32x288xbf16>
      %cst_222 = arith.constant dense<0.000000e+00> : vector<32x222xf32>
      %453 = tpu.matmul %452, %451, %cst_222 {dimension_numbers = #tpu.dot_dimension_numbers<[1], [0], [0], [1], [0, 0, 1, 1], [], []>} : vector<32x288xbf16>, vector<288x222xbf16>, vector<32x222xf32> -> vector<32x222xf32>
      %c0_223 = arith.constant 0 : index
      %c0_224 = arith.constant 0 : index
      %454 = vector.load %arg6[%c0_223, %c0_224] : memref<32x1xf32, #tpu.memory_space<vmem>>, vector<32x1xf32>
      %455 = vector.broadcast %454 : vector<32x1xf32> to vector<32x222xf32>
      %456 = arith.addf %453, %455 : vector<32x222xf32>
      %cst_225 = arith.constant 0.000000e+00 : f32
      %457 = vector.broadcast %cst_225 : f32 to vector<32x222xf32>
      %458 = arith.maximumf %456, %457 : vector<32x222xf32>
      %459 = vector.extract_strided_slice %458 {offsets = [0, 0], sizes = [32, 221], strides = [1, 1]} : vector<32x222xf32> to vector<32x221xf32>
      %460 = vector.extract_strided_slice %458 {offsets = [0, 1], sizes = [32, 221], strides = [1, 1]} : vector<32x222xf32> to vector<32x221xf32>
      %461 = arith.maximumf %459, %460 : vector<32x221xf32>
      %462 = vector.extract_strided_slice %461 {offsets = [0, 0], sizes = [32, 205], strides = [1, 1]} : vector<32x221xf32> to vector<32x205xf32>
      %463 = vector.extract_strided_slice %461 {offsets = [0, 16], sizes = [32, 205], strides = [1, 1]} : vector<32x221xf32> to vector<32x205xf32>
      %464 = arith.maximumf %462, %463 : vector<32x205xf32>
      %465 = arith.index_cast %238 : i32 to index
      %c0_226 = arith.constant 0 : index
      %c0_227 = arith.constant 0 : index
      %466 = vector.load %arg12[%465, %c0_226, %c0_227] : memref<8x32x205xf32, #tpu.memory_space<vmem>>, vector<1x32x205xf32>
      %467 = vector.shape_cast %466 : vector<1x32x205xf32> to vector<32x205xf32>
      %468 = vector.shape_cast %464 : vector<32x205xf32> to vector<1x32x205xf32>
      tpu.vector_store %arg12[%465, %c0_226, %c0_227], %468 {strides = array<i32>} : memref<8x32x205xf32, #tpu.memory_space<vmem>>, vector<1x32x205xf32>,
    }
    %c8_i32_0 = arith.constant 8 : i32
    %cst = arith.constant 0.000000e+00 : f32
    %1 = vector.broadcast %cst : f32 to vector<8x120xf32>
    %c0 = arith.constant 0 : index
    %c0_1 = arith.constant 0 : index
    %c0_2 = arith.constant 0 : index
    %2 = vector.load %arg12[%c0, %c0_1, %c0_2] : memref<8x32x205xf32, #tpu.memory_space<vmem>>, vector<8x1x205xf32>
    %3 = vector.shape_cast %2 : vector<8x1x205xf32> to vector<8x205xf32>
    %4 = arith.truncf %3 : vector<8x205xf32> to vector<8x205xbf16>
    %c0_3 = arith.constant 0 : index
    %c0_4 = arith.constant 0 : index
    %c0_5 = arith.constant 0 : index
    %5 = vector.load %arg7[%c0_3, %c0_4, %c0_5] : memref<32x205x120xbf16, #tpu.memory_space<vmem>>, vector<1x205x120xbf16>
    %6 = vector.shape_cast %5 : vector<1x205x120xbf16> to vector<205x120xbf16>
    %cst_6 = arith.constant dense<0.000000e+00> : vector<8x120xf32>
    %7 = tpu.matmul %4, %6, %cst_6 {dimension_numbers = #tpu.dot_dimension_numbers<[1], [0], [0], [1], [0, 0, 1, 1], [], []>} : vector<8x205xbf16>, vector<205x120xbf16>, vector<8x120xf32> -> vector<8x120xf32>
    %8 = arith.addf %1, %7 : vector<8x120xf32>
    %c0_7 = arith.constant 0 : index
    %c1 = arith.constant 1 : index
    %c0_8 = arith.constant 0 : index
    %9 = vector.load %arg12[%c0_7, %c1, %c0_8] : memref<8x32x205xf32, #tpu.memory_space<vmem>>, vector<8x1x205xf32>
    %10 = vector.shape_cast %9 : vector<8x1x205xf32> to vector<8x205xf32>
    %11 = arith.truncf %10 : vector<8x205xf32> to vector<8x205xbf16>
    %c1_9 = arith.constant 1 : index
    %c0_10 = arith.constant 0 : index
    %c0_11 = arith.constant 0 : index
    %12 = vector.load %arg7[%c1_9, %c0_10, %c0_11] : memref<32x205x120xbf16, #tpu.memory_space<vmem>>, vector<1x205x120xbf16>
    %13 = vector.shape_cast %12 : vector<1x205x120xbf16> to vector<205x120xbf16>
    %cst_12 = arith.constant dense<0.000000e+00> : vector<8x120xf32>
    %14 = tpu.matmul %11, %13, %cst_12 {dimension_numbers = #tpu.dot_dimension_numbers<[1], [0], [0], [1], [0, 0, 1, 1], [], []>} : vector<8x205xbf16>, vector<205x120xbf16>, vector<8x120xf32> -> vector<8x120xf32>
    %15 = arith.addf %8, %14 : vector<8x120xf32>
    %c0_13 = arith.constant 0 : index
    %c2 = arith.constant 2 : index
    %c0_14 = arith.constant 0 : index
    %16 = vector.load %arg12[%c0_13, %c2, %c0_14] : memref<8x32x205xf32, #tpu.memory_space<vmem>>, vector<8x1x205xf32>
    %17 = vector.shape_cast %16 : vector<8x1x205xf32> to vector<8x205xf32>
    %18 = arith.truncf %17 : vector<8x205xf32> to vector<8x205xbf16>
    %c2_15 = arith.constant 2 : index
    %c0_16 = arith.constant 0 : index
    %c0_17 = arith.constant 0 : index
    %19 = vector.load %arg7[%c2_15, %c0_16, %c0_17] : memref<32x205x120xbf16, #tpu.memory_space<vmem>>, vector<1x205x120xbf16>
    %20 = vector.shape_cast %19 : vector<1x205x120xbf16> to vector<205x120xbf16>
    %cst_18 = arith.constant dense<0.000000e+00> : vector<8x120xf32>
    %21 = tpu.matmul %18, %20, %cst_18 {dimension_numbers = #tpu.dot_dimension_numbers<[1], [0], [0], [1], [0, 0, 1, 1], [], []>} : vector<8x205xbf16>, vector<205x120xbf16>, vector<8x120xf32> -> vector<8x120xf32>
    %22 = arith.addf %15, %21 : vector<8x120xf32>
    %c0_19 = arith.constant 0 : index
    %c3 = arith.constant 3 : index
    %c0_20 = arith.constant 0 : index
    %23 = vector.load %arg12[%c0_19, %c3, %c0_20] : memref<8x32x205xf32, #tpu.memory_space<vmem>>, vector<8x1x205xf32>
    %24 = vector.shape_cast %23 : vector<8x1x205xf32> to vector<8x205xf32>
    %25 = arith.truncf %24 : vector<8x205xf32> to vector<8x205xbf16>
    %c3_21 = arith.constant 3 : index
    %c0_22 = arith.constant 0 : index
    %c0_23 = arith.constant 0 : index
    %26 = vector.load %arg7[%c3_21, %c0_22, %c0_23] : memref<32x205x120xbf16, #tpu.memory_space<vmem>>, vector<1x205x120xbf16>
    %27 = vector.shape_cast %26 : vector<1x205x120xbf16> to vector<205x120xbf16>
    %cst_24 = arith.constant dense<0.000000e+00> : vector<8x120xf32>
    %28 = tpu.matmul %25, %27, %cst_24 {dimension_numbers = #tpu.dot_dimension_numbers<[1], [0], [0], [1], [0, 0, 1, 1], [], []>} : vector<8x205xbf16>, vector<205x120xbf16>, vector<8x120xf32> -> vector<8x120xf32>
    %29 = arith.addf %22, %28 : vector<8x120xf32>
    %c0_25 = arith.constant 0 : index
    %c4 = arith.constant 4 : index
    %c0_26 = arith.constant 0 : index
    %30 = vector.load %arg12[%c0_25, %c4, %c0_26] : memref<8x32x205xf32, #tpu.memory_space<vmem>>, vector<8x1x205xf32>
    %31 = vector.shape_cast %30 : vector<8x1x205xf32> to vector<8x205xf32>
    %32 = arith.truncf %31 : vector<8x205xf32> to vector<8x205xbf16>
    %c4_27 = arith.constant 4 : index
    %c0_28 = arith.constant 0 : index
    %c0_29 = arith.constant 0 : index
    %33 = vector.load %arg7[%c4_27, %c0_28, %c0_29] : memref<32x205x120xbf16, #tpu.memory_space<vmem>>, vector<1x205x120xbf16>
    %34 = vector.shape_cast %33 : vector<1x205x120xbf16> to vector<205x120xbf16>
    %cst_30 = arith.constant dense<0.000000e+00> : vector<8x120xf32>
    %35 = tpu.matmul %32, %34, %cst_30 {dimension_numbers = #tpu.dot_dimension_numbers<[1], [0], [0], [1], [0, 0, 1, 1], [], []>} : vector<8x205xbf16>, vector<205x120xbf16>, vector<8x120xf32> -> vector<8x120xf32>
    %36 = arith.addf %29, %35 : vector<8x120xf32>
    %c0_31 = arith.constant 0 : index
    %c5 = arith.constant 5 : index
    %c0_32 = arith.constant 0 : index
    %37 = vector.load %arg12[%c0_31, %c5, %c0_32] : memref<8x32x205xf32, #tpu.memory_space<vmem>>, vector<8x1x205xf32>
    %38 = vector.shape_cast %37 : vector<8x1x205xf32> to vector<8x205xf32>
    %39 = arith.truncf %38 : vector<8x205xf32> to vector<8x205xbf16>
    %c5_33 = arith.constant 5 : index
    %c0_34 = arith.constant 0 : index
    %c0_35 = arith.constant 0 : index
    %40 = vector.load %arg7[%c5_33, %c0_34, %c0_35] : memref<32x205x120xbf16, #tpu.memory_space<vmem>>, vector<1x205x120xbf16>
    %41 = vector.shape_cast %40 : vector<1x205x120xbf16> to vector<205x120xbf16>
    %cst_36 = arith.constant dense<0.000000e+00> : vector<8x120xf32>
    %42 = tpu.matmul %39, %41, %cst_36 {dimension_numbers = #tpu.dot_dimension_numbers<[1], [0], [0], [1], [0, 0, 1, 1], [], []>} : vector<8x205xbf16>, vector<205x120xbf16>, vector<8x120xf32> -> vector<8x120xf32>
    %43 = arith.addf %36, %42 : vector<8x120xf32>
    %c0_37 = arith.constant 0 : index
    %c6 = arith.constant 6 : index
    %c0_38 = arith.constant 0 : index
    %44 = vector.load %arg12[%c0_37, %c6, %c0_38] : memref<8x32x205xf32, #tpu.memory_space<vmem>>, vector<8x1x205xf32>
    %45 = vector.shape_cast %44 : vector<8x1x205xf32> to vector<8x205xf32>
    %46 = arith.truncf %45 : vector<8x205xf32> to vector<8x205xbf16>
    %c6_39 = arith.constant 6 : index
    %c0_40 = arith.constant 0 : index
    %c0_41 = arith.constant 0 : index
    %47 = vector.load %arg7[%c6_39, %c0_40, %c0_41] : memref<32x205x120xbf16, #tpu.memory_space<vmem>>, vector<1x205x120xbf16>
    %48 = vector.shape_cast %47 : vector<1x205x120xbf16> to vector<205x120xbf16>
    %cst_42 = arith.constant dense<0.000000e+00> : vector<8x120xf32>
    %49 = tpu.matmul %46, %48, %cst_42 {dimension_numbers = #tpu.dot_dimension_numbers<[1], [0], [0], [1], [0, 0, 1, 1], [], []>} : vector<8x205xbf16>, vector<205x120xbf16>, vector<8x120xf32> -> vector<8x120xf32>
    %50 = arith.addf %43, %49 : vector<8x120xf32>
    %c0_43 = arith.constant 0 : index
    %c7 = arith.constant 7 : index
    %c0_44 = arith.constant 0 : index
    %51 = vector.load %arg12[%c0_43, %c7, %c0_44] : memref<8x32x205xf32, #tpu.memory_space<vmem>>, vector<8x1x205xf32>
    %52 = vector.shape_cast %51 : vector<8x1x205xf32> to vector<8x205xf32>
    %53 = arith.truncf %52 : vector<8x205xf32> to vector<8x205xbf16>
    %c7_45 = arith.constant 7 : index
    %c0_46 = arith.constant 0 : index
    %c0_47 = arith.constant 0 : index
    %54 = vector.load %arg7[%c7_45, %c0_46, %c0_47] : memref<32x205x120xbf16, #tpu.memory_space<vmem>>, vector<1x205x120xbf16>
    %55 = vector.shape_cast %54 : vector<1x205x120xbf16> to vector<205x120xbf16>
    %cst_48 = arith.constant dense<0.000000e+00> : vector<8x120xf32>
    %56 = tpu.matmul %53, %55, %cst_48 {dimension_numbers = #tpu.dot_dimension_numbers<[1], [0], [0], [1], [0, 0, 1, 1], [], []>} : vector<8x205xbf16>, vector<205x120xbf16>, vector<8x120xf32> -> vector<8x120xf32>
    %57 = arith.addf %50, %56 : vector<8x120xf32>
    %c0_49 = arith.constant 0 : index
    %c8 = arith.constant 8 : index
    %c0_50 = arith.constant 0 : index
    %58 = vector.load %arg12[%c0_49, %c8, %c0_50] : memref<8x32x205xf32, #tpu.memory_space<vmem>>, vector<8x1x205xf32>
    %59 = vector.shape_cast %58 : vector<8x1x205xf32> to vector<8x205xf32>
    %60 = arith.truncf %59 : vector<8x205xf32> to vector<8x205xbf16>
    %c8_51 = arith.constant 8 : index
    %c0_52 = arith.constant 0 : index
    %c0_53 = arith.constant 0 : index
    %61 = vector.load %arg7[%c8_51, %c0_52, %c0_53] : memref<32x205x120xbf16, #tpu.memory_space<vmem>>, vector<1x205x120xbf16>
    %62 = vector.shape_cast %61 : vector<1x205x120xbf16> to vector<205x120xbf16>
    %cst_54 = arith.constant dense<0.000000e+00> : vector<8x120xf32>
    %63 = tpu.matmul %60, %62, %cst_54 {dimension_numbers = #tpu.dot_dimension_numbers<[1], [0], [0], [1], [0, 0, 1, 1], [], []>} : vector<8x205xbf16>, vector<205x120xbf16>, vector<8x120xf32> -> vector<8x120xf32>
    %64 = arith.addf %57, %63 : vector<8x120xf32>
    %c0_55 = arith.constant 0 : index
    %c9 = arith.constant 9 : index
    %c0_56 = arith.constant 0 : index
    %65 = vector.load %arg12[%c0_55, %c9, %c0_56] : memref<8x32x205xf32, #tpu.memory_space<vmem>>, vector<8x1x205xf32>
    %66 = vector.shape_cast %65 : vector<8x1x205xf32> to vector<8x205xf32>
    %67 = arith.truncf %66 : vector<8x205xf32> to vector<8x205xbf16>
    %c9_57 = arith.constant 9 : index
    %c0_58 = arith.constant 0 : index
    %c0_59 = arith.constant 0 : index
    %68 = vector.load %arg7[%c9_57, %c0_58, %c0_59] : memref<32x205x120xbf16, #tpu.memory_space<vmem>>, vector<1x205x120xbf16>
    %69 = vector.shape_cast %68 : vector<1x205x120xbf16> to vector<205x120xbf16>
    %cst_60 = arith.constant dense<0.000000e+00> : vector<8x120xf32>
    %70 = tpu.matmul %67, %69, %cst_60 {dimension_numbers = #tpu.dot_dimension_numbers<[1], [0], [0], [1], [0, 0, 1, 1], [], []>} : vector<8x205xbf16>, vector<205x120xbf16>, vector<8x120xf32> -> vector<8x120xf32>
    %71 = arith.addf %64, %70 : vector<8x120xf32>
    %c0_61 = arith.constant 0 : index
    %c10 = arith.constant 10 : index
    %c0_62 = arith.constant 0 : index
    %72 = vector.load %arg12[%c0_61, %c10, %c0_62] : memref<8x32x205xf32, #tpu.memory_space<vmem>>, vector<8x1x205xf32>
    %73 = vector.shape_cast %72 : vector<8x1x205xf32> to vector<8x205xf32>
    %74 = arith.truncf %73 : vector<8x205xf32> to vector<8x205xbf16>
    %c10_63 = arith.constant 10 : index
    %c0_64 = arith.constant 0 : index
    %c0_65 = arith.constant 0 : index
    %75 = vector.load %arg7[%c10_63, %c0_64, %c0_65] : memref<32x205x120xbf16, #tpu.memory_space<vmem>>, vector<1x205x120xbf16>
    %76 = vector.shape_cast %75 : vector<1x205x120xbf16> to vector<205x120xbf16>
    %cst_66 = arith.constant dense<0.000000e+00> : vector<8x120xf32>
    %77 = tpu.matmul %74, %76, %cst_66 {dimension_numbers = #tpu.dot_dimension_numbers<[1], [0], [0], [1], [0, 0, 1, 1], [], []>} : vector<8x205xbf16>, vector<205x120xbf16>, vector<8x120xf32> -> vector<8x120xf32>
    %78 = arith.addf %71, %77 : vector<8x120xf32>
    %c0_67 = arith.constant 0 : index
    %c11 = arith.constant 11 : index
    %c0_68 = arith.constant 0 : index
    %79 = vector.load %arg12[%c0_67, %c11, %c0_68] : memref<8x32x205xf32, #tpu.memory_space<vmem>>, vector<8x1x205xf32>
    %80 = vector.shape_cast %79 : vector<8x1x205xf32> to vector<8x205xf32>
    %81 = arith.truncf %80 : vector<8x205xf32> to vector<8x205xbf16>
    %c11_69 = arith.constant 11 : index
    %c0_70 = arith.constant 0 : index
    %c0_71 = arith.constant 0 : index
    %82 = vector.load %arg7[%c11_69, %c0_70, %c0_71] : memref<32x205x120xbf16, #tpu.memory_space<vmem>>, vector<1x205x120xbf16>
    %83 = vector.shape_cast %82 : vector<1x205x120xbf16> to vector<205x120xbf16>
    %cst_72 = arith.constant dense<0.000000e+00> : vector<8x120xf32>
    %84 = tpu.matmul %81, %83, %cst_72 {dimension_numbers = #tpu.dot_dimension_numbers<[1], [0], [0], [1], [0, 0, 1, 1], [], []>} : vector<8x205xbf16>, vector<205x120xbf16>, vector<8x120xf32> -> vector<8x120xf32>
    %85 = arith.addf %78, %84 : vector<8x120xf32>
    %c0_73 = arith.constant 0 : index
    %c12 = arith.constant 12 : index
    %c0_74 = arith.constant 0 : index
    %86 = vector.load %arg12[%c0_73, %c12, %c0_74] : memref<8x32x205xf32, #tpu.memory_space<vmem>>, vector<8x1x205xf32>
    %87 = vector.shape_cast %86 : vector<8x1x205xf32> to vector<8x205xf32>
    %88 = arith.truncf %87 : vector<8x205xf32> to vector<8x205xbf16>
    %c12_75 = arith.constant 12 : index
    %c0_76 = arith.constant 0 : index
    %c0_77 = arith.constant 0 : index
    %89 = vector.load %arg7[%c12_75, %c0_76, %c0_77] : memref<32x205x120xbf16, #tpu.memory_space<vmem>>, vector<1x205x120xbf16>
    %90 = vector.shape_cast %89 : vector<1x205x120xbf16> to vector<205x120xbf16>
    %cst_78 = arith.constant dense<0.000000e+00> : vector<8x120xf32>
    %91 = tpu.matmul %88, %90, %cst_78 {dimension_numbers = #tpu.dot_dimension_numbers<[1], [0], [0], [1], [0, 0, 1, 1], [], []>} : vector<8x205xbf16>, vector<205x120xbf16>, vector<8x120xf32> -> vector<8x120xf32>
    %92 = arith.addf %85, %91 : vector<8x120xf32>
    %c0_79 = arith.constant 0 : index
    %c13 = arith.constant 13 : index
    %c0_80 = arith.constant 0 : index
    %93 = vector.load %arg12[%c0_79, %c13, %c0_80] : memref<8x32x205xf32, #tpu.memory_space<vmem>>, vector<8x1x205xf32>
    %94 = vector.shape_cast %93 : vector<8x1x205xf32> to vector<8x205xf32>
    %95 = arith.truncf %94 : vector<8x205xf32> to vector<8x205xbf16>
    %c13_81 = arith.constant 13 : index
    %c0_82 = arith.constant 0 : index
    %c0_83 = arith.constant 0 : index
    %96 = vector.load %arg7[%c13_81, %c0_82, %c0_83] : memref<32x205x120xbf16, #tpu.memory_space<vmem>>, vector<1x205x120xbf16>
    %97 = vector.shape_cast %96 : vector<1x205x120xbf16> to vector<205x120xbf16>
    %cst_84 = arith.constant dense<0.000000e+00> : vector<8x120xf32>
    %98 = tpu.matmul %95, %97, %cst_84 {dimension_numbers = #tpu.dot_dimension_numbers<[1], [0], [0], [1], [0, 0, 1, 1], [], []>} : vector<8x205xbf16>, vector<205x120xbf16>, vector<8x120xf32> -> vector<8x120xf32>
    %99 = arith.addf %92, %98 : vector<8x120xf32>
    %c0_85 = arith.constant 0 : index
    %c14 = arith.constant 14 : index
    %c0_86 = arith.constant 0 : index
    %100 = vector.load %arg12[%c0_85, %c14, %c0_86] : memref<8x32x205xf32, #tpu.memory_space<vmem>>, vector<8x1x205xf32>
    %101 = vector.shape_cast %100 : vector<8x1x205xf32> to vector<8x205xf32>
    %102 = arith.truncf %101 : vector<8x205xf32> to vector<8x205xbf16>
    %c14_87 = arith.constant 14 : index
    %c0_88 = arith.constant 0 : index
    %c0_89 = arith.constant 0 : index
    %103 = vector.load %arg7[%c14_87, %c0_88, %c0_89] : memref<32x205x120xbf16, #tpu.memory_space<vmem>>, vector<1x205x120xbf16>
    %104 = vector.shape_cast %103 : vector<1x205x120xbf16> to vector<205x120xbf16>
    %cst_90 = arith.constant dense<0.000000e+00> : vector<8x120xf32>
    %105 = tpu.matmul %102, %104, %cst_90 {dimension_numbers = #tpu.dot_dimension_numbers<[1], [0], [0], [1], [0, 0, 1, 1], [], []>} : vector<8x205xbf16>, vector<205x120xbf16>, vector<8x120xf32> -> vector<8x120xf32>
    %106 = arith.addf %99, %105 : vector<8x120xf32>
    %c0_91 = arith.constant 0 : index
    %c15 = arith.constant 15 : index
    %c0_92 = arith.constant 0 : index
    %107 = vector.load %arg12[%c0_91, %c15, %c0_92] : memref<8x32x205xf32, #tpu.memory_space<vmem>>, vector<8x1x205xf32>
    %108 = vector.shape_cast %107 : vector<8x1x205xf32> to vector<8x205xf32>
    %109 = arith.truncf %108 : vector<8x205xf32> to vector<8x205xbf16>
    %c15_93 = arith.constant 15 : index
    %c0_94 = arith.constant 0 : index
    %c0_95 = arith.constant 0 : index
    %110 = vector.load %arg7[%c15_93, %c0_94, %c0_95] : memref<32x205x120xbf16, #tpu.memory_space<vmem>>, vector<1x205x120xbf16>
    %111 = vector.shape_cast %110 : vector<1x205x120xbf16> to vector<205x120xbf16>
    %cst_96 = arith.constant dense<0.000000e+00> : vector<8x120xf32>
    %112 = tpu.matmul %109, %111, %cst_96 {dimension_numbers = #tpu.dot_dimension_numbers<[1], [0], [0], [1], [0, 0, 1, 1], [], []>} : vector<8x205xbf16>, vector<205x120xbf16>, vector<8x120xf32> -> vector<8x120xf32>
    %113 = arith.addf %106, %112 : vector<8x120xf32>
    %c0_97 = arith.constant 0 : index
    %c16 = arith.constant 16 : index
    %c0_98 = arith.constant 0 : index
    %114 = vector.load %arg12[%c0_97, %c16, %c0_98] : memref<8x32x205xf32, #tpu.memory_space<vmem>>, vector<8x1x205xf32>
    %115 = vector.shape_cast %114 : vector<8x1x205xf32> to vector<8x205xf32>
    %116 = arith.truncf %115 : vector<8x205xf32> to vector<8x205xbf16>
    %c16_99 = arith.constant 16 : index
    %c0_100 = arith.constant 0 : index
    %c0_101 = arith.constant 0 : index
    %117 = vector.load %arg7[%c16_99, %c0_100, %c0_101] : memref<32x205x120xbf16, #tpu.memory_space<vmem>>, vector<1x205x120xbf16>
    %118 = vector.shape_cast %117 : vector<1x205x120xbf16> to vector<205x120xbf16>
    %cst_102 = arith.constant dense<0.000000e+00> : vector<8x120xf32>
    %119 = tpu.matmul %116, %118, %cst_102 {dimension_numbers = #tpu.dot_dimension_numbers<[1], [0], [0], [1], [0, 0, 1, 1], [], []>} : vector<8x205xbf16>, vector<205x120xbf16>, vector<8x120xf32> -> vector<8x120xf32>
    %120 = arith.addf %113, %119 : vector<8x120xf32>
    %c0_103 = arith.constant 0 : index
    %c17 = arith.constant 17 : index
    %c0_104 = arith.constant 0 : index
    %121 = vector.load %arg12[%c0_103, %c17, %c0_104] : memref<8x32x205xf32, #tpu.memory_space<vmem>>, vector<8x1x205xf32>
    %122 = vector.shape_cast %121 : vector<8x1x205xf32> to vector<8x205xf32>
    %123 = arith.truncf %122 : vector<8x205xf32> to vector<8x205xbf16>
    %c17_105 = arith.constant 17 : index
    %c0_106 = arith.constant 0 : index
    %c0_107 = arith.constant 0 : index
    %124 = vector.load %arg7[%c17_105, %c0_106, %c0_107] : memref<32x205x120xbf16, #tpu.memory_space<vmem>>, vector<1x205x120xbf16>
    %125 = vector.shape_cast %124 : vector<1x205x120xbf16> to vector<205x120xbf16>
    %cst_108 = arith.constant dense<0.000000e+00> : vector<8x120xf32>
    %126 = tpu.matmul %123, %125, %cst_108 {dimension_numbers = #tpu.dot_dimension_numbers<[1], [0], [0], [1], [0, 0, 1, 1], [], []>} : vector<8x205xbf16>, vector<205x120xbf16>, vector<8x120xf32> -> vector<8x120xf32>
    %127 = arith.addf %120, %126 : vector<8x120xf32>
    %c0_109 = arith.constant 0 : index
    %c18 = arith.constant 18 : index
    %c0_110 = arith.constant 0 : index
    %128 = vector.load %arg12[%c0_109, %c18, %c0_110] : memref<8x32x205xf32, #tpu.memory_space<vmem>>, vector<8x1x205xf32>
    %129 = vector.shape_cast %128 : vector<8x1x205xf32> to vector<8x205xf32>
    %130 = arith.truncf %129 : vector<8x205xf32> to vector<8x205xbf16>
    %c18_111 = arith.constant 18 : index
    %c0_112 = arith.constant 0 : index
    %c0_113 = arith.constant 0 : index
    %131 = vector.load %arg7[%c18_111, %c0_112, %c0_113] : memref<32x205x120xbf16, #tpu.memory_space<vmem>>, vector<1x205x120xbf16>
    %132 = vector.shape_cast %131 : vector<1x205x120xbf16> to vector<205x120xbf16>
    %cst_114 = arith.constant dense<0.000000e+00> : vector<8x120xf32>
    %133 = tpu.matmul %130, %132, %cst_114 {dimension_numbers = #tpu.dot_dimension_numbers<[1], [0], [0], [1], [0, 0, 1, 1], [], []>} : vector<8x205xbf16>, vector<205x120xbf16>, vector<8x120xf32> -> vector<8x120xf32>
    %134 = arith.addf %127, %133 : vector<8x120xf32>
    %c0_115 = arith.constant 0 : index
    %c19 = arith.constant 19 : index
    %c0_116 = arith.constant 0 : index
    %135 = vector.load %arg12[%c0_115, %c19, %c0_116] : memref<8x32x205xf32, #tpu.memory_space<vmem>>, vector<8x1x205xf32>
    %136 = vector.shape_cast %135 : vector<8x1x205xf32> to vector<8x205xf32>
    %137 = arith.truncf %136 : vector<8x205xf32> to vector<8x205xbf16>
    %c19_117 = arith.constant 19 : index
    %c0_118 = arith.constant 0 : index
    %c0_119 = arith.constant 0 : index
    %138 = vector.load %arg7[%c19_117, %c0_118, %c0_119] : memref<32x205x120xbf16, #tpu.memory_space<vmem>>, vector<1x205x120xbf16>
    %139 = vector.shape_cast %138 : vector<1x205x120xbf16> to vector<205x120xbf16>
    %cst_120 = arith.constant dense<0.000000e+00> : vector<8x120xf32>
    %140 = tpu.matmul %137, %139, %cst_120 {dimension_numbers = #tpu.dot_dimension_numbers<[1], [0], [0], [1], [0, 0, 1, 1], [], []>} : vector<8x205xbf16>, vector<205x120xbf16>, vector<8x120xf32> -> vector<8x120xf32>
    %141 = arith.addf %134, %140 : vector<8x120xf32>
    %c0_121 = arith.constant 0 : index
    %c20 = arith.constant 20 : index
    %c0_122 = arith.constant 0 : index
    %142 = vector.load %arg12[%c0_121, %c20, %c0_122] : memref<8x32x205xf32, #tpu.memory_space<vmem>>, vector<8x1x205xf32>
    %143 = vector.shape_cast %142 : vector<8x1x205xf32> to vector<8x205xf32>
    %144 = arith.truncf %143 : vector<8x205xf32> to vector<8x205xbf16>
    %c20_123 = arith.constant 20 : index
    %c0_124 = arith.constant 0 : index
    %c0_125 = arith.constant 0 : index
    %145 = vector.load %arg7[%c20_123, %c0_124, %c0_125] : memref<32x205x120xbf16, #tpu.memory_space<vmem>>, vector<1x205x120xbf16>
    %146 = vector.shape_cast %145 : vector<1x205x120xbf16> to vector<205x120xbf16>
    %cst_126 = arith.constant dense<0.000000e+00> : vector<8x120xf32>
    %147 = tpu.matmul %144, %146, %cst_126 {dimension_numbers = #tpu.dot_dimension_numbers<[1], [0], [0], [1], [0, 0, 1, 1], [], []>} : vector<8x205xbf16>, vector<205x120xbf16>, vector<8x120xf32> -> vector<8x120xf32>
    %148 = arith.addf %141, %147 : vector<8x120xf32>
    %c0_127 = arith.constant 0 : index
    %c21 = arith.constant 21 : index
    %c0_128 = arith.constant 0 : index
    %149 = vector.load %arg12[%c0_127, %c21, %c0_128] : memref<8x32x205xf32, #tpu.memory_space<vmem>>, vector<8x1x205xf32>
    %150 = vector.shape_cast %149 : vector<8x1x205xf32> to vector<8x205xf32>
    %151 = arith.truncf %150 : vector<8x205xf32> to vector<8x205xbf16>
    %c21_129 = arith.constant 21 : index
    %c0_130 = arith.constant 0 : index
    %c0_131 = arith.constant 0 : index
    %152 = vector.load %arg7[%c21_129, %c0_130, %c0_131] : memref<32x205x120xbf16, #tpu.memory_space<vmem>>, vector<1x205x120xbf16>
    %153 = vector.shape_cast %152 : vector<1x205x120xbf16> to vector<205x120xbf16>
    %cst_132 = arith.constant dense<0.000000e+00> : vector<8x120xf32>
    %154 = tpu.matmul %151, %153, %cst_132 {dimension_numbers = #tpu.dot_dimension_numbers<[1], [0], [0], [1], [0, 0, 1, 1], [], []>} : vector<8x205xbf16>, vector<205x120xbf16>, vector<8x120xf32> -> vector<8x120xf32>
    %155 = arith.addf %148, %154 : vector<8x120xf32>
    %c0_133 = arith.constant 0 : index
    %c22 = arith.constant 22 : index
    %c0_134 = arith.constant 0 : index
    %156 = vector.load %arg12[%c0_133, %c22, %c0_134] : memref<8x32x205xf32, #tpu.memory_space<vmem>>, vector<8x1x205xf32>
    %157 = vector.shape_cast %156 : vector<8x1x205xf32> to vector<8x205xf32>
    %158 = arith.truncf %157 : vector<8x205xf32> to vector<8x205xbf16>
    %c22_135 = arith.constant 22 : index
    %c0_136 = arith.constant 0 : index
    %c0_137 = arith.constant 0 : index
    %159 = vector.load %arg7[%c22_135, %c0_136, %c0_137] : memref<32x205x120xbf16, #tpu.memory_space<vmem>>, vector<1x205x120xbf16>
    %160 = vector.shape_cast %159 : vector<1x205x120xbf16> to vector<205x120xbf16>
    %cst_138 = arith.constant dense<0.000000e+00> : vector<8x120xf32>
    %161 = tpu.matmul %158, %160, %cst_138 {dimension_numbers = #tpu.dot_dimension_numbers<[1], [0], [0], [1], [0, 0, 1, 1], [], []>} : vector<8x205xbf16>, vector<205x120xbf16>, vector<8x120xf32> -> vector<8x120xf32>
    %162 = arith.addf %155, %161 : vector<8x120xf32>
    %c0_139 = arith.constant 0 : index
    %c23 = arith.constant 23 : index
    %c0_140 = arith.constant 0 : index
    %163 = vector.load %arg12[%c0_139, %c23, %c0_140] : memref<8x32x205xf32, #tpu.memory_space<vmem>>, vector<8x1x205xf32>
    %164 = vector.shape_cast %163 : vector<8x1x205xf32> to vector<8x205xf32>
    %165 = arith.truncf %164 : vector<8x205xf32> to vector<8x205xbf16>
    %c23_141 = arith.constant 23 : index
    %c0_142 = arith.constant 0 : index
    %c0_143 = arith.constant 0 : index
    %166 = vector.load %arg7[%c23_141, %c0_142, %c0_143] : memref<32x205x120xbf16, #tpu.memory_space<vmem>>, vector<1x205x120xbf16>
    %167 = vector.shape_cast %166 : vector<1x205x120xbf16> to vector<205x120xbf16>
    %cst_144 = arith.constant dense<0.000000e+00> : vector<8x120xf32>
    %168 = tpu.matmul %165, %167, %cst_144 {dimension_numbers = #tpu.dot_dimension_numbers<[1], [0], [0], [1], [0, 0, 1, 1], [], []>} : vector<8x205xbf16>, vector<205x120xbf16>, vector<8x120xf32> -> vector<8x120xf32>
    %169 = arith.addf %162, %168 : vector<8x120xf32>
    %c0_145 = arith.constant 0 : index
    %c24 = arith.constant 24 : index
    %c0_146 = arith.constant 0 : index
    %170 = vector.load %arg12[%c0_145, %c24, %c0_146] : memref<8x32x205xf32, #tpu.memory_space<vmem>>, vector<8x1x205xf32>
    %171 = vector.shape_cast %170 : vector<8x1x205xf32> to vector<8x205xf32>
    %172 = arith.truncf %171 : vector<8x205xf32> to vector<8x205xbf16>
    %c24_147 = arith.constant 24 : index
    %c0_148 = arith.constant 0 : index
    %c0_149 = arith.constant 0 : index
    %173 = vector.load %arg7[%c24_147, %c0_148, %c0_149] : memref<32x205x120xbf16, #tpu.memory_space<vmem>>, vector<1x205x120xbf16>
    %174 = vector.shape_cast %173 : vector<1x205x120xbf16> to vector<205x120xbf16>
    %cst_150 = arith.constant dense<0.000000e+00> : vector<8x120xf32>
    %175 = tpu.matmul %172, %174, %cst_150 {dimension_numbers = #tpu.dot_dimension_numbers<[1], [0], [0], [1], [0, 0, 1, 1], [], []>} : vector<8x205xbf16>, vector<205x120xbf16>, vector<8x120xf32> -> vector<8x120xf32>
    %176 = arith.addf %169, %175 : vector<8x120xf32>
    %c0_151 = arith.constant 0 : index
    %c25 = arith.constant 25 : index
    %c0_152 = arith.constant 0 : index
    %177 = vector.load %arg12[%c0_151, %c25, %c0_152] : memref<8x32x205xf32, #tpu.memory_space<vmem>>, vector<8x1x205xf32>
    %178 = vector.shape_cast %177 : vector<8x1x205xf32> to vector<8x205xf32>
    %179 = arith.truncf %178 : vector<8x205xf32> to vector<8x205xbf16>
    %c25_153 = arith.constant 25 : index
    %c0_154 = arith.constant 0 : index
    %c0_155 = arith.constant 0 : index
    %180 = vector.load %arg7[%c25_153, %c0_154, %c0_155] : memref<32x205x120xbf16, #tpu.memory_space<vmem>>, vector<1x205x120xbf16>
    %181 = vector.shape_cast %180 : vector<1x205x120xbf16> to vector<205x120xbf16>
    %cst_156 = arith.constant dense<0.000000e+00> : vector<8x120xf32>
    %182 = tpu.matmul %179, %181, %cst_156 {dimension_numbers = #tpu.dot_dimension_numbers<[1], [0], [0], [1], [0, 0, 1, 1], [], []>} : vector<8x205xbf16>, vector<205x120xbf16>, vector<8x120xf32> -> vector<8x120xf32>
    %183 = arith.addf %176, %182 : vector<8x120xf32>
    %c0_157 = arith.constant 0 : index
    %c26 = arith.constant 26 : index
    %c0_158 = arith.constant 0 : index
    %184 = vector.load %arg12[%c0_157, %c26, %c0_158] : memref<8x32x205xf32, #tpu.memory_space<vmem>>, vector<8x1x205xf32>
    %185 = vector.shape_cast %184 : vector<8x1x205xf32> to vector<8x205xf32>
    %186 = arith.truncf %185 : vector<8x205xf32> to vector<8x205xbf16>
    %c26_159 = arith.constant 26 : index
    %c0_160 = arith.constant 0 : index
    %c0_161 = arith.constant 0 : index
    %187 = vector.load %arg7[%c26_159, %c0_160, %c0_161] : memref<32x205x120xbf16, #tpu.memory_space<vmem>>, vector<1x205x120xbf16>
    %188 = vector.shape_cast %187 : vector<1x205x120xbf16> to vector<205x120xbf16>
    %cst_162 = arith.constant dense<0.000000e+00> : vector<8x120xf32>
    %189 = tpu.matmul %186, %188, %cst_162 {dimension_numbers = #tpu.dot_dimension_numbers<[1], [0], [0], [1], [0, 0, 1, 1], [], []>} : vector<8x205xbf16>, vector<205x120xbf16>, vector<8x120xf32> -> vector<8x120xf32>
    %190 = arith.addf %183, %189 : vector<8x120xf32>
    %c0_163 = arith.constant 0 : index
    %c27 = arith.constant 27 : index
    %c0_164 = arith.constant 0 : index
    %191 = vector.load %arg12[%c0_163, %c27, %c0_164] : memref<8x32x205xf32, #tpu.memory_space<vmem>>, vector<8x1x205xf32>
    %192 = vector.shape_cast %191 : vector<8x1x205xf32> to vector<8x205xf32>
    %193 = arith.truncf %192 : vector<8x205xf32> to vector<8x205xbf16>
    %c27_165 = arith.constant 27 : index
    %c0_166 = arith.constant 0 : index
    %c0_167 = arith.constant 0 : index
    %194 = vector.load %arg7[%c27_165, %c0_166, %c0_167] : memref<32x205x120xbf16, #tpu.memory_space<vmem>>, vector<1x205x120xbf16>
    %195 = vector.shape_cast %194 : vector<1x205x120xbf16> to vector<205x120xbf16>
    %cst_168 = arith.constant dense<0.000000e+00> : vector<8x120xf32>
    %196 = tpu.matmul %193, %195, %cst_168 {dimension_numbers = #tpu.dot_dimension_numbers<[1], [0], [0], [1], [0, 0, 1, 1], [], []>} : vector<8x205xbf16>, vector<205x120xbf16>, vector<8x120xf32> -> vector<8x120xf32>
    %197 = arith.addf %190, %196 : vector<8x120xf32>
    %c0_169 = arith.constant 0 : index
    %c28 = arith.constant 28 : index
    %c0_170 = arith.constant 0 : index
    %198 = vector.load %arg12[%c0_169, %c28, %c0_170] : memref<8x32x205xf32, #tpu.memory_space<vmem>>, vector<8x1x205xf32>
    %199 = vector.shape_cast %198 : vector<8x1x205xf32> to vector<8x205xf32>
    %200 = arith.truncf %199 : vector<8x205xf32> to vector<8x205xbf16>
    %c28_171 = arith.constant 28 : index
    %c0_172 = arith.constant 0 : index
    %c0_173 = arith.constant 0 : index
    %201 = vector.load %arg7[%c28_171, %c0_172, %c0_173] : memref<32x205x120xbf16, #tpu.memory_space<vmem>>, vector<1x205x120xbf16>
    %202 = vector.shape_cast %201 : vector<1x205x120xbf16> to vector<205x120xbf16>
    %cst_174 = arith.constant dense<0.000000e+00> : vector<8x120xf32>
    %203 = tpu.matmul %200, %202, %cst_174 {dimension_numbers = #tpu.dot_dimension_numbers<[1], [0], [0], [1], [0, 0, 1, 1], [], []>} : vector<8x205xbf16>, vector<205x120xbf16>, vector<8x120xf32> -> vector<8x120xf32>
    %204 = arith.addf %197, %203 : vector<8x120xf32>
    %c0_175 = arith.constant 0 : index
    %c29 = arith.constant 29 : index
    %c0_176 = arith.constant 0 : index
    %205 = vector.load %arg12[%c0_175, %c29, %c0_176] : memref<8x32x205xf32, #tpu.memory_space<vmem>>, vector<8x1x205xf32>
    %206 = vector.shape_cast %205 : vector<8x1x205xf32> to vector<8x205xf32>
    %207 = arith.truncf %206 : vector<8x205xf32> to vector<8x205xbf16>
    %c29_177 = arith.constant 29 : index
    %c0_178 = arith.constant 0 : index
    %c0_179 = arith.constant 0 : index
    %208 = vector.load %arg7[%c29_177, %c0_178, %c0_179] : memref<32x205x120xbf16, #tpu.memory_space<vmem>>, vector<1x205x120xbf16>
    %209 = vector.shape_cast %208 : vector<1x205x120xbf16> to vector<205x120xbf16>
    %cst_180 = arith.constant dense<0.000000e+00> : vector<8x120xf32>
    %210 = tpu.matmul %207, %209, %cst_180 {dimension_numbers = #tpu.dot_dimension_numbers<[1], [0], [0], [1], [0, 0, 1, 1], [], []>} : vector<8x205xbf16>, vector<205x120xbf16>, vector<8x120xf32> -> vector<8x120xf32>
    %211 = arith.addf %204, %210 : vector<8x120xf32>
    %c0_181 = arith.constant 0 : index
    %c30 = arith.constant 30 : index
    %c0_182 = arith.constant 0 : index
    %212 = vector.load %arg12[%c0_181, %c30, %c0_182] : memref<8x32x205xf32, #tpu.memory_space<vmem>>, vector<8x1x205xf32>
    %213 = vector.shape_cast %212 : vector<8x1x205xf32> to vector<8x205xf32>
    %214 = arith.truncf %213 : vector<8x205xf32> to vector<8x205xbf16>
    %c30_183 = arith.constant 30 : index
    %c0_184 = arith.constant 0 : index
    %c0_185 = arith.constant 0 : index
    %215 = vector.load %arg7[%c30_183, %c0_184, %c0_185] : memref<32x205x120xbf16, #tpu.memory_space<vmem>>, vector<1x205x120xbf16>
    %216 = vector.shape_cast %215 : vector<1x205x120xbf16> to vector<205x120xbf16>
    %cst_186 = arith.constant dense<0.000000e+00> : vector<8x120xf32>
    %217 = tpu.matmul %214, %216, %cst_186 {dimension_numbers = #tpu.dot_dimension_numbers<[1], [0], [0], [1], [0, 0, 1, 1], [], []>} : vector<8x205xbf16>, vector<205x120xbf16>, vector<8x120xf32> -> vector<8x120xf32>
    %218 = arith.addf %211, %217 : vector<8x120xf32>
    %c0_187 = arith.constant 0 : index
    %c31 = arith.constant 31 : index
    %c0_188 = arith.constant 0 : index
    %219 = vector.load %arg12[%c0_187, %c31, %c0_188] : memref<8x32x205xf32, #tpu.memory_space<vmem>>, vector<8x1x205xf32>
    %220 = vector.shape_cast %219 : vector<8x1x205xf32> to vector<8x205xf32>
    %221 = arith.truncf %220 : vector<8x205xf32> to vector<8x205xbf16>
    %c31_189 = arith.constant 31 : index
    %c0_190 = arith.constant 0 : index
    %c0_191 = arith.constant 0 : index
    %222 = vector.load %arg7[%c31_189, %c0_190, %c0_191] : memref<32x205x120xbf16, #tpu.memory_space<vmem>>, vector<1x205x120xbf16>
    %223 = vector.shape_cast %222 : vector<1x205x120xbf16> to vector<205x120xbf16>
    %cst_192 = arith.constant dense<0.000000e+00> : vector<8x120xf32>
    %224 = tpu.matmul %221, %223, %cst_192 {dimension_numbers = #tpu.dot_dimension_numbers<[1], [0], [0], [1], [0, 0, 1, 1], [], []>} : vector<8x205xbf16>, vector<205x120xbf16>, vector<8x120xf32> -> vector<8x120xf32>
    %225 = arith.addf %218, %224 : vector<8x120xf32>
    %c0_193 = arith.constant 0 : index
    %c0_194 = arith.constant 0 : index
    %226 = vector.load %arg8[%c0_193, %c0_194] : memref<1x120xf32, #tpu.memory_space<vmem>>, vector<1x120xf32>
    %227 = vector.broadcast %226 : vector<1x120xf32> to vector<8x120xf32>
    %228 = arith.addf %225, %227 : vector<8x120xf32>
    %229 = math.tanh %228 : vector<8x120xf32>
    %230 = arith.truncf %229 : vector<8x120xf32> to vector<8x120xbf16>
    %c0_195 = arith.constant 0 : index
    %c0_196 = arith.constant 0 : index
    %231 = vector.load %arg9[%c0_195, %c0_196] : memref<120x10xbf16, #tpu.memory_space<vmem>>, vector<120x10xbf16>
    %cst_197 = arith.constant dense<0.000000e+00> : vector<8x10xf32>
    %232 = tpu.matmul %230, %231, %cst_197 {dimension_numbers = #tpu.dot_dimension_numbers<[1], [0], [0], [1], [0, 0, 1, 1], [], []>} : vector<8x120xbf16>, vector<120x10xbf16>, vector<8x10xf32> -> vector<8x10xf32>
    %c0_198 = arith.constant 0 : index
    %c0_199 = arith.constant 0 : index
    %233 = vector.load %arg10[%c0_198, %c0_199] : memref<1x10xf32, #tpu.memory_space<vmem>>, vector<1x10xf32>
    %234 = vector.broadcast %233 : vector<1x10xf32> to vector<8x10xf32>
    %235 = arith.addf %232, %234 : vector<8x10xf32>
    %c0_200 = arith.constant 0 : index
    %c0_201 = arith.constant 0 : index
    %236 = vector.load %arg11[%c0_200, %c0_201] : memref<8x10xf32, #tpu.memory_space<vmem>>, vector<8x10xf32>
    tpu.vector_store %arg11[%c0_200, %c0_201], %235 {strides = array<i32>} : memref<8x10xf32, #tpu.memory_space<vmem>>, vector<8x10xf32>,
    return
  }
  func.func @transform_0(%arg0: i32) -> (i32, i32, i32) {
    %c0_i32 = arith.constant 0 : i32
    %c0_i32_0 = arith.constant 0 : i32
    %c0_i32_1 = arith.constant 0 : i32
    return %arg0, %c0_i32, %c0_i32_0 : i32, i32, i32
  }
  func.func @transform_1(%arg0: i32) -> (i32, i32) {
    %c0_i32 = arith.constant 0 : i32
    %c0_i32_0 = arith.constant 0 : i32
    %c0_i32_1 = arith.constant 0 : i32
    return %c0_i32, %c0_i32_0 : i32, i32
  }
  func.func @transform_2(%arg0: i32) -> (i32, i32) {
    %c0_i32 = arith.constant 0 : i32
    %c0_i32_0 = arith.constant 0 : i32
    %c0_i32_1 = arith.constant 0 : i32
    return %c0_i32, %c0_i32_0 : i32, i32
  }
  func.func @transform_3(%arg0: i32) -> (i32, i32) {
    %c0_i32 = arith.constant 0 : i32
    %c0_i32_0 = arith.constant 0 : i32
    %c0_i32_1 = arith.constant 0 : i32
    return %c0_i32, %c0_i32_0 : i32, i32
  }
  func.func @transform_4(%arg0: i32) -> (i32, i32) {
    %c0_i32 = arith.constant 0 : i32
    %c0_i32_0 = arith.constant 0 : i32
    %c0_i32_1 = arith.constant 0 : i32
    return %c0_i32, %c0_i32_0 : i32, i32
  }
  func.func @transform_5(%arg0: i32) -> (i32, i32) {
    %c0_i32 = arith.constant 0 : i32
    %c0_i32_0 = arith.constant 0 : i32
    %c0_i32_1 = arith.constant 0 : i32
    return %c0_i32, %c0_i32_0 : i32, i32
  }
  func.func @transform_6(%arg0: i32) -> (i32, i32, i32) {
    %c0_i32 = arith.constant 0 : i32
    %c0_i32_0 = arith.constant 0 : i32
    %c0_i32_1 = arith.constant 0 : i32
    %c0_i32_2 = arith.constant 0 : i32
    return %c0_i32, %c0_i32_0, %c0_i32_1 : i32, i32, i32
  }
  func.func @transform_7(%arg0: i32) -> (i32, i32) {
    %c0_i32 = arith.constant 0 : i32
    %c0_i32_0 = arith.constant 0 : i32
    %c0_i32_1 = arith.constant 0 : i32
    return %c0_i32, %c0_i32_0 : i32, i32
  }
  func.func @transform_8(%arg0: i32) -> (i32, i32) {
    %c0_i32 = arith.constant 0 : i32
    %c0_i32_0 = arith.constant 0 : i32
    %c0_i32_1 = arith.constant 0 : i32
    return %c0_i32, %c0_i32_0 : i32, i32
  }
  func.func @transform_9(%arg0: i32) -> (i32, i32) {
    %c0_i32 = arith.constant 0 : i32
    %c0_i32_0 = arith.constant 0 : i32
    %c0_i32_1 = arith.constant 0 : i32
    return %c0_i32, %c0_i32_0 : i32, i32
  }
  func.func @transform_10(%arg0: i32) -> (i32, i32) {
    %c0_i32 = arith.constant 0 : i32
    %c0_i32_0 = arith.constant 0 : i32
    return %arg0, %c0_i32 : i32, i32
  }
}

</mosaic_0001>

<bundles_post_ra>
// kernel: cnn_small_forward.1
= control target key start
LH: loop header
LB: loop body
LE: loop exit
PB: predicated region body
PF: predicated region fallthrough
CT: control target
= control target key end

     0   :  { %s13374_s13 = smov 0   ;;  %s17973_s0 = inlined_call_operand.vmem [shape: f32[8,36,256], index: 0, kind: input, shape index: {}]   ;;  %s17974_s1 = inlined_call_operand.vmem [shape: f32[1,256], index: 1, kind: input, shape index: {}]   ;;  %s17975_s2 = inlined_call_operand.vmem [shape: f32[32,9], index: 2, kind: input, shape index: {}]   ;;  %s17976_s3 = inlined_call_operand.vmem [shape: f32[32,1], index: 3, kind: input, shape index: {}]   ;;  %s17977_s4 = inlined_call_operand.vmem [shape: bf16[32,288], index: 4, kind: input, shape index: {}]   ;;  %s17978_s5 = inlined_call_operand.vmem [shape: f32[32,1], index: 5, kind: input, shape index: {}]   ;;  %s17979_s6 = inlined_call_operand.vmem [shape: bf16[32,205,120], index: 6, kind: input, shape index: {}]   ;;  %s17980_s7 = inlined_call_operand.vmem [shape: f32[1,120], index: 7, kind: input, shape index: {}]   ;;  %s17981_s8 = inlined_call_operand.vmem [shape: bf16[120,10], index: 8, kind: input, shape index: {}]   ;;  %s17982_s9 = inlined_call_operand.vmem [shape: f32[1,10], index: 9, kind: input, shape index: {}]   ;;  %s17983_s10 = inlined_call_operand.vmem [shape: f32[8,10], index: 10, kind: output, shape index: {}]  }
   0x1 LB: > { %v13382_v0 = vld [vmem:[%s17975_s2 + $0x10] sm:$0xff]  ;;  %v13387_v1 = vld [vmem:[%s17975_s2] sm:$0xff]  ;;  %v13301_v2 = vmov 1   ;;  %v17984_v3 = vmov 0   ;;  %v13397_v4 = vld [vmem:[%s17975_s2 + $0x18] sm:$0xff]  ;;  %v13303_v6 = vmov 2   ;;  %s13299_s13 = sphi %s13374_s13, %s41_s13  }
   0x2   : > { %13260 = vset.pattern.permute.xlu2 %v13301_v2  ;;  %13259 = vset.pattern.permute.xlu1 %v17984_v3  ;;  %v13402_v5 = vld [vmem:[%s17975_s2 + $0x8] sm:$0xff]  ;;  %v13304_v7 = vmov 3   ;;  %v13305_v8 = vmov 4   ;;  %v13306_v9 = vmov 5   ;;  %v13307_v10 = vmov 7   ;;  %s12799_s22 = smul.u32 80, %s13299_s13 }
   0x3   : > { %13258 = vset.pattern.permute.xlu0 %v17984_v3  ;;  %165 = vperm.xlu2 %13260, %v13382_v0   ;;  %v13308_v11 = vmov 6   ;;  %v13309_v12 = vmov 8   ;;  %s13310_s17 = smov 112   ;;  %s13311_s18 = smov 95   ;;  %vm1043_vm0 = vcmask 916480   ;;  %vm1118_vm1 = vcmask 769024  }
   0x4   : > { %76 = vperm.xlu1 %13259, %v13382_v0   ;;  %66 = vperm.xlu0 %13258, %v13387_v1   ;;  %s13440_s25 = scalar_lea.vmem %s17973_s0, %s12799_s22  ;;  %s13312_s19 = smov 94   ;;  %vm1103_vm2 = vcmask 777216   ;;  %vm1187_vm3 = vcmask 261120   ;;  %vm1028_vm4 = vcmask 1031168   ;;  %vm1088_vm5 = vcmask 785408  }
   0x5   : > { %v13443_v14 = vld [vmem:[%s13440_s25] sm:$0xff]  ;;  %v13446_v15 = vld [vmem:[%s13440_s25 + $0x8] sm:$0xff]  ;;  %v13449_v16 = vld [vmem:[%s13440_s25 + $0x10] sm:$0xff]  ;;  %s13313_s20 = smov 126   ;;  %s13314_s21 = smov 96   ;;  %vm1073_vm6 = vcmask 900096  }
   0x6   : > { %18060 = vst [vmem:[#allocation3_spill] sm:$0xff] %v13443_v14  ;;  %v13453_v17 = vld [vmem:[%s13440_s25 + $0x18] sm:$0xff]  ;;  %v13456_v18 = vld [vmem:[%s13440_s25 + $0x20] sm:$0xff]  ;;  %v13459_v19 = vld [vmem:[%s13440_s25 + $0x28] sm:$0xff]  ;;  %v13469_v22 = vperm.slane %v13443_v14, 1  ;;  %v13472_v23 = vperm.slane %v13446_v15, 1 }
   0x7   : > { %18061 = vst [vmem:[#allocation4_spill] sm:$0xff] %v13446_v15  ;;  %v13462_v20 = vld [vmem:[%s13440_s25 + $0x30] sm:$0xff]  ;;  %v13465_v21 = vld [vmem:[%s13440_s25 + $0x38] sm:$0xff]  ;;  %v13475_v24 = vperm.slane %v13449_v16, 2  ;;  %v13478_v25 = vperm.slane %v13453_v17, 2  ;;  %v13481_v26 = vperm.slane %v13456_v18, 3 }
   0x8   : > { %18062 = vst [vmem:[#allocation5_spill] sm:$0xff] %v13449_v16  ;;  %v13484_v27 = vperm.slane %v13459_v19, 3  ;;  %v13487_v29 = vperm.slane %v13462_v20, 4  ;;  %v13490_v30 = vperm.slane %v13465_v21, 4  ;;  %v13493_v31 = vperm.slane %v13443_v14, 0  ;;  %s13315_s22 = smov 127  }
   0x9   : > { %18063 = vst [vmem:[#allocation6_spill] sm:$0xff] %v13453_v17  ;;  %v13496_v32 = vperm.slane %v13446_v15, 0  ;;  %v13499_v33 = vperm.slane %v13449_v16, 1  ;;  %v13502_v34 = vperm.slane %v13453_v17, 1  ;;  %v13505_v35 = vperm.slane %v13456_v18, 2  ;;  %s13316_s23 = smov 110  }
   0xa   : > { %18064 = vst [vmem:[#allocation7_spill] sm:$0xff] %v13456_v18  ;;  %v13508_v36 = vperm.slane %v13459_v19, 2  ;;  %v13517_v39 = vperm.slane %v13462_v20, 3  ;;  %v13520_v40 = vperm.slane %v13465_v21, 3  ;;  %v13542_v47 = vperm.slane %v13443_v14, 3  ;;  %s13317_s24 = smov 111  }
   0xb   : > { %169 = vperm.xlu2 %13260, %v13397_v4   ;;  %18065 = vst [vmem:[#allocation8_spill] sm:$0xff] %v13459_v19  ;;  %v13545_v48 = vperm.slane %v13446_v15, 3  ;;  %v13549_v49 = vperm.slane %v13449_v16, 4  ;;  %v13552_v50 = vperm.slane %v13453_v17, 4  ;;  %v13555_v51 = vperm.slane %v13456_v18, 5 }
   0xc   : > { %81 = vperm.xlu1 %13259, %v13397_v4   ;;  %71 = vperm.xlu0 %13258, %v13402_v5   ;;  %18066 = vst [vmem:[#allocation9_spill] sm:$0xff] %v13462_v20  ;;  %v13558_v52 = vperm.slane %v13459_v19, 5  ;;  %v13568_v55 = vperm.slane %v13462_v20, 6  ;;  %v13571_v56 = vperm.slane %v13465_v21, 6  ;;  %v13592_v63 = vperm.slane %v13443_v14, 2 }
   0xd   : > { %18067 = vst [vmem:[#allocation10_spill] sm:$0xff] %v13465_v21  ;;  %vm1013_vm7 = vcmask 1039360   ;;  %vm1058_vm8 = vcmask 908288   ;;  %vm1410_vm9 = vcmask 629760  }
   0xe   : > { %18068 = vst [vmem:[#allocation11_spill] sm:$0xff] %v13469_v22 }
   0xf   : > { %18069 = vst [vmem:[#allocation12_spill] sm:$0xff] %v13472_v23 }
  0x10   : > { %18070 = vst [vmem:[#allocation13_spill] sm:$0xff] %v13475_v24 }
  0x11   : > { %18071 = vst [vmem:[#allocation14_spill] sm:$0xff] %v13478_v25 }
  0x12   : > { %18072 = vst [vmem:[#allocation15_spill] sm:$0xff] %v13481_v26 }
  0x13   : > { %157 = vperm.xlu2 %13260, %v13387_v1   ;;  %18073 = vst [vmem:[#allocation16_spill] sm:$0xff] %v13484_v27 }
  0x14   : > { %13262 = vset.pattern.permute.xlu1 %v13303_v6  ;;  %13261 = vset.pattern.permute.xlu0 %v13303_v6  ;;  %18074 = vst [vmem:[#allocation17_spill] sm:$0xff] %v13487_v29 }
  0x15   : > { %257 = vperm.xlu1 %13262, %v13397_v4   ;;  %253 = vperm.xlu0 %13261, %v13382_v0   ;;  %18075 = vst [vmem:[#allocation18_spill] sm:$0xff] %v13490_v30 }
  0x1b   : > { %13264 = vset.pattern.permute.xlu2 %v13304_v7 }
  0x1c   : > { %341 = vperm.xlu2 %13264, %v13382_v0  }
  0x1d   : > { %13263 = vset.pattern.permute.xlu1 %v13301_v2  ;;  %13265 = vset.pattern.permute.xlu0 %v13304_v7  ;;  %v49_v2 = vld [vmem:[%s17976_s3 + $0x18] sm:$0xff] }
  0x1e   : > { %161 = vperm.xlu1 %13263, %v13402_v5   ;;  %345 = vperm.xlu0 %13265, %v13397_v4  }
  0x24   : > { %13267 = vset.pattern.permute.xlu2 %v13303_v6 }
  0x25   : > { %249 = vperm.xlu2 %13267, %v13402_v5  }
  0x26   : > { %13266 = vset.pattern.permute.xlu1 %v13303_v6  ;;  %333 = vperm.xlu0 %13265, %v13387_v1   ;;  %v13607_v6 = vperm.slane %v13456_v18, 4 }
  0x27   : > { %245 = vperm.xlu1 %13266, %v13387_v1  }
  0x28   : > { %18076 = vst [vmem:[#allocation19_spill] sm:$0xff] %v13607_v6  ;;  %v18079_v6 = vmov 0  }
  0x2d   : > { %13269 = vset.pattern.permute.xlu2 %v13305_v8 }
  0x2e   : > { %13272 = vset.pattern.permute.xlu0 %v13306_v9  ;;  %433 = vperm.xlu2 %13269, %v13397_v4  }
  0x2f   : > { %13268 = vset.pattern.permute.xlu1 %v13305_v8  ;;  %521 = vperm.xlu0 %13272, %v13397_v4  }
  0x30   : > { %429 = vperm.xlu1 %13268, %v13382_v0  }
  0x36   : > { %13271 = vset.pattern.permute.xlu2 %v13306_v9 }
  0x37   : > { %509 = vperm.xlu0 %13272, %v13387_v1   ;;  %517 = vperm.xlu2 %13271, %v13382_v0  }
  0x38   : > { %13270 = vset.pattern.permute.xlu1 %v13304_v7  ;;  %v13610_v7 = vperm.slane %v13459_v19, 4 }
  0x39   : > { %337 = vperm.xlu1 %13270, %v13402_v5  }
  0x3f   : > { %13279 = vset.pattern.permute.xlu0 %v13307_v10  ;;  %13274 = vset.pattern.permute.xlu2 %v13305_v8 }
  0x40   : > { %697 = vperm.xlu0 %13279, %v13397_v4   ;;  %425 = vperm.xlu2 %13274, %v13402_v5  }
  0x41   : > { %13273 = vset.pattern.permute.xlu1 %v13305_v8 }
  0x42   : > { %421 = vperm.xlu1 %13273, %v13387_v1  }
  0x48   : > { %13276 = vset.pattern.permute.xlu2 %v13308_v11  ;;  %685 = vperm.xlu0 %13279, %v13387_v1  }
  0x49   : > { %609 = vperm.xlu2 %13276, %v13397_v4  }
  0x4a   : > { %13275 = vset.pattern.permute.xlu1 %v13308_v11 }
  0x4b   : > { %605 = vperm.xlu1 %13275, %v13382_v0  }
  0x50   : > { %13285 = vset.pattern.permute.xlu0 %v13309_v12 }
  0x51   : > { %13278 = vset.pattern.permute.xlu2 %v13307_v10  ;;  %777 = vperm.xlu0 %13285, %v13402_v5  }
  0x52   : > { %693 = vperm.xlu2 %13278, %v13382_v0  }
  0x53   : > { %13277 = vset.pattern.permute.xlu1 %v13306_v9 }
  0x54   : > { %513 = vperm.xlu1 %13277, %v13402_v5  }
  0x59   : > { %13288 = vset.pattern.permute.xlu0 %v17984_v3 }
  0x5a   : > { %13281 = vset.pattern.permute.xlu2 %v13308_v11 }
  0x5b   : > { %601 = vperm.xlu2 %13281, %v13402_v5  }
  0x5c   : > { %13280 = vset.pattern.permute.xlu1 %v13308_v11  ;;  %v13618_v11 = vperm.slane %v13465_v21, 5 }
  0x5d   : > { %597 = vperm.xlu1 %13280, %v13387_v1   ;;  %v166_v13 = vpop.permute.xlu2 %165 }
  0x5e   : > { %v13511_v37 = vmul.f32 %v13469_v22, %v166_v13  ;;  %v13514_v38 = vmul.f32 %v13472_v23, %v166_v13  ;;  %v13523_v41 = vmul.f32 %v13475_v24, %v166_v13  ;;  %v13526_v42 = vmul.f32 %v13478_v25, %v166_v13  ;;  %18078 = vst [vmem:[#allocation21_spill] sm:$0xff] %v13618_v11 }
  0x5f   : > { %v13529_v43 = vmul.f32 %v13481_v26, %v166_v13  ;;  %v13532_v44 = vmul.f32 %v13484_v27, %v166_v13  ;;  %v13536_v45 = vmul.f32 %v13487_v29, %v166_v13  ;;  %v13539_v46 = vmul.f32 %v13490_v30, %v166_v13 }
  0x60   : > { %v13631_v11 = vperm.slane %v13443_v14, 4 }
  0x62   : > { %18080 = vst [vmem:[#allocation22_spill] sm:$0xff] %v13631_v11 }
  0x63   : > { %13283 = vset.pattern.permute.xlu2 %v13309_v12 }
  0x64   : > { %785 = vperm.xlu2 %13283, %v13397_v4   ;;  %v13601_v4 = vperm.slane %v13449_v16, 3 }
  0x65   : > { %13282 = vset.pattern.permute.xlu1 %v13309_v12  ;;  %v170_v28 = vpop.permute.xlu2 %169 }
  0x66   : > { %781 = vperm.xlu1 %13282, %v13382_v0   ;;  %v13561_v53 = vmul.f32 %v13469_v22, %v170_v28  ;;  %v13564_v54 = vmul.f32 %v13472_v23, %v170_v28  ;;  %v13574_v57 = vmul.f32 %v13475_v24, %v170_v28  ;;  %v13577_v58 = vmul.f32 %v13478_v25, %v170_v28 }
  0x67   : > { %v13580_v59 = vmul.f32 %v13481_v26, %v170_v28  ;;  %v13583_v60 = vmul.f32 %v13484_v27, %v170_v28  ;;  %v13586_v61 = vmul.f32 %v13487_v29, %v170_v28  ;;  %v13589_v62 = vmul.f32 %v13490_v30, %v170_v28 }
  0x68   : > { %v13595_v0 = vperm.slane %v13446_v15, 2 }
  0x6c   : > { %773 = vperm.xlu2 %13283, %v13387_v1  }
  0x6d   : > { %v158_v1 = vpop.permute.xlu2 %157 }
  0x6e   : > { %13284 = vset.pattern.permute.xlu1 %v13307_v10  ;;  %v174_v8 = vmul.f32 %v13469_v22, %v158_v1  ;;  %v175_v9 = vmul.f32 %v13472_v23, %v158_v1  ;;  %v13615_v10 = vperm.slane %v13462_v20, 5  ;;  %v192_v12 = vmul.f32 %v13475_v24, %v158_v1 }
  0x6f   : > { %689 = vperm.xlu1 %13284, %v13402_v5   ;;  %v13604_v5 = vperm.slane %v13453_v17, 3  ;;  %v193_v13 = vmul.f32 %v13478_v25, %v158_v1  ;;  %v210_v28 = vmul.f32 %v13481_v26, %v158_v1  ;;  %v211_v3 = vmul.f32 %v13484_v27, %v158_v1 }
  0x70   : > { %18077 = vst [vmem:[#allocation20_spill] sm:$0xff] %v13615_v10  ;;  %v228_v22 = vmul.f32 %v13487_v29, %v158_v1  ;;  %v229_v23 = vmul.f32 %v13490_v30, %v158_v1  ;;  %v48_v10 = vld [vmem:[%s17976_s3 + $0x10] sm:$0xff]  ;;  %v13634_v25 = vperm.slane %v13446_v15, 4  ;;  %v13637_v27 = vperm.slane %v13449_v16, 5 }
  0x71   : > { %v13640_v29 = vperm.slane %v13453_v17, 5  ;;  %v13643_v1 = vperm.slane %v13456_v18, 6 }
  0x72   : > { %18081 = vst [vmem:[#allocation23_spill] sm:$0xff] %v13634_v25 }
  0x73   : > { %18082 = vst [vmem:[#allocation24_spill] sm:$0xff] %v13637_v27 }
  0x74   : > { %13287 = vset.pattern.permute.xlu2 %v18079_v6  ;;  %18083 = vst [vmem:[#allocation25_spill] sm:$0xff] %v13640_v29 }
  0x75   : > { %877 = vperm.xlu2 %13287, %v49_v2   ;;  %18084 = vst [vmem:[#allocation26_spill] sm:$0xff] %v13643_v1  ;;  %v13646_v2 = vperm.slane %v13459_v19, 6 }
  0x76   : > { %v77_v26 = vpop.permute.xlu1 %76  ;;  %v67_v24 = vpop.permute.xlu0 %66 }
  0x77   : > { %18085 = vst [vmem:[#allocation27_spill] sm:$0xff] %v13646_v2  ;;  %v90_v14 = vmul.f32 %v13493_v31, %v77_v26  ;;  %v91_v30 = vmul.f32 %v13496_v32, %v77_v26  ;;  %v108_v15 = vmul.f32 %v13499_v33, %v77_v26  ;;  %v109_v25 = vmul.f32 %v13502_v34, %v77_v26 }
  0x78   : > { %13286 = vset.pattern.permute.xlu1 %v18079_v6  ;;  %v126_v16 = vmul.f32 %v13505_v35, %v77_v26  ;;  %v127_v17 = vmul.f32 %v13508_v36, %v77_v26  ;;  %v144_v18 = vmul.f32 %v13517_v39, %v77_v26  ;;  %v145_v1 = vmul.f32 %v13520_v40, %v77_v26 }
  0x79   : > { %872 = vperm.xlu1 %13286, %v48_v10   ;;  %v13658_v19 = vadd.f32 %v13511_v37, %v90_v14  ;;  %v13661_v2 = vadd.f32 %v13514_v38, %v91_v30  ;;  %v13664_v29 = vadd.f32 %v13523_v41, %v108_v15  ;;  %v13667_v6 = vadd.f32 %v13526_v42, %v109_v25  ;;  %v47_v15 = vld [vmem:[%s17976_s3 + $0x8] sm:$0xff]  ;;  %v342_v42 = vpop.permute.xlu2 %341 }
  0x7a   : > { %v13670_v27 = vadd.f32 %v13529_v43, %v126_v16  ;;  %v13673_v11 = vadd.f32 %v13532_v44, %v127_v17  ;;  %v13676_v26 = vadd.f32 %v13536_v45, %v144_v18  ;;  %v13679_v14 = vadd.f32 %v13539_v46, %v145_v1  ;;  %v46_v45 = vld [vmem:[%s17976_s3] sm:$0xff] }
  0x7b   : > { %v86_v30 = vmul.f32 %v13493_v31, %v67_v24  ;;  %v87_v25 = vmul.f32 %v13496_v32, %v67_v24  ;;  %v104_v16 = vmul.f32 %v13499_v33, %v67_v24  ;;  %v105_v37 = vmul.f32 %v13502_v34, %v67_v24 }
  0x7c   : > { %18086 = vst [vmem:[#allocation28_spill] sm:$0xff] %v13679_v14  ;;  %v122_v17 = vmul.f32 %v13505_v35, %v67_v24  ;;  %v123_v18 = vmul.f32 %v13508_v36, %v67_v24  ;;  %v140_v38 = vmul.f32 %v13517_v39, %v67_v24  ;;  %v141_v41 = vmul.f32 %v13520_v40, %v67_v24 }
  0x7d   : > { %v13692_v43 = vadd.f32 %v174_v8, %v86_v30  ;;  %v13694_v44 = vadd.f32 %v175_v9, %v87_v25  ;;  %v13700_v46 = vperm.slane %v13462_v20, 7  ;;  %v13703_v10 = vperm.slane %v13465_v21, 7  ;;  %867 = vperm.xlu2 %13287, %v47_v15  }
  0x7e   : > { %v13705_v1 = vadd.f32 %v192_v12, %v104_v16  ;;  %v13707_v14 = vadd.f32 %v193_v13, %v105_v37  ;;  %v13709_v24 = vadd.f32 %v210_v28, %v122_v17  ;;  %v13711_v8 = vadd.f32 %v211_v3, %v123_v18  ;;  %v82_v9 = vpop.permute.xlu1 %81 }
  0x7f   : > { %18087 = vst [vmem:[#allocation29_spill] sm:$0xff] %v13692_v43  ;;  %v13713_v30 = vadd.f32 %v228_v22, %v140_v38  ;;  %v13715_v25 = vadd.f32 %v229_v23, %v141_v41  ;;  %v13718_v20 = vmul.f32 %v13542_v47, %v342_v42  ;;  %v13721_v21 = vmul.f32 %v13545_v48, %v342_v42  ;;  %v72_v23 = vpop.permute.xlu0 %71 }
  0x80   : > { %18088 = vst [vmem:[#allocation30_spill] sm:$0xff] %v13694_v44  ;;  %v13724_v12 = vmul.f32 %v13549_v49, %v342_v42  ;;  %v13727_v13 = vmul.f32 %v13552_v50, %v342_v42  ;;  %v13730_v3 = vmul.f32 %v13555_v51, %v342_v42  ;;  %v13733_v22 = vmul.f32 %v13558_v52, %v342_v42 }
  0x81   : > { %18089 = vst [vmem:[#allocation31_spill] sm:$0xff] %v13705_v1  ;;  %862 = vperm.xlu1 %13286, %v46_v45   ;;  %v92_v28 = vmul.f32 %v13493_v31, %v82_v9  ;;  %v93_v15 = vmul.f32 %v13496_v32, %v82_v9  ;;  %v110_v16 = vmul.f32 %v13499_v33, %v82_v9 }
  0x82   : > { %18090 = vst [vmem:[#allocation32_spill] sm:$0xff] %v13707_v14  ;;  %v111_v37 = vmul.f32 %v13502_v34, %v82_v9  ;;  %v128_v17 = vmul.f32 %v13505_v35, %v82_v9  ;;  %v129_v18 = vmul.f32 %v13508_v36, %v82_v9  ;;  %v146_v38 = vmul.f32 %v13517_v39, %v82_v9 }
  0x83   : > { %18091 = vst [vmem:[#allocation33_spill] sm:$0xff] %v13709_v24  ;;  %v147_v41 = vmul.f32 %v13520_v40, %v82_v9  ;;  %v189_v45 = vadd.f32 %v13564_v54, %v93_v15  ;;  %v13755_v9 = vmul.f32 %v13571_v56, %v342_v42  ;;  %v13761_v54 = vmul.f32 %v13496_v32, %v72_v23 }
  0x84   : > { %18092 = vst [vmem:[#allocation34_spill] sm:$0xff] %v13711_v8 }
  0x85   : > { %18093 = vst [vmem:[#allocation35_spill] sm:$0xff] %v13713_v30  ;;  %v13752_v30 = vmul.f32 %v13568_v55, %v342_v42  ;;  %v18107_v42 = vld [vmem:[#allocation19_spill] sm:$0xff] }
  0x86   : > { %18094 = vst [vmem:[#allocation36_spill] sm:$0xff] %v13715_v25  ;;  %v243_v25 = vadd.f32 %v13589_v62, %v147_v41  ;;  %v13776_v62 = vmul.f32 %v13517_v39, %v72_v23  ;;  %v18111_v41 = vld [vmem:[#allocation21_spill] sm:$0xff] }
  0x87   : > { %18095 = vst [vmem:[#allocation37_spill] sm:$0xff] %v13718_v20  ;;  %v242_v20 = vadd.f32 %v13586_v61, %v146_v38  ;;  %v250_v61 = vpop.permute.xlu2 %249 }
  0x88   : > { %18096 = vst [vmem:[#allocation38_spill] sm:$0xff] %v13721_v21  ;;  %v225_v21 = vadd.f32 %v13583_v60, %v129_v18  ;;  %v13773_v60 = vmul.f32 %v13508_v36, %v72_v23  ;;  %v13782_v32 = vmul.f32 %v13592_v63, %v250_v61  ;;  %v13791_v36 = vmul.f32 %v13604_v5, %v250_v61  ;;  %v18110_v18 = vld [vmem:[#allocation20_spill] sm:$0xff] }
  0x89   : > { %18097 = vst [vmem:[#allocation39_spill] sm:$0xff] %v13724_v12  ;;  %v224_v12 = vadd.f32 %v13580_v59, %v128_v17  ;;  %v13770_v59 = vmul.f32 %v13505_v35, %v72_v23  ;;  %v13788_v35 = vmul.f32 %v13601_v4, %v250_v61  ;;  %v13797_v39 = vmul.f32 %v13610_v7, %v250_v61 }
  0x8a   : > { %18098 = vst [vmem:[#allocation40_spill] sm:$0xff] %v13727_v13  ;;  %v207_v13 = vadd.f32 %v13577_v58, %v111_v37  ;;  %v13767_v58 = vmul.f32 %v13502_v34, %v72_v23  ;;  %v258_v34 = vpop.permute.xlu1 %257 }
  0x8b   : > { %18099 = vst [vmem:[#allocation41_spill] sm:$0xff] %v13730_v3  ;;  %v206_v3 = vadd.f32 %v13574_v57, %v110_v16  ;;  %v13764_v57 = vmul.f32 %v13499_v33, %v72_v23  ;;  %v13785_v33 = vmul.f32 %v13595_v0, %v250_v61  ;;  %v286_v15 = vmul.f32 %v13601_v4, %v258_v34 }
  0x8c   : > { %18100 = vst [vmem:[#allocation42_spill] sm:$0xff] %v13733_v22  ;;  %v188_v22 = vadd.f32 %v13561_v53, %v92_v28  ;;  %v13758_v53 = vmul.f32 %v13493_v31, %v72_v23  ;;  %v13779_v31 = vmul.f32 %v13520_v40, %v72_v23  ;;  %v13794_v28 = vmul.f32 %v18107_v42, %v250_v61 }
  0x8d   : > { %18101 = vst [vmem:[#allocation43_spill] sm:$0xff] %v13752_v30  ;;  %v268_v40 = vmul.f32 %v13592_v63, %v258_v34  ;;  %v269_v23 = vmul.f32 %v13595_v0, %v258_v34  ;;  %v287_v16 = vmul.f32 %v13604_v5, %v258_v34  ;;  %v304_v37 = vmul.f32 %v18107_v42, %v258_v34 }
  0x8e   : > { %18102 = vst [vmem:[#allocation44_spill] sm:$0xff] %v13755_v9  ;;  %v305_v17 = vmul.f32 %v13610_v7, %v258_v34  ;;  %v322_v38 = vmul.f32 %v18110_v18, %v258_v34 }
  0x8f   : > { %18103 = vst [vmem:[#allocation45_spill] sm:$0xff] %v13782_v32  ;;  %v295_v32 = vadd.f32 %v287_v16, %v207_v13  ;;  %v312_v9 = vadd.f32 %v304_v37, %v224_v12  ;;  %v18127_v16 = vld [vmem:[#allocation26_spill] sm:$0xff] }
  0x90   : > { %18104 = vst [vmem:[#allocation46_spill] sm:$0xff] %v13785_v33  ;;  %v277_v33 = vadd.f32 %v269_v23, %v189_v45  ;;  %v313_v30 = vadd.f32 %v305_v17, %v225_v21  ;;  %v13807_v8 = vadd.f32 %v322_v38, %v242_v20  ;;  %v13820_v20 = vmul.f32 %v18110_v18, %v250_v61  ;;  %v18130_v38 = vld [vmem:[#allocation11_spill] sm:$0xff] }
  0x91   : > { %18105 = vst [vmem:[#allocation47_spill] sm:$0xff] %v13788_v35  ;;  %v276_v35 = vadd.f32 %v268_v40, %v188_v22 }
  0x92   : > { %18106 = vst [vmem:[#allocation48_spill] sm:$0xff] %v13791_v36  ;;  %v323_v36 = vmul.f32 %v18111_v41, %v258_v34  ;;  %v162_v23 = vpop.permute.xlu1 %161 }
  0x93   : > { %18108 = vst [vmem:[#allocation19_spill] sm:$0xff] %v13794_v28  ;;  %v254_v28 = vpop.permute.xlu0 %253 }
  0x94   : > { %18109 = vst [vmem:[#allocation49_spill] sm:$0xff] %v13797_v39  ;;  %v294_v39 = vadd.f32 %v286_v15, %v206_v3  ;;  %v13809_v24 = vadd.f32 %v323_v36, %v243_v25  ;;  %v266_v14 = vmul.f32 %v13592_v63, %v254_v28  ;;  %v267_v1 = vmul.f32 %v13595_v0, %v254_v28  ;;  %v18126_v15 = vld [vmem:[#allocation25_spill] sm:$0xff] }
  0x95   : > { %v284_v44 = vmul.f32 %v13601_v4, %v254_v28  ;;  %v285_v43 = vmul.f32 %v13604_v5, %v254_v28  ;;  %v302_v34 = vmul.f32 %v18107_v42, %v254_v28  ;;  %v303_v22 = vmul.f32 %v13610_v7, %v254_v28  ;;  %18112 = vst [vmem:[#allocation20_spill] sm:$0xff] %v13820_v20 }
  0x96   : > { %v320_v13 = vmul.f32 %v18110_v18, %v254_v28  ;;  %v321_v21 = vmul.f32 %v18111_v41, %v254_v28  ;;  %v13823_v25 = vmul.f32 %v18111_v41, %v250_v61  ;;  %v13826_v12 = vadd.f32 %v266_v14, %v13658_v19  ;;  %v434_v61 = vpop.permute.xlu2 %433  ;;  %v18121_v14 = vld [vmem:[#allocation28_spill] sm:$0xff] }
  0x97   : > { %v13829_v3 = vadd.f32 %v267_v1, %v13661_v2  ;;  %v13832_v45 = vadd.f32 %v284_v44, %v13664_v29  ;;  %v13835_v36 = vadd.f32 %v285_v43, %v13667_v6  ;;  %v13838_v28 = vadd.f32 %v302_v34, %v13670_v27  ;;  %v18123_v1 = vld [vmem:[#allocation22_spill] sm:$0xff]  ;;  %v18124_v44 = vld [vmem:[#allocation23_spill] sm:$0xff]  ;;  %v18125_v43 = vld [vmem:[#allocation24_spill] sm:$0xff] }
  0x98   : > { %18113 = vst [vmem:[#allocation21_spill] sm:$0xff] %v13823_v25  ;;  %v13841_v40 = vadd.f32 %v303_v22, %v13673_v11  ;;  %v13844_v19 = vadd.f32 %v320_v13, %v13676_v26  ;;  %v13847_v2 = vadd.f32 %v321_v21, %v18121_v14  ;;  %v13850_v29 = vmul.f32 %v18123_v1, %v434_v61  ;;  %v18128_v26 = vld [vmem:[#allocation27_spill] sm:$0xff]  ;;  %v18131_v22 = vld [vmem:[#allocation12_spill] sm:$0xff]  ;;  %v18132_v21 = vld [vmem:[#allocation13_spill] sm:$0xff] }
  0x99   : > { %18114 = vst [vmem:[#allocation50_spill] sm:$0xff] %v13826_v12  ;;  %v13853_v6 = vmul.f32 %v18124_v44, %v434_v61  ;;  %v13856_v27 = vmul.f32 %v18125_v43, %v434_v61  ;;  %v13859_v11 = vmul.f32 %v18126_v15, %v434_v61  ;;  %v13862_v37 = vmul.f32 %v18127_v16, %v434_v61  ;;  %v18133_v25 = vld [vmem:[#allocation14_spill] sm:$0xff] }
  0x9a   : > { %18115 = vst [vmem:[#allocation51_spill] sm:$0xff] %v13829_v3  ;;  %v13865_v17 = vmul.f32 %v18128_v26, %v434_v61  ;;  %v176_v34 = vmul.f32 %v18130_v38, %v162_v23  ;;  %v177_v13 = vmul.f32 %v18131_v22, %v162_v23  ;;  %v194_v14 = vmul.f32 %v18132_v21, %v162_v23  ;;  %v18140_v22 = vld [vmem:[#allocation17_spill] sm:$0xff] }
  0x9b   : > { %18116 = vst [vmem:[#allocation52_spill] sm:$0xff] %v13832_v45  ;;  %v195_v20 = vmul.f32 %v18133_v25, %v162_v23  ;;  %v346_v3 = vpop.permute.xlu0 %345  ;;  %v230_v21 = vmul.f32 %v18140_v22, %v162_v23  ;;  %v18141_v25 = vld [vmem:[#allocation18_spill] sm:$0xff] }
  0x9c   : > { %18117 = vst [vmem:[#allocation53_spill] sm:$0xff] %v13835_v36  ;;  %v18137_v36 = vld [vmem:[#allocation16_spill] sm:$0xff]  ;;  %v13880_v12 = vadd.f32 %v176_v34, %v13758_v53  ;;  %v13883_v38 = vadd.f32 %v177_v13, %v13761_v54  ;;  %v356_v53 = vmul.f32 %v13542_v47, %v346_v3  ;;  %v357_v54 = vmul.f32 %v13545_v48, %v346_v3 }
  0x9d   : > { %18118 = vst [vmem:[#allocation54_spill] sm:$0xff] %v13838_v28  ;;  %v213_v45 = vmul.f32 %v18137_v36, %v162_v23  ;;  %v392_v34 = vmul.f32 %v13555_v51, %v346_v3 }
  0x9e   : > { %18119 = vst [vmem:[#allocation55_spill] sm:$0xff] %v13841_v40  ;;  %v18136_v40 = vld [vmem:[#allocation15_spill] sm:$0xff]  ;;  %v13915_v13 = vadd.f32 %v357_v54, %v277_v33 }
  0x9f   : > { %18120 = vst [vmem:[#allocation56_spill] sm:$0xff] %v13844_v19  ;;  %v13875_v19 = vmul.f32 %v13703_v10, %v434_v61  ;;  %v212_v28 = vmul.f32 %v18136_v40, %v162_v23  ;;  %v13897_v36 = vadd.f32 %v213_v45, %v13773_v60  ;;  %v13908_v60 = vadd.f32 %v230_v21, %v13776_v62  ;;  %v18150_v33 = vld [vmem:[#allocation3_spill] sm:$0xff]  ;;  %v18153_v21 = vld [vmem:[#allocation6_spill] sm:$0xff] }
  0xa0   : > { %18122 = vst [vmem:[#allocation28_spill] sm:$0xff] %v13847_v2  ;;  %v13872_v2 = vmul.f32 %v13700_v46, %v434_v61  ;;  %v13891_v61 = vadd.f32 %v195_v20, %v13767_v58  ;;  %v393_v58 = vmul.f32 %v13558_v52, %v346_v3  ;;  %v411_v20 = vmul.f32 %v13571_v56, %v346_v3  ;;  %v18154_v54 = vld [vmem:[#allocation7_spill] sm:$0xff] }
  0xa1   : > { %18129 = vst [vmem:[#allocation22_spill] sm:$0xff] %v13865_v17  ;;  %v231_v17 = vmul.f32 %v18141_v25, %v162_v23  ;;  %v13894_v40 = vadd.f32 %v212_v28, %v13770_v59  ;;  %v374_v23 = vmul.f32 %v13549_v49, %v346_v3  ;;  %v410_v59 = vmul.f32 %v13568_v55, %v346_v3 }
  0xa2   : > { %18134 = vst [vmem:[#allocation23_spill] sm:$0xff] %v13872_v2  ;;  %v13888_v2 = vadd.f32 %v194_v14, %v13764_v57  ;;  %v375_v57 = vmul.f32 %v13552_v50, %v346_v3  ;;  %v13913_v28 = vadd.f32 %v356_v53, %v276_v35  ;;  %v13921_v25 = vadd.f32 %v392_v34, %v312_v9  ;;  %v13929_v3 = vld [vmem:[%s13440_s25 + $0x48] sm:$0xf]  ;;  %v518_v9 = vpop.permute.xlu2 %517 }
  0xa3   : > { %18135 = vst [vmem:[#allocation24_spill] sm:$0xff] %v13875_v19  ;;  %v13911_v45 = vadd.f32 %v231_v17, %v13779_v31  ;;  %v13917_v14 = vadd.f32 %v374_v23, %v294_v39  ;;  %v13932_v62 = vadd.f32 %v410_v59, %v13807_v8  ;;  %v13935_v31 = vadd.f32 %v411_v20, %v13809_v24  ;;  %v18151_v39 = vld [vmem:[#allocation4_spill] sm:$0xff]  ;;  %v18152_v17 = vld [vmem:[#allocation5_spill] sm:$0xff]  ;;  %v246_v24 = vpop.permute.xlu1 %245 }
  0xa4   : > { %18138 = vst [vmem:[#allocation25_spill] sm:$0xff] %v13880_v12  ;;  %v13919_v22 = vadd.f32 %v375_v57, %v295_v32  ;;  %v13938_v35 = vperm.slane %v18150_v33, 5  ;;  %v13941_v32 = vperm.slane %v18151_v39, 5  ;;  %v13947_v53 = vperm.slane %v18153_v21, 6  ;;  %v18156_v8 = vld [vmem:[#allocation8_spill] sm:$0xff]  ;;  %v18168_v33 = vld [vmem:[#allocation33_spill] sm:$0xff] }
  0xa5   : > { %18139 = vst [vmem:[#allocation26_spill] sm:$0xff] %v13883_v38  ;;  %v13950_v23 = vperm.slane %v18154_v54, 7  ;;  %v13953_v57 = vperm.slane %v18156_v8, 7  ;;  %v13965_v20 = vperm.slane %v13929_v3, 0  ;;  %v281_v38 = vmul.f32 %v13604_v5, %v246_v24  ;;  %v18167_v39 = vld [vmem:[#allocation32_spill] sm:$0xff] }
  0xa6   : > { %18142 = vst [vmem:[#allocation27_spill] sm:$0xff] %v13888_v2  ;;  %v13956_v34 = vmul.f32 %v13938_v35, %v518_v9  ;;  %v13971_v54 = vmul.f32 %v13947_v53, %v518_v9  ;;  %v280_v2 = vmul.f32 %v13601_v4, %v246_v24  ;;  %v299_v12 = vmul.f32 %v13610_v7, %v246_v24  ;;  %v18171_v19 = vld [vmem:[#allocation36_spill] sm:$0xff] }
  0xa7   : > { %18143 = vst [vmem:[#allocation11_spill] sm:$0xff] %v13891_v61  ;;  %v13974_v8 = vmul.f32 %v13950_v23, %v518_v9  ;;  %v263_v61 = vmul.f32 %v13595_v0, %v246_v24  ;;  %v289_v0 = vadd.f32 %v281_v38, %v18167_v39 }
  0xa8   : > { %18144 = vst [vmem:[#allocation12_spill] sm:$0xff] %v13894_v40  ;;  %v13926_v40 = vld [vmem:[%s13440_s25 + $0x40] sm:$0xf] }
  0xa9   : > { %18145 = vst [vmem:[#allocation13_spill] sm:$0xff] %v13897_v36  ;;  %v13923_v36 = vadd.f32 %v393_v58, %v313_v30  ;;  %v13944_v30 = vperm.slane %v18152_v17, 6  ;;  %v13959_v58 = vmul.f32 %v13941_v32, %v518_v9  ;;  %v13962_v59 = vperm.slane %v13926_v40, 0  ;;  %v18166_v17 = vld [vmem:[#allocation31_spill] sm:$0xff] }
  0xaa   : > { %18146 = vst [vmem:[#allocation14_spill] sm:$0xff] %v13908_v60  ;;  %v334_v60 = vpop.permute.xlu0 %333 }
  0xab   : > { %18147 = vst [vmem:[#allocation15_spill] sm:$0xff] %v13911_v45  ;;  %v13968_v45 = vmul.f32 %v13944_v30, %v518_v9  ;;  %v387_v38 = vmul.f32 %v13558_v52, %v334_v60 }
  0xac   : > { %18148 = vst [vmem:[#allocation16_spill] sm:$0xff] %v13926_v40 }
  0xad   : > { %18149 = vst [vmem:[#allocation17_spill] sm:$0xff] %v13929_v3  ;;  %v18164_v3 = vld [vmem:[#allocation29_spill] sm:$0xff] }
  0xae   : > { %18155 = vst [vmem:[#allocation18_spill] sm:$0xff] %v13950_v23  ;;  %v18170_v23 = vld [vmem:[#allocation35_spill] sm:$0xff] }
  0xaf   : > { %18157 = vst [vmem:[#allocation57_spill] sm:$0xff] %v13953_v57 }
  0xb0   : > { %18158 = vst [vmem:[#allocation58_spill] sm:$0xff] %v13956_v34  ;;  %v13977_v34 = vmul.f32 %v13953_v57, %v518_v9  ;;  %v18169_v57 = vld [vmem:[#allocation34_spill] sm:$0xff] }
  0xb1   : > { %18159 = vst [vmem:[#allocation59_spill] sm:$0xff] %v13959_v58  ;;  %v262_v58 = vmul.f32 %v13592_v63, %v246_v24  ;;  %v288_v63 = vadd.f32 %v280_v2, %v18166_v17  ;;  %v307_v5 = vadd.f32 %v299_v12, %v18169_v57  ;;  %v386_v2 = vmul.f32 %v13555_v51, %v334_v60 }
  0xb2   : > { %18160 = vst [vmem:[#allocation60_spill] sm:$0xff] %v13968_v45  ;;  %v298_v45 = vmul.f32 %v18107_v42, %v246_v24  ;;  %v405_v12 = vmul.f32 %v13571_v56, %v334_v60 }
  0xb3   : > { %18161 = vst [vmem:[#allocation61_spill] sm:$0xff] %v13971_v54  ;;  %v316_v54 = vmul.f32 %v18110_v18, %v246_v24  ;;  %v270_v40 = vadd.f32 %v262_v58, %v18164_v3  ;;  %v350_v18 = vmul.f32 %v13542_v47, %v334_v60  ;;  %v368_v3 = vmul.f32 %v13549_v49, %v334_v60 }
  0xb4   : > { %18162 = vst [vmem:[#allocation62_spill] sm:$0xff] %v13974_v8  ;;  %v317_v8 = vmul.f32 %v18111_v41, %v246_v24  ;;  %v306_v4 = vadd.f32 %v298_v45, %v18168_v33  ;;  %v351_v41 = vmul.f32 %v13545_v48, %v334_v60  ;;  %v404_v45 = vmul.f32 %v13568_v55, %v334_v60  ;;  %v426_v24 = vpop.permute.xlu2 %425 }
  0xb5   : > { %18163 = vst [vmem:[#allocation63_spill] sm:$0xff] %v13977_v34  ;;  %v18165_v34 = vld [vmem:[#allocation30_spill] sm:$0xff]  ;;  %v324_v42 = vadd.f32 %v316_v54, %v18170_v23  ;;  %v14004_v33 = vmul.f32 %v13962_v59, %v518_v9  ;;  %v14009_v39 = vadd.f32 %v350_v18, %v270_v40  ;;  %v14013_v54 = vadd.f32 %v368_v3, %v288_v63 }
  0xb6   : > { %v271_v21 = vadd.f32 %v263_v61, %v18165_v34  ;;  %v325_v7 = vadd.f32 %v317_v8, %v18171_v19  ;;  %v369_v61 = vmul.f32 %v13552_v50, %v334_v60  ;;  %v14007_v19 = vmul.f32 %v13965_v20, %v518_v9 }
  0xb7   : > { %18172 = vst [vmem:[#allocation29_spill] sm:$0xff] %v14004_v33  ;;  %v14017_v8 = vadd.f32 %v386_v2, %v306_v4  ;;  %v14019_v57 = vadd.f32 %v387_v38, %v307_v5  ;;  %v14021_v60 = vadd.f32 %v404_v45, %v324_v42  ;;  %v14026_v9 = vmul.f32 %v18123_v1, %v426_v24  ;;  %v522_v4 = vpop.permute.xlu0 %521  ;;  %v18189_v2 = vld [vmem:[#allocation22_spill] sm:$0xff]  ;;  %v18199_v33 = vld [vmem:[#allocation39_spill] sm:$0xff] }
  0xb8   : > { %18173 = vst [vmem:[#allocation30_spill] sm:$0xff] %v14007_v19  ;;  %v14011_v17 = vadd.f32 %v351_v41, %v271_v21  ;;  %v14015_v23 = vadd.f32 %v369_v61, %v289_v0  ;;  %v14023_v34 = vadd.f32 %v405_v12, %v325_v7  ;;  %v14029_v40 = vmul.f32 %v18124_v44, %v426_v24  ;;  %v18198_v19 = vld [vmem:[#allocation52_spill] sm:$0xff] }
  0xb9   : > { %18175 = vst [vmem:[#allocation32_spill] sm:$0xff] %v14013_v54  ;;  %v14032_v21 = vmul.f32 %v18125_v43, %v426_v24  ;;  %v14035_v58 = vmul.f32 %v18126_v15, %v426_v24  ;;  %v14038_v63 = vmul.f32 %v18127_v16, %v426_v24  ;;  %v14041_v0 = vmul.f32 %v18128_v26, %v426_v24 }
  0xba   : > { %18174 = vst [vmem:[#allocation31_spill] sm:$0xff] %v14011_v17  ;;  %v14044_v5 = vmul.f32 %v13700_v46, %v426_v24  ;;  %v14047_v42 = vmul.f32 %v13703_v10, %v426_v24  ;;  %v452_v7 = vadd.f32 %v13850_v29, %v13913_v28  ;;  %v453_v18 = vadd.f32 %v13853_v6, %v13915_v13  ;;  %v18190_v28 = vld [vmem:[#allocation23_spill] sm:$0xff]  ;;  %v18191_v13 = vld [vmem:[#allocation24_spill] sm:$0xff] }
  0xbb   : > { %18176 = vst [vmem:[#allocation33_spill] sm:$0xff] %v14015_v23  ;;  %v470_v41 = vadd.f32 %v13856_v27, %v13917_v14  ;;  %v471_v3 = vadd.f32 %v13859_v11, %v13919_v22  ;;  %v488_v61 = vadd.f32 %v13862_v37, %v13921_v25  ;;  %v489_v38 = vadd.f32 %v18189_v2, %v13923_v36  ;;  %v18192_v14 = vld [vmem:[#allocation18_spill] sm:$0xff]  ;;  %v18193_v37 = vld [vmem:[#allocation57_spill] sm:$0xff] }
  0xbc   : > { %18177 = vst [vmem:[#allocation34_spill] sm:$0xff] %v14017_v8  ;;  %v532_v45 = vmul.f32 %v13938_v35, %v522_v4  ;;  %v533_v12 = vmul.f32 %v13941_v32, %v522_v4  ;;  %v550_v29 = vmul.f32 %v13944_v30, %v522_v4  ;;  %v551_v6 = vmul.f32 %v13947_v53, %v522_v4 }
  0xbd   : > { %18178 = vst [vmem:[#allocation35_spill] sm:$0xff] %v14019_v57  ;;  %v506_v27 = vadd.f32 %v18190_v28, %v13932_v62  ;;  %v507_v11 = vadd.f32 %v18191_v13, %v13935_v31  ;;  %v568_v22 = vmul.f32 %v18192_v14, %v522_v4  ;;  %v569_v25 = vmul.f32 %v18193_v37, %v522_v4  ;;  %v18195_v62 = vld [vmem:[#allocation37_spill] sm:$0xff]  ;;  %v18197_v31 = vld [vmem:[#allocation38_spill] sm:$0xff] }
  0xbe   : > { %18179 = vst [vmem:[#allocation36_spill] sm:$0xff] %v14021_v60  ;;  %v540_v24 = vadd.f32 %v532_v45, %v452_v7  ;;  %v541_v36 = vadd.f32 %v533_v12, %v453_v18  ;;  %v586_v2 = vmul.f32 %v13962_v59, %v522_v4  ;;  %v18200_v7 = vld [vmem:[#allocation53_spill] sm:$0xff]  ;;  %v18201_v18 = vld [vmem:[#allocation40_spill] sm:$0xff]  ;;  %v18202_v12 = vld [vmem:[#allocation54_spill] sm:$0xff] }
  0xbf   : > { %18180 = vst [vmem:[#allocation64_spill] sm:$0xff] %v14023_v34  ;;  %v380_v34 = vadd.f32 %v18199_v33, %v18198_v19  ;;  %v381_v45 = vadd.f32 %v18201_v18, %v18200_v7  ;;  %v18203_v60 = vld [vmem:[#allocation41_spill] sm:$0xff] }
  0xc0   : > { %18181 = vst [vmem:[#allocation65_spill] sm:$0xff] %v14026_v9  ;;  %v18196_v9 = vld [vmem:[#allocation51_spill] sm:$0xff] }
  0xc1   : > { %18182 = vst [vmem:[#allocation66_spill] sm:$0xff] %v14029_v40  ;;  %v18194_v40 = vld [vmem:[#allocation50_spill] sm:$0xff]  ;;  %v363_v13 = vadd.f32 %v18197_v31, %v18196_v9  ;;  %v594_v31 = vadd.f32 %v586_v2, %v506_v27 }
  0xc2   : > { %18183 = vst [vmem:[#allocation67_spill] sm:$0xff] %v14032_v21  ;;  %v430_v21 = vpop.permute.xlu1 %429  ;;  %v362_v28 = vadd.f32 %v18195_v62, %v18194_v40  ;;  %v18209_v40 = vld [vmem:[#allocation44_spill] sm:$0xff] }
  0xc3   : > { %18184 = vst [vmem:[#allocation68_spill] sm:$0xff] %v14035_v58  ;;  %v577_v58 = vadd.f32 %v569_v25, %v489_v38  ;;  %v18206_v38 = vld [vmem:[#allocation56_spill] sm:$0xff]  ;;  %v442_v9 = vmul.f32 %v18123_v1, %v430_v21  ;;  %v443_v62 = vmul.f32 %v18124_v44, %v430_v21  ;;  %v460_v33 = vmul.f32 %v18125_v43, %v430_v21 }
  0xc4   : > { %18185 = vst [vmem:[#allocation69_spill] sm:$0xff] %v14038_v63  ;;  %v576_v63 = vadd.f32 %v568_v22, %v488_v61  ;;  %v18208_v22 = vld [vmem:[#allocation28_spill] sm:$0xff]  ;;  %v461_v19 = vmul.f32 %v18126_v15, %v430_v21  ;;  %v479_v18 = vmul.f32 %v18128_v26, %v430_v21 }
  0xc5   : > { %18186 = vst [vmem:[#allocation70_spill] sm:$0xff] %v14041_v0  ;;  %v559_v0 = vadd.f32 %v551_v6, %v471_v3  ;;  %v18205_v3 = vld [vmem:[#allocation42_spill] sm:$0xff]  ;;  %v417_v25 = vadd.f32 %v18209_v40, %v18208_v22 }
  0xc6   : > { %18187 = vst [vmem:[#allocation71_spill] sm:$0xff] %v14044_v5  ;;  %v558_v5 = vadd.f32 %v550_v29, %v470_v41  ;;  %v18204_v41 = vld [vmem:[#allocation55_spill] sm:$0xff]  ;;  %v14103_v22 = vadd.f32 %v461_v19, %v381_v45 }
  0xc7   : > { %18188 = vst [vmem:[#allocation72_spill] sm:$0xff] %v14047_v42  ;;  %v587_v42 = vmul.f32 %v13965_v20, %v522_v4  ;;  %v398_v4 = vadd.f32 %v18203_v60, %v18202_v12  ;;  %v399_v61 = vadd.f32 %v18205_v3, %v18204_v41  ;;  %v18207_v29 = vld [vmem:[#allocation43_spill] sm:$0xff]  ;;  %v478_v60 = vmul.f32 %v18127_v16, %v430_v21 }
  0xc8   : > { %v416_v6 = vadd.f32 %v18207_v29, %v18206_v38  ;;  %v14095_v12 = vadd.f32 %v442_v9, %v362_v28  ;;  %v14097_v41 = vadd.f32 %v443_v62, %v363_v13  ;;  %v496_v3 = vmul.f32 %v13700_v46, %v430_v21  ;;  %18213 = vst [vmem:[#allocation50_spill] sm:$0xff] %v14103_v22  ;;  %v18218_v28 = vld [vmem:[#allocation4_spill] sm:$0xff]  ;;  %v18220_v13 = vld [vmem:[#allocation5_spill] sm:$0xff] }
  0xc9   : > { %v595_v7 = vadd.f32 %v587_v42, %v507_v11  ;;  %v497_v38 = vmul.f32 %v13703_v10, %v430_v21  ;;  %v14101_v29 = vadd.f32 %v460_v33, %v380_v34  ;;  %v14105_v40 = vadd.f32 %v478_v60, %v398_v4  ;;  %v610_v42 = vpop.permute.xlu2 %609  ;;  %v18216_v11 = vld [vmem:[#allocation3_spill] sm:$0xff]  ;;  %v18224_v34 = vld [vmem:[#allocation9_spill] sm:$0xff]  ;;  %v18226_v4 = vld [vmem:[#allocation10_spill] sm:$0xff] }
  0xca   : > { %18210 = vst [vmem:[#allocation22_spill] sm:$0xff] %v14095_v12  ;;  %v14107_v27 = vadd.f32 %v479_v18, %v399_v61  ;;  %v14110_v2 = vperm.slane %v18216_v11, 6  ;;  %v14113_v9 = vperm.slane %v18218_v28, 6  ;;  %v14116_v62 = vperm.slane %v18220_v13, 7  ;;  %v18228_v61 = vld [vmem:[#allocation16_spill] sm:$0xff]  ;;  %v18230_v60 = vld [vmem:[#allocation17_spill] sm:$0xff] }
  0xcb   : > { %18211 = vst [vmem:[#allocation23_spill] sm:$0xff] %v14097_v41  ;;  %v18222_v41 = vld [vmem:[#allocation6_spill] sm:$0xff]  ;;  %v14122_v45 = vperm.slane %v18224_v34, 0  ;;  %v14125_v33 = vperm.slane %v18226_v4, 0  ;;  %v14128_v19 = vperm.slane %v18228_v61, 1  ;;  %v14131_v18 = vperm.slane %v18230_v60, 1 }
  0xcc   : > { %18212 = vst [vmem:[#allocation24_spill] sm:$0xff] %v14101_v29  ;;  %v14119_v21 = vperm.slane %v18222_v41, 7  ;;  %v621_v13 = vmul.f32 %v14113_v9, %v610_v42  ;;  %v14141_v8 = vadd.f32 %v496_v3, %v416_v6  ;;  %v14143_v23 = vadd.f32 %v497_v38, %v417_v25  ;;  %v18241_v3 = vld [vmem:[#allocation27_spill] sm:$0xff] }
  0xcd   : > { %18214 = vst [vmem:[#allocation37_spill] sm:$0xff] %v14105_v40  ;;  %v638_v40 = vmul.f32 %v14116_v62, %v610_v42  ;;  %v656_v22 = vmul.f32 %v14122_v45, %v610_v42  ;;  %v657_v29 = vmul.f32 %v14125_v33, %v610_v42  ;;  %v674_v12 = vmul.f32 %v14128_v19, %v610_v42  ;;  %v18242_v38 = vld [vmem:[#allocation47_spill] sm:$0xff] }
  0xce   : > { %18215 = vst [vmem:[#allocation51_spill] sm:$0xff] %v14107_v27  ;;  %v620_v27 = vmul.f32 %v14110_v2, %v610_v42  ;;  %v639_v41 = vmul.f32 %v14119_v21, %v610_v42  ;;  %v675_v57 = vmul.f32 %v14131_v18, %v610_v42  ;;  %v18245_v42 = vld [vmem:[#allocation12_spill] sm:$0xff] }
  0xcf   : > { %18217 = vst [vmem:[#allocation38_spill] sm:$0xff] %v14110_v2  ;;  %v14147_v2 = vadd.f32 %v621_v13, %v541_v36  ;;  %v14157_v17 = vadd.f32 %v674_v12, %v594_v31  ;;  %v18238_v36 = vld [vmem:[#allocation45_spill] sm:$0xff]  ;;  %v18240_v12 = vld [vmem:[#allocation46_spill] sm:$0xff]  ;;  %v18246_v13 = vld [vmem:[#allocation19_spill] sm:$0xff] }
  0xd0   : > { %18219 = vst [vmem:[#allocation52_spill] sm:$0xff] %v14113_v9  ;;  %v14145_v54 = vadd.f32 %v620_v27, %v540_v24  ;;  %v14149_v9 = vadd.f32 %v638_v40, %v558_v5  ;;  %v14159_v6 = vadd.f32 %v675_v57, %v595_v7  ;;  %v18237_v57 = vld [vmem:[#allocation25_spill] sm:$0xff]  ;;  %v18239_v7 = vld [vmem:[#allocation26_spill] sm:$0xff]  ;;  %v18244_v40 = vld [vmem:[#allocation48_spill] sm:$0xff] }
  0xd1   : > { %18221 = vst [vmem:[#allocation39_spill] sm:$0xff] %v14116_v62  ;;  %v14151_v62 = vadd.f32 %v639_v41, %v559_v0  ;;  %v272_v31 = vadd.f32 %v18238_v36, %v18237_v57  ;;  %v273_v41 = vadd.f32 %v18240_v12, %v18239_v7  ;;  %v18252_v57 = vld [vmem:[#allocation21_spill] sm:$0xff] }
  0xd2   : > { %18223 = vst [vmem:[#allocation53_spill] sm:$0xff] %v14119_v21  ;;  %v14153_v21 = vadd.f32 %v656_v22, %v576_v63  ;;  %v18243_v22 = vld [vmem:[#allocation11_spill] sm:$0xff] }
  0xd3   : > { %18225 = vst [vmem:[#allocation40_spill] sm:$0xff] %v14122_v45  ;;  %v14155_v45 = vadd.f32 %v657_v29, %v577_v58  ;;  %v290_v29 = vadd.f32 %v18242_v38, %v18241_v3  ;;  %v291_v27 = vadd.f32 %v18244_v40, %v18243_v22 }
  0xd4   : > { %18227 = vst [vmem:[#allocation54_spill] sm:$0xff] %v14125_v33  ;;  %v510_v33 = vpop.permute.xlu0 %509 }
  0xd5   : > { %18229 = vst [vmem:[#allocation41_spill] sm:$0xff] %v14128_v19  ;;  %v338_v19 = vpop.permute.xlu1 %337  ;;  %v14162_v25 = vmul.f32 %v13938_v35, %v510_v33  ;;  %v14165_v24 = vmul.f32 %v13941_v32, %v510_v33  ;;  %v14168_v5 = vmul.f32 %v13944_v30, %v510_v33  ;;  %v14171_v63 = vmul.f32 %v13947_v53, %v510_v33 }
  0xd6   : > { %v14174_v58 = vmul.f32 %v18192_v14, %v510_v33  ;;  %v14177_v0 = vmul.f32 %v18193_v37, %v510_v33  ;;  %v18251_v14 = vld [vmem:[#allocation15_spill] sm:$0xff]  ;;  %v352_v7 = vmul.f32 %v13542_v47, %v338_v19  ;;  %v353_v12 = vmul.f32 %v13545_v48, %v338_v19 }
  0xd7   : > { %18231 = vst [vmem:[#allocation55_spill] sm:$0xff] %v14162_v25  ;;  %v18249_v25 = vld [vmem:[#allocation14_spill] sm:$0xff]  ;;  %v327_v36 = vadd.f32 %v18252_v57, %v18251_v14  ;;  %v370_v3 = vmul.f32 %v13549_v49, %v338_v19  ;;  %v371_v38 = vmul.f32 %v13552_v50, %v338_v19  ;;  %v388_v22 = vmul.f32 %v13555_v51, %v338_v19 }
  0xd8   : > { %18232 = vst [vmem:[#allocation42_spill] sm:$0xff] %v14165_v24  ;;  %v389_v40 = vmul.f32 %v13558_v52, %v338_v19  ;;  %v14207_v47 = vmul.f32 %v13965_v20, %v510_v33  ;;  %v14209_v48 = vadd.f32 %v352_v7, %v272_v31  ;;  %v14211_v49 = vadd.f32 %v353_v12, %v273_v41  ;;  %v18258_v31 = vld [vmem:[#allocation8_spill] sm:$0xff] }
  0xd9   : > { %18233 = vst [vmem:[#allocation56_spill] sm:$0xff] %v14168_v5  ;;  %v18247_v5 = vld [vmem:[#allocation13_spill] sm:$0xff]  ;;  %v14213_v50 = vadd.f32 %v370_v3, %v290_v29  ;;  %v14215_v51 = vadd.f32 %v371_v38, %v291_v27  ;;  %v14225_v14 = vperm.slane %v18218_v28, 7  ;;  %v14231_v41 = vperm.slane %v18258_v31, 0 }
  0xda   : > { %18234 = vst [vmem:[#allocation43_spill] sm:$0xff] %v14171_v63  ;;  %v308_v63 = vadd.f32 %v18246_v13, %v18245_v42  ;;  %v14250_v57 = vperm.slane %v18228_v61, 2 }
  0xdb   : > { %18235 = vst [vmem:[#allocation28_spill] sm:$0xff] %v14174_v58  ;;  %v18248_v58 = vld [vmem:[#allocation49_spill] sm:$0xff] }
  0xdc   : > { %18236 = vst [vmem:[#allocation44_spill] sm:$0xff] %v14177_v0  ;;  %v309_v24 = vadd.f32 %v18248_v58, %v18247_v5  ;;  %v18250_v0 = vld [vmem:[#allocation20_spill] sm:$0xff]  ;;  %v406_v5 = vmul.f32 %v13568_v55, %v338_v19  ;;  %v407_v58 = vmul.f32 %v13571_v56, %v338_v19  ;;  %v14217_v52 = vadd.f32 %v388_v22, %v308_v63 }
  0xdd   : > { %v326_v37 = vadd.f32 %v18250_v0, %v18249_v25  ;;  %v694_v25 = vpop.permute.xlu2 %693  ;;  %v14204_v0 = vmul.f32 %v13962_v59, %v510_v33  ;;  %18253 = vst [vmem:[#allocation3_spill] sm:$0xff] %v14207_v47  ;;  %v14222_v56 = vperm.slane %v18216_v11, 7  ;;  %v18256_v33 = vld [vmem:[#allocation7_spill] sm:$0xff]  ;;  %v14238_v63 = vperm.slane %v18224_v34, 1  ;;  %v698_v11 = vpop.permute.xlu0 %697  ;;  %v18321_v47 = vld [vmem:[#allocation6_spill] sm:$0xff] }
  0xde   : > { %v14219_v55 = vadd.f32 %v389_v40, %v309_v24  ;;  %18255 = vst [vmem:[#allocation9_spill] sm:$0xff] %v14225_v14  ;;  %v14228_v19 = vperm.slane %v18256_v33, 0  ;;  %v14235_v27 = vadd.f32 %v407_v58, %v327_v36  ;;  %v14241_v24 = vperm.slane %v18226_v4, 1  ;;  %v422_v42 = vpop.permute.xlu1 %421 }
  0xdf   : > { %18254 = vst [vmem:[#allocation4_spill] sm:$0xff] %v14222_v56  ;;  %v14233_v29 = vadd.f32 %v406_v5, %v326_v37  ;;  %v14244_v28 = vmul.f32 %v14222_v56, %v694_v25  ;;  %v14247_v13 = vmul.f32 %v14225_v14, %v694_v25  ;;  %v14253_v37 = vperm.slane %v18230_v60, 2 }
  0xe0   : > { %18257 = vst [vmem:[#allocation10_spill] sm:$0xff] %v14228_v19  ;;  %v14256_v36 = vmul.f32 %v14228_v19, %v694_v25  ;;  %v14259_v7 = vmul.f32 %v14231_v41, %v694_v25  ;;  %v14262_v12 = vmul.f32 %v14238_v63, %v694_v25  ;;  %v14265_v3 = vmul.f32 %v14241_v24, %v694_v25 }
  0xe1   : > { %18259 = vst [vmem:[#allocation16_spill] sm:$0xff] %v14231_v41  ;;  %v708_v38 = vmul.f32 %v14222_v56, %v698_v11  ;;  %v709_v22 = vmul.f32 %v14225_v14, %v698_v11  ;;  %v726_v40 = vmul.f32 %v14228_v19, %v698_v11  ;;  %v727_v5 = vmul.f32 %v14231_v41, %v698_v11  ;;  %v18308_v56 = vld [vmem:[#allocation50_spill] sm:$0xff] }
  0xe2   : > { %18260 = vst [vmem:[#allocation17_spill] sm:$0xff] %v14238_v63  ;;  %v14272_v58 = vmul.f32 %v14250_v57, %v694_v25  ;;  %v763_v41 = vmul.f32 %v14253_v37, %v698_v11 }
  0xe3   : > { %18261 = vst [vmem:[#allocation25_spill] sm:$0xff] %v14241_v24  ;;  %v14288_v19 = vadd.f32 %v726_v40, %v14149_v9  ;;  %v474_v9 = vmul.f32 %v18127_v16, %v422_v42  ;;  %v492_v40 = vmul.f32 %v13700_v46, %v422_v42  ;;  %v18283_v46 = vld [vmem:[#allocation34_spill] sm:$0xff] }
  0xe4   : > { %18262 = vst [vmem:[#allocation45_spill] sm:$0xff] %v14244_v28  ;;  %v762_v28 = vmul.f32 %v14250_v57, %v698_v11 }
  0xe5   : > { %18263 = vst [vmem:[#allocation26_spill] sm:$0xff] %v14247_v13  ;;  %v14283_v13 = vadd.f32 %v709_v22, %v14147_v2  ;;  %v438_v2 = vmul.f32 %v18123_v1, %v422_v42  ;;  %v456_v22 = vmul.f32 %v18125_v43, %v422_v42 }
  0xe6   : > { %18264 = vst [vmem:[#allocation46_spill] sm:$0xff] %v14250_v57  ;;  %v18304_v57 = vld [vmem:[#allocation23_spill] sm:$0xff] }
  0xe7   : > { %18265 = vst [vmem:[#allocation27_spill] sm:$0xff] %v14253_v37  ;;  %v14314_v1 = vadd.f32 %v438_v2, %v14009_v39  ;;  %v18286_v39 = vld [vmem:[#allocation64_spill] sm:$0xff]  ;;  %v18287_v2 = vld [vmem:[#allocation38_spill] sm:$0xff] }
  0xe8   : > { %18266 = vst [vmem:[#allocation47_spill] sm:$0xff] %v14256_v36  ;;  %v14275_v36 = vmul.f32 %v14253_v37, %v694_v25  ;;  %v14291_v25 = vadd.f32 %v727_v5, %v14151_v62  ;;  %v475_v62 = vmul.f32 %v18128_v26, %v422_v42  ;;  %v18282_v26 = vld [vmem:[#allocation33_spill] sm:$0xff] }
  0xe9   : > { %18267 = vst [vmem:[#allocation11_spill] sm:$0xff] %v14259_v7  ;;  %v744_v7 = vmul.f32 %v14238_v63, %v698_v11  ;;  %v18306_v63 = vld [vmem:[#allocation24_spill] sm:$0xff] }
  0xea   : > { %18268 = vst [vmem:[#allocation48_spill] sm:$0xff] %v14262_v12  ;;  %v745_v12 = vmul.f32 %v14241_v24, %v698_v11  ;;  %v457_v11 = vmul.f32 %v18126_v15, %v422_v42  ;;  %v18281_v15 = vld [vmem:[#allocation32_spill] sm:$0xff] }
  0xeb   : > { %18269 = vst [vmem:[#allocation12_spill] sm:$0xff] %v14265_v3  ;;  %v14280_v3 = vadd.f32 %v708_v38, %v14145_v54  ;;  %v602_v54 = vpop.permute.xlu2 %601  ;;  %v439_v38 = vmul.f32 %v18124_v44, %v422_v42  ;;  %v18280_v44 = vld [vmem:[#allocation31_spill] sm:$0xff]  ;;  %v14320_v16 = vadd.f32 %v456_v22, %v18281_v15  ;;  %v18289_v22 = vld [vmem:[#allocation52_spill] sm:$0xff] }
  0xec   : > { %18270 = vst [vmem:[#allocation19_spill] sm:$0xff] %v14272_v58  ;;  %v14297_v58 = vadd.f32 %v745_v12, %v14155_v45  ;;  %v14308_v45 = vadd.f32 %v762_v28, %v14157_v17  ;;  %v14323_v12 = vadd.f32 %v457_v11, %v18282_v26  ;;  %v18284_v17 = vld [vmem:[#allocation35_spill] sm:$0xff] }
  0xed   : > { %18271 = vst [vmem:[#allocation13_spill] sm:$0xff] %v14275_v36  ;;  %v14294_v36 = vadd.f32 %v744_v7, %v14153_v21  ;;  %v493_v21 = vmul.f32 %v13703_v10, %v422_v42  ;;  %v14311_v7 = vadd.f32 %v763_v41, %v14159_v6  ;;  %v14317_v43 = vadd.f32 %v439_v38, %v18280_v44  ;;  %v606_v6 = vpop.permute.xlu1 %605  ;;  %v18285_v41 = vld [vmem:[#allocation36_spill] sm:$0xff]  ;;  %v18291_v11 = vld [vmem:[#allocation39_spill] sm:$0xff] }
  0xee   : > { %18272 = vst [vmem:[#allocation49_spill] sm:$0xff] %v14280_v3  ;;  %v14326_v10 = vadd.f32 %v474_v9, %v18283_v46  ;;  %v14329_v42 = vadd.f32 %v475_v62, %v18284_v17  ;;  %v14332_v28 = vadd.f32 %v492_v40, %v18285_v41  ;;  %v14338_v38 = vmul.f32 %v18287_v2, %v602_v54  ;;  %v18293_v9 = vld [vmem:[#allocation53_spill] sm:$0xff]  ;;  %v18295_v62 = vld [vmem:[#allocation40_spill] sm:$0xff]  ;;  %v18297_v40 = vld [vmem:[#allocation54_spill] sm:$0xff] }
  0xef   : > { %18273 = vst [vmem:[#allocation14_spill] sm:$0xff] %v14283_v13  ;;  %v14335_v5 = vadd.f32 %v493_v21, %v18286_v39  ;;  %v14341_v44 = vmul.f32 %v18289_v22, %v602_v54  ;;  %v14344_v15 = vmul.f32 %v18291_v11, %v602_v54  ;;  %v14347_v26 = vmul.f32 %v18293_v9, %v602_v54  ;;  %v18299_v21 = vld [vmem:[#allocation41_spill] sm:$0xff] }
  0xf0   : > { %18274 = vst [vmem:[#allocation20_spill] sm:$0xff] %v14288_v19  ;;  %v14350_v46 = vmul.f32 %v18295_v62, %v602_v54  ;;  %v14353_v17 = vmul.f32 %v18297_v40, %v602_v54  ;;  %v14356_v41 = vmul.f32 %v18299_v21, %v602_v54  ;;  %v14359_v39 = vmul.f32 %v14131_v18, %v602_v54 }
  0xf1   : > { %18275 = vst [vmem:[#allocation15_spill] sm:$0xff] %v14291_v25  ;;  %v618_v54 = vmul.f32 %v18287_v2, %v606_v6  ;;  %v673_v19 = vmul.f32 %v14131_v18, %v606_v6 }
  0xf2   : > { %18276 = vst [vmem:[#allocation21_spill] sm:$0xff] %v14294_v36  ;;  %v18312_v36 = vld [vmem:[#allocation51_spill] sm:$0xff] }
  0xf3   : > { %18277 = vst [vmem:[#allocation7_spill] sm:$0xff] %v14297_v58 }
  0xf4   : > { %18278 = vst [vmem:[#allocation8_spill] sm:$0xff] %v14308_v45  ;;  %v18310_v45 = vld [vmem:[#allocation37_spill] sm:$0xff] }
  0xf5   : > { %18279 = vst [vmem:[#allocation73_spill] sm:$0xff] %v14311_v7 }
  0xf6   : > { %18288 = vst [vmem:[#allocation31_spill] sm:$0xff] %v14338_v38  ;;  %v18302_v38 = vld [vmem:[#allocation22_spill] sm:$0xff] }
  0xf7   : > { %18290 = vst [vmem:[#allocation32_spill] sm:$0xff] %v14341_v44  ;;  %v18303_v44 = vld [vmem:[#allocation58_spill] sm:$0xff] }
  0xf8   : > { %18292 = vst [vmem:[#allocation33_spill] sm:$0xff] %v14344_v15  ;;  %v538_v37 = vadd.f32 %v18303_v44, %v18302_v38  ;;  %v18305_v15 = vld [vmem:[#allocation59_spill] sm:$0xff]  ;;  %v636_v38 = vmul.f32 %v18291_v11, %v606_v6  ;;  %v18314_v44 = vld [vmem:[#allocation29_spill] sm:$0xff] }
  0xf9   : > { %18294 = vst [vmem:[#allocation34_spill] sm:$0xff] %v14347_v26  ;;  %v539_v24 = vadd.f32 %v18305_v15, %v18304_v57  ;;  %v18307_v26 = vld [vmem:[#allocation60_spill] sm:$0xff]  ;;  %v637_v57 = vmul.f32 %v18293_v9, %v606_v6  ;;  %v18315_v15 = vld [vmem:[#allocation30_spill] sm:$0xff] }
  0xfa   : > { %18296 = vst [vmem:[#allocation35_spill] sm:$0xff] %v14350_v46  ;;  %v556_v14 = vadd.f32 %v18307_v26, %v18306_v63  ;;  %v18309_v46 = vld [vmem:[#allocation61_spill] sm:$0xff]  ;;  %v592_v63 = vadd.f32 %v18314_v44, %v14141_v8  ;;  %v654_v26 = vmul.f32 %v18295_v62, %v606_v6 }
  0xfb   : > { %18298 = vst [vmem:[#allocation36_spill] sm:$0xff] %v14353_v17  ;;  %v557_v7 = vadd.f32 %v18309_v46, %v18308_v56  ;;  %v18311_v17 = vld [vmem:[#allocation62_spill] sm:$0xff]  ;;  %v593_v56 = vadd.f32 %v18315_v15, %v14143_v23  ;;  %v786_v46 = vpop.permute.xlu2 %785  ;;  %v18320_v44 = vld [vmem:[#allocation5_spill] sm:$0xff] }
  0xfc   : > { %18300 = vst [vmem:[#allocation64_spill] sm:$0xff] %v14356_v41  ;;  %v574_v58 = vadd.f32 %v18311_v17, %v18310_v45  ;;  %v18313_v41 = vld [vmem:[#allocation63_spill] sm:$0xff]  ;;  %v655_v45 = vmul.f32 %v18297_v40, %v606_v6  ;;  %v14389_v13 = vadd.f32 %v636_v38, %v556_v14  ;;  %v14398_v15 = vperm.slane %v18320_v44, 0  ;;  %v18327_v44 = vld [vmem:[#allocation68_spill] sm:$0xff] }
  0xfd   : > { %18301 = vst [vmem:[#allocation38_spill] sm:$0xff] %v14359_v39  ;;  %v575_v25 = vadd.f32 %v18313_v41, %v18312_v36  ;;  %v619_v39 = vmul.f32 %v18289_v22, %v606_v6  ;;  %v14383_v36 = vadd.f32 %v618_v54, %v538_v37  ;;  %v672_v41 = vmul.f32 %v18299_v21, %v606_v6 }
  0xfe   : > { %18316 = vst [vmem:[#allocation52_spill] sm:$0xff] %v14389_v13  ;;  %v14391_v3 = vadd.f32 %v637_v57, %v557_v7  ;;  %v14393_v8 = vadd.f32 %v654_v26, %v574_v58  ;;  %v14401_v37 = vperm.slane %v18321_v47, 0  ;;  %v14410_v14 = vperm.slane %v18224_v34, 2  ;;  %v514_v47 = vpop.permute.xlu1 %513  ;;  %v18324_v57 = vld [vmem:[#allocation65_spill] sm:$0xff] }
  0xff   : > { %v14385_v17 = vadd.f32 %v619_v39, %v539_v24  ;;  %v14395_v23 = vadd.f32 %v655_v45, %v575_v25  ;;  %v14404_v24 = vperm.slane %v18256_v33, 1  ;;  %v14407_v39 = vperm.slane %v18258_v31, 1  ;;  %v18326_v45 = vld [vmem:[#allocation67_spill] sm:$0xff] }
 0x100   : > { %18317 = vst [vmem:[#allocation39_spill] sm:$0xff] %v14391_v3  ;;  %v14413_v58 = vperm.slane %v18226_v4, 2  ;;  %v14416_v25 = vperm.slane %v18228_v61, 3  ;;  %v14419_v7 = vperm.slane %v18230_v60, 3  ;;  %v14421_v6 = vadd.f32 %v672_v41, %v592_v63 }
 0x101   : > { %18318 = vst [vmem:[#allocation53_spill] sm:$0xff] %v14393_v8  ;;  %v14423_v33 = vadd.f32 %v673_v19, %v593_v56  ;;  %v14426_v31 = vmul.f32 %v14398_v15, %v786_v46  ;;  %v14429_v34 = vmul.f32 %v14401_v37, %v786_v46  ;;  %v14432_v4 = vmul.f32 %v14404_v24, %v786_v46  ;;  %v18325_v56 = vld [vmem:[#allocation66_spill] sm:$0xff] }
 0x102   : > { %18319 = vst [vmem:[#allocation40_spill] sm:$0xff] %v14395_v23  ;;  %v14435_v61 = vmul.f32 %v14407_v39, %v786_v46  ;;  %v14438_v60 = vmul.f32 %v14410_v14, %v786_v46  ;;  %v14441_v54 = vmul.f32 %v14413_v58, %v786_v46  ;;  %v14444_v19 = vmul.f32 %v14416_v25, %v786_v46  ;;  %v18329_v8 = vld [vmem:[#allocation70_spill] sm:$0xff] }
 0x103   : > { %18322 = vst [vmem:[#allocation54_spill] sm:$0xff] %v14421_v6  ;;  %v14447_v38 = vmul.f32 %v14419_v7, %v786_v46  ;;  %v448_v63 = vadd.f32 %v18324_v57, %v14209_v48  ;;  %v449_v26 = vadd.f32 %v18325_v56, %v14211_v49  ;;  %v466_v41 = vadd.f32 %v18326_v45, %v14213_v50  ;;  %v18328_v6 = vld [vmem:[#allocation69_spill] sm:$0xff]  ;;  %v18330_v57 = vld [vmem:[#allocation18_spill] sm:$0xff] }
 0x104   : > { %18323 = vst [vmem:[#allocation41_spill] sm:$0xff] %v14423_v33  ;;  %v467_v33 = vadd.f32 %v18327_v44, %v14215_v51  ;;  %v484_v23 = vadd.f32 %v18328_v6, %v14217_v52  ;;  %v485_v3 = vadd.f32 %v18329_v8, %v14219_v55  ;;  %v528_v46 = vmul.f32 %v13938_v35, %v514_v47  ;;  %v18331_v50 = vld [vmem:[#allocation57_spill] sm:$0xff]  ;;  %v774_v52 = vpop.permute.xlu2 %773  ;;  %v18332_v6 = vld [vmem:[#allocation71_spill] sm:$0xff]  ;;  %v18333_v35 = vld [vmem:[#allocation72_spill] sm:$0xff] }
 0x105   : > { %v529_v13 = vmul.f32 %v13941_v32, %v514_v47  ;;  %v546_v48 = vmul.f32 %v13944_v30, %v514_v47  ;;  %v547_v49 = vmul.f32 %v13947_v53, %v514_v47  ;;  %v564_v56 = vmul.f32 %v18330_v57, %v514_v47 }
 0x106   : > { %v565_v45 = vmul.f32 %v18331_v50, %v514_v47  ;;  %v582_v51 = vmul.f32 %v13962_v59, %v514_v47  ;;  %v583_v44 = vmul.f32 %v13965_v20, %v514_v47  ;;  %v502_v55 = vadd.f32 %v18332_v6, %v14233_v29 }
 0x107   : > { %v503_v8 = vadd.f32 %v18333_v35, %v14235_v27  ;;  %v14473_v32 = vadd.f32 %v528_v46, %v448_v63  ;;  %v14475_v30 = vadd.f32 %v529_v13, %v449_v26  ;;  %v14477_v53 = vadd.f32 %v546_v48, %v466_v41  ;;  %v598_v63 = vpop.permute.xlu1 %597  ;;  %v18338_v46 = vld [vmem:[#allocation55_spill] sm:$0xff] }
 0x108   : > { %v14479_v57 = vadd.f32 %v547_v49, %v467_v33  ;;  %v14481_v50 = vadd.f32 %v564_v56, %v484_v23  ;;  %v14483_v59 = vadd.f32 %v565_v45, %v485_v3  ;;  %v14485_v20 = vadd.f32 %v582_v51, %v502_v55  ;;  %v18339_v49 = vld [vmem:[#allocation42_spill] sm:$0xff]  ;;  %v18340_v45 = vld [vmem:[#allocation56_spill] sm:$0xff] }
 0x109   : > { %v14487_v47 = vadd.f32 %v583_v44, %v503_v8  ;;  %v14490_v29 = vmul.f32 %v14398_v15, %v774_v52  ;;  %v14493_v27 = vmul.f32 %v14401_v37, %v774_v52  ;;  %v14496_v13 = vmul.f32 %v14404_v24, %v774_v52  ;;  %v18341_v44 = vld [vmem:[#allocation43_spill] sm:$0xff]  ;;  %v18342_v55 = vld [vmem:[#allocation28_spill] sm:$0xff] }
 0x10a   : > { %v14499_v33 = vmul.f32 %v14407_v39, %v774_v52  ;;  %v14502_v23 = vmul.f32 %v14410_v14, %v774_v52  ;;  %v14505_v3 = vmul.f32 %v14413_v58, %v774_v52  ;;  %v14508_v26 = vmul.f32 %v14416_v25, %v774_v52  ;;  %v18343_v8 = vld [vmem:[#allocation44_spill] sm:$0xff] }
 0x10b   : > { %v14511_v41 = vmul.f32 %v14419_v7, %v774_v52  ;;  %v534_v48 = vadd.f32 %v18338_v46, %v14314_v1  ;;  %v535_v56 = vadd.f32 %v18339_v49, %v14317_v43  ;;  %v552_v51 = vadd.f32 %v18340_v45, %v14320_v16 }
 0x10c   : > { %18334 = vst [vmem:[#allocation22_spill] sm:$0xff] %v14502_v23  ;;  %v553_v6 = vadd.f32 %v18341_v44, %v14323_v12  ;;  %v570_v35 = vadd.f32 %v18342_v55, %v14326_v10  ;;  %v614_v52 = vmul.f32 %v18287_v2, %v598_v63  ;;  %v632_v1 = vmul.f32 %v18291_v11, %v598_v63  ;;  %v18346_v23 = vld [vmem:[#allocation14_spill] sm:$0xff] }
 0x10d   : > { %18335 = vst [vmem:[#allocation58_spill] sm:$0xff] %v14505_v3  ;;  %v633_v43 = vmul.f32 %v18293_v9, %v598_v63  ;;  %v650_v46 = vmul.f32 %v18295_v62, %v598_v63  ;;  %v651_v16 = vmul.f32 %v18297_v40, %v598_v63  ;;  %v668_v12 = vmul.f32 %v18299_v21, %v598_v63  ;;  %v18345_v40 = vld [vmem:[#allocation49_spill] sm:$0xff] }
 0x10e   : > { %18336 = vst [vmem:[#allocation23_spill] sm:$0xff] %v14508_v26  ;;  %v571_v26 = vadd.f32 %v18343_v8, %v14329_v42  ;;  %v669_v49 = vmul.f32 %v14131_v18, %v598_v63  ;;  %v588_v10 = vadd.f32 %v14204_v0, %v14332_v28  ;;  %v18344_v42 = vld [vmem:[#allocation3_spill] sm:$0xff]  ;;  %v622_v45 = vadd.f32 %v614_v52, %v534_v48  ;;  %v878_v8 = vpop.permute.xlu2 %877 }
 0x10f   : > { %18337 = vst [vmem:[#allocation59_spill] sm:$0xff] %v14511_v41  ;;  %v615_v41 = vmul.f32 %v18289_v22, %v598_v63  ;;  %v589_v2 = vadd.f32 %v18344_v42, %v14335_v5  ;;  %v640_v44 = vadd.f32 %v632_v1, %v552_v51  ;;  %v641_v11 = vadd.f32 %v633_v43, %v553_v6  ;;  %v18347_v63 = vld [vmem:[#allocation20_spill] sm:$0xff]  ;;  %v18348_v28 = vld [vmem:[#allocation15_spill] sm:$0xff] }
 0x110   : > { %v658_v55 = vadd.f32 %v650_v46, %v570_v35  ;;  %v659_v9 = vadd.f32 %v651_v16, %v571_v26  ;;  %v676_v62 = vadd.f32 %v668_v12, %v588_v10  ;;  %v804_v21 = vadd.f32 %v14426_v31, %v18345_v40  ;;  %v18351_v51 = vld [vmem:[#allocation8_spill] sm:$0xff]  ;;  %v18352_v35 = vld [vmem:[#allocation73_spill] sm:$0xff]  ;;  %v686_v46 = vpop.permute.xlu0 %685 }
 0x111   : > { %v623_v22 = vadd.f32 %v615_v41, %v535_v56  ;;  %v677_v3 = vadd.f32 %v669_v49, %v589_v2  ;;  %v805_v18 = vadd.f32 %v14429_v34, %v18346_v23  ;;  %v822_v0 = vadd.f32 %v14432_v4, %v18347_v63  ;;  %v18349_v41 = vld [vmem:[#allocation21_spill] sm:$0xff]  ;;  %v18350_v56 = vld [vmem:[#allocation7_spill] sm:$0xff]  ;;  %v782_v49 = vpop.permute.xlu1 %781 }
 0x112   : > { %v823_v5 = vadd.f32 %v14435_v61, %v18348_v28  ;;  %v840_v48 = vadd.f32 %v14438_v60, %v18349_v41  ;;  %v841_v26 = vadd.f32 %v14441_v54, %v18350_v56  ;;  %v858_v6 = vadd.f32 %v14444_v19, %v18351_v51  ;;  %v50_v54 = vld [vmem:[%s17974_s1] sm:$0x3]  ;;  %v18354_v63 = vld [vmem:[#allocation9_spill] sm:$0xff]  ;;  %v18355_v41 = vld [vmem:[#allocation10_spill] sm:$0xff] }
 0x113   : > { %v859_v31 = vadd.f32 %v14447_v38, %v18352_v35  ;;  %v886_v52 = vadd.f32 %v878_v8, %v804_v21  ;;  %v887_v34 = vadd.f32 %v878_v8, %v805_v18  ;;  %v902_v23 = vadd.f32 %v878_v8, %v822_v0  ;;  %v18353_v21 = vld [vmem:[#allocation4_spill] sm:$0xff] }
 0x114   : > { %v903_v1 = vadd.f32 %v878_v8, %v823_v5  ;;  %v918_v4 = vadd.f32 %v878_v8, %v840_v48  ;;  %v919_v43 = vadd.f32 %v878_v8, %v841_v26  ;;  %v934_v12 = vadd.f32 %v878_v8, %v858_v6 }
 0x115   : > { %v894_v61 = vmax.f32 %v886_v52, 0.0  ;;  %v895_v16 = vmax.f32 %v887_v34, 0.0  ;;  %v935_v60 = vadd.f32 %v878_v8, %v859_v31  ;;  %v910_v19 = vmax.f32 %v902_v23, 0.0  ;;  %v18356_v8 = vld [vmem:[#allocation16_spill] sm:$0xff]  ;;  %v18357_v34 = vld [vmem:[#allocation17_spill] sm:$0xff] }
 0x116   : > { %v911_v10 = vmax.f32 %v903_v1, 0.0  ;;  %v926_v42 = vmax.f32 %v918_v4, 0.0  ;;  %v927_v38 = vmax.f32 %v919_v43, 0.0  ;;  %v942_v2 = vmax.f32 %v934_v12, 0.0  ;;  %v18358_v1 = vld [vmem:[#allocation25_spill] sm:$0xff] }
 0x117   : > { %v943_v40 = vmax.f32 %v935_v60, 0.0  ;;  %v702_v18 = vmul.f32 %v18353_v21, %v686_v46  ;;  %v703_v0 = vmul.f32 %v18354_v63, %v686_v46  ;;  %v950_v28 = vmax.f32 %v894_v61, %v910_v19  ;;  %v18360_v60 = vld [vmem:[#allocation27_spill] sm:$0xff] }
 0x118   : > { %v951_v5 = vmax.f32 %v895_v16, %v911_v10  ;;  %v720_v48 = vmul.f32 %v18355_v41, %v686_v46  ;;  %v721_v56 = vmul.f32 %v18356_v8, %v686_v46  ;;  %v14560_v26 = vperm.slane %v50_v54, 0  ;;  %v18359_v16 = vld [vmem:[#allocation46_spill] sm:$0xff] }
 0x119   : > { %v14562_v51 = vperm.slane %v50_v54, 1  ;;  %v958_v6 = vmax.f32 %v926_v42, %v942_v2  ;;  %v959_v35 = vmax.f32 %v927_v38, %v943_v40  ;;  %v14564_v31 = vadd.f32 %v702_v18, %v622_v45 }
 0x11a   : > { %v14566_v52 = vadd.f32 %v703_v0, %v623_v22  ;;  %v738_v23 = vmul.f32 %v18357_v34, %v686_v46  ;;  %v739_v4 = vmul.f32 %v18358_v1, %v686_v46  ;;  %v756_v12 = vmul.f32 %v18359_v16, %v686_v46 }
 0x11b   : > { %v966_v43 = vmax.f32 %v950_v28, %v958_v6  ;;  %v967_v61 = vmax.f32 %v951_v5, %v959_v35  ;;  %v757_v19 = vmul.f32 %v18360_v60, %v686_v46  ;;  %v14572_v10 = vadd.f32 %v720_v48, %v640_v44  ;;  %v18362_v5 = vld [vmem:[#allocation31_spill] sm:$0xff]  ;;  %v18364_v35 = vld [vmem:[#allocation33_spill] sm:$0xff] }
 0x11c   : > { %v14574_v54 = vadd.f32 %v721_v56, %v641_v11  ;;  %v14576_v42 = vadd.f32 %v738_v23, %v658_v55  ;;  %v14578_v45 = vadd.f32 %v739_v4, %v659_v9  ;;  %v14583_v2 = vmul.f32 %v14398_v15, %v782_v49  ;;  %v18363_v56 = vld [vmem:[#allocation32_spill] sm:$0xff]  ;;  %v18365_v4 = vld [vmem:[#allocation34_spill] sm:$0xff] }
 0x11d   : > { %v979_v22 = vmul.f32 %v14560_v26, %v966_v43  ;;  %v980_v38 = vmul.f32 %v14562_v51, %v967_v61  ;;  %v14586_v40 = vmul.f32 %v14401_v37, %v782_v49  ;;  %v14588_v18 = vadd.f32 %v756_v12, %v676_v62  ;;  %v690_v62 = vpop.permute.xlu1 %689  ;;  %v18366_v61 = vld [vmem:[#allocation35_spill] sm:$0xff] }
 0x11e   : > { %v14590_v44 = vadd.f32 %v757_v19, %v677_v3  ;;  %v14593_v11 = vmul.f32 %v14404_v24, %v782_v49  ;;  %v14596_v55 = vmul.f32 %v14407_v39, %v782_v49  ;;  %v14601_v46 = vmul.f32 %v14410_v14, %v782_v49  ;;  %v18367_v19 = vld [vmem:[#allocation36_spill] sm:$0xff] }
 0x11f   : > { %v14598_v9 = vpack.c.bf16 %v980_v38, %v979_v22  ;;  %v14604_v0 = vmul.f32 %v14413_v58, %v782_v49  ;;  %v14607_v28 = vmul.f32 %v14416_v25, %v782_v49  ;;  %v14610_v3 = vmul.f32 %v14419_v7, %v782_v49  ;;  %v18368_v49 = vld [vmem:[#allocation64_spill] sm:$0xff] }
 0x120   : > { %v624_v48 = vadd.f32 %v18362_v5, %v14473_v32  ;;  %v625_v6 = vadd.f32 %v18363_v56, %v14475_v30  ;;  %v642_v23 = vadd.f32 %v18364_v35, %v14477_v53  ;;  %v643_v43 = vadd.f32 %v18365_v4, %v14479_v57  ;;  %v18369_v32 = vld [vmem:[#allocation38_spill] sm:$0xff]  ;;  %v778_v4 = vpop.permute.xlu0 %777 }
 0x121   : > { %18361 = vst [vmem:[#allocation24_spill] sm:$0xff] %v14598_v9  ;;  %v660_v12 = vadd.f32 %v18366_v61, %v14481_v50  ;;  %v661_v22 = vadd.f32 %v18367_v19, %v14483_v59  ;;  %v678_v38 = vadd.f32 %v18368_v49, %v14485_v20  ;;  %v679_v5 = vadd.f32 %v18369_v32, %v14487_v47 }
 0x122   : > { %v704_v30 = vmul.f32 %v18353_v21, %v690_v62  ;;  %v705_v56 = vmul.f32 %v18354_v63, %v690_v62  ;;  %v722_v53 = vmul.f32 %v18355_v41, %v690_v62  ;;  %v723_v57 = vmul.f32 %v18356_v8, %v690_v62 }
 0x123   : > { %v740_v35 = vmul.f32 %v18357_v34, %v690_v62  ;;  %v741_v50 = vmul.f32 %v18358_v1, %v690_v62  ;;  %v758_v59 = vmul.f32 %v18359_v16, %v690_v62  ;;  %v759_v47 = vmul.f32 %v18360_v60, %v690_v62  ;;  %v868_v60 = vpop.permute.xlu2 %867 }
 0x124   : > { %v712_v61 = vadd.f32 %v704_v30, %v624_v48  ;;  %v713_v20 = vadd.f32 %v705_v56, %v625_v6  ;;  %v730_v19 = vadd.f32 %v722_v53, %v642_v23  ;;  %v731_v49 = vadd.f32 %v723_v57, %v643_v43 }
 0x125   : > { %v748_v21 = vadd.f32 %v740_v35, %v660_v12  ;;  %v749_v32 = vadd.f32 %v741_v50, %v661_v22  ;;  %v766_v63 = vadd.f32 %v758_v59, %v678_v38  ;;  %v767_v9 = vadd.f32 %v759_v47, %v679_v5  ;;  %v18370_v47 = vld [vmem:[#allocation45_spill] sm:$0xff] }
 0x126   : > { %v792_v41 = vmul.f32 %v14398_v15, %v778_v4  ;;  %v793_v8 = vmul.f32 %v14401_v37, %v778_v4  ;;  %v810_v34 = vmul.f32 %v14404_v24, %v778_v4  ;;  %v811_v1 = vmul.f32 %v14407_v39, %v778_v4 }
 0x127   : > { %v828_v16 = vmul.f32 %v14410_v14, %v778_v4  ;;  %v829_v48 = vmul.f32 %v14413_v58, %v778_v4  ;;  %v846_v6 = vmul.f32 %v14416_v25, %v778_v4  ;;  %v847_v62 = vmul.f32 %v14419_v7, %v778_v4 }
 0x128   : > { %v800_v23 = vadd.f32 %v792_v41, %v712_v61  ;;  %v801_v43 = vadd.f32 %v793_v8, %v713_v20  ;;  %v818_v12 = vadd.f32 %v810_v34, %v730_v19  ;;  %v819_v22 = vadd.f32 %v811_v1, %v731_v49  ;;  %v18371_v49 = vld [vmem:[#allocation26_spill] sm:$0xff]  ;;  %v873_v41 = vpop.permute.xlu1 %872  ;;  %v18372_v8 = vld [vmem:[#allocation52_spill] sm:$0xff]  ;;  %v18373_v34 = vld [vmem:[#allocation47_spill] sm:$0xff] }
 0x129   : > { %v836_v15 = vadd.f32 %v828_v16, %v748_v21  ;;  %v837_v38 = vadd.f32 %v829_v48, %v749_v32  ;;  %v854_v37 = vadd.f32 %v846_v6, %v766_v63  ;;  %v855_v5 = vadd.f32 %v847_v62, %v767_v9  ;;  %v18374_v16 = vld [vmem:[#allocation39_spill] sm:$0xff]  ;;  %v18376_v62 = vld [vmem:[#allocation53_spill] sm:$0xff] }
 0x12a   : > { %v882_v24 = vadd.f32 %v868_v60, %v800_v23  ;;  %v883_v30 = vadd.f32 %v868_v60, %v801_v43  ;;  %v898_v39 = vadd.f32 %v868_v60, %v818_v12  ;;  %v899_v56 = vadd.f32 %v868_v60, %v819_v22  ;;  %v18375_v48 = vld [vmem:[#allocation11_spill] sm:$0xff]  ;;  %v18377_v23 = vld [vmem:[#allocation48_spill] sm:$0xff] }
 0x12b   : > { %v914_v14 = vadd.f32 %v868_v60, %v836_v15  ;;  %v915_v53 = vadd.f32 %v868_v60, %v837_v38  ;;  %v930_v58 = vadd.f32 %v868_v60, %v854_v37  ;;  %v931_v50 = vadd.f32 %v868_v60, %v855_v5  ;;  %v18378_v12 = vld [vmem:[#allocation40_spill] sm:$0xff]  ;;  %v18381_v38 = vld [vmem:[#allocation19_spill] sm:$0xff]  ;;  %v18382_v5 = vld [vmem:[#allocation41_spill] sm:$0xff] }
 0x12c   : > { %v890_v57 = vmax.f32 %v882_v24, 0.0  ;;  %v891_v25 = vmax.f32 %v883_v30, 0.0  ;;  %v906_v35 = vmax.f32 %v898_v39, 0.0  ;;  %v907_v7 = vmax.f32 %v899_v56, 0.0  ;;  %v18379_v22 = vld [vmem:[#allocation12_spill] sm:$0xff]  ;;  %v18383_v24 = vld [vmem:[#allocation13_spill] sm:$0xff] }
 0x12d   : > { %v922_v59 = vmax.f32 %v914_v14, 0.0  ;;  %v923_v4 = vmax.f32 %v915_v53, 0.0  ;;  %v938_v61 = vmax.f32 %v930_v58, 0.0  ;;  %v939_v20 = vmax.f32 %v931_v50, 0.0 }
 0x12e   : > { %v946_v19 = vmax.f32 %v890_v57, %v906_v35  ;;  %v714_v9 = vadd.f32 %v18370_v47, %v14383_v36  ;;  %v715_v21 = vadd.f32 %v18371_v49, %v14385_v17  ;;  %v947_v32 = vmax.f32 %v891_v25, %v907_v7  ;;  %v18380_v36 = vld [vmem:[#allocation54_spill] sm:$0xff] }
 0x12f   : > { %v954_v63 = vmax.f32 %v922_v59, %v938_v61  ;;  %v732_v1 = vadd.f32 %v18373_v34, %v18372_v8  ;;  %v733_v6 = vadd.f32 %v18375_v48, %v18374_v16  ;;  %v955_v60 = vmax.f32 %v923_v4, %v939_v20 }
 0x130   : > { %v750_v43 = vadd.f32 %v18377_v23, %v18376_v62  ;;  %v751_v15 = vadd.f32 %v18379_v22, %v18378_v12  ;;  %v768_v37 = vadd.f32 %v18381_v38, %v18380_v36  ;;  %v769_v30 = vadd.f32 %v18383_v24, %v18382_v5  ;;  %v863_v34 = vpop.permute.xlu1 %862  ;;  %v18386_v22 = vld [vmem:[#allocation23_spill] sm:$0xff] }
 0x131   : > { %v962_v17 = vmax.f32 %v946_v19, %v954_v63  ;;  %v802_v39 = vadd.f32 %v14583_v2, %v714_v9  ;;  %v803_v56 = vadd.f32 %v14586_v40, %v715_v21  ;;  %v963_v14 = vmax.f32 %v947_v32, %v955_v60 }
 0x132   : > { %v820_v53 = vadd.f32 %v14593_v11, %v732_v1  ;;  %v821_v58 = vadd.f32 %v14596_v55, %v733_v6  ;;  %v838_v57 = vadd.f32 %v14601_v46, %v750_v43  ;;  %v839_v35 = vadd.f32 %v14604_v0, %v751_v15  ;;  %v18385_v43 = vld [vmem:[#allocation58_spill] sm:$0xff] }
 0x133   : > { %v975_v25 = vmul.f32 %v14560_v26, %v962_v17  ;;  %v856_v50 = vadd.f32 %v14607_v28, %v768_v37  ;;  %v857_v7 = vadd.f32 %v14610_v3, %v769_v30  ;;  %v976_v59 = vmul.f32 %v14562_v51, %v963_v14 }
 0x134   : > { %v884_v2 = vadd.f32 %v873_v41, %v802_v39  ;;  %v885_v4 = vadd.f32 %v873_v41, %v803_v56  ;;  %v900_v40 = vadd.f32 %v873_v41, %v820_v53  ;;  %v901_v61 = vadd.f32 %v873_v41, %v821_v58 }
 0x135   : > { %v916_v20 = vadd.f32 %v873_v41, %v838_v57  ;;  %v917_v11 = vadd.f32 %v873_v41, %v839_v35  ;;  %v932_v19 = vadd.f32 %v873_v41, %v856_v50  ;;  %v14670_v55 = vpack.c.bf16 %v976_v59, %v975_v25  ;;  %v18388_v25 = vld [vmem:[#allocation24_spill] sm:$0xff] }
 0x136   : > { %v892_v46 = vmax.f32 %v884_v2, 0.0  ;;  %v893_v47 = vmax.f32 %v885_v4, 0.0  ;;  %v908_v9 = vmax.f32 %v900_v40, 0.0  ;;  %v909_v49 = vmax.f32 %v901_v61, 0.0 }
 0x137   : > { %v924_v0 = vmax.f32 %v916_v20, 0.0  ;;  %v925_v21 = vmax.f32 %v917_v11, 0.0  ;;  %v933_v28 = vadd.f32 %v873_v41, %v857_v7  ;;  %v940_v32 = vmax.f32 %v932_v19, 0.0  ;;  %v18384_v41 = vld [vmem:[#allocation22_spill] sm:$0xff] }
 0x138   : > { %v948_v3 = vmax.f32 %v892_v46, %v908_v9  ;;  %v949_v8 = vmax.f32 %v893_v47, %v909_v49  ;;  %v798_v1 = vadd.f32 %v14490_v29, %v14564_v31  ;;  %v799_v16 = vadd.f32 %v14493_v27, %v14566_v52  ;;  %v18387_v31 = vld [vmem:[#allocation59_spill] sm:$0xff] }
 0x139   : > { %v941_v63 = vmax.f32 %v933_v28, 0.0  ;;  %v956_v48 = vmax.f32 %v924_v0, %v940_v32  ;;  %v816_v6 = vadd.f32 %v14496_v13, %v14572_v10  ;;  %v817_v60 = vadd.f32 %v14499_v33, %v14574_v54 }
 0x13a   : > { %v834_v62 = vadd.f32 %v18384_v41, %v14576_v42  ;;  %v835_v12 = vadd.f32 %v18385_v43, %v14578_v45  ;;  %v852_v29 = vadd.f32 %v18386_v22, %v14588_v18  ;;  %v853_v27 = vadd.f32 %v18387_v31, %v14590_v44  ;;  %v12802_v31 = vld [vmem:[%s17977_s4 + $0x10] sm:$0xf0] }
 0x13b   : > { %v957_v23 = vmax.f32 %v925_v21, %v941_v63  ;;  %v964_v52 = vmax.f32 %v948_v3, %v956_v48  ;;  %v880_v15 = vadd.f32 %v863_v34, %v798_v1  ;;  %v881_v36 = vadd.f32 %v863_v34, %v799_v16 }
 0x13c   : > { %v896_v13 = vadd.f32 %v863_v34, %v816_v6  ;;  %v897_v38 = vadd.f32 %v863_v34, %v817_v60  ;;  %v912_v33 = vadd.f32 %v863_v34, %v834_v62  ;;  %v913_v54 = vadd.f32 %v863_v34, %v835_v12 }
 0x13d   : > { %v965_v10 = vmax.f32 %v949_v8, %v957_v23  ;;  %v977_v42 = vmul.f32 %v14560_v26, %v964_v52  ;;  %v888_v37 = vmax.f32 %v880_v15, 0.0  ;;  %v889_v17 = vmax.f32 %v881_v36, 0.0 }
 0x13e   : > { %v904_v5 = vmax.f32 %v896_v13, 0.0  ;;  %v905_v24 = vmax.f32 %v897_v38, 0.0  ;;  %v920_v18 = vmax.f32 %v912_v33, 0.0  ;;  %v921_v30 = vmax.f32 %v913_v54, 0.0 }
 0x13f   : > { %v978_v45 = vmul.f32 %v14562_v51, %v965_v10  ;;  %v928_v39 = vadd.f32 %v863_v34, %v852_v29  ;;  %v929_v44 = vadd.f32 %v863_v34, %v853_v27  ;;  %v995_v35 = vunpack.c.l.b16 %v18388_v25  ;;  %v10248_v29 = vld [vmem:[%s17977_s4 + $0x8] sm:$0xf] }
 0x140   : > { %v944_v56 = vmax.f32 %v888_v37, %v904_v5  ;;  %v945_v53 = vmax.f32 %v889_v17, %v905_v24  ;;  %v996_v50 = vunpack.c.h.b16 %v18388_v25  ;;  %v991_v9 = vunpack.c.l.b16 %v14670_v55  ;;  %v12805_v37 = vld [vmem:[%s17977_s4 + $0x28] sm:$0xf0] }
 0x141   : > { %v983_v14 = vpack.c.bf16 %v978_v45, %v977_v42  ;;  %v936_v58 = vmax.f32 %v928_v39, 0.0  ;;  %v937_v57 = vmax.f32 %v929_v44, 0.0  ;;  %v992_v49 = vunpack.c.h.b16 %v14670_v55  ;;  %v1136_v55 = vld [vmem:[%s17978_s5 + $0x18] sm:$0xff]  ;;  %v10260_v42 = vld [vmem:[%s17977_s4 + $0x20] sm:$0xf] }
 0x142   : > { %v14770_v36 = vor.u32 %v12802_v31, %v10248_v29  ;;  %v14781_v24 = vor.u32 %v12805_v37, %v10260_v42 }
 0x143   : > { %v993_v7 = vunpack.c.l.b16 %v983_v14  ;;  %v994_v59 = vunpack.c.h.b16 %v983_v14  ;;  %v952_v2 = vmax.f32 %v920_v18, %v936_v58  ;;  %v953_v4 = vmax.f32 %v921_v30, %v937_v57 }
 0x145   : > { %v14692_v40 = vpack.c.b16 %v995_v35, %v993_v7  ;;  %v14694_v61 = vpack.c.b16 %v996_v50, %v994_v59  ;;  %v960_v20 = vmax.f32 %v944_v56, %v952_v2  ;;  %v961_v11 = vmax.f32 %v945_v53, %v953_v4  ;;  %v1134_v35 = vld [vmem:[%s17978_s5 + $0x8] sm:$0xff]  ;;  %v10240_v4 = vld [vmem:[%s17977_s4] sm:$0xf] }
 0x147   : > { %1041 = vrot.lane.b32.xlu1 %v14694_v61, %s13310_s17  ;;  %1099 = vrot.lane.b32.xlu2 %v14692_v40, %s13311_s18  ;;  %v973_v19 = vmul.f32 %v14560_v26, %v960_v20  ;;  %v974_v46 = vmul.f32 %v14562_v51, %v961_v11  ;;  %v1133_v26 = vld [vmem:[%s17978_s5] sm:$0xff]  ;;  %v1135_v51 = vld [vmem:[%s17978_s5 + $0x10] sm:$0xff] }
 0x148   : > { %1039 = vrot.lane.b32.xlu0 %v14692_v40, %s13310_s17  ;;  %v12801_v20 = vld [vmem:[%s17977_s4 + $0x8] sm:$0xf0] }
 0x149   : > { %v981_v47 = vpack.c.bf16 %v974_v46, %v973_v19  ;;  %v10241_v19 = vor.u32 %v12801_v20, %v10240_v4 }
 0x14b   : > { %v989_v0 = vunpack.c.l.b16 %v981_v47  ;;  %v990_v21 = vunpack.c.h.b16 %v981_v47 }
 0x14d   : > { %v14705_v28 = vpack.c.b16 %v991_v9, %v989_v0  ;;  %v14707_v32 = vpack.c.b16 %v992_v49, %v990_v21  ;;  %v10242_v49 = vld [vmem:[%s17977_s4 + $0xc] sm:$0xf0] }
 0x14f   : > { %1114 = vrot.lane.b32.xlu1 %v14692_v40, %s13312_s19  ;;  %1116 = vrot.lane.b32.xlu2 %v14694_v61, %s13312_s19 }
 0x150   : > { %1101 = vrot.lane.b32.xlu0 %v14694_v61, %s13311_s18 }
 0x157   : > { %1037 = vrot.lane.b32.xlu1 %v14707_v32, %s13310_s17  ;;  %1095 = vrot.lane.b32.xlu2 %v14705_v28, %s13311_s18 }
 0x158   : > { %1035 = vrot.lane.b32.xlu0 %v14705_v28, %s13310_s17 }
 0x15f   : > { %1110 = vrot.lane.b32.xlu1 %v14705_v28, %s13312_s19  ;;  %1112 = vrot.lane.b32.xlu2 %v14707_v32, %s13312_s19 }
 0x160   : > { %1097 = vrot.lane.b32.xlu0 %v14707_v32, %s13311_s18 }
 0x167   : > { %1026 = vrot.lane.b32.xlu1 %v14694_v61, %s13313_s20  ;;  %1084 = vrot.lane.b32.xlu2 %v14692_v40, %s13314_s21 }
 0x168   : > { %1024 = vrot.lane.b32.xlu0 %v14692_v40, %s13313_s20 }
 0x16f   : > { %1020 = vrot.lane.b32.xlu1 %v14705_v28, %s13313_s20  ;;  %1022 = vrot.lane.b32.xlu2 %v14707_v32, %s13313_s20 }
 0x170   : > { %1086 = vrot.lane.b32.xlu0 %v14694_v61, %s13314_s21 }
 0x177   : > { %1082 = vrot.lane.b32.xlu1 %v14707_v32, %s13314_s21  ;;  %1009 = vrot.lane.b32.xlu2 %v14692_v40, %s13315_s22 }
 0x178   : > { %1080 = vrot.lane.b32.xlu0 %v14705_v28, %s13314_s21 }
 0x17f   : > { %1069 = vrot.lane.b32.xlu1 %v14692_v40, %s13316_s23  ;;  %1071 = vrot.lane.b32.xlu2 %v14694_v61, %s13316_s23 }
 0x180   : > { %1011 = vrot.lane.b32.xlu0 %v14694_v61, %s13315_s22 }
 0x187   : > { %1007 = vrot.lane.b32.xlu1 %v14707_v32, %s13315_s22  ;;  %1065 = vrot.lane.b32.xlu2 %v14705_v28, %s13316_s23 }
 0x188   : > { %1005 = vrot.lane.b32.xlu0 %v14705_v28, %s13315_s22 }
 0x18f   : > { %1054 = vrot.lane.b32.xlu1 %v14692_v40, %s13317_s24  ;;  %1056 = vrot.lane.b32.xlu2 %v14694_v61, %s13317_s24 }
 0x190   : > { %1067 = vrot.lane.b32.xlu0 %v14707_v32, %s13316_s23 }
 0x197   : > { %1052 = vrot.lane.b32.xlu1 %v14707_v32, %s13317_s24  ;;  %1139 = vperm.xlu2 %13287, %v1133_v26   ;;  %v10252_v26 = vld [vmem:[%s17977_s4 + $0x18] sm:$0xf] }
 0x198   : > { %1050 = vrot.lane.b32.xlu0 %v14705_v28, %s13317_s24 }
 0x19f   : > { %1149 = vperm.xlu1 %13286, %v1135_v51   ;;  %1154 = vperm.xlu2 %13287, %v1136_v55   ;;  %v12804_v51 = vld [vmem:[%s17977_s4 + $0x20] sm:$0xf0] }
 0x1a0   : > { %1144 = vperm.xlu0 %13288, %v1134_v35   ;;  %v10253_v55 = vor.u32 %v12804_v51, %v10252_v26 }
 0x1a1   : > { %v1100_v3 = vpop.permute.xlu2 %1099 }
 0x1a9   : > { %v14753_v63 = vpop.permute.xlu2 %1116 }
 0x1b1   : > { %v1096_v1 = vpop.permute.xlu2 %1095 }
 0x1b9   : > { %v1042_v8 = vpop.permute.xlu1 %1041  ;;  %v14759_v62 = vpop.permute.xlu2 %1112 }
 0x1ba   : > { %v1040_v34 = vpop.permute.xlu0 %1039  ;;  %1251 = vmatpush.bf16.msra.mxu3 %v1042_v8 }
 0x1bb   : > { %v1045_v16 = vsel %vm1043_vm0, %v1040_v34, %v1042_v8 }
 0x1bc   : > { %1194 = vmatpush.bf16.msra.mxu0 %v1045_v16 }
 0x1c1   : > { %v1115_v48 = vpop.permute.xlu1 %1114  ;;  %v1085_v22 = vpop.permute.xlu2 %1084 }
 0x1c2   : > { %v1102_v6 = vpop.permute.xlu0 %1101  ;;  %v1120_v60 = vsel %vm1118_vm1, %v1115_v48, %v14753_v63 }
 0x1c3   : > { %v1105_v41 = vsel %vm1103_vm2, %v1100_v3, %v1102_v6  ;;  %1238 = vmatpush.bf16.msra.mxu2 %v1120_v60  ;;  %v12803_v3 = vld [vmem:[%s17977_s4 + $0x1c] sm:$0xf] }
 0x1c4   : > { %1213 = vmatpush.bf16.msra.mxu1 %v1105_v41 }
 0x1c9   : > { %v1038_v23 = vpop.permute.xlu1 %1037  ;;  %v1023_v10 = vpop.permute.xlu2 %1022 }
 0x1ca   : > { %v1036_v43 = vpop.permute.xlu0 %1035  ;;  %1252 = vmatpush.bf16.msra.mxu3 %v1038_v23 }
 0x1cb   : > { %v1044_v12 = vsel %vm1043_vm0, %v1036_v43, %v1038_v23 }
 0x1cc   : > { %1195 = vmatpush.bf16.msra.mxu0 %v1044_v12 }
 0x1d1   : > { %v1111_v27 = vpop.permute.xlu1 %1110  ;;  %v1010_v18 = vpop.permute.xlu2 %1009 }
 0x1d2   : > { %v1098_v52 = vpop.permute.xlu0 %1097  ;;  %v1119_v15 = vsel %vm1118_vm1, %v1111_v27, %v14759_v62 }
 0x1d3   : > { %v1104_v13 = vsel %vm1103_vm2, %v1096_v1, %v1098_v52  ;;  %1239 = vmatpush.bf16.msra.mxu2 %v1119_v15 }
 0x1d4   : > { %1214 = vmatpush.bf16.msra.mxu1 %v1104_v13 }
 0x1d6   : > { %10262 = vmatmul.msk.bf16.vlgmr.msra.gmra.mxu2 %vm1187_vm3, %v14770_v36 }
 0x1d7   : > { %1270 = vmatpush.bf16.msrb.mxu2 %v1102_v6 }
 0x1d9   : > { %v1027_v38 = vpop.permute.xlu1 %1026  ;;  %v1072_v14 = vpop.permute.xlu2 %1071 }
 0x1da   : > { %v1025_v33 = vpop.permute.xlu0 %1024  ;;  %1253 = vmatpush.bf16.msra.mxu3 %v1027_v38 }
 0x1db   : > { %1271 = vmatpush.bf16.msrb.mxu2 %v1098_v52  ;;  %v1030_v54 = vsel %vm1028_vm4, %v1025_v33, %v1027_v38 }
 0x1dc   : > { %1196 = vmatpush.bf16.msra.mxu0 %v1030_v54 }
 0x1de   : > { %1254 = vmatpush.bf16.msra.mxu3 %v1023_v10 }
 0x1e1   : > { %v1021_v17 = vpop.permute.xlu1 %1020  ;;  %v1066_v2 = vpop.permute.xlu2 %1065 }
 0x1e2   : > { %v1087_v5 = vpop.permute.xlu0 %1086  ;;  %v1029_v45 = vsel %vm1028_vm4, %v1021_v17, %v1023_v10 }
 0x1e3   : > { %1272 = vmatpush.bf16.msrb.mxu2 %v1087_v5  ;;  %1197 = vmatpush.bf16.msra.mxu0 %v1029_v45  ;;  %v1090_v30 = vsel %vm1088_vm5, %v1085_v22, %v1087_v5 }
 0x1e4   : > { %1215 = vmatpush.bf16.msra.mxu1 %v1090_v30 }
 0x1e6   : > { %10263 = vmatmul.msk.bf16.gmra.mxu2 %vm1187_vm3, %v14781_v24 }
 0x1e9   : > { %v1083_v39 = vpop.permute.xlu1 %1082 }
 0x1ea   : > { %v1081_v44 = vpop.permute.xlu0 %1080  ;;  %1273 = vmatpush.bf16.msrb.mxu2 %v1083_v39 }
 0x1eb   : > { %v1089_v56 = vsel %vm1088_vm5, %v1081_v44, %v1083_v39 }
 0x1ec   : > { %1216 = vmatpush.bf16.msra.mxu1 %v1089_v56 }
 0x1ee   : > { %1274 = vmatpush.bf16.msrb.mxu2 %v1072_v14 }
 0x1f1   : > { %v1070_v53 = vpop.permute.xlu1 %1069 }
 0x1f2   : > { %v1012_v58 = vpop.permute.xlu0 %1011  ;;  %v1075_v57 = vsel %vm1073_vm6, %v1070_v53, %v1072_v14 }
 0x1f3   : > { %1255 = vmatpush.bf16.msra.mxu3 %v1012_v58  ;;  %v1015_v25 = vsel %vm1013_vm7, %v1010_v18, %v1012_v58  ;;  %1217 = vmatpush.bf16.msra.mxu1 %v1075_v57 }
 0x1f4   : > { %1198 = vmatpush.bf16.msra.mxu0 %v1015_v25 }
 0x1f9   : > { %v1008_v50 = vpop.permute.xlu1 %1007 }
 0x1fa   : > { %v1006_v7 = vpop.permute.xlu0 %1005  ;;  %1256 = vmatpush.bf16.msra.mxu3 %v1008_v50 }
 0x1fb   : > { %v1014_v59 = vsel %vm1013_vm7, %v1006_v7, %v1008_v50 }
 0x1fc   : > { %1199 = vmatpush.bf16.msra.mxu0 %v1014_v59 }
 0x1fe   : > { %1257 = vmatpush.bf16.msra.mxu3 %v14694_v61  ;;  %v1057_v61 = vpop.permute.xlu2 %1056 }
 0x200   : > { %1200 = vmatpush.bf16.msra.mxu0 %v14692_v40  ;;  %v12800_v40 = vld [vmem:[%s17977_s4 + $0x4] sm:$0xf] }
 0x201   : > { %v1055_v11 = vpop.permute.xlu1 %1054 }
 0x202   : > { %v1068_v46 = vpop.permute.xlu0 %1067  ;;  %1258 = vmatpush.bf16.msra.mxu3 %v14707_v32  ;;  %v1060_v9 = vsel %vm1058_vm8, %v1055_v11, %v1057_v61 }
 0x203   : > { %1275 = vmatpush.bf16.msrb.mxu2 %v1068_v46  ;;  %v1074_v47 = vsel %vm1073_vm6, %v1066_v2, %v1068_v46 }
 0x204   : > { %1201 = vmatpush.bf16.msra.mxu0 %v14705_v28  ;;  %1218 = vmatpush.bf16.msra.mxu1 %v1074_v47  ;;  %v10245_v28 = vor.u32 %v12800_v40, %v10242_v49 }
 0x205   : > { %1259 = vmatmul.bf16.vlgmr.msra.gmra.mxu3 %v10241_v19 }
 0x206   : > { %v1140_v60 = vpop.permute.xlu2 %1139 }
 0x207   : > { %1202 = vmatmul.bf16.vlgmr.msra.gmra.mxu0 %v10241_v19  ;;  %1276 = vmatpush.bf16.msrb.mxu2 %v1057_v61 }
 0x208   : > { %1295 = vmatpush.bf16.msrb.mxu0 %v14753_v63  ;;  %1219 = vmatpush.bf16.msra.mxu1 %v1060_v9 }
 0x209   : > { %v1053_v0 = vpop.permute.xlu1 %1052 }
 0x20a   : > { %v1051_v21 = vpop.permute.xlu0 %1050 }
 0x20b   : > { %1277 = vmatpush.bf16.msrb.mxu2 %v1053_v0  ;;  %v1059_v32 = vsel %vm1058_vm8, %v1051_v21, %v1053_v0 }
 0x20c   : > { %1296 = vmatpush.bf16.msrb.mxu0 %v14759_v62  ;;  %1220 = vmatpush.bf16.msra.mxu1 %v1059_v32 }
 0x20e   : > { %1278 = vmatmul.bf16.vlgmr.msrb.gmra.mxu2 %v10245_v28  ;;  %v1155_v50 = vpop.permute.xlu2 %1154 }
 0x20f   : > { %1221 = vmatmul.bf16.vlgmr.msra.gmra.mxu1 %v10245_v28 }
 0x210   : > { %13230 = vmatpush.bf16.msrb.mxu1 %v14753_v63  ;;  %v10254_v63 = vld [vmem:[%s17977_s4 + $0x24] sm:$0xf0] }
 0x211   : > { %v10257_v8 = vor.u32 %v12803_v3, %v10254_v63  ;;  %v1150_v54 = vpop.permute.xlu1 %1149 }
 0x212   : > { %v1145_v29 = vpop.permute.xlu0 %1144 }
 0x214   : > { %13231 = vmatpush.bf16.msrb.mxu1 %v14759_v62 }
 0x215   : > { %1264 = vmatmul.bf16.gmra.mxu3 %v10253_v55 }
 0x217   : > { %1207 = vmatmul.bf16.gmra.mxu0 %v10253_v55 }
 0x21e   : > { %1283 = vmatmul.bf16.gmra.mxu2 %v10257_v8 }
 0x21f   : > { %1226 = vmatmul.bf16.gmra.mxu1 %v10257_v8 }
 0x227   : > { %10264 = vmatmul.msk.bf16.vlgmr.msrb.gmra.mxu0 %vm1187_vm3, %v14770_v36 }
 0x22f   : > { %10265 = vmatmul.msk.bf16.vlgmr.msrb.gmra.mxu1 %vm1187_vm3, %v14781_v24 }
 0x259   : > { %v1241_v34 = vpop.f32.mrf.mxu2 }
 0x261   : > { %v1243_v1 = vpop.f32.mrf.mxu2 }
 0x269   : > { %v1246_v16 = vpop.f32.mrf.mxu2 }
 0x271   : > { %v1248_v6 = vpop.f32.mrf.mxu2 }
 0x284   : > { %v1203_v48 = vpop.f32.mrf.mxu0 }
 0x285   : > { %v1204_v41 = vadd.f32 %v1203_v48, %v1140_v60 }
 0x288   : > { %v1260_v12 = vpop.f32.mrf.mxu3 }
 0x289   : > { %v1261_v18 = vadd.f32 %v1260_v12, %v1140_v60 }
 0x28c   : > { %v1205_v62 = vpop.f32.mrf.mxu0  ;;  %v1222_v23 = vpop.f32.mrf.mxu1 }
 0x28d   : > { %v1223_v43 = vadd.f32 %v1222_v23, %v1204_v41  ;;  %v1206_v52 = vadd.f32 %v1205_v62, %v1145_v29 }
 0x28f   : > { %v14828_v22 = vadd.f32 %v1241_v34, %v1223_v43 }
 0x290   : > { %v1262_v38 = vpop.f32.mrf.mxu3 }
 0x291   : > { %v1308_v31 = vmax.f32 %v14828_v22, 0.0  ;;  %v1279_v27 = vpop.f32.mrf.mxu2  ;;  %v1263_v57 = vadd.f32 %v1262_v38, %v1145_v29 }
 0x292   : > { %v1280_v39 = vadd.f32 %v1279_v27, %v1261_v18 }
 0x293   : > { %1324 = vrot.lane.b32.xlu1 %v1308_v31, %s13315_s22 }
 0x294   : > { %v1208_v15 = vpop.f32.mrf.mxu0  ;;  %v1224_v36 = vpop.f32.mrf.mxu1 }
 0x295   : > { %v1225_v13 = vadd.f32 %v1224_v36, %v1206_v52  ;;  %v1209_v42 = vadd.f32 %v1208_v15, %v1150_v54 }
 0x297   : > { %v14832_v10 = vadd.f32 %v1243_v1, %v1225_v13 }
 0x298   : > { %v1265_v44 = vpop.f32.mrf.mxu3 }
 0x299   : > { %v1310_v33 = vmax.f32 %v14832_v10, 0.0  ;;  %v1281_v37 = vpop.f32.mrf.mxu2  ;;  %v1266_v25 = vadd.f32 %v1265_v44, %v1150_v54 }
 0x29a   : > { %v1282_v7 = vadd.f32 %v1281_v37, %v1263_v57 }
 0x29b   : > { %1328 = vrot.lane.b32.xlu0 %v1310_v33, %s13315_s22 }
 0x29c   : > { %v1210_v17 = vpop.f32.mrf.mxu0  ;;  %v1227_v5 = vpop.f32.mrf.mxu1 }
 0x29d   : > { %v1228_v45 = vadd.f32 %v1227_v5, %v1209_v42  ;;  %v1211_v20 = vadd.f32 %v1210_v17, %v1155_v50 }
 0x29f   : > { %v1247_v24 = vadd.f32 %v1246_v16, %v1228_v45 }
 0x2a0   : > { %v1267_v46 = vpop.f32.mrf.mxu3 }
 0x2a1   : > { %v1312_v30 = vmax.f32 %v1247_v24, 0.0  ;;  %v1284_v58 = vpop.f32.mrf.mxu2  ;;  %v1268_v49 = vadd.f32 %v1267_v46, %v1155_v50 }
 0x2a2   : > { %v1285_v59 = vadd.f32 %v1284_v58, %v1266_v25 }
 0x2a3   : > { %1332 = vrot.lane.b32.xlu2 %v1312_v30, %s13315_s22 }
 0x2a4   : > { %v1229_v56 = vpop.f32.mrf.mxu1  ;;  %v1298_v14 = vpop.f32.mrf.mxu0 }
 0x2a5   : > { %v1299_v53 = vadd.f32 %v1298_v14, %v1280_v39  ;;  %v1230_v47 = vadd.f32 %v1229_v56, %v1211_v20 }
 0x2a7   : > { %v1309_v35 = vmax.f32 %v1299_v53, 0.0  ;;  %v1249_v0 = vadd.f32 %v1248_v6, %v1230_v47 }
 0x2a9   : > { %v1286_v40 = vpop.f32.mrf.mxu2  ;;  %v1314_v26 = vmax.f32 %v1249_v0, 0.0 }
 0x2aa   : > { %v1287_v21 = vadd.f32 %v1286_v40, %v1268_v49 }
 0x2ab   : > { %1326 = vrot.lane.b32.xlu2 %v1309_v35, %s13315_s22 }
 0x2ac   : > { %v1300_v2 = vpop.f32.mrf.mxu0  ;;  %v1303_v4 = vpop.f32.mrf.mxu1 }
 0x2ad   : > { %v1301_v11 = vadd.f32 %v1300_v2, %v1282_v7  ;;  %v1304_v19 = vadd.f32 %v1303_v4, %v1285_v59 }
 0x2af   : > { %v1311_v61 = vmax.f32 %v1301_v11, 0.0  ;;  %v1313_v9 = vmax.f32 %v1304_v19, 0.0 }
 0x2b1   : > { %1330 = vrot.lane.b32.xlu1 %v1311_v61, %s13315_s22  ;;  %1334 = vrot.lane.b32.xlu0 %v1313_v9, %s13315_s22 }
 0x2b4   : > { %v1305_v28 = vpop.f32.mrf.mxu1 }
 0x2b5   : > { %v1306_v32 = vadd.f32 %v1305_v28, %v1287_v21 }
 0x2b7   : > { %v1315_v51 = vmax.f32 %v1306_v32, 0.0 }
 0x2b9   : > { %1338 = vrot.lane.b32.xlu2 %v1315_v51, %s13315_s22  ;;  %1336 = vrot.lane.b32.xlu1 %v1314_v26, %s13315_s22  ;;  %s12806_s22 = sshll.u32 %s13299_s13, 6  ;;  %s41_s13 = sadd.s32 1, %s13299_s13  }
 0x2ba   : > { %s1408_s23 = scalar_lea.vmem [#allocation2], %s12806_s22  ;;  %p38_p0 = scmp.ge.s32.totalorder %s41_s13, 8  }
 0x2bb   :  { %v12827_v58 = vld [vmem:[%s17979_s6 + $0xa0] sm:$0xff] (%p38_p0)  ;;  %v12814_v57 = vld [vmem:[%s17979_s6 + $0x38] sm:$0xff] (%p38_p0)  ;;  %v10344_v25 = vld [vmem:[%s17979_s6 + $0xc8] sm:$0xf] (%p38_p0)  ;;  %vm1765_vm10 = vcmask (%p38_p0), 1045504   ;;  %vm1766_vm11 = vcmask (%p38_p0), 1046528  }
 0x2bc   :  { %v10397_v50 = vld [vmem:[%s17979_s6 + $0x60] sm:$0xf] (%p38_p0)  ;;  %1772 = vmatpush.bf16.msra.mxu0 (%p38_p0), %v12827_v58  ;;  %1944 = vmatpush.bf16.msra.mxu2 (%p38_p0), %v12814_v57  ;;  %v13318_v59 = vmov (%p38_p0), 65535   ;;  %v12819_v4 = vld [vmem:[%s17979_s6 + $0x60] sm:$0x70] (%p38_p0)  ;;  %v12826_v20 = vld [vmem:[%s17979_s6 + $0x98] sm:$0xff] (%p38_p0) }
 0x2bd   :  { %v1767_v2 = vsel (%p38_p0), %vm1765_vm10, 4294967295, %v13318_v59  ;;  %v10398_v19 = vor.u32 (%p38_p0), %v12819_v4, %v10397_v50  ;;  %v12813_v46 = vld [vmem:[%s17979_s6 + $0x30] sm:$0xff] (%p38_p0)  ;;  %v12818_v49 = vld [vmem:[%s17979_s6 + $0x58] sm:$0xff] (%p38_p0)  ;;  %v12812_v0 = vld [vmem:[%s17979_s6 + $0x28] sm:$0xff] (%p38_p0)  ;;  %vm1647_vm12 = vcmask (%p38_p0), 1041409   ;;  %vm1650_vm13 = vcmask (%p38_p0), 1042434  }
 0x2be   :  { %v14887_v11 = vsel (%p38_p0), %vm1766_vm11, %v1767_v2, 0  ;;  %v12825_v40 = vld [vmem:[%s17979_s6 + $0x90] sm:$0xff] (%p38_p0)  ;;  %v12830_v21 = vld [vmem:[%s17979_s6 + $0xb8] sm:$0xff] (%p38_p0)  ;;  %v12824_v28 = vld [vmem:[%s17979_s6 + $0x88] sm:$0xff] (%p38_p0)  ;;  %vm1653_vm14 = vcmask (%p38_p0), 1043459   ;;  %vm1656_vm15 = vcmask (%p38_p0), 1044484  }
 0x2bf   :  { %v10476_v32 = vld [vmem:[%s17979_s6 + $0x130] sm:$0xf] (%p38_p0)  ;;  %vm1662_vm1 = vcmask (%p38_p0), 1046534   ;;  %vm1665_vm2 = vcmask (%p38_p0), 1047559   ;;  %vm10205_vm3 = vcmask (%p38_p0), 1043456   ;;  %vm10201_vm4 = vcmask (%p38_p0), 982016  }
 0x2c0   :  { %1773 = vmatpush.bf16.msra.mxu0 (%p38_p0), %v12826_v20  ;;  %1945 = vmatpush.bf16.msra.mxu2 (%p38_p0), %v12813_v46  ;;  %v12821_v58 = vld [vmem:[%s17979_s6 + $0x70] sm:$0xff] (%p38_p0)  ;;  %v12808_v46 = vld [vmem:[%s17979_s6 + $0x8] sm:$0xff] (%p38_p0)  ;;  %vm10222_vm5 = vcmask (%p38_p0), 80896  }
 0x2c4   :  { %1774 = vmatpush.bf16.msra.mxu0 (%p38_p0), %v12825_v40  ;;  %1946 = vmatpush.bf16.msra.mxu2 (%p38_p0), %v12812_v0 }
 0x2c8   :  { %1775 = vmatpush.bf16.msra.mxu0 (%p38_p0), %v12824_v28 }
 0x2fd   : > { %v1333_v55 = vpop.permute.xlu2 %1332 }
 0x305   : > { %v1327_v3 = vpop.permute.xlu2 %1326  ;;  %v1325_v63 = vpop.permute.xlu1 %1324 }
 0x306   : > { %v1354_v8 = vmax.f32 %v1309_v35, %v1327_v3  ;;  %v1341_v34 = vsel %vm1013_vm7, %v1325_v63, %v1327_v3  ;;  %v12832_v35 = vld [vmem:[%s17979_s6 + $0xc8] sm:$0x70] (%p38_p0)  ;;  %v12829_v3 = vld [vmem:[%s17979_s6 + $0xb0] sm:$0xff] (%p38_p0)  ;;  %v10555_v63 = vld [vmem:[%s17979_s6 + $0x198] sm:$0xf] (%p38_p0) }
 0x307   : > { %v1353_v1 = vmax.f32 %v1308_v31, %v1341_v34  ;;  %v10345_v7 = vor.u32 (%p38_p0), %v12832_v35, %v10344_v25  ;;  %v12816_v34 = vld [vmem:[%s17979_s6 + $0x48] sm:$0xff] (%p38_p0) }
 0x308   : > { %1371 = vrot.lane.b32.xlu1 %v1354_v8, %s13310_s17 }
 0x309   : > { %1369 = vrot.lane.b32.xlu0 %v1353_v1, %s13310_s17  ;;  %v1770_v47 = vand.u32 (%p38_p0), %v10345_v7, %v14887_v11  ;;  %v12839_v7 = vld [vmem:[%s17979_s6 + $0x100] sm:$0xff] (%p38_p0) }
 0x30b   :  { %1788 = vmatpush.bf16.msra.mxu1 (%p38_p0), %v1770_v47 }
 0x30d   : > { %v1329_v16 = vpop.permute.xlu0 %1328 }
 0x313   : > { %v1339_v12 = vpop.permute.xlu2 %1338 }
 0x314   : > { %v1360_v52 = vmax.f32 %v1315_v51, %v1339_v12  ;;  %v12817_v51 = vld [vmem:[%s17979_s6 + $0x50] sm:$0xff] (%p38_p0) }
 0x323   : > { %v1331_v48 = vpop.permute.xlu1 %1330  ;;  %v1335_v6 = vpop.permute.xlu0 %1334 }
 0x324   : > { %v1342_v60 = vsel %vm1013_vm7, %v1329_v16, %v1331_v48  ;;  %v1356_v41 = vmax.f32 %v1311_v61, %v1331_v48  ;;  %v1343_v62 = vsel %vm1013_vm7, %v1333_v55, %v1335_v6  ;;  %v1358_v31 = vmax.f32 %v1313_v9, %v1335_v6  ;;  %v12831_v9 = vld [vmem:[%s17979_s6 + $0xc0] sm:$0xff] (%p38_p0)  ;;  %v12810_v16 = vld [vmem:[%s17979_s6 + $0x18] sm:$0xff] (%p38_p0) }
 0x325   : > { %v1355_v23 = vmax.f32 %v1310_v33, %v1342_v60  ;;  %v1357_v43 = vmax.f32 %v1312_v30, %v1343_v62  ;;  %v1942_v61 = vand.u32 (%p38_p0), %v10398_v19, %v14887_v11  ;;  %1789 = vmatpush.bf16.msra.mxu1 (%p38_p0), %v12831_v9  ;;  %v12811_v55 = vld [vmem:[%s17979_s6 + $0x20] sm:$0xff] (%p38_p0)  ;;  %v12844_v19 = vld [vmem:[%s17979_s6 + $0x128] sm:$0xff] (%p38_p0) }
 0x326   : > { %1375 = vrot.lane.b32.xlu0 %v1356_v41, %s13310_s17  ;;  %1947 = vmatpush.bf16.msra.mxu2 (%p38_p0), %v12811_v55 }
 0x327   : > { %1373 = vrot.lane.b32.xlu2 %v1355_v23, %s13310_s17  ;;  %1377 = vrot.lane.b32.xlu1 %v1357_v43, %s13310_s17 }
 0x328   :  { %1960 = vmatpush.bf16.msra.mxu3 (%p38_p0), %v1942_v61 }
 0x329   :  { %1790 = vmatpush.bf16.msra.mxu1 (%p38_p0), %v12830_v21 }
 0x32a   :  { %1948 = vmatpush.bf16.msra.mxu2 (%p38_p0), %v12810_v16 }
 0x32b   : > { %v1337_v22 = vpop.permute.xlu1 %1336 }
 0x32c   : > { %v1344_v29 = vsel %vm1013_vm7, %v1337_v22, %v1339_v12  ;;  %1961 = vmatpush.bf16.msra.mxu3 (%p38_p0), %v12818_v49 }
 0x32d   : > { %v1359_v27 = vmax.f32 %v1314_v26, %v1344_v29  ;;  %v12845_v26 = vld [vmem:[%s17979_s6 + $0x130] sm:$0x70] (%p38_p0)  ;;  %1791 = vmatpush.bf16.msra.mxu1 (%p38_p0), %v12829_v3 }
 0x32e   :  { %v10477_v48 = vor.u32 (%p38_p0), %v12845_v26, %v10476_v32  ;;  %v12820_v32 = vld [vmem:[%s17979_s6 + $0x68] sm:$0xff] (%p38_p0) }
 0x32f   : > { %1381 = vrot.lane.b32.xlu0 %v1359_v27, %s13310_s17  ;;  %1379 = vrot.lane.b32.xlu2 %v1358_v31, %s13310_s17 }
 0x330   : > { %1383 = vrot.lane.b32.xlu1 %v1360_v52, %s13310_s17  ;;  %1962 = vmatpush.bf16.msra.mxu3 (%p38_p0), %v12817_v51  ;;  %v2213_v22 = vand.u32 (%p38_p0), %v10477_v48, %v14887_v11 }
 0x334   :  { %1963 = vmatpush.bf16.msra.mxu3 (%p38_p0), %v12816_v34 }
 0x37a   : > { %v1372_v15 = vpop.permute.xlu1 %1371 }
 0x37b   : > { %v1399_v36 = vmax.f32 %v1354_v8, %v1372_v15  ;;  %v1370_v13 = vpop.permute.xlu0 %1369  ;;  %v12858_v8 = vld [vmem:[%s17979_s6 + $0x198] sm:$0x70] (%p38_p0) }
 0x37c   : > { %v1386_v10 = vsel %vm1043_vm0, %v1370_v13, %v1372_v15  ;;  %v10556_v6 = vor.u32 (%p38_p0), %v12858_v8, %v10555_v63  ;;  %v12822_v15 = vld [vmem:[%s17979_s6 + $0x78] sm:$0xff] (%p38_p0)  ;;  %v12853_v8 = vld [vmem:[%s17979_s6 + $0x170] sm:$0xff] (%p38_p0) }
 0x37d   : > { %1411 = vst.msk [vmem:[%s1408_s23 + $0x8] sm:$0xff] %vm1410_vm9, %v1399_v36  ;;  %v1398_v38 = vmax.f32 %v1353_v1, %v1386_v10  ;;  %v12823_v1 = vld [vmem:[%s17979_s6 + $0x80] sm:$0xff] (%p38_p0)  ;;  %v12838_v63 = vld [vmem:[%s17979_s6 + $0xf8] sm:$0xff] (%p38_p0) }
 0x37e   :  { %v14956_v29 = vand.u32 (%p38_p0), %v10556_v6, %v14887_v11  ;;  %1776 = vmatpush.bf16.msra.mxu0 (%p38_p0), %v12823_v1  ;;  %v12843_v6 = vld [vmem:[%s17979_s6 + $0x120] sm:$0xff] (%p38_p0) }
 0x37f   : > { %1409 = vst [vmem:[%s1408_s23] sm:$0xff] %v1398_v38 }
 0x381   : > { %v1374_v33 = vpop.permute.xlu2 %1373 }
 0x382   :  { %1777 = vmatpush.bf16.msra.mxu0 (%p38_p0), %v12822_v15 }
 0x386   :  { %1778 = vmatpush.bf16.msra.mxu0 (%p38_p0), %v12821_v58 }
 0x389   : > { %v1380_v54 = vpop.permute.xlu2 %1379 }
 0x38a   : > { %v1403_v42 = vmax.f32 %v1358_v31, %v1380_v54  ;;  %1779 = vmatpush.bf16.msra.mxu0 (%p38_p0), %v12820_v32 }
 0x38c   : > { %1415 = vst.msk [vmem:[%s1408_s23 + $0x28] sm:$0xff] %vm1410_vm9, %v1403_v42 }
 0x38e   :  { %2487 = vmatpush.bf16.msrb.mxu0 (%p38_p0), %v12853_v8 }
 0x398   : > { %v1376_v37 = vpop.permute.xlu0 %1375 }
 0x399   : > { %v1387_v17 = vsel %vm1043_vm0, %v1374_v33, %v1376_v37  ;;  %v1401_v5 = vmax.f32 %v1356_v41, %v1376_v37  ;;  %v1378_v45 = vpop.permute.xlu1 %1377  ;;  %v12815_v33 = vld [vmem:[%s17979_s6 + $0x40] sm:$0xff] (%p38_p0) }
 0x39a   : > { %v1400_v24 = vmax.f32 %v1355_v23, %v1387_v17  ;;  %v1388_v18 = vsel %vm1043_vm0, %v1378_v45, %v1380_v54  ;;  %v12840_v54 = vld [vmem:[%s17979_s6 + $0x108] sm:$0xff] (%p38_p0)  ;;  %v12809_v45 = vld [vmem:[%s17979_s6 + $0x10] sm:$0xff] (%p38_p0)  ;;  %1964 = vmatpush.bf16.msra.mxu3 (%p38_p0), %v12815_v33 }
 0x39b   : > { %1413 = vst.msk [vmem:[%s1408_s23 + $0x18] sm:$0xff] %vm1410_vm9, %v1401_v5  ;;  %v1402_v30 = vmax.f32 %v1357_v43, %v1388_v18  ;;  %1949 = vmatpush.bf16.msra.mxu2 (%p38_p0), %v12809_v45 }
 0x39c   : > { %1412 = vst [vmem:[%s1408_s23 + $0x10] sm:$0xff] %v1400_v24 }
 0x39d   : > { %1414 = vst [vmem:[%s1408_s23 + $0x20] sm:$0xff] %v1402_v30 }
 0x39e   :  { %2231 = vmatpush.bf16.msrb.mxu3 (%p38_p0), %v2213_v22 }
 0x39f   :  { %1950 = vmatpush.bf16.msra.mxu2 (%p38_p0), %v12808_v46 }
 0x3a1   : > { %v1382_v39 = vpop.permute.xlu0 %1381 }
 0x3a2   : > { %v1384_v44 = vpop.permute.xlu1 %1383  ;;  %40 = sbr.rel (!%p38_p0) target bundleno = 1 (0x1), region = 355  ;;  %2232 = vmatpush.bf16.msrb.mxu3 (%p38_p0), %v12844_v19 }
 0x3a3   : > { %v1405_v56 = vmax.f32 %v1360_v52, %v1384_v44  ;;  %v1389_v14 = vsel %vm1043_vm0, %v1382_v39, %v1384_v44  ;;  %v12828_v52 = vld [vmem:[%s17979_s6 + $0xa8] sm:$0xff] (%p38_p0)  ;;  %vm1659_vm0 = vcmask (%p38_p0), 1045509  }
 0x3a4   : > { %v1404_v53 = vmax.f32 %v1359_v27, %v1389_v14  ;;  %1792 = vmatpush.bf16.msra.mxu1 (%p38_p0), %v12828_v52 }
 0x3a5   : > { %1417 = vst.msk [vmem:[%s1408_s23 + $0x38] sm:$0xff] %vm1410_vm9, %v1405_v56 }
 0x3a6   : > { %1416 = vst [vmem:[%s1408_s23 + $0x30] sm:$0xff] %v1404_v53  ;;  %2233 = vmatpush.bf16.msrb.mxu3 (%p38_p0), %v12843_v6 }
 0x3a8   :  { %2215 = vmatpush.bf16.msrb.mxu1 %v12840_v54 }
 0x3ac   :  { %2216 = vmatpush.bf16.msrb.mxu1 %v12839_v7 }
 0x3ad   :  { %v14942_v60 = vld [vmem:[#allocation2] ss:$8 sm:$0x3]  ;;  %v15034_v54 = vld [vmem:[#allocation2 + $0x1] ss:$8 sm:$0x3] }
 0x3ae   :  { %v14944_v41 = vld [vmem:[#allocation2 + $0x40] ss:$8 sm:$0x3]  ;;  %v1442_v36 = vperm.slane %v14942_v60, 1  ;;  %v1441_v40 = vperm.slane %v14942_v60, 0 }
 0x3af   :  { %v14946_v62 = vld [vmem:[#allocation2 + $0x80] ss:$8 sm:$0x3]  ;;  %v1444_v13 = vperm.slane %v14944_v41, 1  ;;  %v1443_v51 = vperm.slane %v14944_v41, 0 }
 0x3b0   :  { %v14948_v23 = vld [vmem:[#allocation2 + $0xc0] ss:$8 sm:$0x3]  ;;  %v1446_v10 = vperm.slane %v14946_v62, 1  ;;  %v1474_v24 = vpack.c.bf16 %v1442_v36, %v1442_v36  ;;  %v1445_v55 = vperm.slane %v14946_v62, 0  ;;  %v12842_v36 = vld [vmem:[%s17979_s6 + $0x118] sm:$0xff]  ;;  %2217 = vmatpush.bf16.msrb.mxu1 %v12838_v63 }
 0x3b1   :  { %v14950_v43 = vld [vmem:[#allocation2 + $0x100] ss:$8 sm:$0x3]  ;;  %v1448_v38 = vperm.slane %v14948_v23, 1  ;;  %v1476_v18 = vpack.c.bf16 %v1444_v13, %v1444_v13  ;;  %v1447_v3 = vperm.slane %v14948_v23, 0  ;;  %v1473_v23 = vpack.c.bf16 %v1441_v40, %v1441_v40  ;;  %2234 = vmatpush.bf16.msrb.mxu3 %v12842_v36 }
 0x3b2   :  { %v14952_v12 = vld [vmem:[#allocation2 + $0x140] ss:$8 sm:$0x3]  ;;  %v1450_v42 = vperm.slane %v14950_v43, 1  ;;  %v1478_v30 = vpack.c.bf16 %v1446_v10, %v1446_v10  ;;  %v1815_v57 = vunpack.c.l.b16 %v1474_v24  ;;  %v1449_v1 = vperm.slane %v14950_v43, 0 }
 0x3b3   :  { %v14958_v31 = vld [vmem:[#allocation2 + $0x180] ss:$8 sm:$0x3]  ;;  %v1452_v37 = vperm.slane %v14952_v12, 1  ;;  %v1480_v39 = vpack.c.bf16 %v1448_v38, %v1448_v38  ;;  %v1817_v25 = vunpack.c.l.b16 %v1476_v18  ;;  %v1451_v16 = vperm.slane %v14952_v12, 0  ;;  %v12837_v12 = vld [vmem:[%s17979_s6 + $0xf0] sm:$0xff] }
 0x3b4   :  { %v14960_v27 = vld [vmem:[#allocation2 + $0x1c0] ss:$8 sm:$0x3]  ;;  %v1454_v17 = vperm.slane %v14958_v31, 1  ;;  %v1482_v44 = vpack.c.bf16 %v1450_v42, %v1450_v42  ;;  %v1819_v35 = vunpack.c.l.b16 %v1478_v30  ;;  %v1453_v48 = vperm.slane %v14958_v31, 0  ;;  %v12857_v42 = vld [vmem:[%s17979_s6 + $0x190] sm:$0xff]  ;;  %2218 = vmatpush.bf16.msrb.mxu1 %v12837_v12 }
 0x3b5   :  { %v1456_v5 = vperm.slane %v14960_v27, 1  ;;  %v1484_v56 = vpack.c.bf16 %v1452_v37, %v1452_v37  ;;  %v1821_v50 = vunpack.c.l.b16 %v1480_v39  ;;  %v1844_v47 = vrot.slane %v1817_v25, 7  ;;  %v12807_v60 = vld [vmem:[%s17979_s6] sm:$0xff]  ;;  %v12836_v25 = vld [vmem:[%s17979_s6 + $0xe8] sm:$0xff] }
 0x3b6   :  { %v1486_v14 = vpack.c.bf16 %v1454_v17, %v1454_v17  ;;  %v1823_v59 = vunpack.c.l.b16 %v1482_v44  ;;  %v1846_v61 = vrot.slane %v1819_v35, 6  ;;  %v1455_v62 = vperm.slane %v14960_v27, 0  ;;  %v12852_v27 = vld [vmem:[%s17979_s6 + $0x168] sm:$0xff]  ;;  %1951 = vmatpush.bf16.msra.mxu2 %v12807_v60  ;;  %v12851_v35 = vld [vmem:[%s17979_s6 + $0x160] sm:$0xff] }
 0x3b7   :  { %v1488_v53 = vpack.c.bf16 %v1456_v5, %v1456_v5  ;;  %v1825_v2 = vunpack.c.l.b16 %v1484_v56  ;;  %v1848_v9 = vrot.slane %v1821_v50, 5  ;;  %v1845_v26 = vsel %vm1647_vm12, %v1844_v47, %v1815_v57  ;;  %v15040_v24 = vld [vmem:[#allocation2 + $0x41] ss:$8 sm:$0x3]  ;;  %2488 = vmatpush.bf16.msrb.mxu0 %v12852_v27 }
 0x3b8   :  { %v1827_v4 = vunpack.c.l.b16 %v1486_v14  ;;  %v1850_v49 = vrot.slane %v1823_v59, 4  ;;  %v1847_v34 = vsel %vm1650_vm13, %v1846_v61, %v1845_v26  ;;  %v1475_v43 = vpack.c.bf16 %v1443_v51, %v1443_v51  ;;  %v15042_v18 = vld [vmem:[#allocation2 + $0x81] ss:$8 sm:$0x3]  ;;  %v12866_v26 = vld [vmem:[%s17979_s6 + $0x1d8] sm:$0xff]  ;;  %2219 = vmatpush.bf16.msrb.mxu1 %v12836_v25 }
 0x3b9   :  { %v1829_v20 = vunpack.c.l.b16 %v1488_v53  ;;  %v1852_v0 = vrot.slane %v1825_v2, 3  ;;  %v1849_v41 = vsel %vm1653_vm14, %v1848_v9, %v1847_v34  ;;  %v1477_v31 = vpack.c.bf16 %v1445_v55, %v1445_v55  ;;  %v15044_v30 = vld [vmem:[#allocation2 + $0xc1] ss:$8 sm:$0x3] }
 0x3ba   :  { %v1854_v21 = vrot.slane %v1827_v4, 2  ;;  %v1851_v22 = vsel %vm1656_vm15, %v1850_v49, %v1849_v41  ;;  %v1479_v52 = vpack.c.bf16 %v1447_v3, %v1447_v3  ;;  %v1481_v15 = vpack.c.bf16 %v1449_v1, %v1449_v1  ;;  %v15047_v53 = vld [vmem:[#allocation2 + $0x101] ss:$8 sm:$0x3]  ;;  %2503 = vmatpush.bf16.msrb.mxu2 %v14956_v29  ;;  %v12841_v49 = vld [vmem:[%s17979_s6 + $0x110] sm:$0xff] }
 0x3bb   :  { %v1856_v28 = vrot.slane %v1829_v20, 1  ;;  %v1853_v13 = vsel %vm1659_vm0, %v1852_v0, %v1851_v22  ;;  %v1483_v10 = vpack.c.bf16 %v1451_v16, %v1451_v16  ;;  %v1485_v38 = vpack.c.bf16 %v1453_v48, %v1453_v48  ;;  %v15049_v58 = vld [vmem:[#allocation2 + $0x141] ss:$8 sm:$0x3]  ;;  %2489 = vmatpush.bf16.msrb.mxu0 %v12851_v35  ;;  %2235 = vmatpush.bf16.msrb.mxu3 %v12841_v49 }
 0x3bc   :  { %v1487_v33 = vpack.c.bf16 %v1455_v62, %v1455_v62  ;;  %v1855_v37 = vsel %vm1662_vm1, %v1854_v21, %v1853_v13  ;;  %v1814_v17 = vunpack.c.l.b16 %v1473_v23  ;;  %v1816_v5 = vunpack.c.l.b16 %v1475_v43  ;;  %v15058_v2 = vld [vmem:[#allocation2 + $0x181] ss:$8 sm:$0x3]  ;;  %v12850_v23 = vld [vmem:[%s17979_s6 + $0x158] sm:$0xff] }
 0x3bd   :  { %v1818_v45 = vunpack.c.l.b16 %v1477_v31  ;;  %v1857_v39 = vsel %vm1665_vm2, %v1856_v28, %v1855_v37  ;;  %v1820_v44 = vunpack.c.l.b16 %v1479_v52  ;;  %v1822_v56 = vunpack.c.l.b16 %v1481_v15  ;;  %v15061_v9 = vld [vmem:[#allocation2 + $0x1c1] ss:$8 sm:$0x3] }
 0x3be   :  { %v1824_v14 = vunpack.c.l.b16 %v1483_v10  ;;  %v1859_v57 = vpack.c.b16 %v1857_v39, %v1857_v39  ;;  %v1826_v50 = vunpack.c.l.b16 %v1485_v38  ;;  %v1828_v7 = vunpack.c.l.b16 %v1487_v33  ;;  %2504 = vmatpush.bf16.msrb.mxu2 %v12857_v42  ;;  %v12856_v51 = vld [vmem:[%s17979_s6 + $0x188] sm:$0xff]  ;;  %v12835_v60 = vld [vmem:[%s17979_s6 + $0xe0] sm:$0xff]  ;;  %v12865_v10 = vld [vmem:[%s17979_s6 + $0x1d0] sm:$0xff] }
 0x3bf   :  { %v1830_v59 = vrot.slane %v1816_v5, 7  ;;  %v1832_v4 = vrot.slane %v1818_v45, 6  ;;  %v1834_v20 = vrot.slane %v1820_v44, 5  ;;  %v1836_v19 = vrot.slane %v1822_v56, 4  ;;  %v12855_v38 = vld [vmem:[%s17979_s6 + $0x180] sm:$0xff]  ;;  %2220 = vmatpush.bf16.msrb.mxu1 %v12835_v60  ;;  %2490 = vmatpush.bf16.msrb.mxu0 %v12850_v23  ;;  %v12834_v44 = vld [vmem:[%s17979_s6 + $0xd8] sm:$0xff] }
 0x3c0   :  { %v1838_v46 = vrot.slane %v1824_v14, 3  ;;  %v1840_v47 = vrot.slane %v1826_v50, 2  ;;  %v1842_v61 = vrot.slane %v1828_v7, 1  ;;  %v1540_v40 = vperm.slane %v15034_v54, 1  ;;  %10399 = vmatmul.msk.bf16.vlgmr.msra.gmra.mxu3 %vm1410_vm9, %v1859_v57  ;;  %v12849_v56 = vld [vmem:[%s17979_s6 + $0x150] sm:$0xff] }
 0x3c1   :  { %v1831_v29 = vsel %vm1647_vm12, %v1830_v59, %v1814_v17  ;;  %v1542_v21 = vperm.slane %v15040_v24, 1  ;;  %v1544_v28 = vperm.slane %v15042_v18, 1  ;;  %v1546_v32 = vperm.slane %v15044_v30, 1  ;;  %2759 = vmatpush.bf16.msra.mxu3 %v12866_v26  ;;  %v12871_v23 = vld [vmem:[%s17979_s6 + $0x200] sm:$0x70] }
 0x3c2   :  { %v1833_v0 = vsel %vm1650_vm13, %v1832_v4, %v1831_v29  ;;  %v1548_v3 = vperm.slane %v15047_v53, 1  ;;  %v1550_v63 = vperm.slane %v15049_v58, 1  ;;  %v1552_v8 = vperm.slane %v15058_v2, 1  ;;  %2505 = vmatpush.bf16.msrb.mxu2 %v12856_v51 }
 0x3c3   :  { %v1835_v55 = vsel %vm1653_vm14, %v1834_v20, %v1833_v0  ;;  %v1554_v1 = vperm.slane %v15061_v9, 1  ;;  %v1572_v16 = vpack.c.bf16 %v1540_v40, %v1540_v40  ;;  %v1574_v48 = vpack.c.bf16 %v1542_v21, %v1542_v21  ;;  %v12864_v20 = vld [vmem:[%s17979_s6 + $0x1c8] sm:$0xff]  ;;  %2221 = vmatpush.bf16.msrb.mxu1 %v12834_v44  ;;  %2491 = vmatpush.bf16.msrb.mxu0 %v12849_v56 }
 0x3c4   :  { %v1837_v34 = vsel %vm1656_vm15, %v1836_v19, %v1835_v55  ;;  %v1576_v41 = vpack.c.bf16 %v1544_v28, %v1544_v28  ;;  %v1578_v62 = vpack.c.bf16 %v1546_v32, %v1546_v32  ;;  %v1539_v43 = vperm.slane %v15034_v54, 0  ;;  %v12863_v55 = vld [vmem:[%s17979_s6 + $0x1c0] sm:$0xff] }
 0x3c5   :  { %v1839_v6 = vsel %vm1659_vm0, %v1838_v46, %v1837_v34  ;;  %v1580_v22 = vpack.c.bf16 %v1548_v3, %v1548_v3  ;;  %v1582_v31 = vpack.c.bf16 %v1550_v63, %v1550_v63  ;;  %v1584_v52 = vpack.c.bf16 %v1552_v8, %v1552_v8  ;;  %2760 = vmatpush.bf16.msra.mxu3 %v12865_v10  ;;  %v15159_v10 = vld [vmem:[#allocation2 + $0x182] ss:$8 sm:$0x3] }
 0x3c6   :  { %v1841_v12 = vsel %vm1662_vm1, %v1840_v47, %v1839_v6  ;;  %v1586_v36 = vpack.c.bf16 %v1554_v1, %v1554_v1  ;;  %v1631_v27 = vunpack.c.l.b16 %v1572_v16  ;;  %v1633_v13 = vunpack.c.l.b16 %v1574_v48  ;;  %2506 = vmatpush.bf16.msrb.mxu2 %v12855_v38  ;;  %v15137_v1 = vld [vmem:[#allocation2 + $0x2] ss:$8 sm:$0x3] }
 0x3c7   :  { %v1843_v15 = vsel %vm1665_vm2, %v1842_v61, %v1841_v12  ;;  %v1635_v54 = vunpack.c.l.b16 %v1576_v41  ;;  %v1637_v42 = vunpack.c.l.b16 %v1578_v62  ;;  %v1639_v37 = vunpack.c.l.b16 %v1580_v22  ;;  %v15139_v16 = vld [vmem:[#allocation2 + $0x42] ss:$8 sm:$0x3]  ;;  %v12878_v22 = vld [vmem:[%s17979_s6 + $0x238] sm:$0xff] }
 0x3c8   :  { %v1858_v33 = vpack.c.b16 %v1843_v15, %v1843_v15  ;;  %v1641_v17 = vunpack.c.l.b16 %v1582_v31  ;;  %v1643_v5 = vunpack.c.l.b16 %v1584_v52  ;;  %v1645_v45 = vunpack.c.l.b16 %v1586_v36  ;;  %v10634_v62 = vld [vmem:[%s17979_s6 + $0x200] sm:$0xf] }
 0x3c9   :  { %v1667_v39 = vrot.slane %v1633_v13, 7  ;;  %v1669_v14 = vrot.slane %v1635_v54, 6  ;;  %v1671_v57 = vrot.slane %v1637_v42, 5  ;;  %v1673_v25 = vrot.slane %v1639_v37, 4  ;;  %2761 = vmatpush.bf16.msra.mxu3 %v12864_v20  ;;  %v12847_v38 = vld [vmem:[%s17979_s6 + $0x140] sm:$0xff] }
 0x3ca   :  { %1952 = vmatmul.bf16.vlgmr.msra.gmra.mxu2 %v1858_v33  ;;  %v1541_v35 = vperm.slane %v15040_v24, 0  ;;  %v1675_v7 = vrot.slane %v1641_v17, 3  ;;  %v1677_v59 = vrot.slane %v1643_v5, 2  ;;  %v1679_v4 = vrot.slane %v1645_v45, 1  ;;  %v12854_v24 = vld [vmem:[%s17979_s6 + $0x178] sm:$0xff] }
 0x3cb   :  { %v1668_v50 = vsel %vm1647_vm12, %v1667_v39, %v1631_v27  ;;  %v1543_v46 = vperm.slane %v15042_v18, 0  ;;  %v1545_v29 = vperm.slane %v15044_v30, 0  ;;  %v1547_v47 = vperm.slane %v15047_v53, 0  ;;  %v12879_v18 = vld [vmem:[%s17979_s6 + $0x240] sm:$0xff]  ;;  %v12833_v30 = vld [vmem:[%s17979_s6 + $0xd0] sm:$0xff]  ;;  %2507 = vmatpush.bf16.msrb.mxu2 %v12854_v24  ;;  %v12862_v17 = vld [vmem:[%s17979_s6 + $0x1b8] sm:$0xff] }
 0x3cc   :  { %v1670_v19 = vsel %vm1650_vm13, %v1669_v14, %v1668_v50  ;;  %v1549_v40 = vperm.slane %v15049_v58, 0  ;;  %v1551_v49 = vperm.slane %v15058_v2, 0  ;;  %v1553_v0 = vperm.slane %v15061_v9, 0  ;;  %v12848_v58 = vld [vmem:[%s17979_s6 + $0x148] sm:$0xff]  ;;  %2222 = vmatpush.bf16.msrb.mxu1 %v12833_v30  ;;  %v12877_v50 = vld [vmem:[%s17979_s6 + $0x230] sm:$0xff] }
 0x3cd   :  { %v1672_v61 = vsel %vm1653_vm14, %v1671_v57, %v1670_v19  ;;  %v1571_v21 = vpack.c.bf16 %v1539_v43, %v1539_v43  ;;  %v1573_v28 = vpack.c.bf16 %v1541_v35, %v1541_v35  ;;  %v1575_v32 = vpack.c.bf16 %v1543_v46, %v1543_v46  ;;  %v15148_v43 = vld [vmem:[#allocation2 + $0x82] ss:$8 sm:$0x3]  ;;  %2492 = vmatpush.bf16.msrb.mxu0 %v12848_v58 }
 0x3ce   :  { %v1674_v53 = vsel %vm1656_vm15, %v1673_v25, %v1672_v61  ;;  %v1577_v9 = vpack.c.bf16 %v1545_v29, %v1545_v29  ;;  %v1579_v26 = vpack.c.bf16 %v1547_v47, %v1547_v47  ;;  %v1581_v51 = vpack.c.bf16 %v1549_v40, %v1549_v40  ;;  %v15150_v12 = vld [vmem:[#allocation2 + $0xc2] ss:$8 sm:$0x3]  ;;  %2762 = vmatpush.bf16.msra.mxu3 %v12863_v55 }
 0x3cf   :  { %v1676_v2 = vsel %vm1659_vm0, %v1675_v7, %v1674_v53  ;;  %v1583_v63 = vpack.c.bf16 %v1551_v49, %v1551_v49  ;;  %v1585_v8 = vpack.c.bf16 %v1553_v0, %v1553_v0  ;;  %v1630_v34 = vunpack.c.l.b16 %v1571_v21  ;;  %3031 = vmatpush.bf16.msra.mxu2 %v12879_v18  ;;  %v15155_v27 = vld [vmem:[#allocation2 + $0x102] ss:$8 sm:$0x3]  ;;  %v12870_v0 = vld [vmem:[%s17979_s6 + $0x1f8] sm:$0xff] }
 0x3d0   :  { %v1678_v3 = vsel %vm1662_vm1, %v1677_v59, %v1676_v2  ;;  %v1632_v6 = vunpack.c.l.b16 %v1573_v28  ;;  %v1634_v60 = vunpack.c.l.b16 %v1575_v32  ;;  %v1636_v41 = vunpack.c.l.b16 %v1577_v9  ;;  %v15157_v13 = vld [vmem:[#allocation2 + $0x142] ss:$8 sm:$0x3]  ;;  %v15191_v9 = vld [vmem:[#allocation2 + $0x3] ss:$8 sm:$0x3] }
 0x3d1   :  { %v1680_v48 = vsel %vm1665_vm2, %v1679_v4, %v1678_v3  ;;  %v1638_v52 = vunpack.c.l.b16 %v1579_v26  ;;  %v1640_v15 = vunpack.c.l.b16 %v1581_v51  ;;  %v1642_v36 = vunpack.c.l.b16 %v1583_v63  ;;  %v15168_v56 = vld [vmem:[#allocation2 + $0x1c2] ss:$8 sm:$0x3]  ;;  %2493 = vmatpush.bf16.msrb.mxu0 %v12847_v38  ;;  %v15193_v26 = vld [vmem:[#allocation2 + $0x43] ss:$8 sm:$0x3] }
 0x3d2   :  { %v1682_v31 = vpack.c.b16 %v1680_v48, %v1680_v48  ;;  %v1644_v33 = vunpack.c.l.b16 %v1585_v8  ;;  %v1646_v54 = vrot.slane %v1632_v6, 7  ;;  %v1649_v42 = vrot.slane %v1634_v60, 6  ;;  %2763 = vmatpush.bf16.msra.mxu3 %v12862_v17  ;;  %v15196_v8 = vld [vmem:[#allocation2 + $0x83] ss:$8 sm:$0x3]  ;;  %v12861_v6 = vld [vmem:[%s17979_s6 + $0x1b0] sm:$0xff] }
 0x3d3   :  { %v1652_v37 = vrot.slane %v1636_v41, 5  ;;  %v1655_v5 = vrot.slane %v1638_v52, 4  ;;  %v1658_v45 = vrot.slane %v1640_v15, 3  ;;  %v1661_v39 = vrot.slane %v1642_v36, 2  ;;  %3032 = vmatpush.bf16.msra.mxu2 %v12878_v22  ;;  %v12846_v60 = vld [vmem:[%s17979_s6 + $0x138] sm:$0xff]  ;;  %v12869_v15 = vld [vmem:[%s17979_s6 + $0x1f0] sm:$0xff] }
 0x3d4   :  { %10346 = vmatmul.msk.bf16.vlgmr.msra.gmra.mxu1 %vm1410_vm9, %v1682_v31  ;;  %v10635_v44 = vor.u32 %v12871_v23, %v10634_v62  ;;  %v1648_v14 = vsel %vm1647_vm12, %v1646_v54, %v1630_v34  ;;  %v1664_v57 = vrot.slane %v1644_v33, 1  ;;  %v1995_v25 = vperm.slane %v15137_v1, 1  ;;  %v15198_v34 = vld [vmem:[#allocation2 + $0xc3] ss:$8 sm:$0x3] }
 0x3d5   :  { %v1997_v35 = vperm.slane %v15139_v16, 1  ;;  %v1651_v7 = vsel %vm1650_vm13, %v1649_v42, %v1648_v14  ;;  %v1999_v4 = vperm.slane %v15148_v43, 1  ;;  %v2001_v20 = vperm.slane %v15150_v12, 1  ;;  %v15200_v48 = vld [vmem:[#allocation2 + $0x103] ss:$8 sm:$0x3]  ;;  %2494 = vmatpush.bf16.msrb.mxu0 %v12846_v60 }
 0x3d6   :  { %v2757_v59 = vand.u32 %v10635_v44, %v14887_v11  ;;  %v1654_v19 = vsel %vm1653_vm14, %v1652_v37, %v1651_v7  ;;  %v2003_v46 = vperm.slane %v15155_v27, 1  ;;  %v2005_v29 = vperm.slane %v15157_v13, 1  ;;  %v15208_v31 = vld [vmem:[#allocation2 + $0x143] ss:$8 sm:$0x3]  ;;  %2764 = vmatpush.bf16.msra.mxu3 %v12861_v6 }
 0x3d7   :  { %v2007_v47 = vperm.slane %v15159_v10, 1  ;;  %v1657_v24 = vsel %vm1656_vm15, %v1655_v5, %v1654_v19  ;;  %v2009_v61 = vperm.slane %v15168_v56, 1  ;;  %v2027_v40 = vpack.c.bf16 %v1995_v25, %v1995_v25  ;;  %3033 = vmatpush.bf16.msra.mxu2 %v12877_v50  ;;  %v15210_v52 = vld [vmem:[#allocation2 + $0x183] ss:$8 sm:$0x3] }
 0x3d8   :  { %2775 = vmatpush.bf16.msra.mxu1 %v2757_v59  ;;  %v2029_v49 = vpack.c.bf16 %v1997_v35, %v1997_v35  ;;  %v1660_v18 = vsel %vm1659_vm0, %v1658_v45, %v1657_v24  ;;  %v2031_v30 = vpack.c.bf16 %v1999_v4, %v1999_v4  ;;  %v2033_v53 = vpack.c.bf16 %v2001_v20, %v2001_v20  ;;  %v12876_v36 = vld [vmem:[%s17979_s6 + $0x228] sm:$0xff] }
 0x3d9   :  { %v2035_v21 = vpack.c.bf16 %v2003_v46, %v2003_v46  ;;  %v1663_v28 = vsel %vm1662_vm1, %v1661_v39, %v1660_v18  ;;  %v2037_v32 = vpack.c.bf16 %v2005_v29, %v2005_v29  ;;  %v2039_v58 = vpack.c.bf16 %v2007_v47, %v2007_v47  ;;  %v15218_v37 = vld [vmem:[#allocation2 + $0x1c3] ss:$8 sm:$0x3] }
 0x3da   :  { %v2041_v2 = vpack.c.bf16 %v2009_v61, %v2009_v61  ;;  %v1666_v51 = vsel %vm1665_vm2, %v1664_v57, %v1663_v28  ;;  %v2086_v55 = vunpack.c.l.b16 %v2027_v40  ;;  %v2088_v3 = vunpack.c.l.b16 %v2029_v49 }
 0x3db   :  { %v2090_v63 = vunpack.c.l.b16 %v2031_v30  ;;  %v1681_v41 = vpack.c.b16 %v1666_v51, %v1666_v51  ;;  %v2092_v62 = vunpack.c.l.b16 %v2033_v53  ;;  %v2094_v23 = vunpack.c.l.b16 %v2035_v21  ;;  %3034 = vmatpush.bf16.msra.mxu2 %v12876_v36 }
 0x3dc   :  { %v2096_v22 = vunpack.c.l.b16 %v2037_v32  ;;  %2776 = vmatpush.bf16.msra.mxu1 %v12870_v0  ;;  %v2098_v38 = vunpack.c.l.b16 %v2039_v58  ;;  %v2100_v33 = vunpack.c.l.b16 %v2041_v2  ;;  %v2115_v54 = vrot.slane %v2088_v3, 7  ;;  %v12868_v3 = vld [vmem:[%s17979_s6 + $0x1e8] sm:$0xff] }
 0x3dd   :  { %v2117_v42 = vrot.slane %v2090_v63, 6  ;;  %1780 = vmatmul.bf16.vlgmr.msra.gmra.mxu0 %v1681_v41  ;;  %v2119_v17 = vrot.slane %v2092_v62, 5  ;;  %v2121_v5 = vrot.slane %v2094_v23, 4  ;;  %v2267_v39 = vperm.slane %v15191_v9, 1  ;;  %v12875_v62 = vld [vmem:[%s17979_s6 + $0x220] sm:$0xff] }
 0x3de   :  { %v2123_v45 = vrot.slane %v2096_v22, 3  ;;  %v2116_v44 = vsel %vm1647_vm12, %v2115_v54, %v2086_v55  ;;  %v2125_v14 = vrot.slane %v2098_v38, 2  ;;  %v2127_v57 = vrot.slane %v2100_v33, 1  ;;  %v12860_v55 = vld [vmem:[%s17979_s6 + $0x1a8] sm:$0xff]  ;;  %v12859_v38 = vld [vmem:[%s17979_s6 + $0x1a0] sm:$0xff] }
 0x3df   :  { %v2269_v25 = vperm.slane %v15193_v26, 1  ;;  %v2118_v35 = vsel %vm1650_vm13, %v2117_v42, %v2116_v44  ;;  %v2271_v50 = vperm.slane %v15196_v8, 1  ;;  %v2273_v7 = vperm.slane %v15198_v34, 1  ;;  %2765 = vmatpush.bf16.msra.mxu3 %v12860_v55  ;;  %v12867_v33 = vld [vmem:[%s17979_s6 + $0x1e0] sm:$0xff]  ;;  %3035 = vmatpush.bf16.msra.mxu2 %v12875_v62 }
 0x3e0   :  { %v2275_v59 = vperm.slane %v15200_v48, 1  ;;  %2777 = vmatpush.bf16.msra.mxu1 %v12869_v15  ;;  %v2120_v4 = vsel %vm1653_vm14, %v2119_v17, %v2118_v35  ;;  %v2277_v20 = vperm.slane %v15208_v31, 1  ;;  %v2279_v19 = vperm.slane %v15210_v52, 1 }
 0x3e1   :  { %v2281_v46 = vperm.slane %v15218_v37, 1  ;;  %v2122_v29 = vsel %vm1656_vm15, %v2121_v5, %v2120_v4  ;;  %v2299_v47 = vpack.c.bf16 %v2267_v39, %v2267_v39  ;;  %v2301_v24 = vpack.c.bf16 %v2269_v25, %v2269_v25 }
 0x3e2   :  { %v2303_v61 = vpack.c.bf16 %v2271_v50, %v2271_v50  ;;  %v2124_v40 = vsel %vm1659_vm0, %v2123_v45, %v2122_v29  ;;  %v2305_v49 = vpack.c.bf16 %v2273_v7, %v2273_v7  ;;  %v2307_v0 = vpack.c.bf16 %v2275_v59, %v2275_v59  ;;  %v12874_v45 = vld [vmem:[%s17979_s6 + $0x218] sm:$0xff] }
 0x3e3   :  { %v2309_v18 = vpack.c.bf16 %v2277_v20, %v2277_v20  ;;  %v2126_v30 = vsel %vm1662_vm1, %v2125_v14, %v2124_v40  ;;  %v2311_v53 = vpack.c.bf16 %v2279_v19, %v2279_v19  ;;  %v2313_v21 = vpack.c.bf16 %v2281_v46, %v2281_v46  ;;  %2766 = vmatpush.bf16.msra.mxu3 %v12859_v38 }
 0x3e4   :  { %v2358_v28 = vunpack.c.l.b16 %v2299_v47  ;;  %v2128_v32 = vsel %vm1665_vm2, %v2127_v57, %v2126_v30  ;;  %v2360_v58 = vunpack.c.l.b16 %v2301_v24  ;;  %v2362_v2 = vunpack.c.l.b16 %v2303_v61  ;;  %2778 = vmatpush.bf16.msra.mxu1 %v12868_v3  ;;  %3036 = vmatpush.bf16.msra.mxu2 %v12874_v45  ;;  %v12884_v30 = vld [vmem:[%s17979_s6 + $0x268] sm:$0x70] }
 0x3e5   :  { %v2364_v51 = vunpack.c.l.b16 %v2305_v49  ;;  %v2130_v63 = vpack.c.b16 %v2128_v32, %v2128_v32  ;;  %v2366_v6 = vunpack.c.l.b16 %v2307_v0  ;;  %v2368_v60 = vunpack.c.l.b16 %v2309_v18  ;;  %v10713_v18 = vld [vmem:[%s17979_s6 + $0x268] sm:$0xf] }
 0x3e6   :  { %v2370_v41 = vunpack.c.l.b16 %v2311_v53  ;;  %v2372_v23 = vunpack.c.l.b16 %v2313_v21  ;;  %v2387_v22 = vrot.slane %v2360_v58, 7  ;;  %v2389_v15 = vrot.slane %v2362_v2, 6  ;;  %v12873_v58 = vld [vmem:[%s17979_s6 + $0x210] sm:$0xff] }
 0x3e7   :  { %v2391_v36 = vrot.slane %v2364_v51, 5  ;;  %10478 = vmatmul.msk.bf16.vlgmr.msrb.gmra.mxu3 %vm1410_vm9, %v2130_v63  ;;  %v2393_v54 = vrot.slane %v2366_v6, 4  ;;  %v2395_v42 = vrot.slane %v2368_v60, 3  ;;  %v1994_v5 = vperm.slane %v15137_v1, 0 }
 0x3e8   :  { %v2397_v17 = vrot.slane %v2370_v41, 2  ;;  %v2388_v39 = vsel %vm1647_vm12, %v2387_v22, %v2358_v28  ;;  %v2399_v44 = vrot.slane %v2372_v23, 1  ;;  %v1996_v14 = vperm.slane %v15139_v16, 0  ;;  %2779 = vmatpush.bf16.msra.mxu1 %v12867_v33  ;;  %3037 = vmatpush.bf16.msra.mxu2 %v12873_v58 }
 0x3e9   :  { %v1998_v57 = vperm.slane %v15148_v43, 0  ;;  %v2390_v25 = vsel %vm1650_vm13, %v2389_v15, %v2388_v39  ;;  %v2000_v35 = vperm.slane %v15150_v12, 0  ;;  %v2002_v50 = vperm.slane %v15155_v27, 0 }
 0x3ea   :  { %v2004_v1 = vperm.slane %v15157_v13, 0  ;;  %v2392_v7 = vsel %vm1653_vm14, %v2391_v36, %v2390_v25  ;;  %v2006_v59 = vperm.slane %v15159_v10, 0  ;;  %v2008_v4 = vperm.slane %v15168_v56, 0 }
 0x3eb   :  { %v2026_v20 = vpack.c.bf16 %v1994_v5, %v1994_v5  ;;  %v2394_v16 = vsel %vm1656_vm15, %v2393_v54, %v2392_v7  ;;  %v2028_v43 = vpack.c.bf16 %v1996_v14, %v1996_v14  ;;  %v2030_v19 = vpack.c.bf16 %v1998_v57, %v1998_v57 }
 0x3ec   :  { %v2032_v46 = vpack.c.bf16 %v2000_v35, %v2000_v35  ;;  %v2396_v12 = vsel %vm1659_vm0, %v2395_v42, %v2394_v16  ;;  %v2034_v27 = vpack.c.bf16 %v2002_v50, %v2002_v50  ;;  %v2036_v29 = vpack.c.bf16 %v2004_v1, %v2004_v1  ;;  %v15297_v35 = vld [vmem:[#allocation2 + $0x4] ss:$8 sm:$0x3] }
 0x3ed   :  { %v2038_v13 = vpack.c.bf16 %v2006_v59, %v2006_v59  ;;  %v2398_v47 = vsel %vm1662_vm1, %v2397_v17, %v2396_v12  ;;  %v2040_v24 = vpack.c.bf16 %v2008_v4, %v2008_v4  ;;  %v2085_v10 = vunpack.c.l.b16 %v2026_v20  ;;  %v15299_v50 = vld [vmem:[#allocation2 + $0x44] ss:$8 sm:$0x3] }
 0x3ee   :  { %v2087_v61 = vunpack.c.l.b16 %v2028_v43  ;;  %v2400_v56 = vsel %vm1665_vm2, %v2399_v44, %v2398_v47  ;;  %v2089_v40 = vunpack.c.l.b16 %v2030_v19  ;;  %v2091_v49 = vunpack.c.l.b16 %v2032_v46  ;;  %v12872_v1 = vld [vmem:[%s17979_s6 + $0x208] sm:$0xff]  ;;  %v10792_v43 = vld [vmem:[%s17979_s6 + $0x2d0] sm:$0xf]  ;;  %v12897_v19 = vld [vmem:[%s17979_s6 + $0x2d0] sm:$0x70] }
 0x3ef   :  { %v2093_v0 = vunpack.c.l.b16 %v2034_v27  ;;  %v2402_v53 = vpack.c.b16 %v2400_v56, %v2400_v56  ;;  %v2095_v21 = vunpack.c.l.b16 %v2036_v29  ;;  %v2097_v28 = vunpack.c.l.b16 %v2038_v13  ;;  %v12892_v16 = vld [vmem:[%s17979_s6 + $0x2a8] sm:$0xff]  ;;  %3038 = vmatpush.bf16.msra.mxu2 %v12872_v1 }
 0x3f0   :  { %v2099_v32 = vunpack.c.l.b16 %v2040_v24  ;;  %v2101_v2 = vrot.slane %v2087_v61, 7  ;;  %v2103_v51 = vrot.slane %v2089_v40, 6  ;;  %v2105_v55 = vrot.slane %v2091_v49, 5  ;;  %v15314_v46 = vld [vmem:[#allocation2 + $0x84] ss:$8 sm:$0x3] }
 0x3f1   :  { %v2107_v3 = vrot.slane %v2093_v0, 4  ;;  %10557 = vmatmul.msk.bf16.vlgmr.msrb.gmra.mxu2 %vm1410_vm9, %v2402_v53  ;;  %v2109_v63 = vrot.slane %v2095_v21, 3  ;;  %v2111_v6 = vrot.slane %v2097_v28, 2  ;;  %v10714_v41 = vor.u32 %v12884_v30, %v10713_v18  ;;  %v15316_v12 = vld [vmem:[#allocation2 + $0xc4] ss:$8 sm:$0x3] }
 0x3f2   :  { %v2113_v60 = vrot.slane %v2099_v32, 1  ;;  %v2102_v62 = vsel %vm1647_vm12, %v2101_v2, %v2085_v10  ;;  %v2266_v23 = vperm.slane %v15191_v9, 0  ;;  %v2268_v22 = vperm.slane %v15193_v26, 0  ;;  %v12882_v24 = vld [vmem:[%s17979_s6 + $0x258] sm:$0xff] }
 0x3f3   :  { %v2270_v15 = vperm.slane %v15196_v8, 0  ;;  %v2104_v36 = vsel %vm1650_vm13, %v2103_v51, %v2102_v62  ;;  %v3029_v38 = vand.u32 %v10714_v41, %v14887_v11  ;;  %v2272_v33 = vperm.slane %v15198_v34, 0  ;;  %v12883_v34 = vld [vmem:[%s17979_s6 + $0x260] sm:$0xff]  ;;  %v12881_v62 = vld [vmem:[%s17979_s6 + $0x250] sm:$0xff] }
 0x3f4   :  { %v2274_v54 = vperm.slane %v15200_v48, 0  ;;  %v2106_v42 = vsel %vm1653_vm14, %v2105_v55, %v2104_v36  ;;  %v2276_v17 = vperm.slane %v15208_v31, 0  ;;  %v2278_v5 = vperm.slane %v15210_v52, 0  ;;  %v15321_v10 = vld [vmem:[#allocation2 + $0x104] ss:$8 sm:$0x3] }
 0x3f5   :  { %v2280_v9 = vperm.slane %v15218_v37, 0  ;;  %v2108_v26 = vsel %vm1656_vm15, %v2107_v3, %v2106_v42  ;;  %3047 = vmatpush.bf16.msra.mxu0 %v3029_v38  ;;  %v2298_v8 = vpack.c.bf16 %v2266_v23, %v2266_v23  ;;  %v2300_v45 = vpack.c.bf16 %v2268_v22, %v2268_v22  ;;  %v15323_v61 = vld [vmem:[#allocation2 + $0x144] ss:$8 sm:$0x3] }
 0x3f6   :  { %v2302_v39 = vpack.c.bf16 %v2270_v15, %v2270_v15  ;;  %v2110_v48 = vsel %vm1659_vm0, %v2109_v63, %v2108_v26  ;;  %v2304_v44 = vpack.c.bf16 %v2272_v33, %v2272_v33  ;;  %v2306_v14 = vpack.c.bf16 %v2274_v54, %v2274_v54  ;;  %v15325_v18 = vld [vmem:[#allocation2 + $0x184] ss:$8 sm:$0x3] }
 0x3f7   :  { %v2308_v57 = vpack.c.bf16 %v2276_v17, %v2276_v17  ;;  %v2112_v31 = vsel %vm1662_vm1, %v2111_v6, %v2110_v48  ;;  %v2310_v52 = vpack.c.bf16 %v2278_v5, %v2278_v5  ;;  %v2312_v25 = vpack.c.bf16 %v2280_v9, %v2280_v9  ;;  %v15327_v32 = vld [vmem:[#allocation2 + $0x1c4] ss:$8 sm:$0x3] }
 0x3f8   :  { %v2357_v37 = vunpack.c.l.b16 %v2298_v8  ;;  %v2114_v7 = vsel %vm1665_vm2, %v2113_v60, %v2112_v31  ;;  %v2359_v59 = vunpack.c.l.b16 %v2300_v45  ;;  %v2361_v4 = vunpack.c.l.b16 %v2302_v39  ;;  %v12891_v3 = vld [vmem:[%s17979_s6 + $0x2a0] sm:$0xff]  ;;  %v12896_v17 = vld [vmem:[%s17979_s6 + $0x2c8] sm:$0xff]  ;;  %v12890_v45 = vld [vmem:[%s17979_s6 + $0x298] sm:$0xff] }
 0x3f9   :  { %v2363_v20 = vunpack.c.l.b16 %v2304_v44  ;;  %v2129_v27 = vpack.c.b16 %v2114_v7, %v2114_v7  ;;  %v2365_v29 = vunpack.c.l.b16 %v2306_v14  ;;  %v2367_v13 = vunpack.c.l.b16 %v2308_v57  ;;  %3048 = vmatpush.bf16.msra.mxu0 %v12883_v34 }
 0x3fa   :  { %v2369_v47 = vunpack.c.l.b16 %v2310_v52  ;;  %v2371_v56 = vunpack.c.l.b16 %v2312_v25  ;;  %v2373_v40 = vrot.slane %v2359_v59, 7  ;;  %v2375_v49 = vrot.slane %v2361_v4, 6  ;;  %v12880_v25 = vld [vmem:[%s17979_s6 + $0x248] sm:$0xff]  ;;  %v12895_v4 = vld [vmem:[%s17979_s6 + $0x2c0] sm:$0xff] }
 0x3fb   :  { %v2377_v0 = vrot.slane %v2363_v20, 5  ;;  %2223 = vmatmul.bf16.vlgmr.msrb.gmra.mxu1 %v2129_v27  ;;  %v2379_v30 = vrot.slane %v2365_v29, 4  ;;  %v2381_v53 = vrot.slane %v2367_v13, 3  ;;  %v10793_v28 = vor.u32 %v12897_v19, %v10792_v43  ;;  %v12905_v20 = vld [vmem:[%s17979_s6 + $0x310] sm:$0xff] }
 0x3fc   :  { %v2383_v21 = vrot.slane %v2369_v47, 2  ;;  %v2374_v58 = vsel %vm1647_vm12, %v2373_v40, %v2357_v37  ;;  %v2385_v2 = vrot.slane %v2371_v56, 1  ;;  %3303 = vmatpush.bf16.msrb.mxu1 %v12892_v16  ;;  %v2538_v51 = vperm.slane %v15297_v35, 0  ;;  %v12889_v29 = vld [vmem:[%s17979_s6 + $0x290] sm:$0xff] }
 0x3fd   :  { %v2540_v55 = vperm.slane %v15299_v50, 0  ;;  %v2376_v63 = vsel %vm1650_vm13, %v2375_v49, %v2374_v58  ;;  %v3301_v6 = vand.u32 %v10793_v28, %v14887_v11  ;;  %3049 = vmatpush.bf16.msra.mxu0 %v12882_v24  ;;  %v2542_v60 = vperm.slane %v15314_v46, 0 }
 0x3fe   :  { %v2544_v41 = vperm.slane %v15316_v12, 0  ;;  %v2378_v23 = vsel %vm1653_vm14, %v2377_v0, %v2376_v63  ;;  %v2546_v22 = vperm.slane %v15321_v10, 0  ;;  %v2548_v15 = vperm.slane %v15323_v61, 0 }
 0x3ff   :  { %v2550_v36 = vperm.slane %v15325_v18, 0  ;;  %v2380_v38 = vsel %vm1656_vm15, %v2379_v30, %v2378_v23  ;;  %3319 = vmatpush.bf16.msrb.mxu3 %v3301_v6  ;;  %v2552_v33 = vperm.slane %v15327_v32, 0  ;;  %v2570_v54 = vpack.c.bf16 %v2538_v51, %v2538_v51 }
 0x400   :  { %v2572_v42 = vpack.c.bf16 %v2540_v55, %v2540_v55  ;;  %v2382_v5 = vsel %vm1659_vm0, %v2381_v53, %v2380_v38  ;;  %v2574_v9 = vpack.c.bf16 %v2542_v60, %v2542_v60  ;;  %v2576_v26 = vpack.c.bf16 %v2544_v41, %v2544_v41  ;;  %3304 = vmatpush.bf16.msrb.mxu1 %v12891_v3  ;;  %v12903_v38 = vld [vmem:[%s17979_s6 + $0x300] sm:$0xff] }
 0x401   :  { %v2578_v8 = vpack.c.bf16 %v2546_v22, %v2546_v22  ;;  %v2384_v39 = vsel %vm1662_vm1, %v2383_v21, %v2382_v5  ;;  %v2580_v34 = vpack.c.bf16 %v2548_v15, %v2548_v15  ;;  %v2582_v48 = vpack.c.bf16 %v2550_v36, %v2550_v36  ;;  %3050 = vmatpush.bf16.msra.mxu0 %v12881_v62  ;;  %v15392_v15 = vld [vmem:[#allocation2 + $0x5] ss:$8 sm:$0x3]  ;;  %v10871_v5 = vld [vmem:[%s17979_s6 + $0x338] sm:$0xf] }
 0x402   :  { %v2584_v44 = vpack.c.bf16 %v2552_v33, %v2552_v33  ;;  %v2386_v14 = vsel %vm1665_vm2, %v2385_v2, %v2384_v39  ;;  %v2629_v57 = vunpack.c.l.b16 %v2570_v54  ;;  %v2631_v31 = vunpack.c.l.b16 %v2572_v42  ;;  %v12904_v2 = vld [vmem:[%s17979_s6 + $0x308] sm:$0xff] }
 0x403   :  { %v2633_v52 = vunpack.c.l.b16 %v2574_v9  ;;  %v2401_v37 = vpack.c.b16 %v2386_v14, %v2386_v14  ;;  %v2635_v1 = vunpack.c.l.b16 %v2576_v26  ;;  %v2637_v7 = vunpack.c.l.b16 %v2578_v8  ;;  %3320 = vmatpush.bf16.msrb.mxu3 %v12896_v17  ;;  %v15394_v36 = vld [vmem:[#allocation2 + $0x45] ss:$8 sm:$0x3]  ;;  %v12910_v9 = vld [vmem:[%s17979_s6 + $0x338] sm:$0x70] }
 0x404   :  { %v2639_v59 = vunpack.c.l.b16 %v2580_v34  ;;  %v2641_v16 = vunpack.c.l.b16 %v2582_v48  ;;  %v2643_v43 = vunpack.c.l.b16 %v2584_v44  ;;  %v2645_v19 = vrot.slane %v2631_v31, 7  ;;  %3305 = vmatpush.bf16.msrb.mxu1 %v12890_v45  ;;  %v15406_v26 = vld [vmem:[#allocation2 + $0x85] ss:$8 sm:$0x3]  ;;  %v12893_v45 = vld [vmem:[%s17979_s6 + $0x2b0] sm:$0xff] }
 0x405   :  { %v2647_v27 = vrot.slane %v2633_v52, 6  ;;  %2495 = vmatmul.bf16.vlgmr.msrb.gmra.mxu0 %v2401_v37  ;;  %v2649_v13 = vrot.slane %v2635_v1, 5  ;;  %v2651_v47 = vrot.slane %v2637_v7, 4  ;;  %v2539_v56 = vperm.slane %v15297_v35, 1  ;;  %v12894_v35 = vld [vmem:[%s17979_s6 + $0x2b8] sm:$0xff] }
 0x406   :  { %v2653_v24 = vrot.slane %v2639_v59, 3  ;;  %v2646_v40 = vsel %vm1647_vm12, %v2645_v19, %v2629_v57  ;;  %v2655_v49 = vrot.slane %v2641_v16, 2  ;;  %v2657_v0 = vrot.slane %v2643_v43, 1  ;;  %3051 = vmatpush.bf16.msra.mxu0 %v12880_v25  ;;  %v15408_v8 = vld [vmem:[#allocation2 + $0xc5] ss:$8 sm:$0x3] }
 0x407   :  { %v2541_v30 = vperm.slane %v15299_v50, 1  ;;  %v2648_v53 = vsel %vm1650_vm13, %v2647_v27, %v2646_v40  ;;  %v2543_v21 = vperm.slane %v15314_v46, 1  ;;  %v2545_v28 = vperm.slane %v15316_v12, 1  ;;  %3321 = vmatpush.bf16.msrb.mxu3 %v12895_v4  ;;  %v15413_v14 = vld [vmem:[#allocation2 + $0x105] ss:$8 sm:$0x3] }
 0x408   :  { %v2547_v58 = vperm.slane %v15321_v10, 1  ;;  %v2650_v50 = vsel %vm1653_vm14, %v2649_v13, %v2648_v53  ;;  %v2549_v51 = vperm.slane %v15323_v61, 1  ;;  %v2551_v46 = vperm.slane %v15325_v18, 1  ;;  %3306 = vmatpush.bf16.msrb.mxu1 %v12889_v29  ;;  %v12888_v10 = vld [vmem:[%s17979_s6 + $0x288] sm:$0xff]  ;;  %v12918_v52 = vld [vmem:[%s17979_s6 + $0x378] sm:$0xff]  ;;  %v12887_v25 = vld [vmem:[%s17979_s6 + $0x280] sm:$0xff] }
 0x409   :  { %v2553_v12 = vperm.slane %v15327_v32, 1  ;;  %v2652_v55 = vsel %vm1656_vm15, %v2651_v47, %v2650_v50  ;;  %v2571_v3 = vpack.c.bf16 %v2539_v56, %v2539_v56  ;;  %v2573_v63 = vpack.c.bf16 %v2541_v30, %v2541_v30  ;;  %v15415_v57 = vld [vmem:[#allocation2 + $0x145] ss:$8 sm:$0x3]  ;;  %v12902_v27 = vld [vmem:[%s17979_s6 + $0x2f8] sm:$0xff]  ;;  %v12917_v53 = vld [vmem:[%s17979_s6 + $0x370] sm:$0xff] }
 0x40a   :  { %3575 = vmatpush.bf16.msrb.mxu0 %v12905_v20  ;;  %v2575_v6 = vpack.c.bf16 %v2543_v21, %v2543_v21  ;;  %v2654_v60 = vsel %vm1659_vm0, %v2653_v24, %v2652_v55  ;;  %v2577_v41 = vpack.c.bf16 %v2545_v28, %v2545_v28  ;;  %v2579_v62 = vpack.c.bf16 %v2547_v58, %v2547_v58  ;;  %v15417_v31 = vld [vmem:[#allocation2 + $0x185] ss:$8 sm:$0x3]  ;;  %v12886_v56 = vld [vmem:[%s17979_s6 + $0x278] sm:$0xff] }
 0x40b   :  { %v2581_v23 = vpack.c.bf16 %v2549_v51, %v2549_v51  ;;  %v2656_v61 = vsel %vm1662_vm1, %v2655_v49, %v2654_v60  ;;  %v2583_v18 = vpack.c.bf16 %v2551_v46, %v2551_v46  ;;  %v2585_v22 = vpack.c.bf16 %v2553_v12, %v2553_v12  ;;  %3322 = vmatpush.bf16.msrb.mxu3 %v12894_v35  ;;  %v15425_v4 = vld [vmem:[#allocation2 + $0x1c5] ss:$8 sm:$0x3]  ;;  %v12909_v12 = vld [vmem:[%s17979_s6 + $0x330] sm:$0xff] }
 0x40c   :  { %v2630_v32 = vunpack.c.l.b16 %v2571_v3  ;;  %v2658_v33 = vsel %vm1665_vm2, %v2657_v0, %v2656_v61  ;;  %v2632_v54 = vunpack.c.l.b16 %v2573_v63  ;;  %v2634_v42 = vunpack.c.l.b16 %v2575_v6  ;;  %3307 = vmatpush.bf16.msrb.mxu1 %v12888_v10  ;;  %v12901_v61 = vld [vmem:[%s17979_s6 + $0x2f0] sm:$0xff] }
 0x40d   :  { %v2636_v17 = vunpack.c.l.b16 %v2577_v41  ;;  %v2673_v39 = vpack.c.b16 %v2658_v33, %v2658_v33  ;;  %v2638_v34 = vunpack.c.l.b16 %v2579_v62  ;;  %v2640_v48 = vunpack.c.l.b16 %v2581_v23  ;;  %v12916_v23 = vld [vmem:[%s17979_s6 + $0x368] sm:$0xff] }
 0x40e   :  { %3576 = vmatpush.bf16.msrb.mxu0 %v12904_v2  ;;  %v2642_v44 = vunpack.c.l.b16 %v2583_v18  ;;  %v2644_v37 = vunpack.c.l.b16 %v2585_v22  ;;  %v2659_v1 = vrot.slane %v2632_v54, 7  ;;  %v2661_v7 = vrot.slane %v2634_v42, 6 }
 0x40f   :  { %v2663_v59 = vrot.slane %v2636_v17, 5  ;;  %2767 = vmatmul.bf16.vlgmr.msra.gmra.mxu3 %v2673_v39  ;;  %v2665_v20 = vrot.slane %v2638_v34, 4  ;;  %v2667_v16 = vrot.slane %v2640_v48, 3  ;;  %v10872_v19 = vor.u32 %v12910_v9, %v10871_v5  ;;  %v12908_v5 = vld [vmem:[%s17979_s6 + $0x328] sm:$0xff]  ;;  %v12885_v9 = vld [vmem:[%s17979_s6 + $0x270] sm:$0xff] }
 0x410   :  { %v2669_v43 = vrot.slane %v2642_v44, 2  ;;  %v2660_v29 = vsel %vm1647_vm12, %v2659_v1, %v2630_v32  ;;  %v2671_v13 = vrot.slane %v2644_v37, 1  ;;  %v2810_v47 = vperm.slane %v15392_v15, 0  ;;  %3323 = vmatpush.bf16.msrb.mxu3 %v12893_v45  ;;  %3308 = vmatpush.bf16.msrb.mxu1 %v12887_v25  ;;  %v12900_v45 = vld [vmem:[%s17979_s6 + $0x2e8] sm:$0xff] }
 0x411   :  { %v2812_v24 = vperm.slane %v15394_v36, 0  ;;  %v2662_v40 = vsel %vm1650_vm13, %v2661_v7, %v2660_v29  ;;  %v3573_v49 = vand.u32 %v10872_v19, %v14887_v11  ;;  %v2814_v0 = vperm.slane %v15406_v26, 0  ;;  %v12915_v7 = vld [vmem:[%s17979_s6 + $0x360] sm:$0xff] }
 0x412   :  { %3577 = vmatpush.bf16.msrb.mxu0 %v12903_v38  ;;  %v2816_v30 = vperm.slane %v15408_v8, 0  ;;  %v2664_v21 = vsel %vm1653_vm14, %v2663_v59, %v2662_v40  ;;  %v2818_v28 = vperm.slane %v15413_v14, 0  ;;  %v2820_v58 = vperm.slane %v15415_v57, 0 }
 0x413   :  { %v2822_v35 = vperm.slane %v15417_v31, 0  ;;  %v2666_v2 = vsel %vm1656_vm15, %v2665_v20, %v2664_v21  ;;  %3591 = vmatpush.bf16.msrb.mxu2 %v3573_v49  ;;  %v2824_v50 = vperm.slane %v15425_v4, 0  ;;  %v2842_v51 = vpack.c.bf16 %v2810_v47, %v2810_v47  ;;  %v15490_v21 = vld [vmem:[#allocation2 + $0x6] ss:$8 sm:$0x3] }
 0x414   :  { %3847 = vmatpush.bf16.msra.mxu3 %v12918_v52  ;;  %v2844_v46 = vpack.c.bf16 %v2812_v24, %v2812_v24  ;;  %v2668_v10 = vsel %vm1659_vm0, %v2667_v16, %v2666_v2  ;;  %v2846_v55 = vpack.c.bf16 %v2814_v0, %v2814_v0  ;;  %v2848_v3 = vpack.c.bf16 %v2816_v30, %v2816_v30 }
 0x415   :  { %v2850_v63 = vpack.c.bf16 %v2818_v28, %v2818_v28  ;;  %3309 = vmatpush.bf16.msrb.mxu1 %v12886_v56  ;;  %v2670_v6 = vsel %vm1662_vm1, %v2669_v43, %v2668_v10  ;;  %v2852_v60 = vpack.c.bf16 %v2820_v58, %v2820_v58  ;;  %v2854_v41 = vpack.c.bf16 %v2822_v35, %v2822_v35  ;;  %v15495_v35 = vld [vmem:[#allocation2 + $0x86] ss:$8 sm:$0x3] }
 0x416   :  { %3578 = vmatpush.bf16.msrb.mxu0 %v12902_v27  ;;  %v2856_v62 = vpack.c.bf16 %v2824_v50, %v2824_v50  ;;  %v2672_v18 = vsel %vm1665_vm2, %v2671_v13, %v2670_v6  ;;  %v2901_v22 = vunpack.c.l.b16 %v2842_v51  ;;  %v2903_v32 = vunpack.c.l.b16 %v2844_v46  ;;  %v12907_v13 = vld [vmem:[%s17979_s6 + $0x320] sm:$0xff] }
 0x417   :  { %v2905_v38 = vunpack.c.l.b16 %v2846_v55  ;;  %v2674_v33 = vpack.c.b16 %v2672_v18, %v2672_v18  ;;  %v2907_v54 = vunpack.c.l.b16 %v2848_v3  ;;  %v2909_v42 = vunpack.c.l.b16 %v2850_v63  ;;  %3592 = vmatpush.bf16.msrb.mxu2 %v12909_v12  ;;  %v15498_v12 = vld [vmem:[#allocation2 + $0xc6] ss:$8 sm:$0x3]  ;;  %v12906_v3 = vld [vmem:[%s17979_s6 + $0x318] sm:$0xff] }
 0x418   :  { %3848 = vmatpush.bf16.msra.mxu3 %v12917_v53  ;;  %v2911_v17 = vunpack.c.l.b16 %v2852_v60  ;;  %v2913_v39 = vunpack.c.l.b16 %v2854_v41  ;;  %v2915_v34 = vunpack.c.l.b16 %v2856_v62  ;;  %v2917_v48 = vrot.slane %v2903_v32, 7  ;;  %v15500_v10 = vld [vmem:[#allocation2 + $0x106] ss:$8 sm:$0x3] }
 0x419   :  { %v2919_v44 = vrot.slane %v2905_v38, 6  ;;  %10636 = vmatmul.msk.bf16.vlgmr.msra.gmra.mxu1 %vm1410_vm9, %v2674_v33  ;;  %v2921_v52 = vrot.slane %v2907_v54, 5  ;;  %v2923_v25 = vrot.slane %v2909_v42, 4  ;;  %v2811_v1 = vperm.slane %v15392_v15, 1  ;;  %v12899_v18 = vld [vmem:[%s17979_s6 + $0x2e0] sm:$0xff] }
 0x41a   :  { %3579 = vmatpush.bf16.msrb.mxu0 %v12901_v61  ;;  %v2925_v37 = vrot.slane %v2911_v17, 3  ;;  %v2918_v59 = vsel %vm1647_vm12, %v2917_v48, %v2901_v22  ;;  %v2927_v20 = vrot.slane %v2913_v39, 2  ;;  %v2929_v16 = vrot.slane %v2915_v34, 1  ;;  %3310 = vmatpush.bf16.msrb.mxu1 %v12885_v9  ;;  %v15502_v55 = vld [vmem:[#allocation2 + $0x146] ss:$8 sm:$0x3] }
 0x41b   :  { %v2813_v43 = vperm.slane %v15394_v36, 1  ;;  %v2920_v19 = vsel %vm1650_vm13, %v2919_v44, %v2918_v59  ;;  %v2815_v27 = vperm.slane %v15406_v26, 1  ;;  %v2817_v29 = vperm.slane %v15408_v8, 1  ;;  %3593 = vmatpush.bf16.msrb.mxu2 %v12908_v5  ;;  %v15507_v62 = vld [vmem:[#allocation2 + $0x186] ss:$8 sm:$0x3] }
 0x41c   :  { %3849 = vmatpush.bf16.msra.mxu3 %v12916_v23  ;;  %v2819_v15 = vperm.slane %v15413_v14, 1  ;;  %v2922_v47 = vsel %vm1653_vm14, %v2921_v52, %v2920_v19  ;;  %v2821_v24 = vperm.slane %v15415_v57, 1  ;;  %v2823_v36 = vperm.slane %v15417_v31, 1  ;;  %v12931_v23 = vld [vmem:[%s17979_s6 + $0x3e0] sm:$0xff]  ;;  %v12914_v61 = vld [vmem:[%s17979_s6 + $0x358] sm:$0xff] }
 0x41d   :  { %v2825_v56 = vperm.slane %v15425_v4, 1  ;;  %v2924_v26 = vsel %vm1656_vm15, %v2923_v25, %v2922_v47  ;;  %v2843_v40 = vpack.c.bf16 %v2811_v1, %v2811_v1  ;;  %v2845_v8 = vpack.c.bf16 %v2813_v43, %v2813_v43  ;;  %v15493_v4 = vld [vmem:[#allocation2 + $0x46] ss:$8 sm:$0x3]  ;;  %v12930_v1 = vld [vmem:[%s17979_s6 + $0x3d8] sm:$0xff] }
 0x41e   :  { %3580 = vmatpush.bf16.msrb.mxu0 %v12900_v45  ;;  %v2847_v49 = vpack.c.bf16 %v2815_v27, %v2815_v27  ;;  %v2926_v14 = vsel %vm1659_vm0, %v2925_v37, %v2924_v26  ;;  %v2849_v0 = vpack.c.bf16 %v2817_v29, %v2817_v29  ;;  %v2851_v30 = vpack.c.bf16 %v2819_v15, %v2819_v15  ;;  %v15518_v54 = vld [vmem:[#allocation2 + $0x1c6] ss:$8 sm:$0x3] }
 0x41f   :  { %v2853_v53 = vpack.c.bf16 %v2821_v24, %v2821_v24  ;;  %v2928_v28 = vsel %vm1662_vm1, %v2927_v20, %v2926_v14  ;;  %v2855_v57 = vpack.c.bf16 %v2823_v36, %v2823_v36  ;;  %v2857_v58 = vpack.c.bf16 %v2825_v56, %v2825_v56  ;;  %3594 = vmatpush.bf16.msrb.mxu2 %v12907_v13 }
 0x420   :  { %3850 = vmatpush.bf16.msra.mxu3 %v12915_v7  ;;  %v2902_v31 = vunpack.c.l.b16 %v2843_v40  ;;  %v2930_v2 = vsel %vm1665_vm2, %v2929_v16, %v2928_v28  ;;  %v2904_v50 = vunpack.c.l.b16 %v2845_v8  ;;  %v2906_v51 = vunpack.c.l.b16 %v2847_v49  ;;  %v12929_v8 = vld [vmem:[%s17979_s6 + $0x3d0] sm:$0xff]  ;;  %v12923_v28 = vld [vmem:[%s17979_s6 + $0x3a0] sm:$0x70] }
 0x421   :  { %v2908_v46 = vunpack.c.l.b16 %v2849_v0  ;;  %v2945_v63 = vpack.c.b16 %v2930_v2, %v2930_v2  ;;  %v2910_v6 = vunpack.c.l.b16 %v2851_v30  ;;  %v2912_v60 = vunpack.c.l.b16 %v2853_v53  ;;  %v10950_v53 = vld [vmem:[%s17979_s6 + $0x3a0] sm:$0xf] }
 0x422   :  { %v2914_v41 = vunpack.c.l.b16 %v2855_v57  ;;  %v2916_v22 = vunpack.c.l.b16 %v2857_v58  ;;  %v2931_v32 = vrot.slane %v2904_v50, 7  ;;  %v2933_v38 = vrot.slane %v2906_v51, 6  ;;  %3581 = vmatpush.bf16.msrb.mxu0 %v12899_v18  ;;  %v12913_v50 = vld [vmem:[%s17979_s6 + $0x350] sm:$0xff]  ;;  %v12898_v51 = vld [vmem:[%s17979_s6 + $0x2d8] sm:$0xff] }
 0x423   :  { %v2935_v33 = vrot.slane %v2908_v46, 5  ;;  %3039 = vmatmul.bf16.vlgmr.msra.gmra.mxu2 %v2945_v63  ;;  %v2937_v42 = vrot.slane %v2910_v6, 4  ;;  %v2939_v17 = vrot.slane %v2912_v60, 3  ;;  %v3083_v9 = vperm.slane %v15490_v21, 1 }
 0x424   :  { %v2941_v5 = vrot.slane %v2914_v41, 2  ;;  %3851 = vmatpush.bf16.msra.mxu3 %v12914_v61  ;;  %v2932_v45 = vsel %vm1647_vm12, %v2931_v32, %v2902_v31  ;;  %v2943_v39 = vrot.slane %v2916_v22, 1  ;;  %v3085_v34 = vperm.slane %v15493_v4, 1  ;;  %3595 = vmatpush.bf16.msrb.mxu2 %v12906_v3 }
 0x425   :  { %v3087_v48 = vperm.slane %v15495_v35, 1  ;;  %v2934_v44 = vsel %vm1650_vm13, %v2933_v38, %v2932_v45  ;;  %v3089_v52 = vperm.slane %v15498_v12, 1  ;;  %v3091_v25 = vperm.slane %v15500_v10, 1 }
 0x426   :  { %v3093_v37 = vperm.slane %v15502_v55, 1  ;;  %v2936_v7 = vsel %vm1653_vm14, %v2935_v33, %v2934_v44  ;;  %v3095_v59 = vperm.slane %v15507_v62, 1  ;;  %v3097_v20 = vperm.slane %v15518_v54, 1  ;;  %3582 = vmatpush.bf16.msrb.mxu0 %v12898_v51  ;;  %v12928_v33 = vld [vmem:[%s17979_s6 + $0x3c8] sm:$0xff]  ;;  %v12926_v51 = vld [vmem:[%s17979_s6 + $0x3b8] sm:$0xff] }
 0x427   :  { %v3115_v16 = vpack.c.bf16 %v3083_v9, %v3083_v9  ;;  %v2938_v43 = vsel %vm1656_vm15, %v2937_v42, %v2936_v7  ;;  %v3117_v19 = vpack.c.bf16 %v3085_v34, %v3085_v34  ;;  %v3119_v27 = vpack.c.bf16 %v3087_v48, %v3087_v48  ;;  %v15575_v7 = vld [vmem:[#allocation2 + $0x7] ss:$8 sm:$0x3] }
 0x428   :  { %4119 = vmatpush.bf16.msra.mxu2 %v12931_v23  ;;  %v3121_v29 = vpack.c.bf16 %v3089_v52, %v3089_v52  ;;  %v2940_v15 = vsel %vm1659_vm0, %v2939_v17, %v2938_v43  ;;  %v3123_v13 = vpack.c.bf16 %v3091_v25, %v3091_v25  ;;  %v3125_v47 = vpack.c.bf16 %v3093_v37, %v3093_v37 }
 0x429   :  { %v3127_v24 = vpack.c.bf16 %v3095_v59, %v3095_v59  ;;  %v2942_v36 = vsel %vm1662_vm1, %v2941_v5, %v2940_v15  ;;  %v3129_v56 = vpack.c.bf16 %v3097_v20, %v3097_v20  ;;  %v3174_v26 = vunpack.c.l.b16 %v3115_v16  ;;  %3852 = vmatpush.bf16.msra.mxu3 %v12913_v50  ;;  %v15577_v59 = vld [vmem:[#allocation2 + $0x47] ss:$8 sm:$0x3] }
 0x42a   :  { %v3176_v40 = vunpack.c.l.b16 %v3117_v19  ;;  %v2944_v49 = vsel %vm1665_vm2, %v2943_v39, %v2942_v36  ;;  %v3178_v14 = vunpack.c.l.b16 %v3119_v27  ;;  %v3180_v0 = vunpack.c.l.b16 %v3121_v29  ;;  %v15579_v20 = vld [vmem:[#allocation2 + $0x87] ss:$8 sm:$0x3] }
 0x42b   :  { %v3182_v30 = vunpack.c.l.b16 %v3123_v13  ;;  %v2946_v57 = vpack.c.b16 %v2944_v49, %v2944_v49  ;;  %v3184_v58 = vunpack.c.l.b16 %v3125_v47  ;;  %v3186_v31 = vunpack.c.l.b16 %v3127_v24  ;;  %v15582_v29 = vld [vmem:[#allocation2 + $0xc7] ss:$8 sm:$0x3]  ;;  %v12921_v49 = vld [vmem:[%s17979_s6 + $0x390] sm:$0xff] }
 0x42c   :  { %4120 = vmatpush.bf16.msra.mxu2 %v12930_v1  ;;  %v3188_v2 = vunpack.c.l.b16 %v3129_v56  ;;  %v3203_v46 = vrot.slane %v3176_v40, 7  ;;  %v3205_v3 = vrot.slane %v3178_v14, 6  ;;  %v3207_v63 = vrot.slane %v3180_v0, 5  ;;  %v15584_v15 = vld [vmem:[#allocation2 + $0x107] ss:$8 sm:$0x3] }
 0x42d   :  { %v3209_v6 = vrot.slane %v3182_v30, 4  ;;  %10715 = vmatmul.msk.bf16.vlgmr.msra.gmra.mxu0 %vm1410_vm9, %v2946_v57  ;;  %v3211_v60 = vrot.slane %v3184_v58, 3  ;;  %v3213_v41 = vrot.slane %v3186_v31, 2  ;;  %v10951_v61 = vor.u32 %v12923_v28, %v10950_v53  ;;  %v15586_v13 = vld [vmem:[#allocation2 + $0x147] ss:$8 sm:$0x3] }
 0x42e   :  { %v3215_v23 = vrot.slane %v3188_v2, 1  ;;  %v3204_v18 = vsel %vm1647_vm12, %v3203_v46, %v3174_v26  ;;  %v3082_v22 = vperm.slane %v15490_v21, 0  ;;  %v3084_v32 = vperm.slane %v15493_v4, 0  ;;  %v12912_v47 = vld [vmem:[%s17979_s6 + $0x348] sm:$0xff]  ;;  %v12927_v14 = vld [vmem:[%s17979_s6 + $0x3c0] sm:$0xff] }
 0x42f   :  { %v3086_v38 = vperm.slane %v15495_v35, 0  ;;  %v3206_v42 = vsel %vm1650_vm13, %v3205_v3, %v3204_v18  ;;  %v3845_v17 = vand.u32 %v10951_v61, %v14887_v11  ;;  %v3088_v5 = vperm.slane %v15498_v12, 0  ;;  %v12922_v12 = vld [vmem:[%s17979_s6 + $0x398] sm:$0xff]  ;;  %v15591_v40 = vld [vmem:[#allocation2 + $0x187] ss:$8 sm:$0x3]  ;;  %3853 = vmatpush.bf16.msra.mxu3 %v12912_v47 }
 0x430   :  { %4121 = vmatpush.bf16.msra.mxu2 %v12929_v8  ;;  %v3090_v9 = vperm.slane %v15500_v10, 0  ;;  %v3208_v21 = vsel %vm1653_vm14, %v3207_v63, %v3206_v42  ;;  %v3092_v4 = vperm.slane %v15502_v55, 0  ;;  %v3094_v35 = vperm.slane %v15507_v62, 0  ;;  %v15593_v8 = vld [vmem:[#allocation2 + $0x1c7] ss:$8 sm:$0x3] }
 0x431   :  { %v3096_v45 = vperm.slane %v15518_v54, 0  ;;  %v3210_v39 = vsel %vm1656_vm15, %v3209_v6, %v3208_v21  ;;  %3863 = vmatpush.bf16.msra.mxu1 %v3845_v17  ;;  %v3114_v34 = vpack.c.bf16 %v3082_v22, %v3082_v22  ;;  %v3116_v48 = vpack.c.bf16 %v3084_v32, %v3084_v32  ;;  %v12911_v57 = vld [vmem:[%s17979_s6 + $0x340] sm:$0xff]  ;;  %v12920_v18 = vld [vmem:[%s17979_s6 + $0x388] sm:$0xff] }
 0x432   :  { %v3118_v44 = vpack.c.bf16 %v3086_v38, %v3086_v38  ;;  %v3212_v10 = vsel %vm1659_vm0, %v3211_v60, %v3210_v39  ;;  %v3120_v52 = vpack.c.bf16 %v3088_v5, %v3088_v5  ;;  %v3122_v25 = vpack.c.bf16 %v3090_v9, %v3090_v9 }
 0x433   :  { %v3124_v37 = vpack.c.bf16 %v3092_v4, %v3092_v4  ;;  %v3214_v55 = vsel %vm1662_vm1, %v3213_v41, %v3212_v10  ;;  %v3126_v62 = vpack.c.bf16 %v3094_v35, %v3094_v35  ;;  %v3128_v54 = vpack.c.bf16 %v3096_v45, %v3096_v45  ;;  %3854 = vmatpush.bf16.msra.mxu3 %v12911_v57 }
 0x434   :  { %4122 = vmatpush.bf16.msra.mxu2 %v12928_v33  ;;  %v3173_v1 = vunpack.c.l.b16 %v3114_v34  ;;  %v3216_v16 = vsel %vm1665_vm2, %v3215_v23, %v3214_v55  ;;  %v3175_v43 = vunpack.c.l.b16 %v3116_v48  ;;  %v3177_v19 = vunpack.c.l.b16 %v3118_v44  ;;  %v12936_v55 = vld [vmem:[%s17979_s6 + $0x408] sm:$0x70] }
 0x435   :  { %v3179_v27 = vunpack.c.l.b16 %v3120_v52  ;;  %v3218_v24 = vpack.c.b16 %v3216_v16, %v3216_v16  ;;  %v3181_v36 = vunpack.c.l.b16 %v3122_v25  ;;  %v3183_v56 = vunpack.c.l.b16 %v3124_v37  ;;  %3864 = vmatpush.bf16.msra.mxu1 %v12922_v12  ;;  %v11029_v37 = vld [vmem:[%s17979_s6 + $0x408] sm:$0xf] }
 0x436   :  { %v3185_v26 = vunpack.c.l.b16 %v3126_v62  ;;  %v3187_v0 = vunpack.c.l.b16 %v3128_v54  ;;  %v3189_v30 = vrot.slane %v3175_v43, 7  ;;  %v3191_v53 = vrot.slane %v3177_v19, 6  ;;  %v12919_v62 = vld [vmem:[%s17979_s6 + $0x380] sm:$0xff]  ;;  %v12944_v19 = vld [vmem:[%s17979_s6 + $0x448] sm:$0xff] }
 0x437   :  { %v3193_v28 = vrot.slane %v3179_v27, 5  ;;  %10794 = vmatmul.msk.bf16.vlgmr.msrb.gmra.mxu3 %vm1410_vm9, %v3218_v24  ;;  %v3195_v58 = vrot.slane %v3181_v36, 4  ;;  %v3197_v31 = vrot.slane %v3183_v56, 3  ;;  %v3355_v50 = vperm.slane %v15575_v7, 1  ;;  %v12925_v27 = vld [vmem:[%s17979_s6 + $0x3b0] sm:$0xff] }
 0x438   :  { %v3199_v2 = vrot.slane %v3185_v26, 2  ;;  %4123 = vmatpush.bf16.msra.mxu2 %v12927_v14  ;;  %v3190_v46 = vsel %vm1647_vm12, %v3189_v30, %v3173_v1  ;;  %v3201_v3 = vrot.slane %v3187_v0, 1  ;;  %v3357_v63 = vperm.slane %v15577_v59, 1 }
 0x439   :  { %v3359_v6 = vperm.slane %v15579_v20, 1  ;;  %v3192_v60 = vsel %vm1650_vm13, %v3191_v53, %v3190_v46  ;;  %v3361_v41 = vperm.slane %v15582_v29, 1  ;;  %v3363_v23 = vperm.slane %v15584_v15, 1  ;;  %3865 = vmatpush.bf16.msra.mxu1 %v12921_v49 }
 0x43a   :  { %v3365_v61 = vperm.slane %v15586_v13, 1  ;;  %v3194_v22 = vsel %vm1653_vm14, %v3193_v28, %v3192_v60  ;;  %v3367_v32 = vperm.slane %v15591_v40, 1  ;;  %v3369_v38 = vperm.slane %v15593_v8, 1 }
 0x43b   :  { %v3387_v33 = vpack.c.bf16 %v3355_v50, %v3355_v50  ;;  %v3196_v42 = vsel %vm1656_vm15, %v3195_v58, %v3194_v22  ;;  %v3389_v17 = vpack.c.bf16 %v3357_v63, %v3357_v63  ;;  %v3391_v5 = vpack.c.bf16 %v3359_v6, %v3359_v6  ;;  %v15662_v22 = vld [vmem:[#allocation2 + $0x10] ss:$8 sm:$0x3] }
 0x43c   :  { %v3393_v9 = vpack.c.bf16 %v3361_v41, %v3361_v41  ;;  %4124 = vmatpush.bf16.msra.mxu2 %v12926_v51  ;;  %v3198_v21 = vsel %vm1659_vm0, %v3197_v31, %v3196_v42  ;;  %v3395_v4 = vpack.c.bf16 %v3363_v23, %v3363_v23  ;;  %v3397_v35 = vpack.c.bf16 %v3365_v61, %v3365_v61  ;;  %v12943_v51 = vld [vmem:[%s17979_s6 + $0x440] sm:$0xff] }
 0x43d   :  { %v3399_v45 = vpack.c.bf16 %v3367_v32, %v3367_v32  ;;  %v3200_v39 = vsel %vm1662_vm1, %v3199_v2, %v3198_v21  ;;  %v3401_v34 = vpack.c.bf16 %v3369_v38, %v3369_v38  ;;  %v3446_v48 = vunpack.c.l.b16 %v3387_v33  ;;  %3866 = vmatpush.bf16.msra.mxu1 %v12920_v18  ;;  %v15664_v32 = vld [vmem:[#allocation2 + $0x50] ss:$8 sm:$0x3]  ;;  %v12924_v33 = vld [vmem:[%s17979_s6 + $0x3a8] sm:$0xff] }
 0x43e   :  { %v3448_v44 = vunpack.c.l.b16 %v3389_v17  ;;  %v3202_v12 = vsel %vm1665_vm2, %v3201_v3, %v3200_v39  ;;  %v3450_v10 = vunpack.c.l.b16 %v3391_v5  ;;  %v3452_v52 = vunpack.c.l.b16 %v3393_v9  ;;  %v12942_v38 = vld [vmem:[%s17979_s6 + $0x438] sm:$0xff]  ;;  %v11108_v21 = vld [vmem:[%s17979_s6 + $0x470] sm:$0xf] }
 0x43f   :  { %v3454_v25 = vunpack.c.l.b16 %v3395_v4  ;;  %v3217_v54 = vpack.c.b16 %v3202_v12, %v3202_v12  ;;  %v3456_v1 = vunpack.c.l.b16 %v3397_v35  ;;  %v3458_v16 = vunpack.c.l.b16 %v3399_v45  ;;  %v12949_v4 = vld [vmem:[%s17979_s6 + $0x470] sm:$0x70]  ;;  %v15679_v35 = vld [vmem:[#allocation2 + $0x90] ss:$8 sm:$0x3] }
 0x440   :  { %v3460_v43 = vunpack.c.l.b16 %v3401_v34  ;;  %v3475_v47 = vrot.slane %v3448_v44, 7  ;;  %v3477_v24 = vrot.slane %v3450_v10, 6  ;;  %v3479_v36 = vrot.slane %v3452_v52, 5  ;;  %4125 = vmatpush.bf16.msra.mxu2 %v12925_v27  ;;  %v15681_v45 = vld [vmem:[#allocation2 + $0xd0] ss:$8 sm:$0x3] }
 0x441   :  { %v3481_v56 = vrot.slane %v3454_v25, 4  ;;  %3311 = vmatmul.bf16.vlgmr.msrb.gmra.mxu1 %v3217_v54  ;;  %v3483_v26 = vrot.slane %v3456_v1, 3  ;;  %v3485_v49 = vrot.slane %v3458_v16, 2  ;;  %v11030_v0 = vor.u32 %v12936_v55, %v11029_v37  ;;  %v12934_v12 = vld [vmem:[%s17979_s6 + $0x3f8] sm:$0xff] }
 0x442   :  { %v3487_v14 = vrot.slane %v3460_v43, 1  ;;  %v3476_v30 = vsel %vm1647_vm12, %v3475_v47, %v3446_v48  ;;  %v3354_v53 = vperm.slane %v15575_v7, 0  ;;  %v3356_v28 = vperm.slane %v15577_v59, 0  ;;  %3867 = vmatpush.bf16.msra.mxu1 %v12919_v62  ;;  %v15686_v10 = vld [vmem:[#allocation2 + $0x110] ss:$8 sm:$0x3] }
 0x443   :  { %v3358_v57 = vperm.slane %v15579_v20, 0  ;;  %v3478_v58 = vsel %vm1650_vm13, %v3477_v24, %v3476_v30  ;;  %v4117_v31 = vand.u32 %v11030_v0, %v14887_v11  ;;  %v3360_v2 = vperm.slane %v15582_v29, 0  ;;  %v15688_v62 = vld [vmem:[#allocation2 + $0x150] ss:$8 sm:$0x3] }
 0x444   :  { %v3362_v50 = vperm.slane %v15584_v15, 0  ;;  %v3480_v7 = vsel %vm1653_vm14, %v3479_v36, %v3478_v58  ;;  %v3364_v59 = vperm.slane %v15586_v13, 0  ;;  %v3366_v20 = vperm.slane %v15591_v40, 0  ;;  %v12935_v15 = vld [vmem:[%s17979_s6 + $0x400] sm:$0xff]  ;;  %4126 = vmatpush.bf16.msra.mxu2 %v12924_v33  ;;  %v12933_v30 = vld [vmem:[%s17979_s6 + $0x3f0] sm:$0xff] }
 0x445   :  { %v3368_v46 = vperm.slane %v15593_v8, 0  ;;  %v3482_v3 = vsel %vm1656_vm15, %v3481_v56, %v3480_v7  ;;  %4135 = vmatpush.bf16.msra.mxu0 %v4117_v31  ;;  %v3386_v63 = vpack.c.bf16 %v3354_v53, %v3354_v53  ;;  %v3388_v29 = vpack.c.bf16 %v3356_v28, %v3356_v28  ;;  %v15694_v24 = vld [vmem:[#allocation2 + $0x1d0] ss:$8 sm:$0x3]  ;;  %v12948_v7 = vld [vmem:[%s17979_s6 + $0x468] sm:$0xff] }
 0x446   :  { %4391 = vmatpush.bf16.msrb.mxu1 %v12944_v19  ;;  %v3390_v6 = vpack.c.bf16 %v3358_v57, %v3358_v57  ;;  %v3484_v60 = vsel %vm1659_vm0, %v3483_v26, %v3482_v3  ;;  %v3392_v41 = vpack.c.bf16 %v3360_v2, %v3360_v2  ;;  %v3394_v23 = vpack.c.bf16 %v3362_v50, %v3362_v50  ;;  %v15691_v19 = vld [vmem:[#allocation2 + $0x190] ss:$8 sm:$0x3] }
 0x447   :  { %v3396_v61 = vpack.c.bf16 %v3364_v59, %v3364_v59  ;;  %v3486_v13 = vsel %vm1662_vm1, %v3485_v49, %v3484_v60  ;;  %v3398_v40 = vpack.c.bf16 %v3366_v20, %v3366_v20  ;;  %v3400_v18 = vpack.c.bf16 %v3368_v46, %v3368_v46 }
 0x448   :  { %v3445_v8 = vunpack.c.l.b16 %v3386_v63  ;;  %v3488_v42 = vsel %vm1665_vm2, %v3487_v14, %v3486_v13  ;;  %v3447_v17 = vunpack.c.l.b16 %v3388_v29  ;;  %v3449_v5 = vunpack.c.l.b16 %v3390_v6  ;;  %v12932_v13 = vld [vmem:[%s17979_s6 + $0x3e8] sm:$0xff] }
 0x449   :  { %v3451_v9 = vunpack.c.l.b16 %v3392_v41  ;;  %v3490_v39 = vpack.c.b16 %v3488_v42, %v3488_v42  ;;  %v3453_v34 = vunpack.c.l.b16 %v3394_v23  ;;  %v3455_v48 = vunpack.c.l.b16 %v3396_v61  ;;  %4136 = vmatpush.bf16.msra.mxu0 %v12935_v15  ;;  %v12947_v42 = vld [vmem:[%s17979_s6 + $0x460] sm:$0xff] }
 0x44a   :  { %4392 = vmatpush.bf16.msrb.mxu1 %v12943_v51  ;;  %v3457_v44 = vunpack.c.l.b16 %v3398_v40  ;;  %v3459_v52 = vunpack.c.l.b16 %v3400_v18  ;;  %v3461_v25 = vrot.slane %v3447_v17, 7  ;;  %v3463_v37 = vrot.slane %v3449_v5, 6  ;;  %v12941_v40 = vld [vmem:[%s17979_s6 + $0x430] sm:$0xff] }
 0x44b   :  { %v3465_v55 = vrot.slane %v3451_v9, 5  ;;  %10873 = vmatmul.msk.bf16.vlgmr.msrb.gmra.mxu2 %vm1410_vm9, %v3490_v39  ;;  %v3467_v54 = vrot.slane %v3453_v34, 4  ;;  %v3469_v1 = vrot.slane %v3455_v48, 3  ;;  %v11109_v43 = vor.u32 %v12949_v4, %v11108_v21  ;;  %v12957_v17 = vld [vmem:[%s17979_s6 + $0x4b0] sm:$0xff]  ;;  %v12940_v39 = vld [vmem:[%s17979_s6 + $0x428] sm:$0xff] }
 0x44c   :  { %v3471_v16 = vrot.slane %v3457_v44, 2  ;;  %v3462_v27 = vsel %vm1647_vm12, %v3461_v25, %v3445_v8  ;;  %v3473_v47 = vrot.slane %v3459_v52, 1  ;;  %v3626_v36 = vperm.slane %v15662_v22, 0 }
 0x44d   :  { %v3628_v56 = vperm.slane %v15664_v32, 0  ;;  %v3464_v26 = vsel %vm1650_vm13, %v3463_v37, %v3462_v27  ;;  %v4389_v49 = vand.u32 %v11109_v43, %v14887_v11  ;;  %4137 = vmatpush.bf16.msra.mxu0 %v12934_v12  ;;  %v3630_v14 = vperm.slane %v15679_v35, 0  ;;  %v12956_v27 = vld [vmem:[%s17979_s6 + $0x4a8] sm:$0xff] }
 0x44e   :  { %4393 = vmatpush.bf16.msrb.mxu1 %v12942_v38  ;;  %v3632_v0 = vperm.slane %v15681_v45, 0  ;;  %v3466_v53 = vsel %vm1653_vm14, %v3465_v55, %v3464_v26  ;;  %v3634_v28 = vperm.slane %v15686_v10, 0  ;;  %v3636_v57 = vperm.slane %v15688_v62, 0 }
 0x44f   :  { %v3638_v58 = vperm.slane %v15691_v19, 0  ;;  %v3468_v31 = vsel %vm1656_vm15, %v3467_v54, %v3466_v53  ;;  %4407 = vmatpush.bf16.msrb.mxu3 %v4389_v49  ;;  %v3640_v2 = vperm.slane %v15694_v24, 0  ;;  %v3658_v50 = vpack.c.bf16 %v3626_v36, %v3626_v36 }
 0x450   :  { %v3660_v51 = vpack.c.bf16 %v3628_v56, %v3628_v56  ;;  %v3470_v59 = vsel %vm1659_vm0, %v3469_v1, %v3468_v31  ;;  %v3662_v20 = vpack.c.bf16 %v3630_v14, %v3630_v14  ;;  %v3664_v46 = vpack.c.bf16 %v3632_v0, %v3632_v0 }
 0x451   :  { %v3666_v3 = vpack.c.bf16 %v3634_v28, %v3634_v28  ;;  %v3472_v63 = vsel %vm1662_vm1, %v3471_v16, %v3470_v59  ;;  %v3668_v29 = vpack.c.bf16 %v3636_v57, %v3636_v57  ;;  %v3670_v6 = vpack.c.bf16 %v3638_v58, %v3638_v58  ;;  %4138 = vmatpush.bf16.msra.mxu0 %v12933_v30  ;;  %v15752_v58 = vld [vmem:[#allocation2 + $0x11] ss:$8 sm:$0x3]  ;;  %v12962_v59 = vld [vmem:[%s17979_s6 + $0x4d8] sm:$0x70] }
 0x452   :  { %v3672_v15 = vpack.c.bf16 %v3640_v2, %v3640_v2  ;;  %v3474_v60 = vsel %vm1665_vm2, %v3473_v47, %v3472_v63  ;;  %v3717_v41 = vunpack.c.l.b16 %v3658_v50  ;;  %v3719_v23 = vunpack.c.l.b16 %v3660_v51  ;;  %4394 = vmatpush.bf16.msrb.mxu1 %v12941_v40 }
 0x453   :  { %v3721_v61 = vunpack.c.l.b16 %v3662_v20  ;;  %v3489_v18 = vpack.c.b16 %v3474_v60, %v3474_v60  ;;  %v3723_v8 = vunpack.c.l.b16 %v3664_v46  ;;  %v3725_v38 = vunpack.c.l.b16 %v3666_v3  ;;  %4408 = vmatpush.bf16.msrb.mxu3 %v12948_v7  ;;  %v11187_v7 = vld [vmem:[%s17979_s6 + $0x4d8] sm:$0xf]  ;;  %v12945_v3 = vld [vmem:[%s17979_s6 + $0x450] sm:$0xff] }
 0x454   :  { %v3727_v33 = vunpack.c.l.b16 %v3668_v29  ;;  %v3729_v5 = vunpack.c.l.b16 %v3670_v6  ;;  %v3731_v9 = vunpack.c.l.b16 %v3672_v15  ;;  %v3733_v21 = vrot.slane %v3719_v23, 7  ;;  %v15766_v20 = vld [vmem:[#allocation2 + $0x91] ss:$8 sm:$0x3] }
 0x455   :  { %v3735_v4 = vrot.slane %v3721_v61, 6  ;;  %3583 = vmatmul.bf16.vlgmr.msrb.gmra.mxu0 %v3489_v18  ;;  %v3737_v34 = vrot.slane %v3723_v8, 5  ;;  %v3739_v48 = vrot.slane %v3725_v38, 4  ;;  %v3627_v12 = vperm.slane %v15662_v22, 1  ;;  %v12946_v22 = vld [vmem:[%s17979_s6 + $0x458] sm:$0xff] }
 0x456   :  { %v3741_v44 = vrot.slane %v3727_v33, 3  ;;  %v3734_v52 = vsel %vm1647_vm12, %v3733_v21, %v3717_v41  ;;  %v3743_v25 = vrot.slane %v3729_v5, 2  ;;  %v3745_v37 = vrot.slane %v3731_v9, 1  ;;  %4139 = vmatpush.bf16.msra.mxu0 %v12932_v13  ;;  %4395 = vmatpush.bf16.msrb.mxu1 %v12940_v39  ;;  %v15768_v46 = vld [vmem:[#allocation2 + $0xd1] ss:$8 sm:$0x3] }
 0x457   :  { %v3629_v55 = vperm.slane %v15664_v32, 1  ;;  %v3736_v54 = vsel %vm1650_vm13, %v3735_v4, %v3734_v52  ;;  %v3631_v1 = vperm.slane %v15679_v35, 1  ;;  %v3633_v16 = vperm.slane %v15681_v45, 1  ;;  %4409 = vmatpush.bf16.msrb.mxu3 %v12947_v42  ;;  %v15773_v60 = vld [vmem:[#allocation2 + $0x111] ss:$8 sm:$0x3] }
 0x458   :  { %v3635_v43 = vperm.slane %v15686_v10, 1  ;;  %v3738_v32 = vsel %vm1653_vm14, %v3737_v34, %v3736_v54  ;;  %v3637_v47 = vperm.slane %v15688_v62, 1  ;;  %v3639_v35 = vperm.slane %v15691_v19, 1  ;;  %v15754_v19 = vld [vmem:[#allocation2 + $0x51] ss:$8 sm:$0x3] }
 0x459   :  { %v3641_v45 = vperm.slane %v15694_v24, 1  ;;  %v3740_v10 = vsel %vm1656_vm15, %v3739_v48, %v3738_v32  ;;  %v3659_v36 = vpack.c.bf16 %v3627_v12, %v3627_v12  ;;  %v3661_v56 = vpack.c.bf16 %v3629_v55, %v3629_v55  ;;  %v12955_v24 = vld [vmem:[%s17979_s6 + $0x4a0] sm:$0xff]  ;;  %v15775_v41 = vld [vmem:[#allocation2 + $0x151] ss:$8 sm:$0x3] }
 0x45a   :  { %4663 = vmatpush.bf16.msrb.mxu0 %v12957_v17  ;;  %v3663_v26 = vpack.c.bf16 %v3631_v1, %v3631_v1  ;;  %v3742_v49 = vsel %vm1659_vm0, %v3741_v44, %v3740_v10  ;;  %v3665_v14 = vpack.c.bf16 %v3633_v16, %v3633_v16  ;;  %v3667_v0 = vpack.c.bf16 %v3635_v43, %v3635_v43  ;;  %v15777_v23 = vld [vmem:[#allocation2 + $0x191] ss:$8 sm:$0x3]  ;;  %v12939_v13 = vld [vmem:[%s17979_s6 + $0x420] sm:$0xff] }
 0x45b   :  { %v3669_v30 = vpack.c.bf16 %v3637_v47, %v3637_v47  ;;  %v3744_v53 = vsel %vm1662_vm1, %v3743_v25, %v3742_v49  ;;  %v3671_v28 = vpack.c.bf16 %v3639_v35, %v3639_v35  ;;  %v3673_v57 = vpack.c.bf16 %v3641_v45, %v3641_v45  ;;  %4410 = vmatpush.bf16.msrb.mxu3 %v12946_v22  ;;  %v12970_v61 = vld [vmem:[%s17979_s6 + $0x518] sm:$0xff]  ;;  %v12969_v55 = vld [vmem:[%s17979_s6 + $0x510] sm:$0xff] }
 0x45c   :  { %v3718_v62 = vunpack.c.l.b16 %v3659_v36  ;;  %v3746_v31 = vsel %vm1665_vm2, %v3745_v37, %v3744_v53  ;;  %v3720_v2 = vunpack.c.l.b16 %v3661_v56  ;;  %v3722_v50 = vunpack.c.l.b16 %v3663_v26  ;;  %v15785_v33 = vld [vmem:[#allocation2 + $0x1d1] ss:$8 sm:$0x3]  ;;  %4396 = vmatpush.bf16.msrb.mxu1 %v12939_v13 }
 0x45d   :  { %v3724_v51 = vunpack.c.l.b16 %v3665_v14  ;;  %v3761_v63 = vpack.c.b16 %v3746_v31, %v3746_v31  ;;  %v3726_v29 = vunpack.c.l.b16 %v3667_v0  ;;  %v3728_v6 = vunpack.c.l.b16 %v3669_v30  ;;  %v12954_v21 = vld [vmem:[%s17979_s6 + $0x498] sm:$0xff]  ;;  %v12961_v35 = vld [vmem:[%s17979_s6 + $0x4d0] sm:$0xff]  ;;  %v12968_v30 = vld [vmem:[%s17979_s6 + $0x508] sm:$0xff] }
 0x45e   :  { %4664 = vmatpush.bf16.msrb.mxu0 %v12956_v27  ;;  %v3730_v15 = vunpack.c.l.b16 %v3671_v28  ;;  %v3732_v40 = vunpack.c.l.b16 %v3673_v57  ;;  %v3747_v18 = vrot.slane %v3720_v2, 7  ;;  %v3749_v8 = vrot.slane %v3722_v50, 6  ;;  %v12938_v44 = vld [vmem:[%s17979_s6 + $0x418] sm:$0xff]  ;;  %v12953_v53 = vld [vmem:[%s17979_s6 + $0x490] sm:$0xff] }
 0x45f   :  { %v3751_v38 = vrot.slane %v3724_v51, 5  ;;  %3855 = vmatmul.bf16.vlgmr.msra.gmra.mxu3 %v3761_v63  ;;  %v3753_v42 = vrot.slane %v3726_v29, 4  ;;  %v3755_v17 = vrot.slane %v3728_v6, 3  ;;  %v11188_v9 = vor.u32 %v12962_v59, %v11187_v7  ;;  %v12960_v7 = vld [vmem:[%s17979_s6 + $0x4c8] sm:$0xff]  ;;  %v12937_v59 = vld [vmem:[%s17979_s6 + $0x410] sm:$0xff] }
 0x460   :  { %v3757_v5 = vrot.slane %v3730_v15, 2  ;;  %v3748_v4 = vsel %vm1647_vm12, %v3747_v18, %v3718_v62  ;;  %v3759_v39 = vrot.slane %v3732_v40, 1  ;;  %v3898_v34 = vperm.slane %v15752_v58, 0  ;;  %4411 = vmatpush.bf16.msrb.mxu3 %v12945_v3  ;;  %4397 = vmatpush.bf16.msrb.mxu1 %v12938_v44  ;;  %v12952_v3 = vld [vmem:[%s17979_s6 + $0x488] sm:$0xff] }
 0x461   :  { %v3900_v48 = vperm.slane %v15754_v19, 0  ;;  %v3750_v12 = vsel %vm1650_vm13, %v3749_v8, %v3748_v4  ;;  %v4661_v52 = vand.u32 %v11188_v9, %v14887_v11  ;;  %v3902_v25 = vperm.slane %v15766_v20, 0  ;;  %v12967_v8 = vld [vmem:[%s17979_s6 + $0x500] sm:$0xff] }
 0x462   :  { %4665 = vmatpush.bf16.msrb.mxu0 %v12955_v24  ;;  %v3904_v37 = vperm.slane %v15768_v46, 0  ;;  %v3752_v54 = vsel %vm1653_vm14, %v3751_v38, %v3750_v12  ;;  %v3906_v1 = vperm.slane %v15773_v60, 0  ;;  %v3908_v16 = vperm.slane %v15775_v41, 0 }
 0x463   :  { %v3910_v43 = vperm.slane %v15777_v23, 0  ;;  %v3754_v22 = vsel %vm1656_vm15, %v3753_v42, %v3752_v54  ;;  %4679 = vmatpush.bf16.msrb.mxu2 %v4661_v52  ;;  %v3912_v27 = vperm.slane %v15785_v33, 0  ;;  %v3930_v32 = vpack.c.bf16 %v3898_v34, %v3898_v34  ;;  %v15850_v54 = vld [vmem:[#allocation2 + $0x12] ss:$8 sm:$0x3] }
 0x464   :  { %4935 = vmatpush.bf16.msra.mxu3 %v12970_v61  ;;  %v3932_v47 = vpack.c.bf16 %v3900_v48, %v3900_v48  ;;  %v3756_v45 = vsel %vm1659_vm0, %v3755_v17, %v3754_v22  ;;  %v3934_v10 = vpack.c.bf16 %v3902_v25, %v3902_v25  ;;  %v3936_v36 = vpack.c.bf16 %v3904_v37, %v3904_v37 }
 0x465   :  { %v3938_v56 = vpack.c.bf16 %v3906_v1, %v3906_v1  ;;  %v3758_v26 = vsel %vm1662_vm1, %v3757_v5, %v3756_v45  ;;  %v3940_v49 = vpack.c.bf16 %v3908_v16, %v3908_v16  ;;  %v3942_v14 = vpack.c.bf16 %v3910_v43, %v3910_v43  ;;  %4398 = vmatpush.bf16.msrb.mxu1 %v12937_v59  ;;  %v15855_v43 = vld [vmem:[#allocation2 + $0x92] ss:$8 sm:$0x3] }
 0x466   :  { %4666 = vmatpush.bf16.msrb.mxu0 %v12954_v21  ;;  %v3944_v0 = vpack.c.bf16 %v3912_v27, %v3912_v27  ;;  %v3760_v28 = vsel %vm1665_vm2, %v3759_v39, %v3758_v26  ;;  %v3989_v57 = vunpack.c.l.b16 %v3930_v32  ;;  %v3991_v62 = vunpack.c.l.b16 %v3932_v47  ;;  %v12959_v39 = vld [vmem:[%s17979_s6 + $0x4c0] sm:$0xff]  ;;  %v15860_v45 = vld [vmem:[#allocation2 + $0x112] ss:$8 sm:$0x3] }
 0x467   :  { %v3993_v24 = vunpack.c.l.b16 %v3934_v10  ;;  %v3762_v31 = vpack.c.b16 %v3760_v28, %v3760_v28  ;;  %v3995_v2 = vunpack.c.l.b16 %v3936_v36  ;;  %v3997_v50 = vunpack.c.l.b16 %v3938_v56  ;;  %4680 = vmatpush.bf16.msrb.mxu2 %v12961_v35  ;;  %v15858_v35 = vld [vmem:[#allocation2 + $0xd2] ss:$8 sm:$0x3]  ;;  %v12951_v28 = vld [vmem:[%s17979_s6 + $0x480] sm:$0xff] }
 0x468   :  { %4936 = vmatpush.bf16.msra.mxu3 %v12969_v55  ;;  %v3999_v51 = vunpack.c.l.b16 %v3940_v49  ;;  %v4001_v63 = vunpack.c.l.b16 %v3942_v14  ;;  %v4003_v29 = vunpack.c.l.b16 %v3944_v0  ;;  %v4005_v6 = vrot.slane %v3991_v62, 7  ;;  %v15862_v10 = vld [vmem:[#allocation2 + $0x152] ss:$8 sm:$0x3] }
 0x469   :  { %v4007_v15 = vrot.slane %v3993_v24, 6  ;;  %10952 = vmatmul.msk.bf16.vlgmr.msra.gmra.mxu1 %vm1410_vm9, %v3762_v31  ;;  %v4009_v61 = vrot.slane %v3995_v2, 5  ;;  %v4011_v13 = vrot.slane %v3997_v50, 4  ;;  %v3899_v18 = vperm.slane %v15752_v58, 1  ;;  %v12958_v36 = vld [vmem:[%s17979_s6 + $0x4b8] sm:$0xff] }
 0x46a   :  { %4667 = vmatpush.bf16.msrb.mxu0 %v12953_v53  ;;  %v4013_v40 = vrot.slane %v3999_v51, 3  ;;  %v4006_v38 = vsel %vm1647_vm12, %v4005_v6, %v3989_v57  ;;  %v4015_v42 = vrot.slane %v4001_v63, 2  ;;  %v4017_v17 = vrot.slane %v4003_v29, 1  ;;  %v15867_v0 = vld [vmem:[#allocation2 + $0x192] ss:$8 sm:$0x3] }
 0x46b   :  { %v3901_v5 = vperm.slane %v15754_v19, 1  ;;  %v4008_v9 = vsel %vm1650_vm13, %v4007_v15, %v4006_v38  ;;  %v3903_v21 = vperm.slane %v15766_v20, 1  ;;  %v3905_v4 = vperm.slane %v15768_v46, 1  ;;  %4681 = vmatpush.bf16.msrb.mxu2 %v12960_v7  ;;  %v12966_v53 = vld [vmem:[%s17979_s6 + $0x4f8] sm:$0xff] }
 0x46c   :  { %4937 = vmatpush.bf16.msra.mxu3 %v12968_v30  ;;  %v3907_v58 = vperm.slane %v15773_v60, 1  ;;  %v4010_v34 = vsel %vm1653_vm14, %v4009_v61, %v4008_v9  ;;  %v3909_v48 = vperm.slane %v15775_v41, 1  ;;  %v3911_v19 = vperm.slane %v15777_v23, 1  ;;  %v12983_v30 = vld [vmem:[%s17979_s6 + $0x580] sm:$0xff] }
 0x46d   :  { %v3913_v44 = vperm.slane %v15785_v33, 1  ;;  %v4012_v20 = vsel %vm1656_vm15, %v4011_v13, %v4010_v34  ;;  %v3931_v12 = vpack.c.bf16 %v3899_v18, %v3899_v18  ;;  %v3933_v46 = vpack.c.bf16 %v3901_v5, %v3901_v5  ;;  %v15853_v33 = vld [vmem:[#allocation2 + $0x52] ss:$8 sm:$0x3] }
 0x46e   :  { %4668 = vmatpush.bf16.msrb.mxu0 %v12952_v3  ;;  %v3935_v52 = vpack.c.bf16 %v3903_v21, %v3903_v21  ;;  %v4014_v60 = vsel %vm1659_vm0, %v4013_v40, %v4012_v20  ;;  %v3937_v25 = vpack.c.bf16 %v3905_v4, %v3905_v4  ;;  %v3939_v37 = vpack.c.bf16 %v3907_v58, %v3907_v58  ;;  %v15878_v2 = vld [vmem:[#allocation2 + $0x1d2] ss:$8 sm:$0x3] }
 0x46f   :  { %v3941_v55 = vpack.c.bf16 %v3909_v48, %v3909_v48  ;;  %v4016_v1 = vsel %vm1662_vm1, %v4015_v42, %v4014_v60  ;;  %v3943_v41 = vpack.c.bf16 %v3911_v19, %v3911_v19  ;;  %v3945_v16 = vpack.c.bf16 %v3913_v44, %v3913_v44  ;;  %4682 = vmatpush.bf16.msrb.mxu2 %v12959_v39  ;;  %v12982_v18 = vld [vmem:[%s17979_s6 + $0x578] sm:$0xff] }
 0x470   :  { %4938 = vmatpush.bf16.msra.mxu3 %v12967_v8  ;;  %v3990_v23 = vunpack.c.l.b16 %v3931_v12  ;;  %v4018_v22 = vsel %vm1665_vm2, %v4017_v17, %v4016_v1  ;;  %v3992_v27 = vunpack.c.l.b16 %v3933_v46  ;;  %v3994_v32 = vunpack.c.l.b16 %v3935_v52  ;;  %v12981_v46 = vld [vmem:[%s17979_s6 + $0x570] sm:$0xff]  ;;  %v12975_v1 = vld [vmem:[%s17979_s6 + $0x540] sm:$0x70] }
 0x471   :  { %v3996_v47 = vunpack.c.l.b16 %v3937_v25  ;;  %v4033_v56 = vpack.c.b16 %v4018_v22, %v4018_v22  ;;  %v3998_v26 = vunpack.c.l.b16 %v3939_v37  ;;  %v4000_v49 = vunpack.c.l.b16 %v3941_v55  ;;  %v11266_v55 = vld [vmem:[%s17979_s6 + $0x540] sm:$0xf] }
 0x472   :  { %v4002_v14 = vunpack.c.l.b16 %v3943_v41  ;;  %v4004_v57 = vunpack.c.l.b16 %v3945_v16  ;;  %v4019_v62 = vrot.slane %v3992_v27, 7  ;;  %v4021_v24 = vrot.slane %v3994_v32, 6  ;;  %4669 = vmatpush.bf16.msrb.mxu0 %v12951_v28  ;;  %v12965_v27 = vld [vmem:[%s17979_s6 + $0x4f0] sm:$0xff]  ;;  %v12950_v32 = vld [vmem:[%s17979_s6 + $0x478] sm:$0xff] }
 0x473   :  { %v4023_v31 = vrot.slane %v3996_v47, 5  ;;  %4127 = vmatmul.bf16.vlgmr.msra.gmra.mxu2 %v4033_v56  ;;  %v4025_v50 = vrot.slane %v3998_v26, 4  ;;  %v4027_v51 = vrot.slane %v4000_v49, 3  ;;  %v4171_v59 = vperm.slane %v15850_v54, 1 }
 0x474   :  { %v4029_v7 = vrot.slane %v4002_v14, 2  ;;  %4939 = vmatpush.bf16.msra.mxu3 %v12966_v53  ;;  %v4020_v3 = vsel %vm1647_vm12, %v4019_v62, %v3990_v23  ;;  %v4031_v63 = vrot.slane %v4004_v57, 1  ;;  %v4173_v29 = vperm.slane %v15853_v33, 1  ;;  %4683 = vmatpush.bf16.msrb.mxu2 %v12958_v36 }
 0x475   :  { %v4175_v6 = vperm.slane %v15855_v43, 1  ;;  %v4022_v15 = vsel %vm1650_vm13, %v4021_v24, %v4020_v3  ;;  %v4177_v61 = vperm.slane %v15858_v35, 1  ;;  %v4179_v13 = vperm.slane %v15860_v45, 1 }
 0x476   :  { %v4181_v40 = vperm.slane %v15862_v10, 1  ;;  %v4024_v8 = vsel %vm1653_vm14, %v4023_v31, %v4022_v15  ;;  %v4183_v38 = vperm.slane %v15867_v0, 1  ;;  %v4185_v42 = vperm.slane %v15878_v2, 1  ;;  %4670 = vmatpush.bf16.msrb.mxu0 %v12950_v32  ;;  %v12980_v31 = vld [vmem:[%s17979_s6 + $0x568] sm:$0xff]  ;;  %v12978_v32 = vld [vmem:[%s17979_s6 + $0x558] sm:$0xff] }
 0x477   :  { %v4203_v17 = vpack.c.bf16 %v4171_v59, %v4171_v59  ;;  %v4026_v5 = vsel %vm1656_vm15, %v4025_v50, %v4024_v8  ;;  %v4205_v9 = vpack.c.bf16 %v4173_v29, %v4173_v29  ;;  %v4207_v21 = vpack.c.bf16 %v4175_v6, %v4175_v6  ;;  %v15935_v8 = vld [vmem:[#allocation2 + $0x13] ss:$8 sm:$0x3] }
 0x478   :  { %5207 = vmatpush.bf16.msra.mxu2 %v12983_v30  ;;  %v4209_v4 = vpack.c.bf16 %v4177_v61, %v4177_v61  ;;  %v4028_v58 = vsel %vm1659_vm0, %v4027_v51, %v4026_v5  ;;  %v4211_v39 = vpack.c.bf16 %v4179_v13, %v4179_v13  ;;  %v4213_v34 = vpack.c.bf16 %v4181_v40, %v4181_v40 }
 0x479   :  { %v4215_v48 = vpack.c.bf16 %v4183_v38, %v4183_v38  ;;  %v4030_v19 = vsel %vm1662_vm1, %v4029_v7, %v4028_v58  ;;  %v4217_v44 = vpack.c.bf16 %v4185_v42, %v4185_v42  ;;  %v4262_v20 = vunpack.c.l.b16 %v4203_v17  ;;  %4940 = vmatpush.bf16.msra.mxu3 %v12965_v27  ;;  %v15937_v38 = vld [vmem:[#allocation2 + $0x53] ss:$8 sm:$0x3] }
 0x47a   :  { %v4264_v12 = vunpack.c.l.b16 %v4205_v9  ;;  %v4032_v52 = vsel %vm1665_vm2, %v4031_v63, %v4030_v19  ;;  %v4266_v60 = vunpack.c.l.b16 %v4207_v21  ;;  %v4268_v25 = vunpack.c.l.b16 %v4209_v4  ;;  %v15939_v42 = vld [vmem:[#allocation2 + $0x93] ss:$8 sm:$0x3] }
 0x47b   :  { %v4270_v37 = vunpack.c.l.b16 %v4211_v39  ;;  %v4034_v41 = vpack.c.b16 %v4032_v52, %v4032_v52  ;;  %v4272_v16 = vunpack.c.l.b16 %v4213_v34  ;;  %v4274_v23 = vunpack.c.l.b16 %v4215_v48  ;;  %v15942_v4 = vld [vmem:[#allocation2 + $0xd3] ss:$8 sm:$0x3]  ;;  %v12964_v34 = vld [vmem:[%s17979_s6 + $0x4e8] sm:$0xff] }
 0x47c   :  { %5208 = vmatpush.bf16.msra.mxu2 %v12982_v18  ;;  %v4276_v22 = vunpack.c.l.b16 %v4217_v44  ;;  %v4291_v47 = vrot.slane %v4264_v12, 7  ;;  %v4293_v36 = vrot.slane %v4266_v60, 6  ;;  %v4295_v56 = vrot.slane %v4268_v25, 5  ;;  %v15944_v58 = vld [vmem:[#allocation2 + $0x113] ss:$8 sm:$0x3] }
 0x47d   :  { %v4297_v26 = vrot.slane %v4270_v37, 4  ;;  %11031 = vmatmul.msk.bf16.vlgmr.msra.gmra.mxu0 %vm1410_vm9, %v4034_v41  ;;  %v4299_v49 = vrot.slane %v4272_v16, 3  ;;  %v4301_v14 = vrot.slane %v4274_v23, 2  ;;  %v11267_v53 = vor.u32 %v12975_v1, %v11266_v55  ;;  %v15946_v39 = vld [vmem:[#allocation2 + $0x153] ss:$8 sm:$0x3]  ;;  %4941 = vmatpush.bf16.msra.mxu3 %v12964_v34  ;;  %v16001_v34 = vpop.f32.mrf.mxu1 }
 0x47e   :  { %v4303_v30 = vrot.slane %v4276_v22, 1  ;;  %v4292_v28 = vsel %vm1647_vm12, %v4291_v47, %v4262_v20  ;;  %v4170_v57 = vperm.slane %v15850_v54, 0  ;;  %v4172_v62 = vperm.slane %v15853_v33, 0  ;;  %v15951_v12 = vld [vmem:[#allocation2 + $0x193] ss:$8 sm:$0x3] }
 0x47f   :  { %v4174_v24 = vperm.slane %v15855_v43, 0  ;;  %v4294_v50 = vsel %vm1650_vm13, %v4293_v36, %v4292_v28  ;;  %v4933_v51 = vand.u32 %v11267_v53, %v14887_v11  ;;  %v4176_v7 = vperm.slane %v15858_v35, 0  ;;  %v12974_v35 = vld [vmem:[%s17979_s6 + $0x538] sm:$0xff]  ;;  %v12973_v52 = vld [vmem:[%s17979_s6 + $0x530] sm:$0xff]  ;;  %v12979_v60 = vld [vmem:[%s17979_s6 + $0x560] sm:$0xff] }
 0x480   :  { %5209 = vmatpush.bf16.msra.mxu2 %v12981_v46  ;;  %v4178_v59 = vperm.slane %v15860_v45, 0  ;;  %v4296_v54 = vsel %vm1653_vm14, %v4295_v56, %v4294_v50  ;;  %v4180_v33 = vperm.slane %v15862_v10, 0  ;;  %v4182_v43 = vperm.slane %v15867_v0, 0  ;;  %v15953_v46 = vld [vmem:[#allocation2 + $0x1d3] ss:$8 sm:$0x3] }
 0x481   :  { %v4184_v3 = vperm.slane %v15878_v2, 0  ;;  %v4298_v63 = vsel %vm1656_vm15, %v4297_v26, %v4296_v54  ;;  %4951 = vmatpush.bf16.msra.mxu1 %v4933_v51  ;;  %v4202_v29 = vpack.c.bf16 %v4170_v57, %v4170_v57  ;;  %v4204_v6 = vpack.c.bf16 %v4172_v62, %v4172_v62  ;;  %v12963_v41 = vld [vmem:[%s17979_s6 + $0x4e0] sm:$0xff]  ;;  %v12972_v28 = vld [vmem:[%s17979_s6 + $0x528] sm:$0xff] }
 0x482   :  { %v4206_v15 = vpack.c.bf16 %v4174_v24, %v4174_v24  ;;  %v4300_v45 = vsel %vm1659_vm0, %v4299_v49, %v4298_v63  ;;  %v4208_v61 = vpack.c.bf16 %v4176_v7, %v4176_v7  ;;  %v4210_v13 = vpack.c.bf16 %v4178_v59, %v4178_v59  ;;  %4942 = vmatpush.bf16.msra.mxu3 %v12963_v41 }
 0x483   :  { %v4212_v40 = vpack.c.bf16 %v4180_v33, %v4180_v33  ;;  %v4302_v10 = vsel %vm1662_vm1, %v4301_v14, %v4300_v45  ;;  %v4214_v0 = vpack.c.bf16 %v4182_v43, %v4182_v43  ;;  %v4216_v2 = vpack.c.bf16 %v4184_v3, %v4184_v3 }
 0x484   :  { %5210 = vmatpush.bf16.msra.mxu2 %v12980_v31  ;;  %v4261_v18 = vunpack.c.l.b16 %v4202_v29  ;;  %v4304_v17 = vsel %vm1665_vm2, %v4303_v30, %v4302_v10  ;;  %v4263_v5 = vunpack.c.l.b16 %v4204_v6  ;;  %v4265_v9 = vunpack.c.l.b16 %v4206_v15  ;;  %v12988_v10 = vld [vmem:[%s17979_s6 + $0x5a8] sm:$0x70] }
 0x485   :  { %v4267_v21 = vunpack.c.l.b16 %v4208_v61  ;;  %v4306_v48 = vpack.c.b16 %v4304_v17, %v4304_v17  ;;  %v4269_v19 = vunpack.c.l.b16 %v4210_v13  ;;  %v4271_v44 = vunpack.c.l.b16 %v4212_v40  ;;  %4952 = vmatpush.bf16.msra.mxu1 %v12974_v35  ;;  %v11345_v40 = vld [vmem:[%s17979_s6 + $0x5a8] sm:$0xf] }
 0x486   :  { %v4273_v20 = vunpack.c.l.b16 %v4214_v0  ;;  %v4275_v25 = vunpack.c.l.b16 %v4216_v2  ;;  %v4277_v37 = vrot.slane %v4263_v5, 7  ;;  %v4279_v55 = vrot.slane %v4265_v9, 6  ;;  %v12971_v0 = vld [vmem:[%s17979_s6 + $0x520] sm:$0xff]  ;;  %v12996_v9 = vld [vmem:[%s17979_s6 + $0x5e8] sm:$0xff] }
 0x487   :  { %v4281_v1 = vrot.slane %v4267_v21, 5  ;;  %11110 = vmatmul.msk.bf16.vlgmr.msrb.gmra.mxu3 %vm1410_vm9, %v4306_v48  ;;  %v4283_v16 = vrot.slane %v4269_v19, 4  ;;  %v4285_v23 = vrot.slane %v4271_v44, 3  ;;  %v4443_v27 = vperm.slane %v15935_v8, 1  ;;  %v12977_v21 = vld [vmem:[%s17979_s6 + $0x550] sm:$0xff]  ;;  %v16003_v48 = vpop.f32.mrf.mxu3 }
 0x488   :  { %v4287_v22 = vrot.slane %v4273_v20, 2  ;;  %5211 = vmatpush.bf16.msra.mxu2 %v12979_v60  ;;  %v4278_v47 = vsel %vm1647_vm12, %v4277_v37, %v4261_v18  ;;  %v4289_v36 = vrot.slane %v4275_v25, 1  ;;  %v4445_v56 = vperm.slane %v15937_v38, 1 }
 0x489   :  { %v4447_v26 = vperm.slane %v15939_v42, 1  ;;  %v4280_v49 = vsel %vm1650_vm13, %v4279_v55, %v4278_v47  ;;  %v4449_v14 = vperm.slane %v15942_v4, 1  ;;  %v4451_v30 = vperm.slane %v15944_v58, 1  ;;  %4953 = vmatpush.bf16.msra.mxu1 %v12973_v52 }
 0x48a   :  { %v4453_v53 = vperm.slane %v15946_v39, 1  ;;  %v4282_v57 = vsel %vm1653_vm14, %v4281_v1, %v4280_v49  ;;  %v4455_v62 = vperm.slane %v15951_v12, 1  ;;  %v4457_v24 = vperm.slane %v15953_v46, 1 }
 0x48b   :  { %v4475_v31 = vpack.c.bf16 %v4443_v27, %v4443_v27  ;;  %v4284_v50 = vsel %vm1656_vm15, %v4283_v16, %v4282_v57  ;;  %v4477_v51 = vpack.c.bf16 %v4445_v56, %v4445_v56  ;;  %v4479_v7 = vpack.c.bf16 %v4447_v26, %v4447_v26 }
 0x48c   :  { %v4481_v59 = vpack.c.bf16 %v4449_v14, %v4449_v14  ;;  %5212 = vmatpush.bf16.msra.mxu2 %v12978_v32  ;;  %v4286_v54 = vsel %vm1659_vm0, %v4285_v23, %v4284_v50  ;;  %v4483_v33 = vpack.c.bf16 %v4451_v30, %v4451_v30  ;;  %v4485_v43 = vpack.c.bf16 %v4453_v53, %v4453_v53  ;;  %v12994_v50 = vld [vmem:[%s17979_s6 + $0x5d8] sm:$0xff] }
 0x48d   :  { %v4487_v3 = vpack.c.bf16 %v4455_v62, %v4455_v62  ;;  %v4288_v63 = vsel %vm1662_vm1, %v4287_v22, %v4286_v54  ;;  %v4489_v29 = vpack.c.bf16 %v4457_v24, %v4457_v24  ;;  %v4534_v6 = vunpack.c.l.b16 %v4475_v31  ;;  %4954 = vmatpush.bf16.msra.mxu1 %v12972_v28  ;;  %v16026_v24 = vld [vmem:[#allocation2 + $0x14] ss:$8 sm:$0x3] }
 0x48e   :  { %v4536_v15 = vunpack.c.l.b16 %v4477_v51  ;;  %v4290_v35 = vsel %vm1665_vm2, %v4289_v36, %v4288_v63  ;;  %v4538_v45 = vunpack.c.l.b16 %v4479_v7  ;;  %v4540_v61 = vunpack.c.l.b16 %v4481_v59  ;;  %v12995_v36 = vld [vmem:[%s17979_s6 + $0x5e0] sm:$0xff]  ;;  %v16028_v31 = vld [vmem:[#allocation2 + $0x54] ss:$8 sm:$0x3]  ;;  %v12976_v51 = vld [vmem:[%s17979_s6 + $0x548] sm:$0xff]  ;;  %v1796_v7 = vpop.f32.mrf.mxu1 }
 0x48f   :  { %v4542_v13 = vunpack.c.l.b16 %v4483_v33  ;;  %v4305_v2 = vpack.c.b16 %v4290_v35, %v4290_v35  ;;  %v4544_v18 = vunpack.c.l.b16 %v4485_v43  ;;  %v4546_v17 = vunpack.c.l.b16 %v4487_v3  ;;  %v1968_v59 = vpop.f32.mrf.mxu3  ;;  %v11424_v63 = vld [vmem:[%s17979_s6 + $0x610] sm:$0xf] }
 0x490   :  { %v4548_v5 = vunpack.c.l.b16 %v4489_v29  ;;  %v4563_v19 = vrot.slane %v4536_v15, 7  ;;  %v4565_v44 = vrot.slane %v4538_v45, 6  ;;  %v4567_v20 = vrot.slane %v4540_v61, 5  ;;  %5213 = vmatpush.bf16.msra.mxu2 %v12977_v21  ;;  %v13001_v29 = vld [vmem:[%s17979_s6 + $0x610] sm:$0x70] }
 0x491   :  { %v4569_v52 = vrot.slane %v4542_v13, 4  ;;  %4399 = vmatmul.bf16.vlgmr.msrb.gmra.mxu1 %v4305_v2  ;;  %v4571_v60 = vrot.slane %v4544_v18, 3  ;;  %v4573_v25 = vrot.slane %v4546_v17, 2  ;;  %v11346_v55 = vor.u32 %v12988_v10, %v11345_v40  ;;  %v16045_v15 = vld [vmem:[#allocation2 + $0xd4] ss:$8 sm:$0x3]  ;;  %v16054_v2 = vpop.f32.mrf.mxu2 }
 0x492   :  { %v4575_v37 = vrot.slane %v4548_v5, 1  ;;  %v4564_v1 = vsel %vm1647_vm12, %v4563_v19, %v4534_v6  ;;  %v4442_v41 = vperm.slane %v15935_v8, 0  ;;  %v4444_v16 = vperm.slane %v15937_v38, 0  ;;  %4955 = vmatpush.bf16.msra.mxu1 %v12971_v0  ;;  %v16043_v6 = vld [vmem:[#allocation2 + $0x94] ss:$8 sm:$0x3]  ;;  %v16052_v0 = vpop.f32.mrf.mxu0 }
 0x493   :  { %v4446_v23 = vperm.slane %v15939_v42, 0  ;;  %v4566_v22 = vsel %vm1650_vm13, %v4565_v44, %v4564_v1  ;;  %v5205_v27 = vand.u32 %v11346_v55, %v14887_v11  ;;  %v4448_v32 = vperm.slane %v15942_v4, 0  ;;  %v12986_v40 = vld [vmem:[%s17979_s6 + $0x598] sm:$0xff] }
 0x494   :  { %v4450_v47 = vperm.slane %v15944_v58, 0  ;;  %v4568_v8 = vsel %vm1653_vm14, %v4567_v20, %v4566_v22  ;;  %v4452_v38 = vperm.slane %v15946_v39, 0  ;;  %v4454_v42 = vperm.slane %v15951_v12, 0  ;;  %v12987_v58 = vld [vmem:[%s17979_s6 + $0x5a0] sm:$0xff]  ;;  %5214 = vmatpush.bf16.msra.mxu2 %v12976_v51 }
 0x495   :  { %v4456_v56 = vperm.slane %v15953_v46, 0  ;;  %v4570_v26 = vsel %vm1656_vm15, %v4569_v52, %v4568_v8  ;;  %5223 = vmatpush.bf16.msra.mxu0 %v5205_v27  ;;  %v4474_v49 = vpack.c.bf16 %v4442_v41, %v4442_v41  ;;  %v4476_v4 = vpack.c.bf16 %v4444_v16, %v4444_v16  ;;  %v16050_v10 = vld [vmem:[#allocation2 + $0x114] ss:$8 sm:$0x3] }
 0x496   :  { %5479 = vmatpush.bf16.msrb.mxu1 %v12996_v9  ;;  %v4478_v14 = vpack.c.bf16 %v4446_v23, %v4446_v23  ;;  %v4572_v30 = vsel %vm1659_vm0, %v4571_v60, %v4570_v26  ;;  %v4480_v53 = vpack.c.bf16 %v4448_v32, %v4448_v32  ;;  %v4482_v28 = vpack.c.bf16 %v4450_v47, %v4450_v47  ;;  %v16056_v21 = vld [vmem:[#allocation2 + $0x154] ss:$8 sm:$0x3] }
 0x497   :  { %v4484_v57 = vpack.c.bf16 %v4452_v38, %v4452_v38  ;;  %v4574_v39 = vsel %vm1662_vm1, %v4573_v25, %v4572_v30  ;;  %v4486_v12 = vpack.c.bf16 %v4454_v42, %v4454_v42  ;;  %v4488_v62 = vpack.c.bf16 %v4456_v56, %v4456_v56  ;;  %v16059_v60 = vld [vmem:[#allocation2 + $0x194] ss:$8 sm:$0x3] }
 0x498   :  { %v4533_v46 = vunpack.c.l.b16 %v4474_v49  ;;  %v4576_v54 = vsel %vm1665_vm2, %v4575_v37, %v4574_v39  ;;  %v4535_v33 = vunpack.c.l.b16 %v4476_v4  ;;  %v4537_v43 = vunpack.c.l.b16 %v4478_v14  ;;  %v16062_v55 = vld [vmem:[#allocation2 + $0x1d4] ss:$8 sm:$0x3]  ;;  %v13000_v4 = vld [vmem:[%s17979_s6 + $0x608] sm:$0xff] }
 0x499   :  { %v4539_v3 = vunpack.c.l.b16 %v4480_v53  ;;  %v4578_v35 = vpack.c.b16 %v4576_v54, %v4576_v54  ;;  %v4541_v45 = vunpack.c.l.b16 %v4482_v28  ;;  %v4543_v61 = vunpack.c.l.b16 %v4484_v57  ;;  %5224 = vmatpush.bf16.msra.mxu0 %v12987_v58  ;;  %v12985_v32 = vld [vmem:[%s17979_s6 + $0x590] sm:$0xff]  ;;  %v12984_v54 = vld [vmem:[%s17979_s6 + $0x588] sm:$0xff] }
 0x49a   :  { %5480 = vmatpush.bf16.msrb.mxu1 %v12995_v36  ;;  %v4545_v13 = vunpack.c.l.b16 %v4486_v12  ;;  %v4547_v18 = vunpack.c.l.b16 %v4488_v62  ;;  %v4549_v17 = vrot.slane %v4535_v33, 7  ;;  %v4551_v5 = vrot.slane %v4537_v43, 6  ;;  %v1783_v62 = vpop.f32.mrf.mxu0 }
 0x49b   :  { %v4553_v9 = vrot.slane %v4539_v3, 5  ;;  %11189 = vmatmul.msk.bf16.vlgmr.msrb.gmra.mxu2 %vm1410_vm9, %v4578_v35  ;;  %v4555_v19 = vrot.slane %v4541_v45, 4  ;;  %v4557_v44 = vrot.slane %v4543_v61, 3  ;;  %v11425_v52 = vor.u32 %v13001_v29, %v11424_v63  ;;  %v12999_v29 = vld [vmem:[%s17979_s6 + $0x600] sm:$0xff]  ;;  %v13009_v35 = vld [vmem:[%s17979_s6 + $0x650] sm:$0xff] }
 0x49c   :  { %v4559_v20 = vrot.slane %v4545_v13, 2  ;;  %v4550_v25 = vsel %vm1647_vm12, %v4549_v17, %v4533_v46  ;;  %v4561_v37 = vrot.slane %v4547_v18, 1  ;;  %v4714_v1 = vperm.slane %v16026_v24, 0  ;;  %v1955_v46 = vpop.f32.mrf.mxu2  ;;  %v12993_v45 = vld [vmem:[%s17979_s6 + $0x5d0] sm:$0xff]  ;;  %v13007_v62 = vld [vmem:[%s17979_s6 + $0x640] sm:$0xff] }
 0x49d   :  { %v4716_v41 = vperm.slane %v16028_v31, 0  ;;  %v4552_v16 = vsel %vm1650_vm13, %v4551_v5, %v4550_v25  ;;  %v5477_v23 = vand.u32 %v11425_v52, %v14887_v11  ;;  %5225 = vmatpush.bf16.msra.mxu0 %v12986_v40  ;;  %v4718_v22 = vperm.slane %v16043_v6, 0 }
 0x49e   :  { %5481 = vmatpush.bf16.msrb.mxu1 %v12994_v50  ;;  %v4720_v27 = vperm.slane %v16045_v15, 0  ;;  %v4554_v47 = vsel %vm1653_vm14, %v4553_v9, %v4552_v16  ;;  %v4722_v36 = vperm.slane %v16050_v10, 0  ;;  %v4724_v8 = vperm.slane %v16056_v21, 0 }
 0x49f   :  { %v4726_v38 = vperm.slane %v16059_v60, 0  ;;  %v4556_v42 = vsel %vm1656_vm15, %v4555_v19, %v4554_v47  ;;  %5495 = vmatpush.bf16.msrb.mxu3 %v5477_v23  ;;  %v4728_v56 = vperm.slane %v16062_v55, 0  ;;  %v4746_v26 = vpack.c.bf16 %v4714_v1, %v4714_v1  ;;  %v12998_v23 = vld [vmem:[%s17979_s6 + $0x5f8] sm:$0xff] }
 0x4a0   :  { %v4748_v49 = vpack.c.bf16 %v4716_v41, %v4716_v41  ;;  %v4558_v14 = vsel %vm1659_vm0, %v4557_v44, %v4556_v42  ;;  %v4750_v58 = vpack.c.bf16 %v4718_v22, %v4718_v22  ;;  %v4752_v30 = vpack.c.bf16 %v4720_v27, %v4720_v27  ;;  %v12992_v44 = vld [vmem:[%s17979_s6 + $0x5c8] sm:$0xff] }
 0x4a1   :  { %v4754_v53 = vpack.c.bf16 %v4722_v36, %v4722_v36  ;;  %v4560_v28 = vsel %vm1662_vm1, %v4559_v20, %v4558_v14  ;;  %v4756_v57 = vpack.c.bf16 %v4724_v8, %v4724_v8  ;;  %v4758_v39 = vpack.c.bf16 %v4726_v38, %v4726_v38  ;;  %5226 = vmatpush.bf16.msra.mxu0 %v12985_v32  ;;  %v13008_v22 = vld [vmem:[%s17979_s6 + $0x648] sm:$0xff] }
 0x4a2   :  { %v4760_v12 = vpack.c.bf16 %v4728_v56, %v4728_v56  ;;  %v4562_v50 = vsel %vm1665_vm2, %v4561_v37, %v4560_v28  ;;  %v4805_v51 = vunpack.c.l.b16 %v4746_v26  ;;  %v4807_v7 = vunpack.c.l.b16 %v4748_v49  ;;  %5482 = vmatpush.bf16.msrb.mxu1 %v12993_v45  ;;  %v13014_v28 = vld [vmem:[%s17979_s6 + $0x678] sm:$0x70] }
 0x4a3   :  { %v4809_v59 = vunpack.c.l.b16 %v4750_v58  ;;  %v4577_v33 = vpack.c.b16 %v4562_v50, %v4562_v50  ;;  %v4811_v43 = vunpack.c.l.b16 %v4752_v30  ;;  %v4813_v3 = vunpack.c.l.b16 %v4754_v53  ;;  %5496 = vmatpush.bf16.msrb.mxu3 %v13000_v4  ;;  %v16148_v45 = vld [vmem:[#allocation2 + $0x195] ss:$8 sm:$0x3] }
 0x4a4   :  { %v4815_v63 = vunpack.c.l.b16 %v4756_v57  ;;  %v4817_v61 = vunpack.c.l.b16 %v4758_v39  ;;  %v4819_v13 = vunpack.c.l.b16 %v4760_v12  ;;  %v4821_v40 = vrot.slane %v4807_v7, 7  ;;  %v16129_v57 = vld [vmem:[#allocation2 + $0x55] ss:$8 sm:$0x3] }
 0x4a5   :  { %v4823_v18 = vrot.slane %v4809_v59, 6  ;;  %4671 = vmatmul.bf16.vlgmr.msrb.gmra.mxu0 %v4577_v33  ;;  %v4825_v17 = vrot.slane %v4811_v43, 5  ;;  %v4827_v5 = vrot.slane %v4813_v3, 4  ;;  %v4715_v19 = vperm.slane %v16026_v24, 1  ;;  %v12997_v12 = vld [vmem:[%s17979_s6 + $0x5f0] sm:$0xff]  ;;  %v13022_v33 = vld [vmem:[%s17979_s6 + $0x6b8] sm:$0xff] }
 0x4a6   :  { %v4829_v9 = vrot.slane %v4815_v63, 3  ;;  %v4822_v20 = vsel %vm1647_vm12, %v4821_v40, %v4805_v51  ;;  %v4831_v52 = vrot.slane %v4817_v61, 2  ;;  %v4833_v25 = vrot.slane %v4819_v13, 1  ;;  %5227 = vmatpush.bf16.msra.mxu0 %v12984_v54  ;;  %5483 = vmatpush.bf16.msrb.mxu1 %v12992_v44  ;;  %v16131_v39 = vld [vmem:[#allocation2 + $0x95] ss:$8 sm:$0x3]  ;;  %v16153_v13 = vpop.f32.mrf.mxu1  ;;  %v16155_v40 = vpop.f32.mrf.mxu3 }
 0x4a7   :  { %v4717_v37 = vperm.slane %v16028_v31, 1  ;;  %v4824_v1 = vsel %vm1650_vm13, %v4823_v18, %v4822_v20  ;;  %v4719_v41 = vperm.slane %v16043_v6, 1  ;;  %v4721_v16 = vperm.slane %v16045_v15, 1  ;;  %5497 = vmatpush.bf16.msrb.mxu3 %v12999_v29  ;;  %v16139_v59 = vld [vmem:[#allocation2 + $0xd5] ss:$8 sm:$0x3] }
 0x4a8   :  { %v4723_v24 = vperm.slane %v16050_v10, 1  ;;  %v4826_v31 = vsel %vm1653_vm14, %v4825_v17, %v4824_v1  ;;  %v4725_v27 = vperm.slane %v16056_v21, 1  ;;  %v4727_v6 = vperm.slane %v16059_v60, 1  ;;  %v11503_v60 = vld [vmem:[%s17979_s6 + $0x678] sm:$0xf]  ;;  %v12991_v61 = vld [vmem:[%s17979_s6 + $0x5c0] sm:$0xff] }
 0x4a9   :  { %v4729_v15 = vperm.slane %v16062_v55, 1  ;;  %v4828_v10 = vsel %vm1656_vm15, %v4827_v5, %v4826_v31  ;;  %v4747_v32 = vpack.c.bf16 %v4715_v19, %v4715_v19  ;;  %v4749_v47 = vpack.c.bf16 %v4717_v37, %v4717_v37  ;;  %v16123_v55 = vld [vmem:[#allocation2 + $0x15] ss:$8 sm:$0x3] }
 0x4aa   :  { %5751 = vmatpush.bf16.msrb.mxu0 %v13009_v35  ;;  %v4751_v36 = vpack.c.bf16 %v4719_v41, %v4719_v41  ;;  %v4830_v8 = vsel %vm1659_vm0, %v4829_v9, %v4828_v10  ;;  %v4753_v38 = vpack.c.bf16 %v4721_v16, %v4721_v16  ;;  %v4755_v42 = vpack.c.bf16 %v4723_v24, %v4723_v24  ;;  %v16141_v54 = vld [vmem:[#allocation2 + $0x115] ss:$8 sm:$0x3] }
 0x4ab   :  { %v4757_v56 = vpack.c.bf16 %v4725_v27, %v4725_v27  ;;  %v4832_v26 = vsel %vm1662_vm1, %v4831_v52, %v4830_v8  ;;  %v4759_v49 = vpack.c.bf16 %v4727_v6, %v4727_v6  ;;  %v4761_v4 = vpack.c.bf16 %v4729_v15, %v4729_v15  ;;  %5498 = vmatpush.bf16.msrb.mxu3 %v12998_v23  ;;  %v16146_v35 = vld [vmem:[#allocation2 + $0x155] ss:$8 sm:$0x3] }
 0x4ac   :  { %v4806_v21 = vunpack.c.l.b16 %v4747_v32  ;;  %v4834_v14 = vsel %vm1665_vm2, %v4833_v25, %v4832_v26  ;;  %v4808_v58 = vunpack.c.l.b16 %v4749_v47  ;;  %v4810_v30 = vunpack.c.l.b16 %v4751_v36  ;;  %v13006_v19 = vld [vmem:[%s17979_s6 + $0x638] sm:$0xff]  ;;  %5484 = vmatpush.bf16.msrb.mxu1 %v12991_v61  ;;  %v13013_v47 = vld [vmem:[%s17979_s6 + $0x670] sm:$0xff]  ;;  %v13004_v61 = vld [vmem:[%s17979_s6 + $0x628] sm:$0xff] }
 0x4ad   :  { %v4812_v53 = vunpack.c.l.b16 %v4753_v38  ;;  %v4849_v46 = vpack.c.b16 %v4834_v14, %v4834_v14  ;;  %v4814_v50 = vunpack.c.l.b16 %v4755_v42  ;;  %v4816_v51 = vunpack.c.l.b16 %v4757_v56  ;;  %v16163_v25 = vld [vmem:[#allocation2 + $0x1d5] ss:$8 sm:$0x3] }
 0x4ae   :  { %5752 = vmatpush.bf16.msrb.mxu0 %v13008_v22  ;;  %v4818_v7 = vunpack.c.l.b16 %v4759_v49  ;;  %v4820_v43 = vunpack.c.l.b16 %v4761_v4  ;;  %v4835_v3 = vrot.slane %v4808_v58, 7  ;;  %v4837_v63 = vrot.slane %v4810_v30, 6  ;;  %v12990_v1 = vld [vmem:[%s17979_s6 + $0x5b8] sm:$0xff]  ;;  %v13020_v58 = vld [vmem:[%s17979_s6 + $0x6a8] sm:$0xff]  ;;  %v2226_v30 = vpop.f32.mrf.mxu1 }
 0x4af   :  { %v4839_v29 = vrot.slane %v4812_v53, 5  ;;  %4943 = vmatmul.bf16.vlgmr.msra.gmra.mxu3 %v4849_v46  ;;  %v4841_v18 = vrot.slane %v4814_v50, 4  ;;  %v4843_v17 = vrot.slane %v4816_v51, 3  ;;  %v11504_v9 = vor.u32 %v13014_v28, %v11503_v60  ;;  %v2239_v53 = vpop.f32.mrf.mxu3  ;;  %v13012_v50 = vld [vmem:[%s17979_s6 + $0x668] sm:$0xff] }
 0x4b0   :  { %v4845_v5 = vrot.slane %v4818_v7, 2  ;;  %v4836_v44 = vsel %vm1647_vm12, %v4835_v3, %v4806_v21  ;;  %v4847_v20 = vrot.slane %v4820_v43, 1  ;;  %v1795_v52 = vadd.f32 %v16001_v34, %v16052_v0  ;;  %5499 = vmatpush.bf16.msrb.mxu3 %v12997_v12  ;;  %v13021_v34 = vld [vmem:[%s17979_s6 + $0x6b0] sm:$0xff]  ;;  %5485 = vmatpush.bf16.msrb.mxu1 %v12990_v1  ;;  %v16202_v3 = vpop.f32.mrf.mxu0  ;;  %v13035_v53 = vld [vmem:[%s17979_s6 + $0x720] sm:$0xff] }
 0x4b1   :  { %v4986_v37 = vperm.slane %v16123_v55, 0  ;;  %v4838_v41 = vsel %vm1650_vm13, %v4837_v63, %v4836_v44  ;;  %v5749_v16 = vand.u32 %v11504_v9, %v14887_v11  ;;  %v4988_v24 = vperm.slane %v16129_v57, 0  ;;  %v16204_v63 = vpop.f32.mrf.mxu2  ;;  %v16245_v30 = vld [vmem:[#allocation2 + $0x116] ss:$8 sm:$0x3] }
 0x4b2   :  { %5753 = vmatpush.bf16.msrb.mxu0 %v13007_v62  ;;  %v4990_v23 = vperm.slane %v16131_v39, 0  ;;  %v4840_v0 = vsel %vm1653_vm14, %v4839_v29, %v4838_v41  ;;  %v1954_v22 = vadd.f32 %v16054_v2, %v1795_v52  ;;  %v4992_v31 = vperm.slane %v16139_v59, 0  ;;  %v12989_v29 = vld [vmem:[%s17979_s6 + $0x5b0] sm:$0xff] }
 0x4b3   :  { %v4994_v27 = vperm.slane %v16141_v54, 0  ;;  %v4842_v6 = vsel %vm1656_vm15, %v4841_v18, %v4840_v0  ;;  %5767 = vmatpush.bf16.msrb.mxu2 %v5749_v16  ;;  %v4996_v15 = vperm.slane %v16146_v35, 0  ;;  %v4998_v10 = vperm.slane %v16148_v45, 0 }
 0x4b4   :  { %6023 = vmatpush.bf16.msra.mxu3 %v13022_v33  ;;  %v5000_v32 = vperm.slane %v16163_v25, 0  ;;  %v4844_v2 = vsel %vm1659_vm0, %v4843_v17, %v4842_v6  ;;  %v16189_v36 = vadd.f32 %v16003_v48, %v1954_v22  ;;  %v5018_v8 = vpack.c.bf16 %v4986_v37, %v4986_v37  ;;  %v13005_v48 = vld [vmem:[%s17979_s6 + $0x630] sm:$0xff]  ;;  %5486 = vmatpush.bf16.msrb.mxu1 %v12989_v29 }
 0x4b5   :  { %v5020_v38 = vpack.c.bf16 %v4988_v24, %v4988_v24  ;;  %v4846_v42 = vsel %vm1662_vm1, %v4845_v5, %v4844_v2  ;;  %v5022_v56 = vpack.c.bf16 %v4990_v23, %v4990_v23  ;;  %v5024_v26 = vpack.c.bf16 %v4992_v31, %v4992_v31 }
 0x4b6   :  { %5754 = vmatpush.bf16.msrb.mxu0 %v13006_v19  ;;  %v5026_v49 = vpack.c.bf16 %v4994_v27, %v4994_v27  ;;  %v4848_v4 = vsel %vm1665_vm2, %v4847_v20, %v4846_v42  ;;  %v5028_v21 = vpack.c.bf16 %v4996_v15, %v4996_v15  ;;  %v5030_v60 = vpack.c.bf16 %v4998_v10, %v4998_v10  ;;  %v13019_v19 = vld [vmem:[%s17979_s6 + $0x6a0] sm:$0xff]  ;;  %v16236_v42 = vld [vmem:[#allocation2 + $0x16] ss:$8 sm:$0x3] }
 0x4b7   :  { %v5032_v14 = vpack.c.bf16 %v5000_v32, %v5000_v32  ;;  %v4850_v28 = vpack.c.b16 %v4848_v4, %v4848_v4  ;;  %v5077_v12 = vunpack.c.l.b16 %v5018_v8  ;;  %v5079_v62 = vunpack.c.l.b16 %v5020_v38  ;;  %5768 = vmatpush.bf16.msrb.mxu2 %v13013_v47 }
 0x4b8   :  { %6024 = vmatpush.bf16.msra.mxu3 %v13021_v34  ;;  %v5081_v46 = vunpack.c.l.b16 %v5022_v56  ;;  %v5083_v51 = vunpack.c.l.b16 %v5024_v26  ;;  %v5085_v7 = vunpack.c.l.b16 %v5026_v49  ;;  %v5087_v33 = vunpack.c.l.b16 %v5028_v21  ;;  %v16238_v56 = vld [vmem:[#allocation2 + $0x56] ss:$8 sm:$0x3]  ;;  %v2498_v49 = vpop.f32.mrf.mxu0 }
 0x4b9   :  { %v5089_v43 = vunpack.c.l.b16 %v5030_v60  ;;  %11268 = vmatmul.msk.bf16.vlgmr.msra.gmra.mxu1 %vm1410_vm9, %v4850_v28  ;;  %v5091_v18 = vunpack.c.l.b16 %v5032_v14  ;;  %v5093_v17 = vrot.slane %v5079_v62, 7  ;;  %v4987_v9 = vperm.slane %v16123_v55, 1  ;;  %v13011_v55 = vld [vmem:[%s17979_s6 + $0x660] sm:$0xff]  ;;  %v16240_v26 = vld [vmem:[#allocation2 + $0x96] ss:$8 sm:$0x3]  ;;  %v2511_v4 = vpop.f32.mrf.mxu2 }
 0x4ba   :  { %5755 = vmatpush.bf16.msrb.mxu0 %v13005_v48  ;;  %v5095_v5 = vrot.slane %v5081_v46, 6  ;;  %v5097_v44 = vrot.slane %v5083_v51, 5  ;;  %v5099_v20 = vrot.slane %v5085_v7, 4  ;;  %v5101_v52 = vrot.slane %v5087_v33, 3 }
 0x4bb   :  { %v5103_v37 = vrot.slane %v5089_v43, 2  ;;  %v5094_v1 = vsel %vm1647_vm12, %v5093_v17, %v5077_v12  ;;  %v5105_v41 = vrot.slane %v5091_v18, 1  ;;  %v4989_v16 = vperm.slane %v16129_v57, 1  ;;  %5769 = vmatpush.bf16.msrb.mxu2 %v13012_v50  ;;  %v16243_v48 = vld [vmem:[#allocation2 + $0xd6] ss:$8 sm:$0x3] }
 0x4bc   :  { %6025 = vmatpush.bf16.msra.mxu3 %v13020_v58  ;;  %v4991_v24 = vperm.slane %v16131_v39, 1  ;;  %v5096_v23 = vsel %vm1650_vm13, %v5095_v5, %v5094_v1  ;;  %v4993_v34 = vperm.slane %v16139_v59, 1  ;;  %v4995_v0 = vperm.slane %v16141_v54, 1  ;;  %v16250_v50 = vld [vmem:[#allocation2 + $0x156] ss:$8 sm:$0x3] }
 0x4bd   :  { %v4997_v22 = vperm.slane %v16146_v35, 1  ;;  %v5098_v31 = vsel %vm1653_vm14, %v5097_v44, %v5096_v23  ;;  %v4999_v57 = vperm.slane %v16148_v45, 1  ;;  %v5001_v39 = vperm.slane %v16163_v25, 1  ;;  %v13010_v35 = vld [vmem:[%s17979_s6 + $0x658] sm:$0xff]  ;;  %v13003_v44 = vld [vmem:[%s17979_s6 + $0x620] sm:$0xff] }
 0x4be   :  { %5756 = vmatpush.bf16.msrb.mxu0 %v13004_v61  ;;  %v5019_v27 = vpack.c.bf16 %v4987_v9, %v4987_v9  ;;  %v5100_v6 = vsel %vm1656_vm15, %v5099_v20, %v5098_v31  ;;  %v5021_v15 = vpack.c.bf16 %v4989_v16, %v4989_v16  ;;  %v5023_v10 = vpack.c.bf16 %v4991_v24, %v4991_v24  ;;  %v16252_v51 = vld [vmem:[#allocation2 + $0x196] ss:$8 sm:$0x3] }
 0x4bf   :  { %v5025_v32 = vpack.c.bf16 %v4993_v34, %v4993_v34  ;;  %v5102_v59 = vsel %vm1659_vm0, %v5101_v52, %v5100_v6  ;;  %v5027_v47 = vpack.c.bf16 %v4995_v0, %v4995_v0  ;;  %v5029_v54 = vpack.c.bf16 %v4997_v22, %v4997_v22  ;;  %5770 = vmatpush.bf16.msrb.mxu2 %v13011_v55  ;;  %v16254_v7 = vld [vmem:[#allocation2 + $0x1d6] ss:$8 sm:$0x3] }
 0x4c0   :  { %6026 = vmatpush.bf16.msra.mxu3 %v13019_v19  ;;  %v5031_v2 = vpack.c.bf16 %v4999_v57, %v4999_v57  ;;  %v5104_v45 = vsel %vm1662_vm1, %v5103_v37, %v5102_v59  ;;  %v5033_v25 = vpack.c.bf16 %v5001_v39, %v5001_v39  ;;  %v5078_v8 = vunpack.c.l.b16 %v5019_v27  ;;  %v13018_v18 = vld [vmem:[%s17979_s6 + $0x698] sm:$0xff] }
 0x4c1   :  { %v5080_v38 = vunpack.c.l.b16 %v5021_v15  ;;  %v5106_v21 = vsel %vm1665_vm2, %v5105_v41, %v5104_v45  ;;  %v5082_v60 = vunpack.c.l.b16 %v5023_v10  ;;  %v5084_v14 = vunpack.c.l.b16 %v5025_v32  ;;  %v13034_v41 = vld [vmem:[%s17979_s6 + $0x718] sm:$0xff] }
 0x4c2   :  { %v5086_v58 = vunpack.c.l.b16 %v5027_v47  ;;  %v5121_v28 = vpack.c.b16 %v5106_v21, %v5106_v21  ;;  %v5088_v12 = vunpack.c.l.b16 %v5029_v54  ;;  %v5090_v62 = vunpack.c.l.b16 %v5031_v2  ;;  %5757 = vmatpush.bf16.msrb.mxu0 %v13003_v44  ;;  %v13033_v54 = vld [vmem:[%s17979_s6 + $0x710] sm:$0xff] }
 0x4c3   :  { %v5092_v46 = vunpack.c.l.b16 %v5033_v25  ;;  %v5107_v33 = vrot.slane %v5080_v38, 7  ;;  %v5109_v43 = vrot.slane %v5082_v60, 6  ;;  %v5111_v29 = vrot.slane %v5084_v14, 5  ;;  %5771 = vmatpush.bf16.msrb.mxu2 %v13010_v35  ;;  %v13027_v60 = vld [vmem:[%s17979_s6 + $0x6e0] sm:$0x70]  ;;  %v13017_v14 = vld [vmem:[%s17979_s6 + $0x690] sm:$0xff] }
 0x4c4   :  { %v5113_v61 = vrot.slane %v5086_v58, 4  ;;  %5215 = vmatmul.bf16.vlgmr.msra.gmra.mxu2 %v5121_v28  ;;  %v5115_v17 = vrot.slane %v5088_v12, 3  ;;  %v5117_v5 = vrot.slane %v5090_v62, 2  ;;  %v2238_v19 = vadd.f32 %v16155_v40, %v16153_v13  ;;  %6027 = vmatpush.bf16.msra.mxu3 %v13018_v18  ;;  %v13002_v58 = vld [vmem:[%s17979_s6 + $0x618] sm:$0xff]  ;;  %v16300_v28 = vpop.f32.mrf.mxu1 }
 0x4c5   :  { %v5119_v9 = vrot.slane %v5092_v46, 1  ;;  %v5108_v20 = vsel %vm1647_vm12, %v5107_v33, %v5078_v8  ;;  %v5259_v52 = vperm.slane %v16236_v42, 1  ;;  %v5261_v37 = vperm.slane %v16238_v56, 1  ;;  %v11582_v8 = vld [vmem:[%s17979_s6 + $0x6e0] sm:$0xf] }
 0x4c6   :  { %v5263_v1 = vperm.slane %v16240_v26, 1  ;;  %v5110_v13 = vsel %vm1650_vm13, %v5109_v43, %v5108_v20  ;;  %v2241_v40 = vadd.f32 %v2238_v19, %v16189_v36  ;;  %v5265_v16 = vperm.slane %v16243_v48, 1  ;;  %v13032_v43 = vld [vmem:[%s17979_s6 + $0x708] sm:$0xff]  ;;  %5758 = vmatpush.bf16.msrb.mxu0 %v13002_v58 }
 0x4c7   :  { %6295 = vmatpush.bf16.msra.mxu2 %v13035_v53  ;;  %v5267_v24 = vperm.slane %v16245_v30, 1  ;;  %v5112_v55 = vsel %vm1653_vm14, %v5111_v29, %v5110_v13  ;;  %v5269_v23 = vperm.slane %v16250_v50, 1  ;;  %v5271_v34 = vperm.slane %v16252_v51, 1  ;;  %v16298_v53 = vpop.f32.mrf.mxu3 }
 0x4c8   :  { %v5273_v0 = vperm.slane %v16254_v7, 1  ;;  %v5114_v22 = vsel %vm1656_vm15, %v5113_v61, %v5112_v55  ;;  %v5291_v31 = vpack.c.bf16 %v5259_v52, %v5259_v52  ;;  %v5293_v57 = vpack.c.bf16 %v5261_v37, %v5261_v37  ;;  %6028 = vmatpush.bf16.msra.mxu3 %v13017_v14 }
 0x4c9   :  { %v5295_v39 = vpack.c.bf16 %v5263_v1, %v5263_v1  ;;  %v5116_v36 = vsel %vm1659_vm0, %v5115_v17, %v5114_v22  ;;  %v5297_v27 = vpack.c.bf16 %v5265_v16, %v5265_v16  ;;  %v5299_v6 = vpack.c.bf16 %v5267_v24, %v5267_v24 }
 0x4ca   :  { %v5301_v15 = vpack.c.bf16 %v5269_v23, %v5269_v23  ;;  %v5118_v10 = vsel %vm1662_vm1, %v5117_v5, %v5116_v36  ;;  %v5303_v32 = vpack.c.bf16 %v5271_v34, %v5271_v34  ;;  %v5305_v59 = vpack.c.bf16 %v5273_v0, %v5273_v0  ;;  %v16329_v36 = vld [vmem:[#allocation2 + $0x17] ss:$8 sm:$0x3] }
 0x4cb   :  { %6296 = vmatpush.bf16.msra.mxu2 %v13034_v41  ;;  %v5350_v47 = vunpack.c.l.b16 %v5291_v31  ;;  %v5120_v2 = vsel %vm1665_vm2, %v5119_v9, %v5118_v10  ;;  %v5352_v35 = vunpack.c.l.b16 %v5293_v57  ;;  %v5354_v45 = vunpack.c.l.b16 %v5295_v39 }
 0x4cc   :  { %v5356_v25 = vunpack.c.l.b16 %v5297_v27  ;;  %v5122_v38 = vpack.c.b16 %v5120_v2, %v5120_v2  ;;  %v5358_v49 = vunpack.c.l.b16 %v5299_v6  ;;  %v5360_v4 = vunpack.c.l.b16 %v5301_v15  ;;  %v2783_v31 = vpop.f32.mrf.mxu1  ;;  %v16331_v27 = vld [vmem:[#allocation2 + $0x57] ss:$8 sm:$0x3] }
 0x4cd   :  { %v5362_v21 = vunpack.c.l.b16 %v5303_v32  ;;  %v5364_v12 = vunpack.c.l.b16 %v5305_v59  ;;  %v5379_v62 = vrot.slane %v5352_v35, 7  ;;  %v5381_v46 = vrot.slane %v5354_v45, 6  ;;  %v16333_v6 = vld [vmem:[#allocation2 + $0x97] ss:$8 sm:$0x3]  ;;  %v13016_v45 = vld [vmem:[%s17979_s6 + $0x688] sm:$0xff] }
 0x4ce   :  { %v5383_v33 = vrot.slane %v5356_v25, 5  ;;  %11347 = vmatmul.msk.bf16.vlgmr.msra.gmra.mxu0 %vm1410_vm9, %v5122_v38  ;;  %v5385_v29 = vrot.slane %v5358_v49, 4  ;;  %v5387_v61 = vrot.slane %v5360_v4, 3  ;;  %v2510_v17 = vadd.f32 %v16204_v63, %v16202_v3  ;;  %v16335_v15 = vld [vmem:[#allocation2 + $0xd7] ss:$8 sm:$0x3]  ;;  %6029 = vmatpush.bf16.msra.mxu3 %v13016_v45 }
 0x4cf   :  { %6297 = vmatpush.bf16.msra.mxu2 %v13033_v54  ;;  %v5389_v18 = vrot.slane %v5362_v21, 2  ;;  %v5380_v5 = vsel %vm1647_vm12, %v5379_v62, %v5350_v47  ;;  %v5391_v9 = vrot.slane %v5364_v12, 1  ;;  %v11583_v19 = vor.u32 %v13027_v60, %v11582_v8  ;;  %v16337_v54 = vld [vmem:[#allocation2 + $0x117] ss:$8 sm:$0x3]  ;;  %v13031_v60 = vld [vmem:[%s17979_s6 + $0x700] sm:$0xff] }
 0x4d0   :  { %v5258_v44 = vperm.slane %v16236_v42, 0  ;;  %v5382_v20 = vsel %vm1650_vm13, %v5381_v46, %v5380_v5  ;;  %v16311_v52 = vadd.f32 %v2510_v17, %v2241_v40  ;;  %v5260_v37 = vperm.slane %v16238_v56, 0  ;;  %v16339_v2 = vld [vmem:[#allocation2 + $0x157] ss:$8 sm:$0x3] }
 0x4d1   :  { %v5262_v1 = vperm.slane %v16240_v26, 0  ;;  %v5384_v41 = vsel %vm1653_vm14, %v5383_v33, %v5382_v20  ;;  %v6021_v3 = vand.u32 %v11583_v19, %v14887_v11  ;;  %v5264_v63 = vperm.slane %v16243_v48, 0  ;;  %v13026_v48 = vld [vmem:[%s17979_s6 + $0x6d8] sm:$0xff]  ;;  %v13025_v21 = vld [vmem:[%s17979_s6 + $0x6d0] sm:$0xff] }
 0x4d2   :  { %v5266_v13 = vperm.slane %v16245_v30, 0  ;;  %v5386_v42 = vsel %vm1656_vm15, %v5385_v29, %v5384_v41  ;;  %v5268_v16 = vperm.slane %v16250_v50, 0  ;;  %v5270_v40 = vperm.slane %v16252_v51, 0  ;;  %v2770_v50 = vpop.f32.mrf.mxu3  ;;  %v16341_v35 = vld [vmem:[#allocation2 + $0x197] ss:$8 sm:$0x3] }
 0x4d3   :  { %6298 = vmatpush.bf16.msra.mxu2 %v13032_v43  ;;  %v5272_v24 = vperm.slane %v16254_v7, 0  ;;  %v5388_v56 = vsel %vm1659_vm0, %v5387_v61, %v5386_v42  ;;  %6039 = vmatpush.bf16.msra.mxu1 %v6021_v3  ;;  %v5290_v26 = vpack.c.bf16 %v5258_v44, %v5258_v44  ;;  %v5292_v55 = vpack.c.bf16 %v5260_v37, %v5260_v37  ;;  %v16346_v4 = vld [vmem:[#allocation2 + $0x1d7] ss:$8 sm:$0x3]  ;;  %v13015_v61 = vld [vmem:[%s17979_s6 + $0x680] sm:$0xff]  ;;  %v13024_v41 = vld [vmem:[%s17979_s6 + $0x6c8] sm:$0xff] }
 0x4d4   :  { %v5294_v23 = vpack.c.bf16 %v5262_v1, %v5262_v1  ;;  %v5390_v30 = vsel %vm1662_vm1, %v5389_v18, %v5388_v56  ;;  %v5296_v34 = vpack.c.bf16 %v5264_v63, %v5264_v63  ;;  %v5298_v0 = vpack.c.bf16 %v5266_v13, %v5266_v13  ;;  %v13030_v19 = vld [vmem:[%s17979_s6 + $0x6f8] sm:$0xff]  ;;  %6030 = vmatpush.bf16.msra.mxu3 %v13015_v61 }
 0x4d5   :  { %v5300_v22 = vpack.c.bf16 %v5268_v16, %v5268_v16  ;;  %v5392_v51 = vsel %vm1665_vm2, %v5391_v9, %v5390_v30  ;;  %v5302_v7 = vpack.c.bf16 %v5270_v40, %v5270_v40  ;;  %v5304_v57 = vpack.c.bf16 %v5272_v24, %v5272_v24 }
 0x4d6   :  { %v5349_v39 = vunpack.c.l.b16 %v5290_v26  ;;  %v5394_v10 = vpack.c.b16 %v5392_v51, %v5392_v51  ;;  %v5351_v32 = vunpack.c.l.b16 %v5292_v55  ;;  %v5353_v59 = vunpack.c.l.b16 %v5294_v23 }
 0x4d7   :  { %v5355_v47 = vunpack.c.l.b16 %v5296_v34  ;;  %v5357_v25 = vunpack.c.l.b16 %v5298_v0  ;;  %v5359_v8 = vunpack.c.l.b16 %v5300_v22  ;;  %v5361_v38 = vunpack.c.l.b16 %v5302_v7  ;;  %6040 = vmatpush.bf16.msra.mxu1 %v13026_v48  ;;  %6299 = vmatpush.bf16.msra.mxu2 %v13031_v60 }
 0x4d8   :  { %v5363_v49 = vunpack.c.l.b16 %v5304_v57  ;;  %11426 = vmatmul.msk.bf16.vlgmr.msrb.gmra.mxu3 %vm1410_vm9, %v5394_v10  ;;  %v5365_v14 = vrot.slane %v5351_v32, 7  ;;  %v5367_v58 = vrot.slane %v5353_v59, 6  ;;  %v5531_v62 = vperm.slane %v16329_v36, 1  ;;  %v11661_v57 = vld [vmem:[%s17979_s6 + $0x748] sm:$0xf]  ;;  %v13023_v10 = vld [vmem:[%s17979_s6 + $0x6c0] sm:$0xff] }
 0x4d9   :  { %v5369_v12 = vrot.slane %v5355_v47, 5  ;;  %v5371_v46 = vrot.slane %v5357_v25, 4  ;;  %v5373_v33 = vrot.slane %v5359_v8, 3  ;;  %v5375_v43 = vrot.slane %v5361_v38, 2  ;;  %v13048_v25 = vld [vmem:[%s17979_s6 + $0x788] sm:$0xff]  ;;  %v16391_v8 = vpop.f32.mrf.mxu2  ;;  %v16393_v38 = vpop.f32.mrf.mxu0 }
 0x4da   :  { %v5377_v29 = vrot.slane %v5363_v49, 1  ;;  %v5366_v18 = vsel %vm1647_vm12, %v5365_v14, %v5349_v39  ;;  %v5533_v17 = vperm.slane %v16331_v27, 1  ;;  %v5535_v5 = vperm.slane %v16333_v6, 1  ;;  %v13040_v39 = vld [vmem:[%s17979_s6 + $0x748] sm:$0x70]  ;;  %v13029_v49 = vld [vmem:[%s17979_s6 + $0x6f0] sm:$0xff] }
 0x4db   :  { %v5537_v9 = vperm.slane %v16335_v15, 1  ;;  %v5368_v44 = vsel %vm1650_vm13, %v5367_v58, %v5366_v18  ;;  %v5539_v20 = vperm.slane %v16337_v54, 1  ;;  %v5541_v37 = vperm.slane %v16339_v2, 1  ;;  %6041 = vmatpush.bf16.msra.mxu1 %v13025_v21  ;;  %6300 = vmatpush.bf16.msra.mxu2 %v13030_v19 }
 0x4dc   :  { %v5543_v1 = vperm.slane %v16341_v35, 1  ;;  %v5370_v3 = vsel %vm1653_vm14, %v5369_v12, %v5368_v44  ;;  %v5545_v63 = vperm.slane %v16346_v4, 1  ;;  %v5563_v13 = vpack.c.bf16 %v5531_v62, %v5531_v62  ;;  %v13047_v44 = vld [vmem:[%s17979_s6 + $0x780] sm:$0xff] }
 0x4dd   :  { %v5565_v42 = vpack.c.bf16 %v5533_v17, %v5533_v17  ;;  %v5372_v16 = vsel %vm1656_vm15, %v5371_v46, %v5370_v3  ;;  %v5567_v40 = vpack.c.bf16 %v5535_v5, %v5535_v5  ;;  %v5569_v24 = vpack.c.bf16 %v5537_v9, %v5537_v9 }
 0x4de   :  { %v5571_v56 = vpack.c.bf16 %v5539_v20, %v5539_v20  ;;  %v5374_v26 = vsel %vm1659_vm0, %v5373_v33, %v5372_v16  ;;  %v5573_v55 = vpack.c.bf16 %v5541_v37, %v5541_v37  ;;  %v5575_v23 = vpack.c.bf16 %v5543_v1, %v5543_v1  ;;  %v13039_v1 = vld [vmem:[%s17979_s6 + $0x740] sm:$0xff] }
 0x4df   :  { %v5577_v48 = vpack.c.bf16 %v5545_v63, %v5545_v63  ;;  %v5376_v30 = vsel %vm1662_vm1, %v5375_v43, %v5374_v26  ;;  %v5622_v34 = vunpack.c.l.b16 %v5563_v13  ;;  %v5624_v0 = vunpack.c.l.b16 %v5565_v42  ;;  %6042 = vmatpush.bf16.msra.mxu1 %v13024_v41  ;;  %6301 = vmatpush.bf16.msra.mxu2 %v13029_v49 }
 0x4e0   :  { %v5626_v22 = vunpack.c.l.b16 %v5567_v40  ;;  %v5378_v50 = vsel %vm1665_vm2, %v5377_v29, %v5376_v30  ;;  %v5628_v31 = vunpack.c.l.b16 %v5569_v24  ;;  %v5630_v51 = vunpack.c.l.b16 %v5571_v56  ;;  %v16435_v30 = vld [vmem:[#allocation2 + $0xa0] ss:$8 sm:$0x3] }
 0x4e1   :  { %v5632_v7 = vunpack.c.l.b16 %v5573_v55  ;;  %v5393_v32 = vpack.c.b16 %v5378_v50, %v5378_v50  ;;  %v5634_v59 = vunpack.c.l.b16 %v5575_v23  ;;  %v5636_v47 = vunpack.c.l.b16 %v5577_v48  ;;  %v3042_v16 = vpop.f32.mrf.mxu2  ;;  %v3055_v40 = vpop.f32.mrf.mxu0  ;;  %v16431_v23 = vld [vmem:[#allocation2 + $0x20] ss:$8 sm:$0x3] }
 0x4e2   :  { %v5651_v45 = vrot.slane %v5624_v0, 7  ;;  %v5653_v21 = vrot.slane %v5626_v22, 6  ;;  %v5655_v60 = vrot.slane %v5628_v31, 5  ;;  %v5657_v14 = vrot.slane %v5630_v51, 4  ;;  %v13028_v0 = vld [vmem:[%s17979_s6 + $0x6e8] sm:$0xff] }
 0x4e3   :  { %v5659_v58 = vrot.slane %v5632_v7, 3  ;;  %5487 = vmatmul.bf16.vlgmr.msrb.gmra.mxu1 %v5393_v32  ;;  %v5661_v62 = vrot.slane %v5634_v59, 2  ;;  %v5663_v46 = vrot.slane %v5636_v47, 1  ;;  %v11662_v33 = vor.u32 %v13040_v39, %v11661_v57  ;;  %v16433_v48 = vld [vmem:[#allocation2 + $0x60] ss:$8 sm:$0x3]  ;;  %6302 = vmatpush.bf16.msra.mxu2 %v13028_v0 }
 0x4e4   :  { %v5652_v12 = vsel %vm1647_vm12, %v5651_v45, %v5622_v34  ;;  %v2782_v29 = vadd.f32 %v16300_v28, %v16298_v53  ;;  %v5530_v61 = vperm.slane %v16329_v36, 0  ;;  %v5532_v18 = vperm.slane %v16331_v27, 0  ;;  %6043 = vmatpush.bf16.msra.mxu1 %v13023_v10  ;;  %v13046_v34 = vld [vmem:[%s17979_s6 + $0x778] sm:$0xff]  ;;  %v16446_v57 = vld [vmem:[#allocation2 + $0xe0] ss:$8 sm:$0x3] }
 0x4e5   :  { %v5654_v43 = vsel %vm1650_vm13, %v5653_v21, %v5652_v12  ;;  %v6293_v5 = vand.u32 %v11662_v33, %v14887_v11  ;;  %v5534_v9 = vperm.slane %v16333_v6, 0  ;;  %v5536_v19 = vperm.slane %v16335_v15, 0  ;;  %v13038_v7 = vld [vmem:[%s17979_s6 + $0x738] sm:$0xff]  ;;  %v16448_v39 = vld [vmem:[#allocation2 + $0x120] ss:$8 sm:$0x3] }
 0x4e6   :  { %v5656_v17 = vsel %vm1653_vm14, %v5655_v60, %v5654_v43  ;;  %v16413_v28 = vadd.f32 %v2782_v29, %v16311_v52  ;;  %v5538_v36 = vperm.slane %v16337_v54, 0  ;;  %v5540_v27 = vperm.slane %v16339_v2, 0  ;;  %v16450_v10 = vld [vmem:[#allocation2 + $0x160] ss:$8 sm:$0x3] }
 0x4e7   :  { %v5658_v53 = vsel %vm1656_vm15, %v5657_v14, %v5656_v17  ;;  %6311 = vmatpush.bf16.msra.mxu0 %v6293_v5  ;;  %v5542_v6 = vperm.slane %v16341_v35, 0  ;;  %v5544_v15 = vperm.slane %v16346_v4, 0  ;;  %v5562_v37 = vpack.c.bf16 %v5530_v61, %v5530_v61  ;;  %v11740_v35 = vld [vmem:[%s17979_s6 + $0x7b0] sm:$0xf]  ;;  %v13053_v4 = vld [vmem:[%s17979_s6 + $0x7b0] sm:$0x70] }
 0x4e8   :  { %6567 = vmatpush.bf16.msrb.mxu1 %v13048_v25  ;;  %v5660_v20 = vsel %vm1659_vm0, %v5659_v58, %v5658_v53  ;;  %v5564_v52 = vpack.c.bf16 %v5532_v18, %v5532_v18  ;;  %v5566_v3 = vpack.c.bf16 %v5534_v9, %v5534_v9  ;;  %v5568_v63 = vpack.c.bf16 %v5536_v19, %v5536_v19  ;;  %v16453_v25 = vld [vmem:[#allocation2 + $0x1a0] ss:$8 sm:$0x3]  ;;  %v13037_v17 = vld [vmem:[%s17979_s6 + $0x730] sm:$0xff] }
 0x4e9   :  { %v5662_v41 = vsel %vm1662_vm1, %v5661_v62, %v5660_v20  ;;  %v5570_v2 = vpack.c.bf16 %v5538_v36, %v5538_v36  ;;  %v5572_v13 = vpack.c.bf16 %v5540_v27, %v5540_v27  ;;  %v5574_v42 = vpack.c.bf16 %v5542_v6, %v5542_v6  ;;  %v16457_v33 = vld [vmem:[#allocation2 + $0x1e0] ss:$8 sm:$0x3] }
 0x4ea   :  { %v5664_v54 = vsel %vm1665_vm2, %v5663_v46, %v5662_v41  ;;  %v5576_v56 = vpack.c.bf16 %v5544_v15, %v5544_v15  ;;  %v5621_v26 = vunpack.c.l.b16 %v5562_v37  ;;  %v5623_v55 = vunpack.c.l.b16 %v5564_v52  ;;  %v13052_v53 = vld [vmem:[%s17979_s6 + $0x7a8] sm:$0xff] }
 0x4eb   :  { %v5666_v24 = vpack.c.b16 %v5664_v54, %v5664_v54  ;;  %v5625_v22 = vunpack.c.l.b16 %v5566_v3  ;;  %v5627_v50 = vunpack.c.l.b16 %v5568_v63  ;;  %v5629_v31 = vunpack.c.l.b16 %v5570_v2  ;;  %6312 = vmatpush.bf16.msra.mxu0 %v13039_v1  ;;  %v13036_v16 = vld [vmem:[%s17979_s6 + $0x728] sm:$0xff] }
 0x4ec   :  { %6568 = vmatpush.bf16.msrb.mxu1 %v13047_v44  ;;  %v5631_v51 = vunpack.c.l.b16 %v5572_v13  ;;  %v5633_v32 = vunpack.c.l.b16 %v5574_v42  ;;  %v5635_v59 = vunpack.c.l.b16 %v5576_v56  ;;  %v5637_v47 = vrot.slane %v5623_v55, 7  ;;  %v13061_v55 = vld [vmem:[%s17979_s6 + $0x7f0] sm:$0xff] }
 0x4ed   :  { %11505 = vmatmul.msk.bf16.vlgmr.msrb.gmra.mxu2 %vm1410_vm9, %v5666_v24  ;;  %v11741_v45 = vor.u32 %v13053_v4, %v11740_v35  ;;  %v5639_v49 = vrot.slane %v5625_v22, 6  ;;  %v5641_v21 = vrot.slane %v5627_v50, 5  ;;  %v5643_v60 = vrot.slane %v5629_v31, 4  ;;  %v13051_v4 = vld [vmem:[%s17979_s6 + $0x7a0] sm:$0xff] }
 0x4ee   :  { %v5645_v14 = vrot.slane %v5631_v51, 3  ;;  %v5638_v58 = vsel %vm1647_vm12, %v5637_v47, %v5621_v26  ;;  %v5647_v12 = vrot.slane %v5633_v32, 2  ;;  %v5649_v62 = vrot.slane %v5635_v59, 1  ;;  %v16491_v51 = vpop.f32.mrf.mxu1 }
 0x4ef   :  { %v6565_v46 = vand.u32 %v11741_v45, %v14887_v11  ;;  %v5640_v43 = vsel %vm1650_vm13, %v5639_v49, %v5638_v58  ;;  %6313 = vmatpush.bf16.msra.mxu0 %v13038_v7  ;;  %v5802_v29 = vperm.slane %v16431_v23, 0  ;;  %v5804_v61 = vperm.slane %v16433_v48, 0  ;;  %v16493_v7 = vpop.f32.mrf.mxu3  ;;  %v13044_v49 = vld [vmem:[%s17979_s6 + $0x768] sm:$0xff] }
 0x4f0   :  { %6569 = vmatpush.bf16.msrb.mxu1 %v13046_v34  ;;  %v5806_v18 = vperm.slane %v16435_v30, 0  ;;  %v5642_v5 = vsel %vm1653_vm14, %v5641_v21, %v5640_v43  ;;  %v5808_v9 = vperm.slane %v16446_v57, 0  ;;  %v5810_v19 = vperm.slane %v16448_v39, 0  ;;  %v13045_v34 = vld [vmem:[%s17979_s6 + $0x770] sm:$0xff]  ;;  %v13060_v43 = vld [vmem:[%s17979_s6 + $0x7e8] sm:$0xff] }
 0x4f1   :  { %6583 = vmatpush.bf16.msrb.mxu3 %v6565_v46  ;;  %v5812_v44 = vperm.slane %v16450_v10, 0  ;;  %v5644_v36 = vsel %vm1656_vm15, %v5643_v60, %v5642_v5  ;;  %v5814_v27 = vperm.slane %v16453_v25, 0  ;;  %v5816_v20 = vperm.slane %v16457_v33, 0 }
 0x4f2   :  { %v5834_v6 = vpack.c.bf16 %v5802_v29, %v5802_v29  ;;  %v5646_v15 = vsel %vm1659_vm0, %v5645_v14, %v5644_v36  ;;  %v5836_v37 = vpack.c.bf16 %v5804_v61, %v5804_v61  ;;  %v5838_v1 = vpack.c.bf16 %v5806_v18, %v5806_v18 }
 0x4f3   :  { %v5840_v41 = vpack.c.bf16 %v5808_v9, %v5808_v9  ;;  %v5648_v52 = vsel %vm1662_vm1, %v5647_v12, %v5646_v15  ;;  %v5842_v3 = vpack.c.bf16 %v5810_v19, %v5810_v19  ;;  %v5844_v63 = vpack.c.bf16 %v5812_v44, %v5812_v44  ;;  %6314 = vmatpush.bf16.msra.mxu0 %v13037_v17  ;;  %v13050_v12 = vld [vmem:[%s17979_s6 + $0x798] sm:$0xff] }
 0x4f4   :  { %v5846_v54 = vpack.c.bf16 %v5814_v27, %v5814_v27  ;;  %v5650_v2 = vsel %vm1665_vm2, %v5649_v62, %v5648_v52  ;;  %v5848_v13 = vpack.c.bf16 %v5816_v20, %v5816_v20  ;;  %v5893_v42 = vunpack.c.l.b16 %v5834_v6  ;;  %6570 = vmatpush.bf16.msrb.mxu1 %v13045_v34  ;;  %v13066_v15 = vld [vmem:[%s17979_s6 + $0x818] sm:$0x70]  ;;  %v13059_v52 = vld [vmem:[%s17979_s6 + $0x7e0] sm:$0xff] }
 0x4f5   :  { %v5895_v35 = vunpack.c.l.b16 %v5836_v37  ;;  %6584 = vmatpush.bf16.msrb.mxu3 %v13052_v53  ;;  %v5665_v40 = vpack.c.b16 %v5650_v2, %v5650_v2  ;;  %v5897_v24 = vunpack.c.l.b16 %v5838_v1  ;;  %v5899_v56 = vunpack.c.l.b16 %v5840_v41  ;;  %v16533_v37 = vld [vmem:[#allocation2 + $0x21] ss:$8 sm:$0x3]  ;;  %v13074_v41 = vld [vmem:[%s17979_s6 + $0x858] sm:$0xff] }
 0x4f6   :  { %v5901_v26 = vunpack.c.l.b16 %v5842_v3  ;;  %v5903_v0 = vunpack.c.l.b16 %v5844_v63  ;;  %v5905_v22 = vunpack.c.l.b16 %v5846_v54  ;;  %v5907_v50 = vunpack.c.l.b16 %v5848_v13  ;;  %v16535_v1 = vld [vmem:[#allocation2 + $0x61] ss:$8 sm:$0x3]  ;;  %v3314_v3 = vpop.f32.mrf.mxu1 }
 0x4f7   :  { %v5909_v31 = vrot.slane %v5895_v35, 7  ;;  %5759 = vmatmul.bf16.vlgmr.msrb.gmra.mxu0 %v5665_v40  ;;  %v5911_v32 = vrot.slane %v5897_v24, 6  ;;  %v5913_v59 = vrot.slane %v5899_v56, 5  ;;  %v3054_v45 = vadd.f32 %v16393_v38, %v16391_v8  ;;  %v3327_v63 = vpop.f32.mrf.mxu3  ;;  %v16543_v35 = vld [vmem:[#allocation2 + $0xa1] ss:$8 sm:$0x3] }
 0x4f8   :  { %v5915_v47 = vrot.slane %v5901_v26, 4  ;;  %v5917_v60 = vrot.slane %v5903_v0, 3  ;;  %v5919_v14 = vrot.slane %v5905_v22, 2  ;;  %v5921_v58 = vrot.slane %v5907_v50, 1  ;;  %6315 = vmatpush.bf16.msra.mxu0 %v13036_v16  ;;  %6571 = vmatpush.bf16.msrb.mxu1 %v13044_v49  ;;  %v13043_v22 = vld [vmem:[%s17979_s6 + $0x760] sm:$0xff]  ;;  %v13064_v63 = vld [vmem:[%s17979_s6 + $0x808] sm:$0xff] }
 0x4f9   :  { %v5910_v21 = vsel %vm1647_vm12, %v5909_v31, %v5893_v42  ;;  %6585 = vmatpush.bf16.msrb.mxu3 %v13051_v4  ;;  %v16506_v8 = vadd.f32 %v3054_v45, %v16413_v28  ;;  %v5803_v38 = vperm.slane %v16431_v23, 1  ;;  %v5805_v46 = vperm.slane %v16433_v48, 1  ;;  %v16545_v4 = vld [vmem:[#allocation2 + $0xe1] ss:$8 sm:$0x3] }
 0x4fa   :  { %v5912_v62 = vsel %vm1650_vm13, %v5911_v32, %v5910_v21  ;;  %v5807_v61 = vperm.slane %v16435_v30, 1  ;;  %v5809_v18 = vperm.slane %v16446_v57, 1  ;;  %v5811_v17 = vperm.slane %v16448_v39, 1  ;;  %v13049_v30 = vld [vmem:[%s17979_s6 + $0x790] sm:$0xff] }
 0x4fb   :  { %v5914_v29 = vsel %vm1653_vm14, %v5913_v59, %v5912_v62  ;;  %v5813_v5 = vperm.slane %v16450_v10, 1  ;;  %v5815_v23 = vperm.slane %v16453_v25, 1  ;;  %v5817_v48 = vperm.slane %v16457_v33, 1  ;;  %v11819_v25 = vld [vmem:[%s17979_s6 + $0x818] sm:$0xf] }
 0x4fc   :  { %6839 = vmatpush.bf16.msrb.mxu0 %v13061_v55  ;;  %v5916_v28 = vsel %vm1656_vm15, %v5915_v47, %v5914_v29  ;;  %v5835_v19 = vpack.c.bf16 %v5803_v38, %v5803_v38  ;;  %v5837_v44 = vpack.c.bf16 %v5805_v46, %v5805_v46  ;;  %v5839_v53 = vpack.c.bf16 %v5807_v61, %v5807_v61  ;;  %v16547_v16 = vld [vmem:[#allocation2 + $0x121] ss:$8 sm:$0x3]  ;;  %v13058_v47 = vld [vmem:[%s17979_s6 + $0x7d8] sm:$0xff] }
 0x4fd   :  { %v5918_v9 = vsel %vm1659_vm0, %v5917_v60, %v5916_v28  ;;  %6586 = vmatpush.bf16.msrb.mxu3 %v13050_v12  ;;  %v5841_v39 = vpack.c.bf16 %v5809_v18, %v5809_v18  ;;  %v5843_v36 = vpack.c.bf16 %v5811_v17, %v5811_v17  ;;  %v5845_v10 = vpack.c.bf16 %v5813_v5, %v5813_v5  ;;  %v16549_v55 = vld [vmem:[#allocation2 + $0x161] ss:$8 sm:$0x3]  ;;  %v13042_v46 = vld [vmem:[%s17979_s6 + $0x758] sm:$0xff] }
 0x4fe   :  { %v5920_v57 = vsel %vm1662_vm1, %v5919_v14, %v5918_v9  ;;  %v5847_v27 = vpack.c.bf16 %v5815_v23, %v5815_v23  ;;  %v5849_v20 = vpack.c.bf16 %v5817_v48, %v5817_v48  ;;  %v5894_v6 = vunpack.c.l.b16 %v5835_v19  ;;  %v16551_v34 = vld [vmem:[#allocation2 + $0x1a1] ss:$8 sm:$0x3]  ;;  %6572 = vmatpush.bf16.msrb.mxu1 %v13043_v22  ;;  %v13073_v14 = vld [vmem:[%s17979_s6 + $0x850] sm:$0xff] }
 0x4ff   :  { %v5922_v33 = vsel %vm1665_vm2, %v5921_v58, %v5920_v57  ;;  %v5896_v2 = vunpack.c.l.b16 %v5837_v44  ;;  %v5898_v13 = vunpack.c.l.b16 %v5839_v53  ;;  %v5900_v42 = vunpack.c.l.b16 %v5841_v39  ;;  %v16553_v0 = vld [vmem:[#allocation2 + $0x1e1] ss:$8 sm:$0x3]  ;;  %v13065_v48 = vld [vmem:[%s17979_s6 + $0x810] sm:$0xff] }
 0x500   :  { %6840 = vmatpush.bf16.msrb.mxu0 %v13060_v43  ;;  %v5937_v54 = vpack.c.b16 %v5922_v33, %v5922_v33  ;;  %v5902_v40 = vunpack.c.l.b16 %v5843_v36  ;;  %v5904_v24 = vunpack.c.l.b16 %v5845_v10  ;;  %v5906_v56 = vunpack.c.l.b16 %v5847_v27  ;;  %v13056_v22 = vld [vmem:[%s17979_s6 + $0x7c8] sm:$0xff] }
 0x501   :  { %v5908_v26 = vunpack.c.l.b16 %v5849_v20  ;;  %6587 = vmatpush.bf16.msrb.mxu3 %v13049_v30  ;;  %v5923_v50 = vrot.slane %v5896_v2, 7  ;;  %v5925_v31 = vrot.slane %v5898_v13, 6  ;;  %v5927_v32 = vrot.slane %v5900_v42, 5  ;;  %v13072_v20 = vld [vmem:[%s17979_s6 + $0x848] sm:$0xff] }
 0x502   :  { %6031 = vmatmul.bf16.vlgmr.msra.gmra.mxu3 %v5937_v54  ;;  %v11820_v59 = vor.u32 %v13066_v15, %v11819_v25  ;;  %v5929_v45 = vrot.slane %v5902_v40, 4  ;;  %v5931_v49 = vrot.slane %v5904_v24, 3  ;;  %v5933_v21 = vrot.slane %v5906_v56, 2  ;;  %6573 = vmatpush.bf16.msrb.mxu1 %v13042_v46  ;;  %v16595_v40 = vpop.f32.mrf.mxu0  ;;  %v16597_v24 = vpop.f32.mrf.mxu2  ;;  %v13041_v56 = vld [vmem:[%s17979_s6 + $0x750] sm:$0xff] }
 0x503   :  { %v5935_v60 = vrot.slane %v5908_v26, 1  ;;  %v5924_v58 = vsel %vm1647_vm12, %v5923_v50, %v5894_v6  ;;  %v6074_v62 = vperm.slane %v16533_v37, 0  ;;  %v6076_v38 = vperm.slane %v16535_v1, 0  ;;  %v13057_v6 = vld [vmem:[%s17979_s6 + $0x7d0] sm:$0xff]  ;;  %v13071_v26 = vld [vmem:[%s17979_s6 + $0x840] sm:$0xff] }
 0x504   :  { %6841 = vmatpush.bf16.msrb.mxu0 %v13059_v52  ;;  %v6837_v12 = vand.u32 %v11820_v59, %v14887_v11  ;;  %v5926_v43 = vsel %vm1650_vm13, %v5925_v31, %v5924_v58  ;;  %v6078_v29 = vperm.slane %v16543_v35, 0  ;;  %v6080_v61 = vperm.slane %v16545_v4, 0 }
 0x505   :  { %7111 = vmatpush.bf16.msra.mxu3 %v13074_v41  ;;  %v6082_v18 = vperm.slane %v16547_v16, 0  ;;  %v5928_v17 = vsel %vm1653_vm14, %v5927_v32, %v5926_v43  ;;  %v6084_v28 = vperm.slane %v16549_v55, 0  ;;  %v6086_v5 = vperm.slane %v16551_v34, 0 }
 0x506   :  { %6855 = vmatpush.bf16.msrb.mxu2 %v6837_v12  ;;  %v6088_v23 = vperm.slane %v16553_v0, 0  ;;  %v5930_v9 = vsel %vm1656_vm15, %v5929_v45, %v5928_v17  ;;  %v6106_v19 = vpack.c.bf16 %v6074_v62, %v6074_v62  ;;  %v6108_v44 = vpack.c.bf16 %v6076_v38, %v6076_v38  ;;  %v13063_v62 = vld [vmem:[%s17979_s6 + $0x800] sm:$0xff]  ;;  %6574 = vmatpush.bf16.msrb.mxu1 %v13041_v56 }
 0x507   :  { %v6110_v53 = vpack.c.bf16 %v6078_v29, %v6078_v29  ;;  %v5932_v30 = vsel %vm1659_vm0, %v5931_v49, %v5930_v9  ;;  %v6112_v57 = vpack.c.bf16 %v6080_v61, %v6080_v61  ;;  %v6114_v39 = vpack.c.bf16 %v6082_v18, %v6082_v18  ;;  %v16634_v9 = vld [vmem:[#allocation2 + $0x22] ss:$8 sm:$0x3] }
 0x508   :  { %6842 = vmatpush.bf16.msrb.mxu0 %v13058_v47  ;;  %v6116_v36 = vpack.c.bf16 %v6084_v28, %v6084_v28  ;;  %v5934_v10 = vsel %vm1662_vm1, %v5933_v21, %v5932_v30  ;;  %v6118_v25 = vpack.c.bf16 %v6086_v5, %v6086_v5  ;;  %v6120_v33 = vpack.c.bf16 %v6088_v23, %v6088_v23  ;;  %v13055_v56 = vld [vmem:[%s17979_s6 + $0x7c0] sm:$0xff] }
 0x509   :  { %7112 = vmatpush.bf16.msra.mxu3 %v13073_v14  ;;  %v6165_v27 = vunpack.c.l.b16 %v6106_v19  ;;  %v5936_v15 = vsel %vm1665_vm2, %v5935_v60, %v5934_v10  ;;  %v6167_v41 = vunpack.c.l.b16 %v6108_v44  ;;  %v6169_v52 = vunpack.c.l.b16 %v6110_v53  ;;  %v16641_v10 = vld [vmem:[#allocation2 + $0xe2] ss:$8 sm:$0x3] }
 0x50a   :  { %v6171_v3 = vunpack.c.l.b16 %v6112_v57  ;;  %6856 = vmatpush.bf16.msrb.mxu2 %v13065_v48  ;;  %v5938_v54 = vpack.c.b16 %v5936_v15, %v5936_v15  ;;  %v6173_v2 = vunpack.c.l.b16 %v6114_v39  ;;  %v6175_v13 = vunpack.c.l.b16 %v6116_v36  ;;  %v3586_v19 = vpop.f32.mrf.mxu0  ;;  %v3599_v44 = vpop.f32.mrf.mxu2  ;;  %v16639_v36 = vld [vmem:[#allocation2 + $0xa2] ss:$8 sm:$0x3] }
 0x50b   :  { %v6177_v42 = vunpack.c.l.b16 %v6118_v25  ;;  %v6179_v50 = vunpack.c.l.b16 %v6120_v33  ;;  %v6181_v31 = vrot.slane %v6167_v41, 7  ;;  %v6183_v32 = vrot.slane %v6169_v52, 6  ;;  %v16643_v25 = vld [vmem:[#allocation2 + $0x122] ss:$8 sm:$0x3] }
 0x50c   :  { %6843 = vmatpush.bf16.msrb.mxu0 %v13057_v6  ;;  %v6185_v59 = vrot.slane %v6171_v3, 5  ;;  %11584 = vmatmul.msk.bf16.vlgmr.msra.gmra.mxu1 %vm1410_vm9, %v5938_v54  ;;  %v6187_v47 = vrot.slane %v6173_v2, 4  ;;  %v6189_v45 = vrot.slane %v6175_v13, 3  ;;  %v3326_v21 = vadd.f32 %v16493_v7, %v16491_v51  ;;  %v13087_v33 = vld [vmem:[%s17979_s6 + $0x8c0] sm:$0xff] }
 0x50d   :  { %7113 = vmatpush.bf16.msra.mxu3 %v13072_v20  ;;  %v6191_v49 = vrot.slane %v6177_v42, 2  ;;  %v6182_v60 = vsel %vm1647_vm12, %v6181_v31, %v6165_v27  ;;  %v6193_v14 = vrot.slane %v6179_v50, 1  ;;  %v6075_v58 = vperm.slane %v16533_v37, 1  ;;  %v16648_v41 = vld [vmem:[#allocation2 + $0x162] ss:$8 sm:$0x3] }
 0x50e   :  { %v6077_v12 = vperm.slane %v16535_v1, 1  ;;  %6857 = vmatpush.bf16.msrb.mxu2 %v13064_v63  ;;  %v6184_v38 = vsel %vm1650_vm13, %v6183_v32, %v6182_v60  ;;  %v16619_v46 = vadd.f32 %v3326_v21, %v16506_v8  ;;  %v6079_v51 = vperm.slane %v16543_v35, 1  ;;  %v16650_v52 = vld [vmem:[#allocation2 + $0x1a2] ss:$8 sm:$0x3]  ;;  %v13070_v42 = vld [vmem:[%s17979_s6 + $0x838] sm:$0xff] }
 0x50f   :  { %v6081_v7 = vperm.slane %v16545_v4, 1  ;;  %v6186_v37 = vsel %vm1653_vm14, %v6185_v59, %v6184_v38  ;;  %v6083_v1 = vperm.slane %v16547_v16, 1  ;;  %v6085_v43 = vperm.slane %v16549_v55, 1  ;;  %v13062_v16 = vld [vmem:[%s17979_s6 + $0x7f8] sm:$0xff] }
 0x510   :  { %6844 = vmatpush.bf16.msrb.mxu0 %v13056_v22  ;;  %v6087_v29 = vperm.slane %v16551_v34, 1  ;;  %v6188_v61 = vsel %vm1656_vm15, %v6187_v47, %v6186_v37  ;;  %v6089_v18 = vperm.slane %v16553_v0, 1  ;;  %v6107_v8 = vpack.c.bf16 %v6075_v58, %v6075_v58  ;;  %v16636_v0 = vld [vmem:[#allocation2 + $0x62] ss:$8 sm:$0x3] }
 0x511   :  { %7114 = vmatpush.bf16.msra.mxu3 %v13071_v26  ;;  %v6109_v17 = vpack.c.bf16 %v6077_v12, %v6077_v12  ;;  %v6190_v35 = vsel %vm1659_vm0, %v6189_v45, %v6188_v61  ;;  %v6111_v28 = vpack.c.bf16 %v6079_v51, %v6079_v51  ;;  %v6113_v4 = vpack.c.bf16 %v6081_v7, %v6081_v7  ;;  %v16652_v3 = vld [vmem:[#allocation2 + $0x1e2] ss:$8 sm:$0x3] }
 0x512   :  { %v6115_v5 = vpack.c.bf16 %v6083_v1, %v6083_v1  ;;  %6858 = vmatpush.bf16.msrb.mxu2 %v13063_v62  ;;  %v6192_v55 = vsel %vm1662_vm1, %v6191_v49, %v6190_v35  ;;  %v6117_v23 = vpack.c.bf16 %v6085_v43, %v6085_v43  ;;  %v6119_v34 = vpack.c.bf16 %v6087_v29, %v6087_v29  ;;  %v13086_v49 = vld [vmem:[%s17979_s6 + $0x8b8] sm:$0xff] }
 0x513   :  { %v6121_v48 = vpack.c.bf16 %v6089_v18, %v6089_v18  ;;  %v6194_v53 = vsel %vm1665_vm2, %v6193_v14, %v6192_v55  ;;  %v6166_v30 = vunpack.c.l.b16 %v6107_v8  ;;  %v6168_v57 = vunpack.c.l.b16 %v6109_v17 }
 0x514   :  { %v6170_v39 = vunpack.c.l.b16 %v6111_v28  ;;  %v6209_v27 = vpack.c.b16 %v6194_v53, %v6194_v53  ;;  %v6172_v20 = vunpack.c.l.b16 %v6113_v4  ;;  %v6174_v6 = vunpack.c.l.b16 %v6115_v5  ;;  %6845 = vmatpush.bf16.msrb.mxu0 %v13055_v56  ;;  %v13085_v5 = vld [vmem:[%s17979_s6 + $0x8b0] sm:$0xff] }
 0x515   :  { %v6176_v15 = vunpack.c.l.b16 %v6117_v23  ;;  %v6178_v63 = vunpack.c.l.b16 %v6119_v34  ;;  %v6180_v54 = vunpack.c.l.b16 %v6121_v48  ;;  %v6195_v2 = vrot.slane %v6168_v57, 7  ;;  %7115 = vmatpush.bf16.msra.mxu3 %v13070_v42  ;;  %v11898_v48 = vld [vmem:[%s17979_s6 + $0x880] sm:$0xf]  ;;  %v13079_v57 = vld [vmem:[%s17979_s6 + $0x880] sm:$0x70] }
 0x516   :  { %v6197_v13 = vrot.slane %v6170_v39, 6  ;;  %6859 = vmatpush.bf16.msrb.mxu2 %v13062_v16  ;;  %v6199_v26 = vrot.slane %v6172_v20, 5  ;;  %v6201_v22 = vrot.slane %v6174_v6, 4  ;;  %v6347_v31 = vperm.slane %v16634_v9, 1  ;;  %v13069_v39 = vld [vmem:[%s17979_s6 + $0x830] sm:$0xff]  ;;  %v16695_v20 = vpop.f32.mrf.mxu1 }
 0x517   :  { %6303 = vmatmul.bf16.vlgmr.msra.gmra.mxu2 %v6209_v27  ;;  %v6203_v50 = vrot.slane %v6176_v15, 3  ;;  %v6196_v32 = vsel %vm1647_vm12, %v6195_v2, %v6166_v30  ;;  %v6205_v59 = vrot.slane %v6178_v63, 2  ;;  %v6207_v47 = vrot.slane %v6180_v54, 1  ;;  %v16693_v27 = vpop.f32.mrf.mxu3  ;;  %v13084_v2 = vld [vmem:[%s17979_s6 + $0x8a8] sm:$0xff] }
 0x518   :  { %v6349_v45 = vperm.slane %v16636_v0, 1  ;;  %v6198_v21 = vsel %vm1650_vm13, %v6197_v13, %v6196_v32  ;;  %v6351_v60 = vperm.slane %v16639_v36, 1  ;;  %v6353_v14 = vperm.slane %v16641_v10, 1 }
 0x519   :  { %v6355_v58 = vperm.slane %v16643_v25, 1  ;;  %v6200_v12 = vsel %vm1653_vm14, %v6199_v26, %v6198_v21  ;;  %v6357_v62 = vperm.slane %v16648_v41, 1  ;;  %v6359_v38 = vperm.slane %v16650_v52, 1  ;;  %7116 = vmatpush.bf16.msra.mxu3 %v13069_v39 }
 0x51a   :  { %7383 = vmatpush.bf16.msra.mxu2 %v13087_v33  ;;  %v6361_v51 = vperm.slane %v16652_v3, 1  ;;  %v6202_v7 = vsel %vm1656_vm15, %v6201_v22, %v6200_v12  ;;  %v6379_v37 = vpack.c.bf16 %v6347_v31, %v6347_v31  ;;  %v6381_v1 = vpack.c.bf16 %v6349_v45, %v6349_v45  ;;  %v13054_v33 = vld [vmem:[%s17979_s6 + $0x7b8] sm:$0xff] }
 0x51b   :  { %v6383_v43 = vpack.c.bf16 %v6351_v60, %v6351_v60  ;;  %v6204_v29 = vsel %vm1659_vm0, %v6203_v50, %v6202_v7  ;;  %v6385_v61 = vpack.c.bf16 %v6353_v14, %v6353_v14  ;;  %v6387_v18 = vpack.c.bf16 %v6355_v58, %v6355_v58  ;;  %6846 = vmatpush.bf16.msrb.mxu0 %v13054_v33 }
 0x51c   :  { %v6389_v8 = vpack.c.bf16 %v6357_v62, %v6357_v62  ;;  %v6206_v17 = vsel %vm1662_vm1, %v6205_v59, %v6204_v29  ;;  %v6391_v35 = vpack.c.bf16 %v6359_v38, %v6359_v38  ;;  %v6393_v28 = vpack.c.bf16 %v6361_v51, %v6361_v51  ;;  %v16725_v29 = vld [vmem:[#allocation2 + $0x23] ss:$8 sm:$0x3] }
 0x51d   :  { %v6438_v4 = vunpack.c.l.b16 %v6379_v37  ;;  %v6208_v16 = vsel %vm1665_vm2, %v6207_v47, %v6206_v17  ;;  %v6440_v55 = vunpack.c.l.b16 %v6381_v1  ;;  %v6442_v23 = vunpack.c.l.b16 %v6383_v43 }
 0x51e   :  { %7384 = vmatpush.bf16.msra.mxu2 %v13086_v49  ;;  %v6444_v34 = vunpack.c.l.b16 %v6385_v61  ;;  %v6210_v19 = vpack.c.b16 %v6208_v16, %v6208_v16  ;;  %v6446_v44 = vunpack.c.l.b16 %v6387_v18  ;;  %v6448_v53 = vunpack.c.l.b16 %v6389_v8  ;;  %v3871_v37 = vpop.f32.mrf.mxu1  ;;  %v16727_v61 = vld [vmem:[#allocation2 + $0x63] ss:$8 sm:$0x3] }
 0x51f   :  { %v6450_v30 = vunpack.c.l.b16 %v6391_v35  ;;  %v6452_v6 = vunpack.c.l.b16 %v6393_v28  ;;  %v6467_v15 = vrot.slane %v6440_v55, 7  ;;  %v6469_v63 = vrot.slane %v6442_v23, 6  ;;  %v16729_v18 = vld [vmem:[#allocation2 + $0xa3] ss:$8 sm:$0x3] }
 0x520   :  { %v6471_v54 = vrot.slane %v6444_v34, 5  ;;  %11663 = vmatmul.msk.bf16.vlgmr.msra.gmra.mxu0 %vm1410_vm9, %v6210_v19  ;;  %v6473_v13 = vrot.slane %v6446_v44, 4  ;;  %v6475_v42 = vrot.slane %v6448_v53, 3  ;;  %v3598_v26 = vadd.f32 %v16597_v24, %v16595_v40  ;;  %v16731_v8 = vld [vmem:[#allocation2 + $0xe3] ss:$8 sm:$0x3] }
 0x521   :  { %v6477_v56 = vrot.slane %v6450_v30, 2  ;;  %v6468_v22 = vsel %vm1647_vm12, %v6467_v15, %v6438_v4  ;;  %v6479_v50 = vrot.slane %v6452_v6, 1  ;;  %v11899_v31 = vor.u32 %v13079_v57, %v11898_v48  ;;  %v16735_v16 = vld [vmem:[#allocation2 + $0x163] ss:$8 sm:$0x3]  ;;  %v13077_v30 = vld [vmem:[%s17979_s6 + $0x870] sm:$0xff] }
 0x522   :  { %7385 = vmatpush.bf16.msra.mxu2 %v13085_v5  ;;  %v6346_v32 = vperm.slane %v16634_v9, 0  ;;  %v6470_v59 = vsel %vm1650_vm13, %v6469_v63, %v6468_v22  ;;  %v16707_v47 = vadd.f32 %v3598_v26, %v16619_v46  ;;  %v6348_v45 = vperm.slane %v16636_v0, 0  ;;  %v16733_v5 = vld [vmem:[#allocation2 + $0x123] ss:$8 sm:$0x3] }
 0x523   :  { %v6350_v49 = vperm.slane %v16639_v36, 0  ;;  %v6472_v21 = vsel %vm1653_vm14, %v6471_v54, %v6470_v59  ;;  %v7109_v40 = vand.u32 %v11899_v31, %v14887_v11  ;;  %v6352_v24 = vperm.slane %v16641_v10, 0  ;;  %v13078_v10 = vld [vmem:[%s17979_s6 + $0x878] sm:$0xff]  ;;  %v16737_v55 = vld [vmem:[#allocation2 + $0x1a3] ss:$8 sm:$0x3] }
 0x524   :  { %v6354_v60 = vperm.slane %v16643_v25, 0  ;;  %v6474_v9 = vsel %vm1656_vm15, %v6473_v13, %v6472_v21  ;;  %v6356_v14 = vperm.slane %v16648_v41, 0  ;;  %v6358_v46 = vperm.slane %v16650_v52, 0  ;;  %v3858_v41 = vpop.f32.mrf.mxu3  ;;  %v13068_v23 = vld [vmem:[%s17979_s6 + $0x828] sm:$0xff]  ;;  %v13083_v57 = vld [vmem:[%s17979_s6 + $0x8a0] sm:$0xff]  ;;  %v13082_v31 = vld [vmem:[%s17979_s6 + $0x898] sm:$0xff] }
 0x525   :  { %v6360_v58 = vperm.slane %v16652_v3, 0  ;;  %v6476_v0 = vsel %vm1659_vm0, %v6475_v42, %v6474_v9  ;;  %7127 = vmatpush.bf16.msra.mxu1 %v7109_v40  ;;  %v6378_v36 = vpack.c.bf16 %v6346_v32, %v6346_v32  ;;  %v6380_v12 = vpack.c.bf16 %v6348_v45, %v6348_v45  ;;  %v16742_v53 = vld [vmem:[#allocation2 + $0x1e3] ss:$8 sm:$0x3]  ;;  %7117 = vmatpush.bf16.msra.mxu3 %v13068_v23 }
 0x526   :  { %7386 = vmatpush.bf16.msra.mxu2 %v13084_v2  ;;  %v6382_v62 = vpack.c.bf16 %v6350_v49, %v6350_v49  ;;  %v6478_v25 = vsel %vm1662_vm1, %v6477_v56, %v6476_v0  ;;  %v6384_v38 = vpack.c.bf16 %v6352_v24, %v6352_v24  ;;  %v6386_v51 = vpack.c.bf16 %v6354_v60, %v6354_v60  ;;  %v13067_v42 = vld [vmem:[%s17979_s6 + $0x820] sm:$0xff]  ;;  %v13076_v21 = vld [vmem:[%s17979_s6 + $0x868] sm:$0xff] }
 0x527   :  { %v6388_v7 = vpack.c.bf16 %v6356_v14, %v6356_v14  ;;  %v6480_v52 = vsel %vm1665_vm2, %v6479_v50, %v6478_v25  ;;  %v6390_v3 = vpack.c.bf16 %v6358_v46, %v6358_v46  ;;  %v6392_v1 = vpack.c.bf16 %v6360_v58, %v6360_v58 }
 0x528   :  { %v6437_v43 = vunpack.c.l.b16 %v6378_v36  ;;  %v6482_v17 = vpack.c.b16 %v6480_v52, %v6480_v52  ;;  %v6439_v35 = vunpack.c.l.b16 %v6380_v12  ;;  %v6441_v28 = vunpack.c.l.b16 %v6382_v62 }
 0x529   :  { %v6443_v4 = vunpack.c.l.b16 %v6384_v38  ;;  %v6445_v34 = vunpack.c.l.b16 %v6386_v51  ;;  %v6447_v48 = vunpack.c.l.b16 %v6388_v7  ;;  %v6449_v19 = vunpack.c.l.b16 %v6390_v3  ;;  %7128 = vmatpush.bf16.msra.mxu1 %v13078_v10  ;;  %7118 = vmatpush.bf16.msra.mxu3 %v13067_v42 }
 0x52a   :  { %v6451_v44 = vunpack.c.l.b16 %v6392_v1  ;;  %11742 = vmatmul.msk.bf16.vlgmr.msrb.gmra.mxu3 %vm1410_vm9, %v6482_v17  ;;  %v6453_v39 = vrot.slane %v6439_v35, 7  ;;  %v6455_v33 = vrot.slane %v6441_v28, 6  ;;  %v6619_v15 = vperm.slane %v16725_v29, 1  ;;  %7387 = vmatpush.bf16.msra.mxu2 %v13083_v57  ;;  %v11977_v1 = vld [vmem:[%s17979_s6 + $0x8e8] sm:$0xf]  ;;  %v13075_v17 = vld [vmem:[%s17979_s6 + $0x860] sm:$0xff] }
 0x52b   :  { %v6457_v6 = vrot.slane %v6443_v4, 5  ;;  %v6459_v63 = vrot.slane %v6445_v34, 4  ;;  %v6461_v54 = vrot.slane %v6447_v48, 3  ;;  %v6463_v2 = vrot.slane %v6449_v19, 2  ;;  %v13100_v34 = vld [vmem:[%s17979_s6 + $0x928] sm:$0xff]  ;;  %v16787_v48 = vpop.f32.mrf.mxu2  ;;  %v16789_v19 = vpop.f32.mrf.mxu0 }
 0x52c   :  { %v6465_v13 = vrot.slane %v6451_v44, 1  ;;  %v6454_v56 = vsel %vm1647_vm12, %v6453_v39, %v6437_v43  ;;  %v6621_v26 = vperm.slane %v16727_v61, 1  ;;  %v6623_v22 = vperm.slane %v16729_v18, 1  ;;  %v13092_v43 = vld [vmem:[%s17979_s6 + $0x8e8] sm:$0x70]  ;;  %v13081_v44 = vld [vmem:[%s17979_s6 + $0x890] sm:$0xff] }
 0x52d   :  { %v6625_v50 = vperm.slane %v16731_v8, 1  ;;  %v6456_v32 = vsel %vm1650_vm13, %v6455_v33, %v6454_v56  ;;  %v6627_v59 = vperm.slane %v16733_v5, 1  ;;  %v6629_v45 = vperm.slane %v16735_v16, 1  ;;  %7129 = vmatpush.bf16.msra.mxu1 %v13077_v30 }
 0x52e   :  { %v6631_v49 = vperm.slane %v16737_v55, 1  ;;  %v6458_v40 = vsel %vm1653_vm14, %v6457_v6, %v6456_v32  ;;  %v6633_v24 = vperm.slane %v16742_v53, 1  ;;  %v6651_v60 = vpack.c.bf16 %v6619_v15, %v6619_v15  ;;  %7388 = vmatpush.bf16.msra.mxu2 %v13082_v31  ;;  %v13099_v32 = vld [vmem:[%s17979_s6 + $0x920] sm:$0xff] }
 0x52f   :  { %v6653_v9 = vpack.c.bf16 %v6621_v26, %v6621_v26  ;;  %v6460_v14 = vsel %vm1656_vm15, %v6459_v63, %v6458_v40  ;;  %v6655_v46 = vpack.c.bf16 %v6623_v22, %v6623_v22  ;;  %v6657_v58 = vpack.c.bf16 %v6625_v50, %v6625_v50 }
 0x530   :  { %v6659_v0 = vpack.c.bf16 %v6627_v59, %v6627_v59  ;;  %v6462_v36 = vsel %vm1659_vm0, %v6461_v54, %v6460_v14  ;;  %v6661_v12 = vpack.c.bf16 %v6629_v45, %v6629_v45  ;;  %v6663_v62 = vpack.c.bf16 %v6631_v49, %v6631_v49  ;;  %v13091_v49 = vld [vmem:[%s17979_s6 + $0x8e0] sm:$0xff] }
 0x531   :  { %v6665_v10 = vpack.c.bf16 %v6633_v24, %v6633_v24  ;;  %v6464_v25 = vsel %vm1662_vm1, %v6463_v2, %v6462_v36  ;;  %v6710_v38 = vunpack.c.l.b16 %v6651_v60  ;;  %v6712_v51 = vunpack.c.l.b16 %v6653_v9  ;;  %7130 = vmatpush.bf16.msra.mxu1 %v13076_v21 }
 0x532   :  { %v6714_v7 = vunpack.c.l.b16 %v6655_v46  ;;  %v6466_v41 = vsel %vm1665_vm2, %v6465_v13, %v6464_v25  ;;  %v6716_v37 = vunpack.c.l.b16 %v6657_v58  ;;  %v6718_v52 = vunpack.c.l.b16 %v6659_v0  ;;  %7389 = vmatpush.bf16.msra.mxu2 %v13081_v44  ;;  %v16831_v25 = vld [vmem:[#allocation2 + $0xa4] ss:$8 sm:$0x3] }
 0x533   :  { %v6720_v3 = vunpack.c.l.b16 %v6661_v12  ;;  %v6481_v35 = vpack.c.b16 %v6466_v41, %v6466_v41  ;;  %v6722_v28 = vunpack.c.l.b16 %v6663_v62  ;;  %v6724_v4 = vunpack.c.l.b16 %v6665_v10  ;;  %v4130_v14 = vpop.f32.mrf.mxu2  ;;  %v4143_v46 = vpop.f32.mrf.mxu0  ;;  %v16827_v62 = vld [vmem:[#allocation2 + $0x24] ss:$8 sm:$0x3] }
 0x534   :  { %v6739_v23 = vrot.slane %v6712_v51, 7  ;;  %v6741_v30 = vrot.slane %v6714_v7, 6  ;;  %v6743_v57 = vrot.slane %v6716_v37, 5  ;;  %v6745_v39 = vrot.slane %v6718_v52, 4  ;;  %v13080_v51 = vld [vmem:[%s17979_s6 + $0x888] sm:$0xff] }
 0x535   :  { %v6747_v33 = vrot.slane %v6720_v3, 3  ;;  %6575 = vmatmul.bf16.vlgmr.msrb.gmra.mxu1 %v6481_v35  ;;  %v6749_v15 = vrot.slane %v6722_v28, 2  ;;  %v6751_v63 = vrot.slane %v6724_v4, 1  ;;  %v11978_v54 = vor.u32 %v13092_v43, %v11977_v1  ;;  %v16829_v10 = vld [vmem:[#allocation2 + $0x64] ss:$8 sm:$0x3] }
 0x536   :  { %v6740_v6 = vsel %vm1647_vm12, %v6739_v23, %v6710_v38  ;;  %v3870_v13 = vadd.f32 %v16695_v20, %v16693_v27  ;;  %v6618_v42 = vperm.slane %v16725_v29, 0  ;;  %v6620_v56 = vperm.slane %v16727_v61, 0  ;;  %7131 = vmatpush.bf16.msra.mxu1 %v13075_v17  ;;  %v13098_v38 = vld [vmem:[%s17979_s6 + $0x918] sm:$0xff]  ;;  %v16842_v1 = vld [vmem:[#allocation2 + $0xe4] ss:$8 sm:$0x3]  ;;  %7390 = vmatpush.bf16.msra.mxu2 %v13080_v51 }
 0x537   :  { %v6742_v2 = vsel %vm1650_vm13, %v6741_v30, %v6740_v6  ;;  %v7381_v22 = vand.u32 %v11978_v54, %v14887_v11  ;;  %v6622_v50 = vperm.slane %v16729_v18, 0  ;;  %v6624_v31 = vperm.slane %v16731_v8, 0  ;;  %v13090_v3 = vld [vmem:[%s17979_s6 + $0x8d8] sm:$0xff]  ;;  %v16844_v43 = vld [vmem:[#allocation2 + $0x124] ss:$8 sm:$0x3] }
 0x538   :  { %v6744_v26 = vsel %vm1653_vm14, %v6743_v57, %v6742_v2  ;;  %v16809_v20 = vadd.f32 %v3870_v13, %v16707_v47  ;;  %v6626_v29 = vperm.slane %v16733_v5, 0  ;;  %v6628_v61 = vperm.slane %v16735_v16, 0  ;;  %v16846_v17 = vld [vmem:[#allocation2 + $0x164] ss:$8 sm:$0x3] }
 0x539   :  { %v6746_v27 = vsel %vm1656_vm15, %v6745_v39, %v6744_v26  ;;  %7399 = vmatpush.bf16.msra.mxu0 %v7381_v22  ;;  %v6630_v18 = vperm.slane %v16737_v55, 0  ;;  %v6632_v8 = vperm.slane %v16742_v53, 0  ;;  %v6650_v45 = vpack.c.bf16 %v6618_v42, %v6618_v42  ;;  %v12056_v55 = vld [vmem:[%s17979_s6 + $0x950] sm:$0xf]  ;;  %v13105_v53 = vld [vmem:[%s17979_s6 + $0x950] sm:$0x70] }
 0x53a   :  { %7655 = vmatpush.bf16.msrb.mxu1 %v13100_v34  ;;  %v6748_v59 = vsel %vm1659_vm0, %v6747_v33, %v6746_v27  ;;  %v6652_v47 = vpack.c.bf16 %v6620_v56, %v6620_v56  ;;  %v6654_v40 = vpack.c.bf16 %v6622_v50, %v6622_v50  ;;  %v6656_v24 = vpack.c.bf16 %v6624_v31, %v6624_v31  ;;  %v16849_v34 = vld [vmem:[#allocation2 + $0x1a4] ss:$8 sm:$0x3]  ;;  %v13089_v26 = vld [vmem:[%s17979_s6 + $0x8d0] sm:$0xff] }
 0x53b   :  { %v6750_v21 = vsel %vm1662_vm1, %v6749_v15, %v6748_v59  ;;  %v6658_v16 = vpack.c.bf16 %v6626_v29, %v6626_v29  ;;  %v6660_v60 = vpack.c.bf16 %v6628_v61, %v6628_v61  ;;  %v6662_v9 = vpack.c.bf16 %v6630_v18, %v6630_v18  ;;  %v16853_v54 = vld [vmem:[#allocation2 + $0x1e4] ss:$8 sm:$0x3] }
 0x53c   :  { %v6752_v5 = vsel %vm1665_vm2, %v6751_v63, %v6750_v21  ;;  %v6664_v0 = vpack.c.bf16 %v6632_v8, %v6632_v8  ;;  %v6709_v36 = vunpack.c.l.b16 %v6650_v45  ;;  %v6711_v12 = vunpack.c.l.b16 %v6652_v47  ;;  %v13104_v27 = vld [vmem:[%s17979_s6 + $0x948] sm:$0xff] }
 0x53d   :  { %v6754_v58 = vpack.c.b16 %v6752_v5, %v6752_v5  ;;  %v6713_v7 = vunpack.c.l.b16 %v6654_v40  ;;  %v6715_v41 = vunpack.c.l.b16 %v6656_v24  ;;  %v6717_v37 = vunpack.c.l.b16 %v6658_v16  ;;  %7400 = vmatpush.bf16.msra.mxu0 %v13091_v49  ;;  %v13088_v14 = vld [vmem:[%s17979_s6 + $0x8c8] sm:$0xff] }
 0x53e   :  { %7656 = vmatpush.bf16.msrb.mxu1 %v13099_v32  ;;  %v6719_v52 = vunpack.c.l.b16 %v6660_v60  ;;  %v6721_v35 = vunpack.c.l.b16 %v6662_v9  ;;  %v6723_v28 = vunpack.c.l.b16 %v6664_v0  ;;  %v6725_v4 = vrot.slane %v6711_v12, 7  ;;  %v13113_v12 = vld [vmem:[%s17979_s6 + $0x990] sm:$0xff] }
 0x53f   :  { %11821 = vmatmul.msk.bf16.vlgmr.msrb.gmra.mxu2 %vm1410_vm9, %v6754_v58  ;;  %v12057_v23 = vor.u32 %v13105_v53, %v12056_v55  ;;  %v6727_v44 = vrot.slane %v6713_v7, 6  ;;  %v6729_v30 = vrot.slane %v6715_v41, 5  ;;  %v6731_v57 = vrot.slane %v6717_v37, 4  ;;  %v13103_v53 = vld [vmem:[%s17979_s6 + $0x940] sm:$0xff] }
 0x540   :  { %v6733_v39 = vrot.slane %v6719_v52, 3  ;;  %v6726_v33 = vsel %vm1647_vm12, %v6725_v4, %v6709_v36  ;;  %v6735_v6 = vrot.slane %v6721_v35, 2  ;;  %v6737_v15 = vrot.slane %v6723_v28, 1  ;;  %v16887_v52 = vpop.f32.mrf.mxu1 }
 0x541   :  { %v7653_v63 = vand.u32 %v12057_v23, %v14887_v11  ;;  %v6728_v2 = vsel %vm1650_vm13, %v6727_v44, %v6726_v33  ;;  %7401 = vmatpush.bf16.msra.mxu0 %v13090_v3  ;;  %v6890_v13 = vperm.slane %v16827_v62, 0  ;;  %v6892_v42 = vperm.slane %v16829_v10, 0  ;;  %v16889_v3 = vpop.f32.mrf.mxu3  ;;  %v13096_v44 = vld [vmem:[%s17979_s6 + $0x908] sm:$0xff] }
 0x542   :  { %7657 = vmatpush.bf16.msrb.mxu1 %v13098_v38  ;;  %v6894_v56 = vperm.slane %v16831_v25, 0  ;;  %v6730_v22 = vsel %vm1653_vm14, %v6729_v30, %v6728_v2  ;;  %v6896_v50 = vperm.slane %v16842_v1, 0  ;;  %v6898_v31 = vperm.slane %v16844_v43, 0  ;;  %v13097_v38 = vld [vmem:[%s17979_s6 + $0x910] sm:$0xff]  ;;  %v13112_v2 = vld [vmem:[%s17979_s6 + $0x988] sm:$0xff] }
 0x543   :  { %7671 = vmatpush.bf16.msrb.mxu3 %v7653_v63  ;;  %v6900_v32 = vperm.slane %v16846_v17, 0  ;;  %v6732_v29 = vsel %vm1656_vm15, %v6731_v57, %v6730_v22  ;;  %v6902_v61 = vperm.slane %v16849_v34, 0  ;;  %v6904_v59 = vperm.slane %v16853_v54, 0 }
 0x544   :  { %v6922_v18 = vpack.c.bf16 %v6890_v13, %v6890_v13  ;;  %v6734_v8 = vsel %vm1659_vm0, %v6733_v39, %v6732_v29  ;;  %v6924_v45 = vpack.c.bf16 %v6892_v42, %v6892_v42  ;;  %v6926_v49 = vpack.c.bf16 %v6894_v56, %v6894_v56 }
 0x545   :  { %v6928_v21 = vpack.c.bf16 %v6896_v50, %v6896_v50  ;;  %v6736_v47 = vsel %vm1662_vm1, %v6735_v6, %v6734_v8  ;;  %v6930_v40 = vpack.c.bf16 %v6898_v31, %v6898_v31  ;;  %v6932_v24 = vpack.c.bf16 %v6900_v32, %v6900_v32  ;;  %7402 = vmatpush.bf16.msra.mxu0 %v13089_v26  ;;  %v13102_v6 = vld [vmem:[%s17979_s6 + $0x938] sm:$0xff] }
 0x546   :  { %v6934_v5 = vpack.c.bf16 %v6902_v61, %v6902_v61  ;;  %v6738_v16 = vsel %vm1665_vm2, %v6737_v15, %v6736_v47  ;;  %v6936_v60 = vpack.c.bf16 %v6904_v59, %v6904_v59  ;;  %v6981_v9 = vunpack.c.l.b16 %v6922_v18  ;;  %7658 = vmatpush.bf16.msrb.mxu1 %v13097_v38  ;;  %v13118_v8 = vld [vmem:[%s17979_s6 + $0x9b8] sm:$0x70]  ;;  %v13111_v47 = vld [vmem:[%s17979_s6 + $0x980] sm:$0xff] }
 0x547   :  { %v6983_v55 = vunpack.c.l.b16 %v6924_v45  ;;  %7672 = vmatpush.bf16.msrb.mxu3 %v13104_v27  ;;  %v6753_v46 = vpack.c.b16 %v6738_v16, %v6738_v16  ;;  %v6985_v58 = vunpack.c.l.b16 %v6926_v49  ;;  %v6987_v0 = vunpack.c.l.b16 %v6928_v21  ;;  %v16929_v45 = vld [vmem:[#allocation2 + $0x25] ss:$8 sm:$0x3]  ;;  %v13126_v21 = vld [vmem:[%s17979_s6 + $0x9f8] sm:$0xff] }
 0x548   :  { %v6989_v36 = vunpack.c.l.b16 %v6930_v40  ;;  %v6991_v51 = vunpack.c.l.b16 %v6932_v24  ;;  %v6993_v7 = vunpack.c.l.b16 %v6934_v5  ;;  %v6995_v41 = vunpack.c.l.b16 %v6936_v60  ;;  %v16931_v49 = vld [vmem:[#allocation2 + $0x65] ss:$8 sm:$0x3]  ;;  %v4402_v40 = vpop.f32.mrf.mxu1 }
 0x549   :  { %v6997_v37 = vrot.slane %v6983_v55, 7  ;;  %6847 = vmatmul.bf16.vlgmr.msrb.gmra.mxu0 %v6753_v46  ;;  %v6999_v35 = vrot.slane %v6985_v58, 6  ;;  %v7001_v28 = vrot.slane %v6987_v0, 5  ;;  %v4142_v23 = vadd.f32 %v16789_v19, %v16787_v48  ;;  %v4415_v24 = vpop.f32.mrf.mxu3  ;;  %v16939_v55 = vld [vmem:[#allocation2 + $0xa5] ss:$8 sm:$0x3] }
 0x54a   :  { %v7003_v4 = vrot.slane %v6989_v36, 4  ;;  %v7005_v57 = vrot.slane %v6991_v51, 3  ;;  %v7007_v39 = vrot.slane %v6993_v7, 2  ;;  %v7009_v33 = vrot.slane %v6995_v41, 1  ;;  %7403 = vmatpush.bf16.msra.mxu0 %v13088_v14  ;;  %7659 = vmatpush.bf16.msrb.mxu1 %v13096_v44  ;;  %v13095_v7 = vld [vmem:[%s17979_s6 + $0x900] sm:$0xff]  ;;  %v13116_v24 = vld [vmem:[%s17979_s6 + $0x9a8] sm:$0xff] }
 0x54b   :  { %v6998_v30 = vsel %vm1647_vm12, %v6997_v37, %v6981_v9  ;;  %7673 = vmatpush.bf16.msrb.mxu3 %v13103_v53  ;;  %v16902_v48 = vadd.f32 %v4142_v23, %v16809_v20  ;;  %v6891_v19 = vperm.slane %v16827_v62, 1  ;;  %v6893_v63 = vperm.slane %v16829_v10, 1  ;;  %v16941_v53 = vld [vmem:[#allocation2 + $0xe5] ss:$8 sm:$0x3] }
 0x54c   :  { %v7000_v15 = vsel %vm1650_vm13, %v6999_v35, %v6998_v30  ;;  %v6895_v42 = vperm.slane %v16831_v25, 1  ;;  %v6897_v56 = vperm.slane %v16842_v1, 1  ;;  %v6899_v26 = vperm.slane %v16844_v43, 1  ;;  %v13101_v25 = vld [vmem:[%s17979_s6 + $0x930] sm:$0xff] }
 0x54d   :  { %v7002_v13 = vsel %vm1653_vm14, %v7001_v28, %v7000_v15  ;;  %v6901_v22 = vperm.slane %v16846_v17, 1  ;;  %v6903_v62 = vperm.slane %v16849_v34, 1  ;;  %v6905_v10 = vperm.slane %v16853_v54, 1  ;;  %v12135_v34 = vld [vmem:[%s17979_s6 + $0x9b8] sm:$0xf] }
 0x54e   :  { %7927 = vmatpush.bf16.msrb.mxu0 %v13113_v12  ;;  %v7004_v20 = vsel %vm1656_vm15, %v7003_v4, %v7002_v13  ;;  %v6923_v31 = vpack.c.bf16 %v6891_v19, %v6891_v19  ;;  %v6925_v32 = vpack.c.bf16 %v6893_v63, %v6893_v63  ;;  %v6927_v27 = vpack.c.bf16 %v6895_v42, %v6895_v42  ;;  %v16943_v14 = vld [vmem:[#allocation2 + $0x125] ss:$8 sm:$0x3]  ;;  %v13110_v4 = vld [vmem:[%s17979_s6 + $0x978] sm:$0xff] }
 0x54f   :  { %v7006_v50 = vsel %vm1659_vm0, %v7005_v57, %v7004_v20  ;;  %7674 = vmatpush.bf16.msrb.mxu3 %v13102_v6  ;;  %v6929_v43 = vpack.c.bf16 %v6897_v56, %v6897_v56  ;;  %v6931_v29 = vpack.c.bf16 %v6899_v26, %v6899_v26  ;;  %v6933_v17 = vpack.c.bf16 %v6901_v22, %v6901_v22  ;;  %v16945_v12 = vld [vmem:[#allocation2 + $0x165] ss:$8 sm:$0x3]  ;;  %v13094_v63 = vld [vmem:[%s17979_s6 + $0x8f8] sm:$0xff] }
 0x550   :  { %v7008_v1 = vsel %vm1662_vm1, %v7007_v39, %v7006_v50  ;;  %v6935_v61 = vpack.c.bf16 %v6903_v62, %v6903_v62  ;;  %v6937_v59 = vpack.c.bf16 %v6905_v10, %v6905_v10  ;;  %v6982_v18 = vunpack.c.l.b16 %v6923_v31  ;;  %v16947_v38 = vld [vmem:[#allocation2 + $0x1a5] ss:$8 sm:$0x3]  ;;  %7660 = vmatpush.bf16.msrb.mxu1 %v13095_v7  ;;  %v13125_v39 = vld [vmem:[%s17979_s6 + $0x9f0] sm:$0xff] }
 0x551   :  { %v7010_v54 = vsel %vm1665_vm2, %v7009_v33, %v7008_v1  ;;  %v6984_v16 = vunpack.c.l.b16 %v6925_v32  ;;  %v6986_v60 = vunpack.c.l.b16 %v6927_v27  ;;  %v6988_v9 = vunpack.c.l.b16 %v6929_v43  ;;  %v16949_v51 = vld [vmem:[#allocation2 + $0x1e5] ss:$8 sm:$0x3]  ;;  %v13117_v10 = vld [vmem:[%s17979_s6 + $0x9b0] sm:$0xff] }
 0x552   :  { %7928 = vmatpush.bf16.msrb.mxu0 %v13112_v2  ;;  %v7025_v5 = vpack.c.b16 %v7010_v54, %v7010_v54  ;;  %v6990_v46 = vunpack.c.l.b16 %v6931_v29  ;;  %v6992_v58 = vunpack.c.l.b16 %v6933_v17  ;;  %v6994_v0 = vunpack.c.l.b16 %v6935_v61  ;;  %v13108_v7 = vld [vmem:[%s17979_s6 + $0x968] sm:$0xff] }
 0x553   :  { %v6996_v36 = vunpack.c.l.b16 %v6937_v59  ;;  %7675 = vmatpush.bf16.msrb.mxu3 %v13101_v25  ;;  %v7011_v41 = vrot.slane %v6984_v16, 7  ;;  %v7013_v37 = vrot.slane %v6986_v60, 6  ;;  %v7015_v35 = vrot.slane %v6988_v9, 5  ;;  %v13124_v59 = vld [vmem:[%s17979_s6 + $0x9e8] sm:$0xff] }
 0x554   :  { %7119 = vmatmul.bf16.vlgmr.msra.gmra.mxu3 %v7025_v5  ;;  %v12136_v28 = vor.u32 %v13118_v8, %v12135_v34  ;;  %v7017_v23 = vrot.slane %v6990_v46, 4  ;;  %v7019_v44 = vrot.slane %v6992_v58, 3  ;;  %v7021_v30 = vrot.slane %v6994_v0, 2  ;;  %7661 = vmatpush.bf16.msrb.mxu1 %v13094_v63  ;;  %v16991_v46 = vpop.f32.mrf.mxu0  ;;  %v16993_v58 = vpop.f32.mrf.mxu2  ;;  %v13093_v0 = vld [vmem:[%s17979_s6 + $0x8f0] sm:$0xff] }
 0x555   :  { %v7023_v57 = vrot.slane %v6996_v36, 1  ;;  %v7012_v33 = vsel %vm1647_vm12, %v7011_v41, %v6982_v18  ;;  %v7162_v15 = vperm.slane %v16929_v45, 0  ;;  %v7164_v19 = vperm.slane %v16931_v49, 0  ;;  %v13109_v18 = vld [vmem:[%s17979_s6 + $0x970] sm:$0xff]  ;;  %v13123_v36 = vld [vmem:[%s17979_s6 + $0x9e0] sm:$0xff] }
 0x556   :  { %7929 = vmatpush.bf16.msrb.mxu0 %v13111_v47  ;;  %v7925_v6 = vand.u32 %v12136_v28, %v14887_v11  ;;  %v7014_v2 = vsel %vm1650_vm13, %v7013_v37, %v7012_v33  ;;  %v7166_v13 = vperm.slane %v16939_v55, 0  ;;  %v7168_v42 = vperm.slane %v16941_v53, 0 }
 0x557   :  { %8199 = vmatpush.bf16.msra.mxu3 %v13126_v21  ;;  %v7170_v56 = vperm.slane %v16943_v14, 0  ;;  %v7016_v26 = vsel %vm1653_vm14, %v7015_v35, %v7014_v2  ;;  %v7172_v20 = vperm.slane %v16945_v12, 0  ;;  %v7174_v22 = vperm.slane %v16947_v38, 0 }
 0x558   :  { %7943 = vmatpush.bf16.msrb.mxu2 %v7925_v6  ;;  %v7176_v62 = vperm.slane %v16949_v51, 0  ;;  %v7018_v50 = vsel %vm1656_vm15, %v7017_v23, %v7016_v26  ;;  %v7194_v31 = vpack.c.bf16 %v7162_v15, %v7162_v15  ;;  %v7196_v32 = vpack.c.bf16 %v7164_v19, %v7164_v19  ;;  %v13115_v15 = vld [vmem:[%s17979_s6 + $0x9a0] sm:$0xff]  ;;  %7662 = vmatpush.bf16.msrb.mxu1 %v13093_v0 }
 0x559   :  { %v7198_v27 = vpack.c.bf16 %v7166_v13, %v7166_v13  ;;  %v7020_v25 = vsel %vm1659_vm0, %v7019_v44, %v7018_v50  ;;  %v7200_v1 = vpack.c.bf16 %v7168_v42, %v7168_v42  ;;  %v7202_v43 = vpack.c.bf16 %v7170_v56, %v7170_v56  ;;  %v17030_v50 = vld [vmem:[#allocation2 + $0x26] ss:$8 sm:$0x3] }
 0x55a   :  { %7930 = vmatpush.bf16.msrb.mxu0 %v13110_v4  ;;  %v7204_v29 = vpack.c.bf16 %v7172_v20, %v7172_v20  ;;  %v7022_v17 = vsel %vm1662_vm1, %v7021_v30, %v7020_v25  ;;  %v7206_v34 = vpack.c.bf16 %v7174_v22, %v7174_v22  ;;  %v7208_v54 = vpack.c.bf16 %v7176_v62, %v7176_v62  ;;  %v13107_v0 = vld [vmem:[%s17979_s6 + $0x960] sm:$0xff] }
 0x55b   :  { %8200 = vmatpush.bf16.msra.mxu3 %v13125_v39  ;;  %v7253_v61 = vunpack.c.l.b16 %v7194_v31  ;;  %v7024_v8 = vsel %vm1665_vm2, %v7023_v57, %v7022_v17  ;;  %v7255_v21 = vunpack.c.l.b16 %v7196_v32  ;;  %v7257_v47 = vunpack.c.l.b16 %v7198_v27  ;;  %v17037_v17 = vld [vmem:[#allocation2 + $0xe6] ss:$8 sm:$0x3] }
 0x55c   :  { %v7259_v40 = vunpack.c.l.b16 %v7200_v1  ;;  %7944 = vmatpush.bf16.msrb.mxu2 %v13117_v10  ;;  %v7026_v5 = vpack.c.b16 %v7024_v8, %v7024_v8  ;;  %v7261_v16 = vunpack.c.l.b16 %v7202_v43  ;;  %v7263_v60 = vunpack.c.l.b16 %v7204_v29  ;;  %v4674_v31 = vpop.f32.mrf.mxu0  ;;  %v4687_v32 = vpop.f32.mrf.mxu2  ;;  %v17035_v29 = vld [vmem:[#allocation2 + $0xa6] ss:$8 sm:$0x3] }
 0x55d   :  { %v7265_v9 = vunpack.c.l.b16 %v7206_v34  ;;  %v7267_v41 = vunpack.c.l.b16 %v7208_v54  ;;  %v7269_v37 = vrot.slane %v7255_v21, 7  ;;  %v7271_v35 = vrot.slane %v7257_v47, 6  ;;  %v17039_v34 = vld [vmem:[#allocation2 + $0x126] ss:$8 sm:$0x3] }
 0x55e   :  { %7931 = vmatpush.bf16.msrb.mxu0 %v13109_v18  ;;  %v7273_v28 = vrot.slane %v7259_v40, 5  ;;  %11900 = vmatmul.msk.bf16.vlgmr.msra.gmra.mxu1 %vm1410_vm9, %v7026_v5  ;;  %v7275_v4 = vrot.slane %v7261_v16, 4  ;;  %v7277_v23 = vrot.slane %v7263_v60, 3  ;;  %v4414_v30 = vadd.f32 %v16889_v3, %v16887_v52  ;;  %v13139_v54 = vld [vmem:[%s17979_s6 + $0xa60] sm:$0xff] }
 0x55f   :  { %8201 = vmatpush.bf16.msra.mxu3 %v13124_v59  ;;  %v7279_v44 = vrot.slane %v7265_v9, 2  ;;  %v7270_v57 = vsel %vm1647_vm12, %v7269_v37, %v7253_v61  ;;  %v7281_v39 = vrot.slane %v7267_v41, 1  ;;  %v7163_v33 = vperm.slane %v16929_v45, 1  ;;  %v17044_v21 = vld [vmem:[#allocation2 + $0x166] ss:$8 sm:$0x3] }
 0x560   :  { %v7165_v6 = vperm.slane %v16931_v49, 1  ;;  %7945 = vmatpush.bf16.msrb.mxu2 %v13116_v24  ;;  %v7272_v19 = vsel %vm1650_vm13, %v7271_v35, %v7270_v57  ;;  %v17015_v63 = vadd.f32 %v4414_v30, %v16902_v48  ;;  %v7167_v52 = vperm.slane %v16939_v55, 1  ;;  %v17046_v47 = vld [vmem:[#allocation2 + $0x1a6] ss:$8 sm:$0x3]  ;;  %v13122_v9 = vld [vmem:[%s17979_s6 + $0x9d8] sm:$0xff] }
 0x561   :  { %v7169_v3 = vperm.slane %v16941_v53, 1  ;;  %v7274_v45 = vsel %vm1653_vm14, %v7273_v28, %v7272_v19  ;;  %v7171_v49 = vperm.slane %v16943_v14, 1  ;;  %v7173_v2 = vperm.slane %v16945_v12, 1  ;;  %v13114_v14 = vld [vmem:[%s17979_s6 + $0x998] sm:$0xff] }
 0x562   :  { %7932 = vmatpush.bf16.msrb.mxu0 %v13108_v7  ;;  %v7175_v13 = vperm.slane %v16947_v38, 1  ;;  %v7276_v42 = vsel %vm1656_vm15, %v7275_v4, %v7274_v45  ;;  %v7177_v56 = vperm.slane %v16949_v51, 1  ;;  %v7195_v48 = vpack.c.bf16 %v7163_v33, %v7163_v33  ;;  %v17032_v51 = vld [vmem:[#allocation2 + $0x66] ss:$8 sm:$0x3] }
 0x563   :  { %8202 = vmatpush.bf16.msra.mxu3 %v13123_v36  ;;  %v7197_v26 = vpack.c.bf16 %v7165_v6, %v7165_v6  ;;  %v7278_v55 = vsel %vm1659_vm0, %v7277_v23, %v7276_v42  ;;  %v7199_v20 = vpack.c.bf16 %v7167_v52, %v7167_v52  ;;  %v7201_v53 = vpack.c.bf16 %v7169_v3, %v7169_v3  ;;  %v17048_v40 = vld [vmem:[#allocation2 + $0x1e6] ss:$8 sm:$0x3] }
 0x564   :  { %v7203_v22 = vpack.c.bf16 %v7171_v49, %v7171_v49  ;;  %7946 = vmatpush.bf16.msrb.mxu2 %v13115_v15  ;;  %v7280_v12 = vsel %vm1662_vm1, %v7279_v44, %v7278_v55  ;;  %v7205_v62 = vpack.c.bf16 %v7173_v2, %v7173_v2  ;;  %v7207_v38 = vpack.c.bf16 %v7175_v13, %v7175_v13  ;;  %v13138_v44 = vld [vmem:[%s17979_s6 + $0xa58] sm:$0xff] }
 0x565   :  { %v7209_v10 = vpack.c.bf16 %v7177_v56, %v7177_v56  ;;  %v7282_v27 = vsel %vm1665_vm2, %v7281_v39, %v7280_v12  ;;  %v7254_v25 = vunpack.c.l.b16 %v7195_v48  ;;  %v7256_v1 = vunpack.c.l.b16 %v7197_v26 }
 0x566   :  { %v7258_v43 = vunpack.c.l.b16 %v7199_v20  ;;  %v7297_v61 = vpack.c.b16 %v7282_v27, %v7282_v27  ;;  %v7260_v59 = vunpack.c.l.b16 %v7201_v53  ;;  %v7262_v18 = vunpack.c.l.b16 %v7203_v22  ;;  %7933 = vmatpush.bf16.msrb.mxu0 %v13107_v0  ;;  %v13137_v22 = vld [vmem:[%s17979_s6 + $0xa50] sm:$0xff] }
 0x567   :  { %v7264_v8 = vunpack.c.l.b16 %v7205_v62  ;;  %v7266_v24 = vunpack.c.l.b16 %v7207_v38  ;;  %v7268_v5 = vunpack.c.l.b16 %v7209_v10  ;;  %v7283_v16 = vrot.slane %v7256_v1, 7  ;;  %8203 = vmatpush.bf16.msra.mxu3 %v13122_v9  ;;  %v12214_v10 = vld [vmem:[%s17979_s6 + $0xa20] sm:$0xf]  ;;  %v13131_v1 = vld [vmem:[%s17979_s6 + $0xa20] sm:$0x70] }
 0x568   :  { %v7285_v60 = vrot.slane %v7258_v43, 6  ;;  %7947 = vmatpush.bf16.msrb.mxu2 %v13114_v14  ;;  %v7287_v36 = vrot.slane %v7260_v59, 5  ;;  %v7289_v7 = vrot.slane %v7262_v18, 4  ;;  %v7435_v37 = vperm.slane %v17030_v50, 1  ;;  %v13121_v43 = vld [vmem:[%s17979_s6 + $0x9d0] sm:$0xff]  ;;  %v17091_v59 = vpop.f32.mrf.mxu1 }
 0x569   :  { %7391 = vmatmul.bf16.vlgmr.msra.gmra.mxu2 %v7297_v61  ;;  %v7291_v41 = vrot.slane %v7264_v8, 3  ;;  %v7284_v35 = vsel %vm1647_vm12, %v7283_v16, %v7254_v25  ;;  %v7293_v28 = vrot.slane %v7266_v24, 2  ;;  %v7295_v4 = vrot.slane %v7268_v5, 1  ;;  %v17089_v61 = vpop.f32.mrf.mxu3  ;;  %v13136_v16 = vld [vmem:[%s17979_s6 + $0xa48] sm:$0xff] }
 0x56a   :  { %v7437_v23 = vperm.slane %v17032_v51, 1  ;;  %v7286_v30 = vsel %vm1650_vm13, %v7285_v60, %v7284_v35  ;;  %v7439_v57 = vperm.slane %v17035_v29, 1  ;;  %v7441_v39 = vperm.slane %v17037_v17, 1 }
 0x56b   :  { %v7443_v33 = vperm.slane %v17039_v34, 1  ;;  %v7288_v6 = vsel %vm1653_vm14, %v7287_v36, %v7286_v30  ;;  %v7445_v15 = vperm.slane %v17044_v21, 1  ;;  %v7447_v19 = vperm.slane %v17046_v47, 1  ;;  %8204 = vmatpush.bf16.msra.mxu3 %v13121_v43 }
 0x56c   :  { %8471 = vmatpush.bf16.msra.mxu2 %v13139_v54  ;;  %v7449_v52 = vperm.slane %v17048_v40, 1  ;;  %v7290_v3 = vsel %vm1656_vm15, %v7289_v7, %v7288_v6  ;;  %v7467_v45 = vpack.c.bf16 %v7435_v37, %v7435_v37  ;;  %v7469_v49 = vpack.c.bf16 %v7437_v23, %v7437_v23  ;;  %v13106_v54 = vld [vmem:[%s17979_s6 + $0x958] sm:$0xff] }
 0x56d   :  { %v7471_v2 = vpack.c.bf16 %v7439_v57, %v7439_v57  ;;  %v7292_v13 = vsel %vm1659_vm0, %v7291_v41, %v7290_v3  ;;  %v7473_v42 = vpack.c.bf16 %v7441_v39, %v7441_v39  ;;  %v7475_v56 = vpack.c.bf16 %v7443_v33, %v7443_v33  ;;  %7934 = vmatpush.bf16.msrb.mxu0 %v13106_v54 }
 0x56e   :  { %v7477_v48 = vpack.c.bf16 %v7445_v15, %v7445_v15  ;;  %v7294_v26 = vsel %vm1662_vm1, %v7293_v28, %v7292_v13  ;;  %v7479_v55 = vpack.c.bf16 %v7447_v19, %v7447_v19  ;;  %v7481_v20 = vpack.c.bf16 %v7449_v52, %v7449_v52  ;;  %v17121_v13 = vld [vmem:[#allocation2 + $0x27] ss:$8 sm:$0x3] }
 0x56f   :  { %v7526_v53 = vunpack.c.l.b16 %v7467_v45  ;;  %v7296_v14 = vsel %vm1665_vm2, %v7295_v4, %v7294_v26  ;;  %v7528_v12 = vunpack.c.l.b16 %v7469_v49  ;;  %v7530_v62 = vunpack.c.l.b16 %v7471_v2 }
 0x570   :  { %8472 = vmatpush.bf16.msra.mxu2 %v13138_v44  ;;  %v7532_v38 = vunpack.c.l.b16 %v7473_v42  ;;  %v7298_v31 = vpack.c.b16 %v7296_v14, %v7296_v14  ;;  %v7534_v32 = vunpack.c.l.b16 %v7475_v56  ;;  %v7536_v27 = vunpack.c.l.b16 %v7477_v48  ;;  %v4959_v45 = vpop.f32.mrf.mxu1  ;;  %v17123_v42 = vld [vmem:[#allocation2 + $0x67] ss:$8 sm:$0x3] }
 0x571   :  { %v7538_v25 = vunpack.c.l.b16 %v7479_v55  ;;  %v7540_v18 = vunpack.c.l.b16 %v7481_v20  ;;  %v7555_v8 = vrot.slane %v7528_v12, 7  ;;  %v7557_v24 = vrot.slane %v7530_v62, 6  ;;  %v17125_v56 = vld [vmem:[#allocation2 + $0xa7] ss:$8 sm:$0x3] }
 0x572   :  { %v7559_v5 = vrot.slane %v7532_v38, 5  ;;  %11979 = vmatmul.msk.bf16.vlgmr.msra.gmra.mxu0 %vm1410_vm9, %v7298_v31  ;;  %v7561_v60 = vrot.slane %v7534_v32, 4  ;;  %v7563_v9 = vrot.slane %v7536_v27, 3  ;;  %v4686_v36 = vadd.f32 %v16993_v58, %v16991_v46  ;;  %v17127_v48 = vld [vmem:[#allocation2 + $0xe7] ss:$8 sm:$0x3] }
 0x573   :  { %v7565_v0 = vrot.slane %v7538_v25, 2  ;;  %v7556_v7 = vsel %vm1647_vm12, %v7555_v8, %v7526_v53  ;;  %v7567_v41 = vrot.slane %v7540_v18, 1  ;;  %v12215_v37 = vor.u32 %v13131_v1, %v12214_v10  ;;  %v17131_v14 = vld [vmem:[#allocation2 + $0x167] ss:$8 sm:$0x3]  ;;  %v13129_v25 = vld [vmem:[%s17979_s6 + $0xa10] sm:$0xff] }
 0x574   :  { %8473 = vmatpush.bf16.msra.mxu2 %v13137_v22  ;;  %v7434_v35 = vperm.slane %v17030_v50, 0  ;;  %v7558_v28 = vsel %vm1650_vm13, %v7557_v24, %v7556_v7  ;;  %v17103_v4 = vadd.f32 %v4686_v36, %v17015_v63  ;;  %v7436_v23 = vperm.slane %v17032_v51, 0  ;;  %v17129_v22 = vld [vmem:[#allocation2 + $0x127] ss:$8 sm:$0x3] }
 0x575   :  { %v7438_v44 = vperm.slane %v17035_v29, 0  ;;  %v7560_v30 = vsel %vm1653_vm14, %v7559_v5, %v7558_v28  ;;  %v8197_v46 = vand.u32 %v12215_v37, %v14887_v11  ;;  %v7440_v58 = vperm.slane %v17037_v17, 0  ;;  %v13130_v17 = vld [vmem:[%s17979_s6 + $0xa18] sm:$0xff]  ;;  %v17133_v12 = vld [vmem:[#allocation2 + $0x1a7] ss:$8 sm:$0x3] }
 0x576   :  { %v7442_v57 = vperm.slane %v17039_v34, 0  ;;  %v7562_v50 = vsel %vm1656_vm15, %v7561_v60, %v7560_v30  ;;  %v7444_v39 = vperm.slane %v17044_v21, 0  ;;  %v7446_v63 = vperm.slane %v17046_v47, 0  ;;  %v4946_v21 = vpop.f32.mrf.mxu3  ;;  %v13120_v62 = vld [vmem:[%s17979_s6 + $0x9c8] sm:$0xff]  ;;  %v13135_v1 = vld [vmem:[%s17979_s6 + $0xa40] sm:$0xff]  ;;  %v13134_v37 = vld [vmem:[%s17979_s6 + $0xa38] sm:$0xff] }
 0x577   :  { %v7448_v33 = vperm.slane %v17048_v40, 0  ;;  %v7564_v51 = vsel %vm1659_vm0, %v7563_v9, %v7562_v50  ;;  %8215 = vmatpush.bf16.msra.mxu1 %v8197_v46  ;;  %v7466_v29 = vpack.c.bf16 %v7434_v35, %v7434_v35  ;;  %v7468_v6 = vpack.c.bf16 %v7436_v23, %v7436_v23  ;;  %v17138_v27 = vld [vmem:[#allocation2 + $0x1e7] ss:$8 sm:$0x3]  ;;  %8205 = vmatpush.bf16.msra.mxu3 %v13120_v62 }
 0x578   :  { %8474 = vmatpush.bf16.msra.mxu2 %v13136_v16  ;;  %v7470_v15 = vpack.c.bf16 %v7438_v44, %v7438_v44  ;;  %v7566_v34 = vsel %vm1662_vm1, %v7565_v0, %v7564_v51  ;;  %v7472_v19 = vpack.c.bf16 %v7440_v58, %v7440_v58  ;;  %v7474_v52 = vpack.c.bf16 %v7442_v57, %v7442_v57  ;;  %v13119_v9 = vld [vmem:[%s17979_s6 + $0x9c0] sm:$0xff]  ;;  %v13128_v30 = vld [vmem:[%s17979_s6 + $0xa08] sm:$0xff] }
 0x579   :  { %v7476_v3 = vpack.c.bf16 %v7444_v39, %v7444_v39  ;;  %v7568_v47 = vsel %vm1665_vm2, %v7567_v41, %v7566_v34  ;;  %v7478_v40 = vpack.c.bf16 %v7446_v63, %v7446_v63  ;;  %v7480_v49 = vpack.c.bf16 %v7448_v33, %v7448_v33 }
 0x57a   :  { %v7525_v2 = vunpack.c.l.b16 %v7466_v29  ;;  %v7570_v26 = vpack.c.b16 %v7568_v47, %v7568_v47  ;;  %v7527_v55 = vunpack.c.l.b16 %v7468_v6  ;;  %v7529_v20 = vunpack.c.l.b16 %v7470_v15 }
 0x57b   :  { %v7531_v53 = vunpack.c.l.b16 %v7472_v19  ;;  %v7533_v38 = vunpack.c.l.b16 %v7474_v52  ;;  %v7535_v10 = vunpack.c.l.b16 %v7476_v3  ;;  %v7537_v31 = vunpack.c.l.b16 %v7478_v40  ;;  %8216 = vmatpush.bf16.msra.mxu1 %v13130_v17  ;;  %8206 = vmatpush.bf16.msra.mxu3 %v13119_v9 }
 0x57c   :  { %v7539_v32 = vunpack.c.l.b16 %v7480_v49  ;;  %12058 = vmatmul.msk.bf16.vlgmr.msrb.gmra.mxu3 %vm1410_vm9, %v7570_v26  ;;  %v7541_v43 = vrot.slane %v7527_v55, 7  ;;  %v7543_v54 = vrot.slane %v7529_v20, 6  ;;  %v7707_v8 = vperm.slane %v17121_v13, 1  ;;  %8475 = vmatpush.bf16.msra.mxu2 %v13135_v1  ;;  %v12293_v49 = vld [vmem:[%s17979_s6 + $0xa88] sm:$0xf]  ;;  %v13127_v26 = vld [vmem:[%s17979_s6 + $0xa00] sm:$0xff] }
 0x57d   :  { %v7545_v18 = vrot.slane %v7531_v53, 5  ;;  %v7547_v24 = vrot.slane %v7533_v38, 4  ;;  %v7549_v5 = vrot.slane %v7535_v10, 3  ;;  %v7551_v16 = vrot.slane %v7537_v31, 2  ;;  %v13152_v38 = vld [vmem:[%s17979_s6 + $0xac8] sm:$0xff]  ;;  %v17183_v10 = vpop.f32.mrf.mxu2  ;;  %v17185_v31 = vpop.f32.mrf.mxu0 }
 0x57e   :  { %v7553_v60 = vrot.slane %v7539_v32, 1  ;;  %v7542_v0 = vsel %vm1647_vm12, %v7541_v43, %v7525_v2  ;;  %v7709_v36 = vperm.slane %v17123_v42, 1  ;;  %v7711_v7 = vperm.slane %v17125_v56, 1  ;;  %v13144_v2 = vld [vmem:[%s17979_s6 + $0xa88] sm:$0x70]  ;;  %v13133_v32 = vld [vmem:[%s17979_s6 + $0xa30] sm:$0xff] }
 0x57f   :  { %v7713_v41 = vperm.slane %v17127_v48, 1  ;;  %v7544_v35 = vsel %vm1650_vm13, %v7543_v54, %v7542_v0  ;;  %v7715_v28 = vperm.slane %v17129_v22, 1  ;;  %v7717_v23 = vperm.slane %v17131_v14, 1  ;;  %8217 = vmatpush.bf16.msra.mxu1 %v13129_v25 }
 0x580   :  { %v7719_v44 = vperm.slane %v17133_v12, 1  ;;  %v7546_v46 = vsel %vm1653_vm14, %v7545_v18, %v7544_v35  ;;  %v7721_v58 = vperm.slane %v17138_v27, 1  ;;  %v7739_v57 = vpack.c.bf16 %v7707_v8, %v7707_v8  ;;  %8476 = vmatpush.bf16.msra.mxu2 %v13134_v37  ;;  %v13151_v35 = vld [vmem:[%s17979_s6 + $0xac0] sm:$0xff] }
 0x581   :  { %v7741_v50 = vpack.c.bf16 %v7709_v36, %v7709_v36  ;;  %v7548_v39 = vsel %vm1656_vm15, %v7547_v24, %v7546_v46  ;;  %v7743_v63 = vpack.c.bf16 %v7711_v7, %v7711_v7  ;;  %v7745_v33 = vpack.c.bf16 %v7713_v41, %v7713_v41 }
 0x582   :  { %v7747_v51 = vpack.c.bf16 %v7715_v28, %v7715_v28  ;;  %v7550_v29 = vsel %vm1659_vm0, %v7549_v5, %v7548_v39  ;;  %v7749_v6 = vpack.c.bf16 %v7717_v23, %v7717_v23  ;;  %v7751_v15 = vpack.c.bf16 %v7719_v44, %v7719_v44  ;;  %v13143_v44 = vld [vmem:[%s17979_s6 + $0xa80] sm:$0xff] }
 0x583   :  { %v7753_v17 = vpack.c.bf16 %v7721_v58, %v7721_v58  ;;  %v7552_v34 = vsel %vm1662_vm1, %v7551_v16, %v7550_v29  ;;  %v7798_v19 = vunpack.c.l.b16 %v7739_v57  ;;  %v7800_v52 = vunpack.c.l.b16 %v7741_v50  ;;  %8218 = vmatpush.bf16.msra.mxu1 %v13128_v30 }
 0x584   :  { %v7802_v3 = vunpack.c.l.b16 %v7743_v63  ;;  %v7554_v21 = vsel %vm1665_vm2, %v7553_v60, %v7552_v34  ;;  %v7804_v45 = vunpack.c.l.b16 %v7745_v33  ;;  %v7806_v47 = vunpack.c.l.b16 %v7747_v51  ;;  %8477 = vmatpush.bf16.msra.mxu2 %v13133_v32  ;;  %v17227_v34 = vld [vmem:[#allocation2 + $0xb0] ss:$8 sm:$0x3] }
 0x585   :  { %v7808_v40 = vunpack.c.l.b16 %v7749_v6  ;;  %v7569_v55 = vpack.c.b16 %v7554_v21, %v7554_v21  ;;  %v7810_v20 = vunpack.c.l.b16 %v7751_v15  ;;  %v7812_v53 = vunpack.c.l.b16 %v7753_v17  ;;  %v5218_v39 = vpop.f32.mrf.mxu2  ;;  %v5231_v63 = vpop.f32.mrf.mxu0  ;;  %v17223_v15 = vld [vmem:[#allocation2 + $0x30] ss:$8 sm:$0x3] }
 0x586   :  { %v7827_v62 = vrot.slane %v7800_v52, 7  ;;  %v7829_v25 = vrot.slane %v7802_v3, 6  ;;  %v7831_v1 = vrot.slane %v7804_v45, 5  ;;  %v7833_v43 = vrot.slane %v7806_v47, 4  ;;  %v13132_v52 = vld [vmem:[%s17979_s6 + $0xa28] sm:$0xff] }
 0x587   :  { %v7835_v54 = vrot.slane %v7808_v40, 3  ;;  %7663 = vmatmul.bf16.vlgmr.msrb.gmra.mxu1 %v7569_v55  ;;  %v7837_v8 = vrot.slane %v7810_v20, 2  ;;  %v7839_v24 = vrot.slane %v7812_v53, 1  ;;  %v12294_v5 = vor.u32 %v13144_v2, %v12293_v49  ;;  %v17225_v17 = vld [vmem:[#allocation2 + $0x70] ss:$8 sm:$0x3] }
 0x588   :  { %v7828_v18 = vsel %vm1647_vm12, %v7827_v62, %v7798_v19  ;;  %v4958_v60 = vadd.f32 %v17091_v59, %v17089_v61  ;;  %v7706_v9 = vperm.slane %v17121_v13, 0  ;;  %v7708_v0 = vperm.slane %v17123_v42, 0  ;;  %8219 = vmatpush.bf16.msra.mxu1 %v13127_v26  ;;  %v13150_v19 = vld [vmem:[%s17979_s6 + $0xab8] sm:$0xff]  ;;  %8478 = vmatpush.bf16.msra.mxu2 %v13132_v52  ;;  %v13140_v39 = vld [vmem:[%s17979_s6 + $0xa68] sm:$0xff] }
 0x589   :  { %v7830_v16 = vsel %vm1650_vm13, %v7829_v25, %v7828_v18  ;;  %v8469_v7 = vand.u32 %v12294_v5, %v14887_v11  ;;  %v7710_v41 = vperm.slane %v17125_v56, 0  ;;  %v7712_v37 = vperm.slane %v17127_v48, 0  ;;  %v13142_v40 = vld [vmem:[%s17979_s6 + $0xa78] sm:$0xff] }
 0x58a   :  { %v7832_v36 = vsel %vm1653_vm14, %v7831_v1, %v7830_v16  ;;  %v17205_v59 = vadd.f32 %v4958_v60, %v17103_v4  ;;  %v7714_v13 = vperm.slane %v17129_v22, 0  ;;  %v7716_v42 = vperm.slane %v17131_v14, 0  ;;  %v17238_v49 = vld [vmem:[#allocation2 + $0xf0] ss:$8 sm:$0x3] }
 0x58b   :  { %v7834_v61 = vsel %vm1656_vm15, %v7833_v43, %v7832_v36  ;;  %8487 = vmatpush.bf16.msra.mxu0 %v8469_v7  ;;  %v7718_v56 = vperm.slane %v17133_v12, 0  ;;  %v7720_v48 = vperm.slane %v17138_v27, 0  ;;  %v7738_v23 = vpack.c.bf16 %v7706_v9, %v7706_v9  ;;  %v12372_v12 = vld [vmem:[%s17979_s6 + $0xaf0] sm:$0xf]  ;;  %v13157_v27 = vld [vmem:[%s17979_s6 + $0xaf0] sm:$0x70] }
 0x58c   :  { %8743 = vmatpush.bf16.msrb.mxu1 %v13152_v38  ;;  %v7836_v28 = vsel %vm1659_vm0, %v7835_v54, %v7834_v61  ;;  %v7740_v4 = vpack.c.bf16 %v7708_v0, %v7708_v0  ;;  %v7742_v46 = vpack.c.bf16 %v7710_v41, %v7710_v41  ;;  %v7744_v58 = vpack.c.bf16 %v7712_v37, %v7712_v37  ;;  %v17240_v2 = vld [vmem:[#allocation2 + $0x130] ss:$8 sm:$0x3]  ;;  %v13156_v61 = vld [vmem:[%s17979_s6 + $0xae8] sm:$0xff] }
 0x58d   :  { %v7838_v30 = vsel %vm1662_vm1, %v7837_v8, %v7836_v28  ;;  %v7746_v14 = vpack.c.bf16 %v7714_v13, %v7714_v13  ;;  %v7748_v57 = vpack.c.bf16 %v7716_v42, %v7716_v42  ;;  %v7750_v50 = vpack.c.bf16 %v7718_v56, %v7718_v56  ;;  %v17242_v26 = vld [vmem:[#allocation2 + $0x170] ss:$8 sm:$0x3] }
 0x58e   :  { %v7840_v22 = vsel %vm1665_vm2, %v7839_v24, %v7838_v30  ;;  %v7752_v51 = vpack.c.bf16 %v7720_v48, %v7720_v48  ;;  %v7797_v29 = vunpack.c.l.b16 %v7738_v23  ;;  %v7799_v6 = vunpack.c.l.b16 %v7740_v4  ;;  %v17245_v38 = vld [vmem:[#allocation2 + $0x1b0] ss:$8 sm:$0x3] }
 0x58f   :  { %v7842_v33 = vpack.c.b16 %v7840_v22, %v7840_v22  ;;  %v7801_v3 = vunpack.c.l.b16 %v7742_v46  ;;  %v7803_v21 = vunpack.c.l.b16 %v7744_v58  ;;  %v7805_v45 = vunpack.c.l.b16 %v7746_v14  ;;  %8488 = vmatpush.bf16.msra.mxu0 %v13143_v44  ;;  %v17249_v5 = vld [vmem:[#allocation2 + $0x1f0] ss:$8 sm:$0x3] }
 0x590   :  { %8744 = vmatpush.bf16.msrb.mxu1 %v13151_v35  ;;  %v7807_v47 = vunpack.c.l.b16 %v7748_v57  ;;  %v7809_v55 = vunpack.c.l.b16 %v7750_v50  ;;  %v7811_v20 = vunpack.c.l.b16 %v7752_v51  ;;  %v7813_v53 = vrot.slane %v7799_v6, 7  ;;  %v13141_v36 = vld [vmem:[%s17979_s6 + $0xa70] sm:$0xff] }
 0x591   :  { %12137 = vmatmul.msk.bf16.vlgmr.msrb.gmra.mxu2 %vm1410_vm9, %v7842_v33  ;;  %v12373_v62 = vor.u32 %v13157_v27, %v12372_v12  ;;  %v7815_v32 = vrot.slane %v7801_v3, 6  ;;  %v7817_v25 = vrot.slane %v7803_v21, 5  ;;  %v7819_v1 = vrot.slane %v7805_v45, 4  ;;  %v13155_v27 = vld [vmem:[%s17979_s6 + $0xae0] sm:$0xff]  ;;  %v13165_v6 = vld [vmem:[%s17979_s6 + $0xb30] sm:$0xff] }
 0x592   :  { %v7821_v43 = vrot.slane %v7807_v47, 3  ;;  %v7814_v54 = vsel %vm1647_vm12, %v7813_v53, %v7797_v29  ;;  %v7823_v18 = vrot.slane %v7809_v55, 2  ;;  %v7825_v8 = vrot.slane %v7811_v20, 1  ;;  %v17283_v47 = vpop.f32.mrf.mxu1 }
 0x593   :  { %v8741_v24 = vand.u32 %v12373_v62, %v14887_v11  ;;  %v7816_v16 = vsel %vm1650_vm13, %v7815_v32, %v7814_v54  ;;  %8489 = vmatpush.bf16.msra.mxu0 %v13142_v40  ;;  %v7978_v60 = vperm.slane %v17223_v15, 0  ;;  %v7980_v9 = vperm.slane %v17225_v17, 0  ;;  %v17285_v40 = vpop.f32.mrf.mxu3  ;;  %v13148_v32 = vld [vmem:[%s17979_s6 + $0xaa8] sm:$0xff] }
 0x594   :  { %8745 = vmatpush.bf16.msrb.mxu1 %v13150_v19  ;;  %v7982_v0 = vperm.slane %v17227_v34, 0  ;;  %v7818_v7 = vsel %vm1653_vm14, %v7817_v25, %v7816_v16  ;;  %v7984_v41 = vperm.slane %v17238_v49, 0  ;;  %v7986_v37 = vperm.slane %v17240_v2, 0  ;;  %v13149_v19 = vld [vmem:[%s17979_s6 + $0xab0] sm:$0xff]  ;;  %v13164_v16 = vld [vmem:[%s17979_s6 + $0xb28] sm:$0xff] }
 0x595   :  { %8759 = vmatpush.bf16.msrb.mxu3 %v8741_v24  ;;  %v7988_v35 = vperm.slane %v17242_v26, 0  ;;  %v7820_v13 = vsel %vm1656_vm15, %v7819_v1, %v7818_v7  ;;  %v7990_v42 = vperm.slane %v17245_v38, 0  ;;  %v7992_v28 = vperm.slane %v17249_v5, 0 }
 0x596   :  { %v8010_v56 = vpack.c.bf16 %v7978_v60, %v7978_v60  ;;  %v7822_v48 = vsel %vm1659_vm0, %v7821_v43, %v7820_v13  ;;  %v8012_v23 = vpack.c.bf16 %v7980_v9, %v7980_v9  ;;  %v8014_v44 = vpack.c.bf16 %v7982_v0, %v7982_v0 }
 0x597   :  { %v8016_v30 = vpack.c.bf16 %v7984_v41, %v7984_v41  ;;  %v7824_v4 = vsel %vm1662_vm1, %v7823_v18, %v7822_v48  ;;  %v8018_v46 = vpack.c.bf16 %v7986_v37, %v7986_v37  ;;  %v8020_v58 = vpack.c.bf16 %v7988_v35, %v7988_v35  ;;  %8490 = vmatpush.bf16.msra.mxu0 %v13141_v36  ;;  %v13154_v18 = vld [vmem:[%s17979_s6 + $0xad8] sm:$0xff] }
 0x598   :  { %v8022_v22 = vpack.c.bf16 %v7990_v42, %v7990_v42  ;;  %v7826_v14 = vsel %vm1665_vm2, %v7825_v8, %v7824_v4  ;;  %v8024_v57 = vpack.c.bf16 %v7992_v28, %v7992_v28  ;;  %v8069_v50 = vunpack.c.l.b16 %v8010_v56  ;;  %8746 = vmatpush.bf16.msrb.mxu1 %v13149_v19  ;;  %v13170_v48 = vld [vmem:[%s17979_s6 + $0xb58] sm:$0x70]  ;;  %v13163_v4 = vld [vmem:[%s17979_s6 + $0xb20] sm:$0xff]  ;;  %v17343_v19 = vld [vmem:[#allocation2 + $0x1b1] ss:$8 sm:$0x3] }
 0x599   :  { %v8071_v12 = vunpack.c.l.b16 %v8012_v23  ;;  %8760 = vmatpush.bf16.msrb.mxu3 %v13156_v61  ;;  %v7841_v63 = vpack.c.b16 %v7826_v14, %v7826_v14  ;;  %v8073_v33 = vunpack.c.l.b16 %v8014_v44  ;;  %v8075_v51 = vunpack.c.l.b16 %v8016_v30  ;;  %v17325_v23 = vld [vmem:[#allocation2 + $0x31] ss:$8 sm:$0x3] }
 0x59a   :  { %v8077_v29 = vunpack.c.l.b16 %v8018_v46  ;;  %v8079_v52 = vunpack.c.l.b16 %v8020_v58  ;;  %v8081_v3 = vunpack.c.l.b16 %v8022_v22  ;;  %v8083_v21 = vunpack.c.l.b16 %v8024_v57  ;;  %v17327_v44 = vld [vmem:[#allocation2 + $0x71] ss:$8 sm:$0x3]  ;;  %v5490_v46 = vpop.f32.mrf.mxu1 }
 0x59b   :  { %v8085_v45 = vrot.slane %v8071_v12, 7  ;;  %7935 = vmatmul.bf16.vlgmr.msrb.gmra.mxu0 %v7841_v63  ;;  %v8087_v55 = vrot.slane %v8073_v33, 6  ;;  %v8089_v20 = vrot.slane %v8075_v51, 5  ;;  %v5230_v62 = vadd.f32 %v17185_v31, %v17183_v10  ;;  %v13178_v30 = vld [vmem:[%s17979_s6 + $0xb98] sm:$0xff]  ;;  %v5503_v58 = vpop.f32.mrf.mxu3 }
 0x59c   :  { %v8091_v53 = vrot.slane %v8077_v29, 4  ;;  %v8093_v1 = vrot.slane %v8079_v52, 3  ;;  %v8095_v43 = vrot.slane %v8081_v3, 2  ;;  %v8097_v54 = vrot.slane %v8083_v21, 1  ;;  %8491 = vmatpush.bf16.msra.mxu0 %v13140_v39  ;;  %8747 = vmatpush.bf16.msrb.mxu1 %v13148_v32  ;;  %v13147_v3 = vld [vmem:[%s17979_s6 + $0xaa0] sm:$0xff]  ;;  %v13168_v58 = vld [vmem:[%s17979_s6 + $0xb48] sm:$0xff] }
 0x59d   :  { %v8086_v25 = vsel %vm1647_vm12, %v8085_v45, %v8069_v50  ;;  %8761 = vmatpush.bf16.msrb.mxu3 %v13155_v27  ;;  %v17298_v10 = vadd.f32 %v5230_v62, %v17205_v59  ;;  %v7979_v31 = vperm.slane %v17223_v15, 1  ;;  %v7981_v24 = vperm.slane %v17225_v17, 1  ;;  %v17335_v12 = vld [vmem:[#allocation2 + $0xb1] ss:$8 sm:$0x3] }
 0x59e   :  { %v8088_v8 = vsel %vm1650_vm13, %v8087_v55, %v8086_v25  ;;  %v7983_v9 = vperm.slane %v17227_v34, 1  ;;  %v7985_v0 = vperm.slane %v17238_v49, 1  ;;  %v7987_v36 = vperm.slane %v17240_v2, 1  ;;  %v13153_v34 = vld [vmem:[%s17979_s6 + $0xad0] sm:$0xff] }
 0x59f   :  { %v8090_v60 = vsel %vm1653_vm14, %v8089_v20, %v8088_v8  ;;  %v7989_v7 = vperm.slane %v17242_v26, 1  ;;  %v7991_v15 = vperm.slane %v17245_v38, 1  ;;  %v7993_v17 = vperm.slane %v17249_v5, 1  ;;  %v12451_v38 = vld [vmem:[%s17979_s6 + $0xb58] sm:$0xf] }
 0x5a0   :  { %9015 = vmatpush.bf16.msrb.mxu0 %v13165_v6  ;;  %v8092_v59 = vsel %vm1656_vm15, %v8091_v53, %v8090_v60  ;;  %v8011_v37 = vpack.c.bf16 %v7979_v31, %v7979_v31  ;;  %v8013_v35 = vpack.c.bf16 %v7981_v24, %v7981_v24  ;;  %v8015_v61 = vpack.c.bf16 %v7983_v9, %v7983_v9  ;;  %v17337_v27 = vld [vmem:[#allocation2 + $0xf1] ss:$8 sm:$0x3] }
 0x5a1   :  { %v8094_v41 = vsel %vm1659_vm0, %v8093_v1, %v8092_v59  ;;  %8762 = vmatpush.bf16.msrb.mxu3 %v13154_v18  ;;  %v8017_v2 = vpack.c.bf16 %v7985_v0, %v7985_v0  ;;  %v8019_v13 = vpack.c.bf16 %v7987_v36, %v7987_v36  ;;  %v8021_v26 = vpack.c.bf16 %v7989_v7, %v7989_v7  ;;  %v17339_v39 = vld [vmem:[#allocation2 + $0x131] ss:$8 sm:$0x3] }
 0x5a2   :  { %v8096_v49 = vsel %vm1662_vm1, %v8095_v43, %v8094_v41  ;;  %v8023_v42 = vpack.c.bf16 %v7991_v15, %v7991_v15  ;;  %v8025_v28 = vpack.c.bf16 %v7993_v17, %v7993_v17  ;;  %v8070_v56 = vunpack.c.l.b16 %v8011_v37  ;;  %v17341_v6 = vld [vmem:[#allocation2 + $0x171] ss:$8 sm:$0x3]  ;;  %8748 = vmatpush.bf16.msrb.mxu1 %v13147_v3  ;;  %v13160_v3 = vld [vmem:[%s17979_s6 + $0xb08] sm:$0xff] }
 0x5a3   :  { %v8098_v5 = vsel %vm1665_vm2, %v8097_v54, %v8096_v49  ;;  %v8072_v14 = vunpack.c.l.b16 %v8013_v35  ;;  %v8074_v57 = vunpack.c.l.b16 %v8015_v61  ;;  %v8076_v50 = vunpack.c.l.b16 %v8017_v2  ;;  %v17345_v52 = vld [vmem:[#allocation2 + $0x1f1] ss:$8 sm:$0x3] }
 0x5a4   :  { %9016 = vmatpush.bf16.msrb.mxu0 %v13164_v16  ;;  %v8113_v22 = vpack.c.b16 %v8098_v5, %v8098_v5  ;;  %v8078_v63 = vunpack.c.l.b16 %v8019_v13  ;;  %v8080_v33 = vunpack.c.l.b16 %v8021_v26  ;;  %v8082_v51 = vunpack.c.l.b16 %v8023_v42  ;;  %v13162_v53 = vld [vmem:[%s17979_s6 + $0xb18] sm:$0xff]  ;;  %v13177_v43 = vld [vmem:[%s17979_s6 + $0xb90] sm:$0xff] }
 0x5a5   :  { %v8084_v29 = vunpack.c.l.b16 %v8025_v28  ;;  %8763 = vmatpush.bf16.msrb.mxu3 %v13153_v34  ;;  %v8099_v21 = vrot.slane %v8072_v14, 7  ;;  %v8101_v45 = vrot.slane %v8074_v57, 6  ;;  %v8103_v55 = vrot.slane %v8076_v50, 5  ;;  %v13146_v24 = vld [vmem:[%s17979_s6 + $0xa98] sm:$0xff]  ;;  %v13169_v17 = vld [vmem:[%s17979_s6 + $0xb50] sm:$0xff]  ;;  %v13176_v28 = vld [vmem:[%s17979_s6 + $0xb88] sm:$0xff] }
 0x5a6   :  { %8207 = vmatmul.bf16.vlgmr.msra.gmra.mxu3 %v8113_v22  ;;  %v12452_v20 = vor.u32 %v13170_v48, %v12451_v38  ;;  %v8105_v62 = vrot.slane %v8078_v63, 4  ;;  %v8107_v32 = vrot.slane %v8080_v33, 3  ;;  %v8109_v25 = vrot.slane %v8082_v51, 2  ;;  %8749 = vmatpush.bf16.msrb.mxu1 %v13146_v24  ;;  %v17387_v63 = vpop.f32.mrf.mxu0  ;;  %v17389_v33 = vpop.f32.mrf.mxu2  ;;  %v13145_v51 = vld [vmem:[%s17979_s6 + $0xa90] sm:$0xff] }
 0x5a7   :  { %v8111_v1 = vrot.slane %v8084_v29, 1  ;;  %v8100_v54 = vsel %vm1647_vm12, %v8099_v21, %v8070_v56  ;;  %v8250_v8 = vperm.slane %v17325_v23, 0  ;;  %v8252_v31 = vperm.slane %v17327_v44, 0  ;;  %v13161_v56 = vld [vmem:[%s17979_s6 + $0xb10] sm:$0xff]  ;;  %v13175_v29 = vld [vmem:[%s17979_s6 + $0xb80] sm:$0xff] }
 0x5a8   :  { %9017 = vmatpush.bf16.msrb.mxu0 %v13163_v4  ;;  %v9013_v18 = vand.u32 %v12452_v20, %v14887_v11  ;;  %v8102_v16 = vsel %vm1650_vm13, %v8101_v45, %v8100_v54  ;;  %v8254_v60 = vperm.slane %v17335_v12, 0  ;;  %v8256_v9 = vperm.slane %v17337_v27, 0 }
 0x5a9   :  { %9287 = vmatpush.bf16.msra.mxu3 %v13178_v30  ;;  %v8258_v0 = vperm.slane %v17339_v39, 0  ;;  %v8104_v36 = vsel %vm1653_vm14, %v8103_v55, %v8102_v16  ;;  %v8260_v59 = vperm.slane %v17341_v6, 0  ;;  %v8262_v7 = vperm.slane %v17343_v19, 0 }
 0x5aa   :  { %9031 = vmatpush.bf16.msrb.mxu2 %v9013_v18  ;;  %v8264_v15 = vperm.slane %v17345_v52, 0  ;;  %v8106_v41 = vsel %vm1656_vm15, %v8105_v62, %v8104_v36  ;;  %v8282_v37 = vpack.c.bf16 %v8250_v8, %v8250_v8  ;;  %v8284_v35 = vpack.c.bf16 %v8252_v31, %v8252_v31  ;;  %v13167_v8 = vld [vmem:[%s17979_s6 + $0xb40] sm:$0xff]  ;;  %8750 = vmatpush.bf16.msrb.mxu1 %v13145_v51 }
 0x5ab   :  { %v8286_v61 = vpack.c.bf16 %v8254_v60, %v8254_v60  ;;  %v8108_v34 = vsel %vm1659_vm0, %v8107_v32, %v8106_v41  ;;  %v8288_v49 = vpack.c.bf16 %v8256_v9, %v8256_v9  ;;  %v8290_v2 = vpack.c.bf16 %v8258_v0, %v8258_v0  ;;  %v17426_v41 = vld [vmem:[#allocation2 + $0x32] ss:$8 sm:$0x3]  ;;  %v13159_v51 = vld [vmem:[%s17979_s6 + $0xb00] sm:$0xff] }
 0x5ac   :  { %9018 = vmatpush.bf16.msrb.mxu0 %v13162_v53  ;;  %v8292_v13 = vpack.c.bf16 %v8260_v59, %v8260_v59  ;;  %v8110_v26 = vsel %vm1662_vm1, %v8109_v25, %v8108_v34  ;;  %v8294_v38 = vpack.c.bf16 %v8262_v7, %v8262_v7  ;;  %v8296_v5 = vpack.c.bf16 %v8264_v15, %v8264_v15 }
 0x5ad   :  { %9288 = vmatpush.bf16.msra.mxu3 %v13177_v43  ;;  %v8341_v42 = vunpack.c.l.b16 %v8282_v37  ;;  %v8112_v48 = vsel %vm1665_vm2, %v8111_v1, %v8110_v26  ;;  %v8343_v30 = vunpack.c.l.b16 %v8284_v35  ;;  %v8345_v4 = vunpack.c.l.b16 %v8286_v61  ;;  %v17433_v26 = vld [vmem:[#allocation2 + $0xf2] ss:$8 sm:$0x3] }
 0x5ae   :  { %v8347_v46 = vunpack.c.l.b16 %v8288_v49  ;;  %9032 = vmatpush.bf16.msrb.mxu2 %v13169_v17  ;;  %v8114_v22 = vpack.c.b16 %v8112_v48, %v8112_v48  ;;  %v8349_v14 = vunpack.c.l.b16 %v8290_v2  ;;  %v8351_v57 = vunpack.c.l.b16 %v8292_v13  ;;  %v5762_v37 = vpop.f32.mrf.mxu0  ;;  %v5775_v35 = vpop.f32.mrf.mxu2  ;;  %v17431_v13 = vld [vmem:[#allocation2 + $0xb2] ss:$8 sm:$0x3] }
 0x5af   :  { %v8353_v50 = vunpack.c.l.b16 %v8294_v38  ;;  %v8355_v21 = vunpack.c.l.b16 %v8296_v5  ;;  %v8357_v45 = vrot.slane %v8343_v30, 7  ;;  %v8359_v55 = vrot.slane %v8345_v4, 6  ;;  %v17435_v38 = vld [vmem:[#allocation2 + $0x132] ss:$8 sm:$0x3]  ;;  %v13191_v5 = vld [vmem:[%s17979_s6 + $0xc00] sm:$0xff] }
 0x5b0   :  { %9019 = vmatpush.bf16.msrb.mxu0 %v13161_v56  ;;  %v8361_v20 = vrot.slane %v8347_v46, 5  ;;  %12216 = vmatmul.msk.bf16.vlgmr.msra.gmra.mxu1 %vm1410_vm9, %v8114_v22  ;;  %v8363_v53 = vrot.slane %v8349_v14, 4  ;;  %v8365_v62 = vrot.slane %v8351_v57, 3  ;;  %v5502_v25 = vadd.f32 %v17285_v40, %v17283_v47  ;;  %v17440_v30 = vld [vmem:[#allocation2 + $0x172] ss:$8 sm:$0x3] }
 0x5b1   :  { %9289 = vmatpush.bf16.msra.mxu3 %v13176_v28  ;;  %v8367_v32 = vrot.slane %v8353_v50, 2  ;;  %v8358_v1 = vsel %vm1647_vm12, %v8357_v45, %v8341_v42  ;;  %v8369_v43 = vrot.slane %v8355_v21, 1  ;;  %v8251_v54 = vperm.slane %v17325_v23, 1  ;;  %v17442_v4 = vld [vmem:[#allocation2 + $0x1b2] ss:$8 sm:$0x3] }
 0x5b2   :  { %v8253_v18 = vperm.slane %v17327_v44, 1  ;;  %9033 = vmatpush.bf16.msrb.mxu2 %v13168_v58  ;;  %v8360_v31 = vsel %vm1650_vm13, %v8359_v55, %v8358_v1  ;;  %v17411_v24 = vadd.f32 %v5502_v25, %v17298_v10  ;;  %v8255_v47 = vperm.slane %v17335_v12, 1  ;;  %v17444_v46 = vld [vmem:[#allocation2 + $0x1f2] ss:$8 sm:$0x3] }
 0x5b3   :  { %v8257_v40 = vperm.slane %v17337_v27, 1  ;;  %v8362_v23 = vsel %vm1653_vm14, %v8361_v20, %v8360_v31  ;;  %v8259_v44 = vperm.slane %v17339_v39, 1  ;;  %v8261_v16 = vperm.slane %v17341_v6, 1  ;;  %v13166_v39 = vld [vmem:[%s17979_s6 + $0xb38] sm:$0xff] }
 0x5b4   :  { %9020 = vmatpush.bf16.msrb.mxu0 %v13160_v3  ;;  %v8263_v60 = vperm.slane %v17343_v19, 1  ;;  %v8364_v9 = vsel %vm1656_vm15, %v8363_v53, %v8362_v23  ;;  %v8265_v0 = vperm.slane %v17345_v52, 1  ;;  %v8283_v10 = vpack.c.bf16 %v8251_v54, %v8251_v54  ;;  %v17428_v52 = vld [vmem:[#allocation2 + $0x72] ss:$8 sm:$0x3] }
 0x5b5   :  { %9290 = vmatpush.bf16.msra.mxu3 %v13175_v29  ;;  %v8285_v36 = vpack.c.bf16 %v8253_v18, %v8253_v18  ;;  %v8366_v12 = vsel %vm1659_vm0, %v8365_v62, %v8364_v9  ;;  %v8287_v59 = vpack.c.bf16 %v8255_v47, %v8255_v47  ;;  %v8289_v27 = vpack.c.bf16 %v8257_v40, %v8257_v40  ;;  %v13174_v50 = vld [vmem:[%s17979_s6 + $0xb78] sm:$0xff] }
 0x5b6   :  { %v8291_v7 = vpack.c.bf16 %v8259_v44, %v8259_v44  ;;  %9034 = vmatpush.bf16.msrb.mxu2 %v13167_v8  ;;  %v8368_v6 = vsel %vm1662_vm1, %v8367_v32, %v8366_v12  ;;  %v8293_v15 = vpack.c.bf16 %v8261_v16, %v8261_v16  ;;  %v8295_v19 = vpack.c.bf16 %v8263_v60, %v8263_v60  ;;  %v13190_v32 = vld [vmem:[%s17979_s6 + $0xbf8] sm:$0xff] }
 0x5b7   :  { %v8297_v17 = vpack.c.bf16 %v8265_v0, %v8265_v0  ;;  %v8370_v61 = vsel %vm1665_vm2, %v8369_v43, %v8368_v6  ;;  %v8342_v34 = vunpack.c.l.b16 %v8283_v10  ;;  %v8344_v49 = vunpack.c.l.b16 %v8285_v36 }
 0x5b8   :  { %v8346_v2 = vunpack.c.l.b16 %v8287_v59  ;;  %v8385_v42 = vpack.c.b16 %v8370_v61, %v8370_v61  ;;  %v8348_v28 = vunpack.c.l.b16 %v8289_v27  ;;  %v8350_v56 = vunpack.c.l.b16 %v8291_v7  ;;  %9021 = vmatpush.bf16.msrb.mxu0 %v13159_v51  ;;  %v13189_v7 = vld [vmem:[%s17979_s6 + $0xbf0] sm:$0xff] }
 0x5b9   :  { %v8352_v48 = vunpack.c.l.b16 %v8293_v15  ;;  %v8354_v58 = vunpack.c.l.b16 %v8295_v19  ;;  %v8356_v22 = vunpack.c.l.b16 %v8297_v17  ;;  %v8371_v14 = vrot.slane %v8344_v49, 7  ;;  %9291 = vmatpush.bf16.msra.mxu3 %v13174_v50  ;;  %v12530_v17 = vld [vmem:[%s17979_s6 + $0xbc0] sm:$0xf]  ;;  %v13183_v49 = vld [vmem:[%s17979_s6 + $0xbc0] sm:$0x70] }
 0x5ba   :  { %v8373_v57 = vrot.slane %v8346_v2, 6  ;;  %9035 = vmatpush.bf16.msrb.mxu2 %v13166_v39  ;;  %v8375_v29 = vrot.slane %v8348_v28, 5  ;;  %v8377_v3 = vrot.slane %v8350_v56, 4  ;;  %v8523_v45 = vperm.slane %v17426_v41, 1  ;;  %v13173_v2 = vld [vmem:[%s17979_s6 + $0xb70] sm:$0xff]  ;;  %v17487_v28 = vpop.f32.mrf.mxu1 }
 0x5bb   :  { %8479 = vmatmul.bf16.vlgmr.msra.gmra.mxu2 %v8385_v42  ;;  %v8379_v21 = vrot.slane %v8352_v48, 3  ;;  %v8372_v55 = vsel %vm1647_vm12, %v8371_v14, %v8342_v34  ;;  %v8381_v20 = vrot.slane %v8354_v58, 2  ;;  %v8383_v53 = vrot.slane %v8356_v22, 1  ;;  %v17485_v42 = vpop.f32.mrf.mxu3  ;;  %v13188_v14 = vld [vmem:[%s17979_s6 + $0xbe8] sm:$0xff] }
 0x5bc   :  { %v8525_v62 = vperm.slane %v17428_v52, 1  ;;  %v8374_v25 = vsel %vm1650_vm13, %v8373_v57, %v8372_v55  ;;  %v8527_v1 = vperm.slane %v17431_v13, 1  ;;  %v8529_v43 = vperm.slane %v17433_v26, 1 }
 0x5bd   :  { %v8531_v54 = vperm.slane %v17435_v38, 1  ;;  %v8376_v18 = vsel %vm1653_vm14, %v8375_v29, %v8374_v25  ;;  %v8533_v8 = vperm.slane %v17440_v30, 1  ;;  %v8535_v31 = vperm.slane %v17442_v4, 1  ;;  %9292 = vmatpush.bf16.msra.mxu3 %v13173_v2 }
 0x5be   :  { %9559 = vmatpush.bf16.msra.mxu2 %v13191_v5  ;;  %v8537_v47 = vperm.slane %v17444_v46, 1  ;;  %v8378_v40 = vsel %vm1656_vm15, %v8377_v3, %v8376_v18  ;;  %v8555_v23 = vpack.c.bf16 %v8523_v45, %v8523_v45  ;;  %v8557_v44 = vpack.c.bf16 %v8525_v62, %v8525_v62  ;;  %v13158_v5 = vld [vmem:[%s17979_s6 + $0xaf8] sm:$0xff] }
 0x5bf   :  { %v8559_v16 = vpack.c.bf16 %v8527_v1, %v8527_v1  ;;  %v8380_v60 = vsel %vm1659_vm0, %v8379_v21, %v8378_v40  ;;  %v8561_v9 = vpack.c.bf16 %v8529_v43, %v8529_v43  ;;  %v8563_v0 = vpack.c.bf16 %v8531_v54, %v8531_v54  ;;  %9022 = vmatpush.bf16.msrb.mxu0 %v13158_v5 }
 0x5c0   :  { %v8565_v10 = vpack.c.bf16 %v8533_v8, %v8533_v8  ;;  %v8382_v36 = vsel %vm1662_vm1, %v8381_v20, %v8380_v60  ;;  %v8567_v12 = vpack.c.bf16 %v8535_v31, %v8535_v31  ;;  %v8569_v59 = vpack.c.bf16 %v8537_v47, %v8537_v47  ;;  %v17517_v60 = vld [vmem:[#allocation2 + $0x33] ss:$8 sm:$0x3] }
 0x5c1   :  { %v8614_v27 = vunpack.c.l.b16 %v8555_v23  ;;  %v8384_v39 = vsel %vm1665_vm2, %v8383_v53, %v8382_v36  ;;  %v8616_v6 = vunpack.c.l.b16 %v8557_v44  ;;  %v8618_v15 = vunpack.c.l.b16 %v8559_v16 }
 0x5c2   :  { %9560 = vmatpush.bf16.msra.mxu2 %v13190_v32  ;;  %v8620_v19 = vunpack.c.l.b16 %v8561_v9  ;;  %v8386_v37 = vpack.c.b16 %v8384_v39, %v8384_v39  ;;  %v8622_v35 = vunpack.c.l.b16 %v8563_v0  ;;  %v8624_v61 = vunpack.c.l.b16 %v8565_v10  ;;  %v6047_v23 = vpop.f32.mrf.mxu1  ;;  %v17519_v9 = vld [vmem:[#allocation2 + $0x73] ss:$8 sm:$0x3] }
 0x5c3   :  { %v8626_v34 = vunpack.c.l.b16 %v8567_v12  ;;  %v8628_v56 = vunpack.c.l.b16 %v8569_v59  ;;  %v8643_v48 = vrot.slane %v8616_v6, 7  ;;  %v8645_v58 = vrot.slane %v8618_v15, 6  ;;  %v17521_v0 = vld [vmem:[#allocation2 + $0xb3] ss:$8 sm:$0x3]  ;;  %v13172_v15 = vld [vmem:[%s17979_s6 + $0xb68] sm:$0xff] }
 0x5c4   :  { %v8647_v22 = vrot.slane %v8620_v19, 5  ;;  %12295 = vmatmul.msk.bf16.vlgmr.msra.gmra.mxu0 %vm1410_vm9, %v8386_v37  ;;  %v8649_v57 = vrot.slane %v8622_v35, 4  ;;  %v8651_v50 = vrot.slane %v8624_v61, 3  ;;  %v5774_v29 = vadd.f32 %v17389_v33, %v17387_v63  ;;  %v17523_v10 = vld [vmem:[#allocation2 + $0xf3] ss:$8 sm:$0x3]  ;;  %9293 = vmatpush.bf16.msra.mxu3 %v13172_v15 }
 0x5c5   :  { %v8653_v51 = vrot.slane %v8626_v34, 2  ;;  %v8644_v3 = vsel %vm1647_vm12, %v8643_v48, %v8614_v27  ;;  %v8655_v21 = vrot.slane %v8628_v56, 1  ;;  %v12531_v45 = vor.u32 %v13183_v49, %v12530_v17  ;;  %v17527_v39 = vld [vmem:[#allocation2 + $0x173] ss:$8 sm:$0x3]  ;;  %v13187_v49 = vld [vmem:[%s17979_s6 + $0xbe0] sm:$0xff] }
 0x5c6   :  { %9561 = vmatpush.bf16.msra.mxu2 %v13189_v7  ;;  %v8522_v55 = vperm.slane %v17426_v41, 0  ;;  %v8646_v20 = vsel %vm1650_vm13, %v8645_v58, %v8644_v3  ;;  %v17499_v53 = vadd.f32 %v5774_v29, %v17411_v24  ;;  %v8524_v62 = vperm.slane %v17428_v52, 0  ;;  %v17525_v7 = vld [vmem:[#allocation2 + $0x133] ss:$8 sm:$0x3] }
 0x5c7   :  { %v8526_v32 = vperm.slane %v17431_v13, 0  ;;  %v8648_v25 = vsel %vm1653_vm14, %v8647_v22, %v8646_v20  ;;  %v9285_v63 = vand.u32 %v12531_v45, %v14887_v11  ;;  %v8528_v33 = vperm.slane %v17433_v26, 0  ;;  %v13182_v26 = vld [vmem:[%s17979_s6 + $0xbb8] sm:$0xff]  ;;  %v13181_v34 = vld [vmem:[%s17979_s6 + $0xbb0] sm:$0xff] }
 0x5c8   :  { %v8530_v1 = vperm.slane %v17435_v38, 0  ;;  %v8650_v41 = vsel %vm1656_vm15, %v8649_v57, %v8648_v25  ;;  %v8532_v43 = vperm.slane %v17440_v30, 0  ;;  %v8534_v24 = vperm.slane %v17442_v4, 0  ;;  %v6034_v30 = vpop.f32.mrf.mxu3  ;;  %v17529_v6 = vld [vmem:[#allocation2 + $0x1b3] ss:$8 sm:$0x3] }
 0x5c9   :  { %v8536_v54 = vperm.slane %v17444_v46, 0  ;;  %v8652_v52 = vsel %vm1659_vm0, %v8651_v50, %v8650_v41  ;;  %9303 = vmatpush.bf16.msra.mxu1 %v9285_v63  ;;  %v8554_v13 = vpack.c.bf16 %v8522_v55, %v8522_v55  ;;  %v8556_v18 = vpack.c.bf16 %v8524_v62, %v8524_v62  ;;  %v17534_v61 = vld [vmem:[#allocation2 + $0x1f3] ss:$8 sm:$0x3]  ;;  %v13171_v50 = vld [vmem:[%s17979_s6 + $0xb60] sm:$0xff]  ;;  %v13180_v25 = vld [vmem:[%s17979_s6 + $0xba8] sm:$0xff] }
 0x5ca   :  { %9562 = vmatpush.bf16.msra.mxu2 %v13188_v14  ;;  %v8558_v8 = vpack.c.bf16 %v8526_v32, %v8526_v32  ;;  %v8654_v38 = vsel %vm1662_vm1, %v8653_v51, %v8652_v52  ;;  %v8560_v31 = vpack.c.bf16 %v8528_v33, %v8528_v33  ;;  %v8562_v47 = vpack.c.bf16 %v8530_v1, %v8530_v1  ;;  %v13186_v45 = vld [vmem:[%s17979_s6 + $0xbd8] sm:$0xff] }
 0x5cb   :  { %v8564_v40 = vpack.c.bf16 %v8532_v43, %v8532_v43  ;;  %v8656_v4 = vsel %vm1665_vm2, %v8655_v21, %v8654_v38  ;;  %v8566_v46 = vpack.c.bf16 %v8534_v24, %v8534_v24  ;;  %v8568_v44 = vpack.c.bf16 %v8536_v54, %v8536_v54  ;;  %9294 = vmatpush.bf16.msra.mxu3 %v13171_v50 }
 0x5cc   :  { %v8613_v16 = vunpack.c.l.b16 %v8554_v13  ;;  %v8658_v36 = vpack.c.b16 %v8656_v4, %v8656_v4  ;;  %v8615_v12 = vunpack.c.l.b16 %v8556_v18  ;;  %v8617_v59 = vunpack.c.l.b16 %v8558_v8 }
 0x5cd   :  { %v8619_v27 = vunpack.c.l.b16 %v8560_v31  ;;  %v8621_v19 = vunpack.c.l.b16 %v8562_v47  ;;  %v8623_v17 = vunpack.c.l.b16 %v8564_v40  ;;  %v8625_v37 = vunpack.c.l.b16 %v8566_v46  ;;  %9304 = vmatpush.bf16.msra.mxu1 %v13182_v26 }
 0x5ce   :  { %v8627_v35 = vunpack.c.l.b16 %v8568_v44  ;;  %12374 = vmatmul.msk.bf16.vlgmr.msrb.gmra.mxu3 %vm1410_vm9, %v8658_v36  ;;  %v8629_v2 = vrot.slane %v8615_v12, 7  ;;  %v8631_v5 = vrot.slane %v8617_v59, 6  ;;  %v8795_v48 = vperm.slane %v17517_v60, 1  ;;  %9563 = vmatpush.bf16.msra.mxu2 %v13187_v49  ;;  %v12609_v44 = vld [vmem:[%s17979_s6 + $0xc28] sm:$0xf]  ;;  %v13179_v36 = vld [vmem:[%s17979_s6 + $0xba0] sm:$0xff] }
 0x5cf   :  { %v8633_v56 = vrot.slane %v8619_v27, 5  ;;  %v8635_v58 = vrot.slane %v8621_v19, 4  ;;  %v8637_v22 = vrot.slane %v8623_v17, 3  ;;  %v8639_v14 = vrot.slane %v8625_v37, 2  ;;  %v13204_v19 = vld [vmem:[%s17979_s6 + $0xc68] sm:$0xff]  ;;  %v17579_v17 = vpop.f32.mrf.mxu2  ;;  %v17581_v37 = vpop.f32.mrf.mxu0 }
 0x5d0   :  { %v8641_v57 = vrot.slane %v8627_v35, 1  ;;  %v8630_v51 = vsel %vm1647_vm12, %v8629_v2, %v8613_v16  ;;  %v8797_v29 = vperm.slane %v17519_v9, 1  ;;  %v8799_v3 = vperm.slane %v17521_v0, 1  ;;  %v13196_v16 = vld [vmem:[%s17979_s6 + $0xc28] sm:$0x70]  ;;  %v13185_v35 = vld [vmem:[%s17979_s6 + $0xbd0] sm:$0xff] }
 0x5d1   :  { %v8801_v21 = vperm.slane %v17523_v10, 1  ;;  %v8632_v55 = vsel %vm1650_vm13, %v8631_v5, %v8630_v51  ;;  %v8803_v20 = vperm.slane %v17525_v7, 1  ;;  %v8805_v62 = vperm.slane %v17527_v39, 1  ;;  %9305 = vmatpush.bf16.msra.mxu1 %v13181_v34 }
 0x5d2   :  { %v8807_v32 = vperm.slane %v17529_v6, 1  ;;  %v8634_v63 = vsel %vm1653_vm14, %v8633_v56, %v8632_v55  ;;  %v8809_v33 = vperm.slane %v17534_v61, 1  ;;  %v8827_v1 = vpack.c.bf16 %v8795_v48, %v8795_v48  ;;  %9564 = vmatpush.bf16.msra.mxu2 %v13186_v45  ;;  %v13203_v55 = vld [vmem:[%s17979_s6 + $0xc60] sm:$0xff] }
 0x5d3   :  { %v8829_v41 = vpack.c.bf16 %v8797_v29, %v8797_v29  ;;  %v8636_v43 = vsel %vm1656_vm15, %v8635_v58, %v8634_v63  ;;  %v8831_v24 = vpack.c.bf16 %v8799_v3, %v8799_v3  ;;  %v8833_v54 = vpack.c.bf16 %v8801_v21, %v8801_v21 }
 0x5d4   :  { %v8835_v52 = vpack.c.bf16 %v8803_v20, %v8803_v20  ;;  %v8638_v13 = vsel %vm1659_vm0, %v8637_v22, %v8636_v43  ;;  %v8837_v18 = vpack.c.bf16 %v8805_v62, %v8805_v62  ;;  %v8839_v8 = vpack.c.bf16 %v8807_v32, %v8807_v32  ;;  %v13195_v32 = vld [vmem:[%s17979_s6 + $0xc20] sm:$0xff]  ;;  %v17613_v43 = vld [vmem:[#allocation2 + $0x34] ss:$8 sm:$0x3] }
 0x5d5   :  { %v8841_v26 = vpack.c.bf16 %v8809_v33, %v8809_v33  ;;  %v8640_v38 = vsel %vm1662_vm1, %v8639_v14, %v8638_v13  ;;  %v8886_v31 = vunpack.c.l.b16 %v8827_v1  ;;  %v8888_v47 = vunpack.c.l.b16 %v8829_v41  ;;  %9306 = vmatpush.bf16.msra.mxu1 %v13180_v25 }
 0x5d6   :  { %v8890_v40 = vunpack.c.l.b16 %v8831_v24  ;;  %v8642_v30 = vsel %vm1665_vm2, %v8641_v57, %v8640_v38  ;;  %v8892_v23 = vunpack.c.l.b16 %v8833_v54  ;;  %v8894_v4 = vunpack.c.l.b16 %v8835_v52  ;;  %9565 = vmatpush.bf16.msra.mxu2 %v13185_v35  ;;  %v17621_v38 = vld [vmem:[#allocation2 + $0x134] ss:$8 sm:$0x3] }
 0x5d7   :  { %v8896_v46 = vunpack.c.l.b16 %v8837_v18  ;;  %v8657_v12 = vpack.c.b16 %v8642_v30, %v8642_v30  ;;  %v8898_v59 = vunpack.c.l.b16 %v8839_v8  ;;  %v8900_v27 = vunpack.c.l.b16 %v8841_v26  ;;  %v6319_v24 = vpop.f32.mrf.mxu0  ;;  %v17617_v8 = vld [vmem:[#allocation2 + $0xb4] ss:$8 sm:$0x3] }
 0x5d8   :  { %v8915_v15 = vrot.slane %v8888_v47, 7  ;;  %v8917_v34 = vrot.slane %v8890_v40, 6  ;;  %v8919_v49 = vrot.slane %v8892_v23, 5  ;;  %v8921_v2 = vrot.slane %v8894_v4, 4  ;;  %v13184_v47 = vld [vmem:[%s17979_s6 + $0xbc8] sm:$0xff] }
 0x5d9   :  { %v8923_v5 = vrot.slane %v8896_v46, 3  ;;  %8751 = vmatmul.bf16.vlgmr.msrb.gmra.mxu1 %v8657_v12  ;;  %v8925_v48 = vrot.slane %v8898_v59, 2  ;;  %v8927_v58 = vrot.slane %v8900_v27, 1  ;;  %v12610_v22 = vor.u32 %v13196_v16, %v12609_v44  ;;  %v17619_v26 = vld [vmem:[#allocation2 + $0xf4] ss:$8 sm:$0x3] }
 0x5da   :  { %v8916_v56 = vsel %vm1647_vm12, %v8915_v15, %v8886_v31  ;;  %v6046_v57 = vadd.f32 %v17487_v28, %v17485_v42  ;;  %v8794_v50 = vperm.slane %v17517_v60, 0  ;;  %v8796_v51 = vperm.slane %v17519_v9, 0  ;;  %9307 = vmatpush.bf16.msra.mxu1 %v13179_v36  ;;  %v13202_v31 = vld [vmem:[%s17979_s6 + $0xc58] sm:$0xff]  ;;  %9566 = vmatpush.bf16.msra.mxu2 %v13184_v47 }
 0x5db   :  { %v8918_v14 = vsel %vm1650_vm13, %v8917_v34, %v8916_v56  ;;  %v9557_v3 = vand.u32 %v12610_v22, %v14887_v11  ;;  %v8798_v21 = vperm.slane %v17521_v0, 0  ;;  %v8800_v45 = vperm.slane %v17523_v10, 0  ;;  %v13194_v46 = vld [vmem:[%s17979_s6 + $0xc18] sm:$0xff] }
 0x5dc   :  { %v8920_v29 = vsel %vm1653_vm14, %v8919_v49, %v8918_v14  ;;  %v17601_v28 = vadd.f32 %v6046_v57, %v17499_v53  ;;  %v8802_v60 = vperm.slane %v17525_v7, 0  ;;  %v8804_v9 = vperm.slane %v17527_v39, 0  ;;  %v17632_v44 = vld [vmem:[#allocation2 + $0x174] ss:$8 sm:$0x3] }
 0x5dd   :  { %v8922_v42 = vsel %vm1656_vm15, %v8921_v2, %v8920_v29  ;;  %9575 = vmatpush.bf16.msra.mxu0 %v9557_v3  ;;  %v8806_v0 = vperm.slane %v17529_v6, 0  ;;  %v8808_v10 = vperm.slane %v17534_v61, 0  ;;  %v8826_v62 = vpack.c.bf16 %v8794_v50, %v8794_v50  ;;  %v17615_v6 = vld [vmem:[#allocation2 + $0x74] ss:$8 sm:$0x3]  ;;  %v6306_v61 = vpop.f32.mrf.mxu2 }
 0x5de   :  { %9831 = vmatpush.bf16.msrb.mxu1 %v13204_v19  ;;  %v8924_v20 = vsel %vm1659_vm0, %v8923_v5, %v8922_v42  ;;  %v8828_v53 = vpack.c.bf16 %v8796_v51, %v8796_v51  ;;  %v8830_v63 = vpack.c.bf16 %v8798_v21, %v8798_v21  ;;  %v8832_v33 = vpack.c.bf16 %v8800_v45, %v8800_v45  ;;  %v17634_v16 = vld [vmem:[#allocation2 + $0x1b4] ss:$8 sm:$0x3] }
 0x5df   :  { %v8926_v25 = vsel %vm1662_vm1, %v8925_v48, %v8924_v20  ;;  %v8834_v39 = vpack.c.bf16 %v8802_v60, %v8802_v60  ;;  %v8836_v1 = vpack.c.bf16 %v8804_v9, %v8804_v9  ;;  %v8838_v41 = vpack.c.bf16 %v8806_v0, %v8806_v0  ;;  %v17637_v27 = vld [vmem:[#allocation2 + $0x1f4] ss:$8 sm:$0x3] }
 0x5e0   :  { %v8928_v7 = vsel %vm1665_vm2, %v8927_v58, %v8926_v25  ;;  %v8840_v52 = vpack.c.bf16 %v8808_v10, %v8808_v10  ;;  %v8885_v13 = vunpack.c.l.b16 %v8826_v62  ;;  %v8887_v18 = vunpack.c.l.b16 %v8828_v53  ;;  %v13193_v50 = vld [vmem:[%s17979_s6 + $0xc10] sm:$0xff] }
 0x5e1   :  { %v8930_v54 = vpack.c.b16 %v8928_v7, %v8928_v7  ;;  %v8889_v40 = vunpack.c.l.b16 %v8830_v63  ;;  %v8891_v30 = vunpack.c.l.b16 %v8832_v33  ;;  %v8893_v23 = vunpack.c.l.b16 %v8834_v39  ;;  %9576 = vmatpush.bf16.msra.mxu0 %v13195_v32 }
 0x5e2   :  { %9832 = vmatpush.bf16.msrb.mxu1 %v13203_v55  ;;  %v8895_v4 = vunpack.c.l.b16 %v8836_v1  ;;  %v8897_v36 = vunpack.c.l.b16 %v8838_v41  ;;  %v8899_v12 = vunpack.c.l.b16 %v8840_v52  ;;  %v8901_v59 = vrot.slane %v8887_v18, 7  ;;  %v12688_v1 = vld [vmem:[%s17979_s6 + $0xc90] sm:$0xf]  ;;  %v13192_v41 = vld [vmem:[%s17979_s6 + $0xc08] sm:$0xff] }
 0x5e3   :  { %12453 = vmatmul.msk.bf16.vlgmr.msrb.gmra.mxu2 %vm1410_vm9, %v8930_v54  ;;  %v9066_v15 = vperm.slane %v17613_v43, 0  ;;  %v8903_v19 = vrot.slane %v8889_v40, 6  ;;  %v8905_v35 = vrot.slane %v8891_v30, 5  ;;  %v8907_v34 = vrot.slane %v8893_v23, 4  ;;  %v13217_v18 = vld [vmem:[%s17979_s6 + $0xcd0] sm:$0xff] }
 0x5e4   :  { %v8909_v49 = vrot.slane %v8895_v4, 3  ;;  %v8902_v2 = vsel %vm1647_vm12, %v8901_v59, %v8885_v13  ;;  %v8911_v5 = vrot.slane %v8897_v36, 2  ;;  %v8913_v56 = vrot.slane %v8899_v12, 1  ;;  %v13209_v13 = vld [vmem:[%s17979_s6 + $0xc90] sm:$0x70]  ;;  %v13200_v59 = vld [vmem:[%s17979_s6 + $0xc48] sm:$0xff] }
 0x5e5   :  { %v9068_v48 = vperm.slane %v17615_v6, 0  ;;  %v8904_v58 = vsel %vm1650_vm13, %v8903_v19, %v8902_v2  ;;  %9577 = vmatpush.bf16.msra.mxu0 %v13194_v46  ;;  %v9070_v22 = vperm.slane %v17617_v8, 0  ;;  %v9072_v14 = vperm.slane %v17619_v26, 0 }
 0x5e6   :  { %9833 = vmatpush.bf16.msrb.mxu1 %v13202_v31  ;;  %v9074_v57 = vperm.slane %v17621_v38, 0  ;;  %v8906_v51 = vsel %vm1653_vm14, %v8905_v35, %v8904_v58  ;;  %v9076_v29 = vperm.slane %v17632_v44, 0  ;;  %v9078_v3 = vperm.slane %v17634_v16, 0  ;;  %v13201_v31 = vld [vmem:[%s17979_s6 + $0xc50] sm:$0xff] }
 0x5e7   :  { %v9080_v21 = vperm.slane %v17637_v27, 0  ;;  %v8908_v45 = vsel %vm1656_vm15, %v8907_v34, %v8906_v51  ;;  %v9098_v55 = vpack.c.bf16 %v9066_v15, %v9066_v15  ;;  %v9100_v42 = vpack.c.bf16 %v9068_v48, %v9068_v48 }
 0x5e8   :  { %v9102_v60 = vpack.c.bf16 %v9070_v22, %v9070_v22  ;;  %v8910_v9 = vsel %vm1659_vm0, %v8909_v49, %v8908_v45  ;;  %v9104_v20 = vpack.c.bf16 %v9072_v14, %v9072_v14  ;;  %v9106_v0 = vpack.c.bf16 %v9074_v57, %v9074_v57 }
 0x5e9   :  { %v9108_v10 = vpack.c.bf16 %v9076_v29, %v9076_v29  ;;  %v8912_v62 = vsel %vm1662_vm1, %v8911_v5, %v8910_v9  ;;  %v9110_v32 = vpack.c.bf16 %v9078_v3, %v9078_v3  ;;  %v9112_v25 = vpack.c.bf16 %v9080_v21, %v9080_v21  ;;  %9578 = vmatpush.bf16.msra.mxu0 %v13193_v50  ;;  %v17710_v9 = vld [vmem:[#allocation2 + $0x75] ss:$8 sm:$0x3] }
 0x5ea   :  { %v9157_v53 = vunpack.c.l.b16 %v9098_v55  ;;  %v8914_v63 = vsel %vm1665_vm2, %v8913_v56, %v8912_v62  ;;  %v9159_v33 = vunpack.c.l.b16 %v9100_v42  ;;  %v9161_v7 = vunpack.c.l.b16 %v9102_v60  ;;  %9834 = vmatpush.bf16.msrb.mxu1 %v13201_v31  ;;  %v12767_v55 = vld [vmem:[%s17979_s6 + $0xcf8] sm:$0xf]  ;;  %v13222_v42 = vld [vmem:[%s17979_s6 + $0xcf8] sm:$0x70] }
 0x5eb   :  { %v9163_v39 = vunpack.c.l.b16 %v9104_v20  ;;  %v8929_v61 = vpack.c.b16 %v8914_v63, %v8914_v63  ;;  %v9165_v24 = vunpack.c.l.b16 %v9106_v0  ;;  %v9167_v54 = vunpack.c.l.b16 %v9108_v10  ;;  %v17708_v60 = vld [vmem:[#allocation2 + $0x35] ss:$8 sm:$0x3]  ;;  %v13215_v63 = vld [vmem:[%s17979_s6 + $0xcc0] sm:$0xff] }
 0x5ec   :  { %v9169_v52 = vunpack.c.l.b16 %v9110_v32  ;;  %v9171_v47 = vunpack.c.l.b16 %v9112_v25  ;;  %v9173_v40 = vrot.slane %v9159_v33, 7  ;;  %v9175_v30 = vrot.slane %v9161_v7, 6  ;;  %v17712_v32 = vld [vmem:[#allocation2 + $0xb5] ss:$8 sm:$0x3] }
 0x5ed   :  { %v9177_v23 = vrot.slane %v9163_v39, 5  ;;  %9023 = vmatmul.bf16.vlgmr.msrb.gmra.mxu0 %v8929_v61  ;;  %v9179_v4 = vrot.slane %v9165_v24, 4  ;;  %v9181_v46 = vrot.slane %v9167_v54, 3  ;;  %v6318_v12 = vadd.f32 %v17581_v37, %v17579_v17  ;;  %v13216_v37 = vld [vmem:[%s17979_s6 + $0xcc8] sm:$0xff]  ;;  %v13207_v54 = vld [vmem:[%s17979_s6 + $0xc80] sm:$0xff] }
 0x5ee   :  { %v9183_v36 = vrot.slane %v9169_v52, 2  ;;  %v9174_v15 = vsel %vm1647_vm12, %v9173_v40, %v9157_v53  ;;  %v9185_v19 = vrot.slane %v9171_v47, 1  ;;  %v12689_v35 = vor.u32 %v13209_v13, %v12688_v1  ;;  %9579 = vmatpush.bf16.msra.mxu0 %v13192_v41  ;;  %9835 = vmatpush.bf16.msrb.mxu1 %v13200_v59  ;;  %v17714_v25 = vld [vmem:[#allocation2 + $0xf5] ss:$8 sm:$0x3]  ;;  %v17730_v52 = vpop.f32.mrf.mxu1  ;;  %v17732_v13 = vpop.f32.mrf.mxu3 }
 0x5ef   :  { %v9067_v34 = vperm.slane %v17613_v43, 1  ;;  %v9176_v49 = vsel %vm1650_vm13, %v9175_v30, %v9174_v15  ;;  %v17681_v2 = vadd.f32 %v6318_v12, %v17601_v28  ;;  %v9069_v5 = vperm.slane %v17615_v6, 1  ;;  %v17716_v53 = vld [vmem:[#allocation2 + $0x135] ss:$8 sm:$0x3] }
 0x5f0   :  { %v9071_v17 = vperm.slane %v17617_v8, 1  ;;  %v9178_v56 = vsel %vm1653_vm14, %v9177_v23, %v9176_v49  ;;  %v9829_v48 = vand.u32 %v12689_v35, %v14887_v11  ;;  %v9073_v43 = vperm.slane %v17619_v26, 1  ;;  %v13208_v26 = vld [vmem:[%s17979_s6 + $0xc88] sm:$0xff]  ;;  %v17721_v41 = vld [vmem:[#allocation2 + $0x175] ss:$8 sm:$0x3] }
 0x5f1   :  { %v9075_v58 = vperm.slane %v17621_v38, 1  ;;  %v9180_v28 = vsel %vm1656_vm15, %v9179_v4, %v9178_v56  ;;  %v9077_v22 = vperm.slane %v17632_v44, 1  ;;  %v9079_v6 = vperm.slane %v17634_v16, 1  ;;  %v17723_v61 = vld [vmem:[#allocation2 + $0x1b5] ss:$8 sm:$0x3] }
 0x5f2   :  { %10103 = vmatpush.bf16.msrb.mxu0 %v13217_v18  ;;  %v9081_v8 = vperm.slane %v17637_v27, 1  ;;  %v9182_v14 = vsel %vm1659_vm0, %v9181_v46, %v9180_v28  ;;  %9847 = vmatpush.bf16.msrb.mxu3 %v9829_v48  ;;  %v9099_v57 = vpack.c.bf16 %v9067_v34, %v9067_v34  ;;  %v9101_v50 = vpack.c.bf16 %v9069_v5, %v9069_v5  ;;  %v17725_v24 = vld [vmem:[#allocation2 + $0x1f5] ss:$8 sm:$0x3]  ;;  %v13199_v18 = vld [vmem:[%s17979_s6 + $0xc40] sm:$0xff] }
 0x5f3   :  { %v9103_v51 = vpack.c.bf16 %v9071_v17, %v9071_v17  ;;  %v9184_v38 = vsel %vm1662_vm1, %v9183_v36, %v9182_v14  ;;  %v9105_v29 = vpack.c.bf16 %v9073_v43, %v9073_v43  ;;  %v9107_v3 = vpack.c.bf16 %v9075_v58, %v9075_v58  ;;  %v13214_v23 = vld [vmem:[%s17979_s6 + $0xcb8] sm:$0xff]  ;;  %9836 = vmatpush.bf16.msrb.mxu1 %v13199_v18  ;;  %v13221_v28 = vld [vmem:[%s17979_s6 + $0xcf0] sm:$0xff] }
 0x5f4   :  { %v9109_v44 = vpack.c.bf16 %v9077_v22, %v9077_v22  ;;  %v9186_v16 = vsel %vm1665_vm2, %v9185_v19, %v9184_v38  ;;  %v9111_v27 = vpack.c.bf16 %v9079_v6, %v9079_v6  ;;  %v9113_v21 = vpack.c.bf16 %v9081_v8, %v9081_v8  ;;  %v13198_v59 = vld [vmem:[%s17979_s6 + $0xc38] sm:$0xff] }
 0x5f5   :  { %v9158_v45 = vunpack.c.l.b16 %v9099_v57  ;;  %v9201_v20 = vpack.c.b16 %v9186_v16, %v9186_v16  ;;  %v9160_v0 = vunpack.c.l.b16 %v9101_v50  ;;  %v9162_v10 = vunpack.c.l.b16 %v9103_v51  ;;  %v13206_v56 = vld [vmem:[%s17979_s6 + $0xc78] sm:$0xff]  ;;  %v13205_v16 = vld [vmem:[%s17979_s6 + $0xc70] sm:$0xff] }
 0x5f6   :  { %10104 = vmatpush.bf16.msrb.mxu0 %v13216_v37  ;;  %v9164_v62 = vunpack.c.l.b16 %v9105_v29  ;;  %v9166_v33 = vunpack.c.l.b16 %v9107_v3  ;;  %v9168_v7 = vunpack.c.l.b16 %v9109_v44  ;;  %v9170_v39 = vunpack.c.l.b16 %v9111_v27  ;;  %9848 = vmatpush.bf16.msrb.mxu3 %v13208_v26  ;;  %v6578_v27 = vpop.f32.mrf.mxu1 }
 0x5f7   :  { %v9172_v1 = vunpack.c.l.b16 %v9113_v21  ;;  %9295 = vmatmul.bf16.vlgmr.msra.gmra.mxu3 %v9201_v20  ;;  %v9187_v31 = vrot.slane %v9160_v0, 7  ;;  %v9189_v47 = vrot.slane %v9162_v10, 6  ;;  %v12768_v30 = vor.u32 %v13222_v42, %v12767_v55  ;;  %9837 = vmatpush.bf16.msrb.mxu1 %v13198_v59  ;;  %v6591_v21 = vpop.f32.mrf.mxu3  ;;  %v13220_v0 = vld [vmem:[%s17979_s6 + $0xce8] sm:$0xff]  ;;  %v13213_v10 = vld [vmem:[%s17979_s6 + $0xcb0] sm:$0xff] }
 0x5f8   :  { %v9191_v40 = vrot.slane %v9164_v62, 5  ;;  %v9193_v4 = vrot.slane %v9166_v33, 4  ;;  %v9195_v46 = vrot.slane %v9168_v7, 3  ;;  %v9197_v36 = vrot.slane %v9170_v39, 2  ;;  %v17774_v39 = vpop.f32.mrf.mxu0 }
 0x5f9   :  { %v9199_v12 = vrot.slane %v9172_v1, 1  ;;  %v9188_v15 = vsel %vm1647_vm12, %v9187_v31, %v9158_v45  ;;  %v10101_v19 = vand.u32 %v12768_v30, %v14887_v11  ;;  %v9338_v35 = vperm.slane %v17708_v60, 0  ;;  %v17776_v1 = vpop.f32.mrf.mxu2 }
 0x5fa   :  { %10105 = vmatpush.bf16.msrb.mxu0 %v13215_v63  ;;  %v9340_v34 = vperm.slane %v17710_v9, 0  ;;  %v9190_v49 = vsel %vm1650_vm13, %v9189_v47, %v9188_v15  ;;  %v9342_v5 = vperm.slane %v17712_v32, 0  ;;  %v9344_v17 = vperm.slane %v17714_v25, 0  ;;  %9849 = vmatpush.bf16.msrb.mxu3 %v13207_v54  ;;  %v13197_v54 = vld [vmem:[%s17979_s6 + $0xc30] sm:$0xff] }
 0x5fb   :  { %v9346_v37 = vperm.slane %v17716_v53, 0  ;;  %v9192_v48 = vsel %vm1653_vm14, %v9191_v40, %v9190_v49  ;;  %10119 = vmatpush.bf16.msrb.mxu2 %v10101_v19  ;;  %v9348_v11 = vperm.slane %v17721_v41, 0  ;;  %v9350_v43 = vperm.slane %v17723_v61, 0  ;;  %v13219_v19 = vld [vmem:[%s17979_s6 + $0xce0] sm:$0xff]  ;;  %9838 = vmatpush.bf16.msrb.mxu1 %v13197_v54 }
 0x5fc   :  { %v9352_v58 = vperm.slane %v17725_v24, 0  ;;  %v9194_v22 = vsel %vm1656_vm15, %v9193_v4, %v9192_v48  ;;  %v9370_v6 = vpack.c.bf16 %v9338_v35, %v9338_v35  ;;  %v9372_v8 = vpack.c.bf16 %v9340_v34, %v9340_v34 }
 0x5fd   :  { %v9374_v14 = vpack.c.bf16 %v9342_v5, %v9342_v5  ;;  %v9196_v57 = vsel %vm1659_vm0, %v9195_v46, %v9194_v22  ;;  %v9376_v50 = vpack.c.bf16 %v9344_v17, %v9344_v17  ;;  %v9378_v51 = vpack.c.bf16 %v9346_v37, %v9346_v37 }
 0x5fe   :  { %10106 = vmatpush.bf16.msrb.mxu0 %v13214_v23  ;;  %v9380_v26 = vpack.c.bf16 %v9348_v11, %v9348_v11  ;;  %v9198_v38 = vsel %vm1662_vm1, %v9197_v36, %v9196_v57  ;;  %v9382_v29 = vpack.c.bf16 %v9350_v43, %v9350_v43  ;;  %v9384_v3 = vpack.c.bf16 %v9352_v58, %v9352_v58 }
 0x5ff   :  { %v9429_v44 = vunpack.c.l.b16 %v9370_v6  ;;  %9850 = vmatpush.bf16.msrb.mxu3 %v13206_v56  ;;  %v9200_v45 = vsel %vm1665_vm2, %v9199_v12, %v9198_v38  ;;  %v9431_v55 = vunpack.c.l.b16 %v9372_v8  ;;  %v9433_v42 = vunpack.c.l.b16 %v9374_v14  ;;  %10120 = vmatpush.bf16.msrb.mxu2 %v13221_v28  ;;  %v17802_v6 = vld [vmem:[#allocation2 + $0x36] ss:$8 sm:$0x3] }
 0x600   :  { %v9435_v20 = vunpack.c.l.b16 %v9376_v50  ;;  %v9202_v62 = vpack.c.b16 %v9200_v45, %v9200_v45  ;;  %v9437_v63 = vunpack.c.l.b16 %v9378_v51  ;;  %v9439_v33 = vunpack.c.l.b16 %v9380_v26  ;;  %v17804_v8 = vld [vmem:[#allocation2 + $0x76] ss:$8 sm:$0x3]  ;;  %v6850_v57 = vpop.f32.mrf.mxu0 }
 0x601   :  { %v9441_v7 = vunpack.c.l.b16 %v9382_v29  ;;  %v9443_v18 = vunpack.c.l.b16 %v9384_v3  ;;  %v9445_v31 = vrot.slane %v9431_v55, 7  ;;  %v9447_v47 = vrot.slane %v9433_v42, 6  ;;  %v17806_v14 = vld [vmem:[#allocation2 + $0xb6] ss:$8 sm:$0x3]  ;;  %v6863_v50 = vpop.f32.mrf.mxu2 }
 0x602   :  { %v9449_v40 = vrot.slane %v9435_v20, 5  ;;  %10107 = vmatpush.bf16.msrb.mxu0 %v13213_v10  ;;  %12532 = vmatmul.msk.bf16.vlgmr.msra.gmra.mxu1 %vm1410_vm9, %v9202_v62  ;;  %v9451_v30 = vrot.slane %v9437_v63, 4  ;;  %v9453_v23 = vrot.slane %v9439_v33, 3  ;;  %v9339_v46 = vperm.slane %v17708_v60, 1 }
 0x603   :  { %v9455_v4 = vrot.slane %v9441_v7, 2  ;;  %9851 = vmatpush.bf16.msrb.mxu3 %v13205_v16  ;;  %v9446_v36 = vsel %vm1647_vm12, %v9445_v31, %v9429_v44  ;;  %v9457_v12 = vrot.slane %v9443_v18, 1  ;;  %v9341_v59 = vperm.slane %v17710_v9, 1  ;;  %10121 = vmatpush.bf16.msrb.mxu2 %v13220_v0  ;;  %v17809_v3 = vld [vmem:[#allocation2 + $0xf6] ss:$8 sm:$0x3] }
 0x604   :  { %v9343_v15 = vperm.slane %v17712_v32, 1  ;;  %v9448_v35 = vsel %vm1650_vm13, %v9447_v47, %v9446_v36  ;;  %v9345_v34 = vperm.slane %v17714_v25, 1  ;;  %v9347_v60 = vperm.slane %v17716_v53, 1  ;;  %v13218_v53 = vld [vmem:[%s17979_s6 + $0xcd8] sm:$0xff]  ;;  %v13212_v16 = vld [vmem:[%s17979_s6 + $0xca8] sm:$0xff] }
 0x605   :  { %v9349_v49 = vperm.slane %v17721_v41, 1  ;;  %v9450_v5 = vsel %vm1653_vm14, %v9449_v40, %v9448_v35  ;;  %v9351_v9 = vperm.slane %v17723_v61, 1  ;;  %v9353_v32 = vperm.slane %v17725_v24, 1  ;;  %v17811_v44 = vld [vmem:[#allocation2 + $0x136] ss:$8 sm:$0x3] }
 0x606   :  { %v9371_v17 = vpack.c.bf16 %v9339_v46, %v9339_v46  ;;  %v9452_v37 = vsel %vm1656_vm15, %v9451_v30, %v9450_v5  ;;  %v9373_v56 = vpack.c.bf16 %v9341_v59, %v9341_v59  ;;  %v9375_v48 = vpack.c.bf16 %v9343_v15, %v9343_v15  ;;  %v17816_v42 = vld [vmem:[#allocation2 + $0x176] ss:$8 sm:$0x3]  ;;  %10108 = vmatpush.bf16.msrb.mxu0 %v13212_v16  ;;  %v17848_v50 = vld [vmem:[#allocation2 + $0x137] ss:$8 sm:$0x3] }
 0x607   :  { %v9377_v11 = vpack.c.bf16 %v9345_v34, %v9345_v34  ;;  %v9454_v43 = vsel %vm1659_vm0, %v9453_v23, %v9452_v37  ;;  %v9379_v58 = vpack.c.bf16 %v9347_v60, %v9347_v60  ;;  %v9381_v25 = vpack.c.bf16 %v9349_v49, %v9349_v49  ;;  %10122 = vmatpush.bf16.msrb.mxu2 %v13219_v19  ;;  %v17818_v20 = vld [vmem:[#allocation2 + $0x1b6] ss:$8 sm:$0x3] }
 0x608   :  { %v9383_v28 = vpack.c.bf16 %v9351_v9, %v9351_v9  ;;  %v9456_v41 = vsel %vm1662_vm1, %v9455_v4, %v9454_v43  ;;  %v9385_v61 = vpack.c.bf16 %v9353_v32, %v9353_v32  ;;  %v9430_v24 = vunpack.c.l.b16 %v9371_v17  ;;  %v17822_v31 = vld [vmem:[#allocation2 + $0x1f6] ss:$8 sm:$0x3] }
 0x609   :  { %v9432_v22 = vunpack.c.l.b16 %v9373_v56  ;;  %v9458_v51 = vsel %vm1665_vm2, %v9457_v12, %v9456_v41  ;;  %v9434_v26 = vunpack.c.l.b16 %v9375_v48  ;;  %v9436_v38 = vunpack.c.l.b16 %v9377_v11  ;;  %v17839_v48 = vld [vmem:[#allocation2 + $0x37] ss:$8 sm:$0x3] }
 0x60a   :  { %v9438_v29 = vunpack.c.l.b16 %v9379_v58  ;;  %v9473_v27 = vpack.c.b16 %v9458_v51, %v9458_v51  ;;  %v9440_v21 = vunpack.c.l.b16 %v9381_v25  ;;  %v9442_v45 = vunpack.c.l.b16 %v9383_v28  ;;  %v17841_v11 = vld [vmem:[#allocation2 + $0x77] ss:$8 sm:$0x3] }
 0x60b   :  { %v9444_v55 = vunpack.c.l.b16 %v9385_v61  ;;  %v9459_v0 = vrot.slane %v9432_v22, 7  ;;  %v9461_v10 = vrot.slane %v9434_v26, 6  ;;  %v9463_v62 = vrot.slane %v9436_v38, 5  ;;  %10123 = vmatpush.bf16.msrb.mxu2 %v13218_v53  ;;  %v17844_v53 = vld [vmem:[#allocation2 + $0xb7] ss:$8 sm:$0x3]  ;;  %v17855_v38 = vpop.f32.mrf.mxu3 }
 0x60c   :  { %v9465_v63 = vrot.slane %v9438_v29, 4  ;;  %9567 = vmatmul.bf16.vlgmr.msra.gmra.mxu2 %v9473_v27  ;;  %v9467_v33 = vrot.slane %v9440_v21, 3  ;;  %v9469_v7 = vrot.slane %v9442_v45, 2  ;;  %v6590_v18 = vadd.f32 %v17732_v13, %v17730_v52  ;;  %v17846_v41 = vld [vmem:[#allocation2 + $0xf7] ss:$8 sm:$0x3]  ;;  %v17857_v29 = vpop.f32.mrf.mxu1 }
 0x60d   :  { %v9471_v54 = vrot.slane %v9444_v55, 1  ;;  %v9460_v47 = vsel %vm1647_vm12, %v9459_v0, %v9430_v24  ;;  %v9611_v40 = vperm.slane %v17802_v6, 1  ;;  %v9613_v30 = vperm.slane %v17804_v8, 1  ;;  %v17850_v51 = vld [vmem:[#allocation2 + $0x177] ss:$8 sm:$0x3] }
 0x60e   :  { %v9615_v23 = vperm.slane %v17806_v14, 1  ;;  %v9462_v4 = vsel %vm1650_vm13, %v9461_v10, %v9460_v47  ;;  %v6593_v46 = vadd.f32 %v6590_v18, %v17681_v2  ;;  %v9617_v36 = vperm.slane %v17809_v3, 1  ;;  %v13211_v26 = vld [vmem:[%s17979_s6 + $0xca0] sm:$0xff]  ;;  %v17859_v55 = vld [vmem:[#allocation2 + $0x1b7] ss:$8 sm:$0x3] }
 0x60f   :  { %v9619_v12 = vperm.slane %v17811_v44, 1  ;;  %v9464_v52 = vsel %vm1653_vm14, %v9463_v62, %v9462_v4  ;;  %v9621_v13 = vperm.slane %v17816_v42, 1  ;;  %v9623_v59 = vperm.slane %v17818_v20, 1  ;;  %10109 = vmatpush.bf16.msrb.mxu0 %v13211_v26 }
 0x610   :  { %v9625_v15 = vperm.slane %v17822_v31, 1  ;;  %v9466_v19 = vsel %vm1656_vm15, %v9465_v63, %v9464_v52  ;;  %v9643_v35 = vpack.c.bf16 %v9611_v40, %v9611_v40  ;;  %v9645_v34 = vpack.c.bf16 %v9613_v30, %v9613_v30  ;;  %v13210_v40 = vld [vmem:[%s17979_s6 + $0xc98] sm:$0xff] }
 0x611   :  { %v9647_v60 = vpack.c.bf16 %v9615_v23, %v9615_v23  ;;  %v9468_v49 = vsel %vm1659_vm0, %v9467_v33, %v9466_v19  ;;  %v9649_v2 = vpack.c.bf16 %v9617_v36, %v9617_v36  ;;  %v9651_v5 = vpack.c.bf16 %v9619_v12, %v9619_v12  ;;  %v17864_v33 = vld [vmem:[#allocation2 + $0x1f7] ss:$8 sm:$0x3] }
 0x612   :  { %v9653_v9 = vpack.c.bf16 %v9621_v13, %v9621_v13  ;;  %v9470_v32 = vsel %vm1662_vm1, %v9469_v7, %v9468_v49  ;;  %v9655_v17 = vpack.c.bf16 %v9623_v59, %v9623_v59  ;;  %v9657_v37 = vpack.c.bf16 %v9625_v15, %v9625_v15 }
 0x613   :  { %v9702_v56 = vunpack.c.l.b16 %v9643_v35  ;;  %v9472_v43 = vsel %vm1665_vm2, %v9471_v54, %v9470_v32  ;;  %v9704_v58 = vunpack.c.l.b16 %v9645_v34  ;;  %v9706_v25 = vunpack.c.l.b16 %v9647_v60  ;;  %10110 = vmatpush.bf16.msrb.mxu0 %v13210_v40  ;;  %v7122_v32 = vpop.f32.mrf.mxu3 }
 0x614   :  { %v9708_v28 = vunpack.c.l.b16 %v9649_v2  ;;  %v9474_v61 = vpack.c.b16 %v9472_v43, %v9472_v43  ;;  %v9710_v24 = vunpack.c.l.b16 %v9651_v5  ;;  %v9712_v22 = vunpack.c.l.b16 %v9653_v9 }
 0x615   :  { %v9714_v57 = vunpack.c.l.b16 %v9655_v17  ;;  %v9716_v16 = vunpack.c.l.b16 %v9657_v37  ;;  %v9731_v27 = vrot.slane %v9704_v58, 7  ;;  %v9733_v21 = vrot.slane %v9706_v25, 6  ;;  %v7135_v17 = vpop.f32.mrf.mxu1 }
 0x616   :  { %v9735_v45 = vrot.slane %v9708_v28, 5  ;;  %12611 = vmatmul.msk.bf16.vlgmr.msra.gmra.mxu0 %vm1410_vm9, %v9474_v61  ;;  %v9737_v0 = vrot.slane %v9710_v24, 4  ;;  %v9739_v10 = vrot.slane %v9712_v22, 3  ;;  %v6862_v63 = vadd.f32 %v17776_v1, %v17774_v39  ;;  %v17886_v22 = vpop.f32.mrf.mxu2 }
 0x617   :  { %v9741_v62 = vrot.slane %v9714_v57, 2  ;;  %v9732_v7 = vsel %vm1647_vm12, %v9731_v27, %v9702_v56  ;;  %v9743_v54 = vrot.slane %v9716_v16, 1  ;;  %v9883_v18 = vperm.slane %v17839_v48, 1  ;;  %v17888_v57 = vpop.f32.mrf.mxu0 }
 0x618   :  { %v9885_v47 = vperm.slane %v17841_v11, 1  ;;  %v9734_v30 = vsel %vm1650_vm13, %v9733_v21, %v9732_v7  ;;  %v17873_v23 = vadd.f32 %v6862_v63, %v6593_v46  ;;  %v9887_v39 = vperm.slane %v17844_v53, 1 }
 0x619   :  { %v9889_v1 = vperm.slane %v17846_v41, 1  ;;  %v9736_v4 = vsel %vm1653_vm14, %v9735_v45, %v9734_v30  ;;  %v9891_v36 = vperm.slane %v17848_v50, 1  ;;  %v9893_v12 = vperm.slane %v17850_v51, 1 }
 0x61a   :  { %v9895_v52 = vperm.slane %v17859_v55, 1  ;;  %v9738_v13 = vsel %vm1656_vm15, %v9737_v0, %v9736_v4  ;;  %v9897_v59 = vperm.slane %v17864_v33, 1  ;;  %v9915_v15 = vpack.c.bf16 %v9883_v18, %v9883_v18 }
 0x61b   :  { %v9917_v19 = vpack.c.bf16 %v9885_v47, %v9885_v47  ;;  %v9740_v46 = vsel %vm1659_vm0, %v9739_v10, %v9738_v13  ;;  %v9919_v35 = vpack.c.bf16 %v9887_v39, %v9887_v39  ;;  %v9921_v34 = vpack.c.bf16 %v9889_v1, %v9889_v1 }
 0x61c   :  { %v9923_v60 = vpack.c.bf16 %v9891_v36, %v9891_v36  ;;  %v9742_v49 = vsel %vm1662_vm1, %v9741_v62, %v9740_v46  ;;  %v9925_v2 = vpack.c.bf16 %v9893_v12, %v9893_v12  ;;  %v9927_v5 = vpack.c.bf16 %v9895_v52, %v9895_v52 }
 0x61d   :  { %v9929_v9 = vpack.c.bf16 %v9897_v59, %v9897_v59  ;;  %v9744_v37 = vsel %vm1665_vm2, %v9743_v54, %v9742_v49  ;;  %v9974_v56 = vunpack.c.l.b16 %v9915_v15  ;;  %v9976_v43 = vunpack.c.l.b16 %v9917_v19  ;;  %v17903_v59 = vpop.f32.mrf.mxu1 }
 0x61e   :  { %v9978_v58 = vunpack.c.l.b16 %v9919_v35  ;;  %v9746_v25 = vpack.c.b16 %v9744_v37, %v9744_v37  ;;  %v9980_v28 = vunpack.c.l.b16 %v9921_v34  ;;  %v9982_v61 = vunpack.c.l.b16 %v9923_v60 }
 0x61f   :  { %v9984_v24 = vunpack.c.l.b16 %v9925_v2  ;;  %v9986_v26 = vunpack.c.l.b16 %v9927_v5  ;;  %v9988_v16 = vunpack.c.l.b16 %v9929_v9  ;;  %v10003_v27 = vrot.slane %v9976_v43, 7  ;;  %v7407_v34 = vpop.f32.mrf.mxu0 }
 0x620   :  { %v10005_v21 = vrot.slane %v9978_v58, 6  ;;  %12690 = vmatmul.msk.bf16.vlgmr.msrb.gmra.mxu3 %vm1410_vm9, %v9746_v25  ;;  %v10007_v45 = vrot.slane %v9980_v28, 5  ;;  %v10009_v0 = vrot.slane %v9982_v61, 4  ;;  %v9610_v62 = vperm.slane %v17802_v6, 0 }
 0x621   :  { %v10011_v10 = vrot.slane %v9984_v24, 3  ;;  %v10004_v63 = vsel %vm1647_vm12, %v10003_v27, %v9974_v56  ;;  %v10013_v7 = vrot.slane %v9986_v26, 2  ;;  %v10015_v54 = vrot.slane %v9988_v16, 1 }
 0x622   :  { %v9612_v18 = vperm.slane %v17804_v8, 0  ;;  %v10006_v47 = vsel %vm1650_vm13, %v10005_v21, %v10004_v63  ;;  %v9614_v40 = vperm.slane %v17806_v14, 0  ;;  %v9616_v30 = vperm.slane %v17809_v3, 0  ;;  %v17905_v14 = vpop.f32.mrf.mxu3 }
 0x623   :  { %v9618_v39 = vperm.slane %v17811_v44, 0  ;;  %v10008_v1 = vsel %vm1653_vm14, %v10007_v45, %v10006_v47  ;;  %v9620_v4 = vperm.slane %v17816_v42, 0  ;;  %v9622_v6 = vperm.slane %v17818_v20, 0 }
 0x624   :  { %v9624_v36 = vperm.slane %v17822_v31, 0  ;;  %v10010_v12 = vsel %vm1656_vm15, %v10009_v0, %v10008_v1  ;;  %v9642_v52 = vpack.c.bf16 %v9610_v62, %v9610_v62  ;;  %v9644_v8 = vpack.c.bf16 %v9612_v18, %v9612_v18  ;;  %v7394_v31 = vpop.f32.mrf.mxu2 }
 0x625   :  { %v9646_v13 = vpack.c.bf16 %v9614_v40, %v9614_v40  ;;  %v10012_v3 = vsel %vm1659_vm0, %v10011_v10, %v10010_v12  ;;  %v9648_v44 = vpack.c.bf16 %v9616_v30, %v9616_v30  ;;  %v9650_v15 = vpack.c.bf16 %v9618_v39, %v9618_v39 }
 0x626   :  { %v9652_v19 = vpack.c.bf16 %v9620_v4, %v9620_v4  ;;  %v10014_v42 = vsel %vm1662_vm1, %v10013_v7, %v10012_v3  ;;  %v9654_v46 = vpack.c.bf16 %v9622_v6, %v9622_v6  ;;  %v9656_v20 = vpack.c.bf16 %v9624_v36, %v9624_v36  ;;  %v7666_v7 = vpop.f32.mrf.mxu1 }
 0x627   :  { %v9701_v35 = vunpack.c.l.b16 %v9642_v52  ;;  %v10016_v60 = vsel %vm1665_vm2, %v10015_v54, %v10014_v42  ;;  %v9703_v49 = vunpack.c.l.b16 %v9644_v8  ;;  %v9705_v2 = vunpack.c.l.b16 %v9646_v13  ;;  %v7936_v30 = vpop.f32.mrf.mxu0 }
 0x628   :  { %v9707_v5 = vunpack.c.l.b16 %v9648_v44  ;;  %v10018_v9 = vpack.c.b16 %v10016_v60, %v10016_v60  ;;  %v9709_v32 = vunpack.c.l.b16 %v9650_v15  ;;  %v9711_v17 = vunpack.c.l.b16 %v9652_v19 }
 0x629   :  { %v9713_v37 = vunpack.c.l.b16 %v9654_v46  ;;  %v9715_v56 = vunpack.c.l.b16 %v9656_v20  ;;  %v9717_v43 = vrot.slane %v9703_v49, 7  ;;  %v9719_v58 = vrot.slane %v9705_v2, 6 }
 0x62a   :  { %v9721_v25 = vrot.slane %v9707_v5, 5  ;;  %12769 = vmatmul.msk.bf16.vlgmr.msrb.gmra.mxu2 %vm1410_vm9, %v10018_v9  ;;  %v9723_v28 = vrot.slane %v9709_v32, 4  ;;  %v9725_v61 = vrot.slane %v9711_v17, 3  ;;  %v7134_v26 = vadd.f32 %v17857_v29, %v17855_v38  ;;  %v7679_v54 = vpop.f32.mrf.mxu3 }
 0x62b   :  { %v9727_v24 = vrot.slane %v9713_v37, 2  ;;  %v9718_v16 = vsel %vm1647_vm12, %v9717_v43, %v9701_v35  ;;  %v9729_v27 = vrot.slane %v9715_v56, 1  ;;  %v9882_v21 = vperm.slane %v17839_v48, 0 }
 0x62c   :  { %v9884_v45 = vperm.slane %v17841_v11, 0  ;;  %v9720_v0 = vsel %vm1650_vm13, %v9719_v58, %v9718_v16  ;;  %v7137_v10 = vadd.f32 %v7134_v26, %v17873_v23  ;;  %v9886_v62 = vperm.slane %v17844_v53, 0  ;;  %v7949_v53 = vpop.f32.mrf.mxu2 }
 0x62d   :  { %v9888_v63 = vperm.slane %v17846_v41, 0  ;;  %v9722_v18 = vsel %vm1653_vm14, %v9721_v25, %v9720_v0  ;;  %v9890_v38 = vperm.slane %v17848_v50, 0  ;;  %v9892_v29 = vperm.slane %v17850_v51, 0 }
 0x62e   :  { %v9894_v48 = vperm.slane %v17859_v55, 0  ;;  %v9724_v11 = vsel %vm1656_vm15, %v9723_v28, %v9722_v18  ;;  %v9896_v47 = vperm.slane %v17864_v33, 0  ;;  %v9914_v40 = vpack.c.bf16 %v9882_v21, %v9882_v21  ;;  %v8221_v60 = vpop.f32.mrf.mxu1 }
 0x62f   :  { %v9916_v23 = vpack.c.bf16 %v9884_v45, %v9884_v45  ;;  %v9726_v41 = vsel %vm1659_vm0, %v9725_v61, %v9724_v11  ;;  %v9918_v39 = vpack.c.bf16 %v9886_v62, %v9886_v62  ;;  %v9920_v1 = vpack.c.bf16 %v9888_v63, %v9888_v63  ;;  %v7938_v43 = vpop.f32.mrf.mxu0 }
 0x630   :  { %v9922_v4 = vpack.c.bf16 %v9890_v38, %v9890_v38  ;;  %v9728_v6 = vsel %vm1662_vm1, %v9727_v24, %v9726_v41  ;;  %v9924_v50 = vpack.c.bf16 %v9892_v29, %v9892_v29  ;;  %v9926_v36 = vpack.c.bf16 %v9894_v48, %v9894_v48 }
 0x631   :  { %v9928_v51 = vpack.c.bf16 %v9896_v47, %v9896_v47  ;;  %v9730_v55 = vsel %vm1665_vm2, %v9729_v27, %v9728_v6  ;;  %v9973_v12 = vunpack.c.l.b16 %v9914_v40  ;;  %v9975_v52 = vunpack.c.l.b16 %v9916_v23 }
 0x632   :  { %v9977_v8 = vunpack.c.l.b16 %v9918_v39  ;;  %v9745_v33 = vpack.c.b16 %v9730_v55, %v9730_v55  ;;  %v9979_v13 = vunpack.c.l.b16 %v9920_v1  ;;  %v9981_v3 = vunpack.c.l.b16 %v9922_v4  ;;  %v8208_v34 = vpop.f32.mrf.mxu3  ;;  %v10151_v1 = vld [vmem:[%s17981_s8 + $0x38] sm:$0xf] }
 0x633   :  { %v9983_v44 = vunpack.c.l.b16 %v9924_v50  ;;  %v9985_v15 = vunpack.c.l.b16 %v9926_v36  ;;  %v9987_v19 = vunpack.c.l.b16 %v9928_v51  ;;  %v9989_v42 = vrot.slane %v9975_v52, 7  ;;  %v13229_v51 = vld [vmem:[%s17981_s8 + $0x30] sm:$0xff] }
 0x634   :  { %v9991_v46 = vrot.slane %v9977_v8, 6  ;;  %9839 = vmatmul.bf16.vlgmr.msrb.gmra.mxu1 %v9745_v33  ;;  %v9993_v20 = vrot.slane %v9979_v13, 5  ;;  %v9995_v35 = vrot.slane %v9981_v3, 4  ;;  %v7406_v31 = vadd.f32 %v17888_v57, %v17886_v22  ;;  %v7951_v58 = vpop.f32.mrf.mxu2  ;;  %v13228_v8 = vld [vmem:[%s17981_s8 + $0x28] sm:$0xff]  ;;  %v13227_v13 = vld [vmem:[%s17981_s8 + $0x20] sm:$0xff] }
 0x635   :  { %v9990_v49 = vsel %vm1647_vm12, %v9989_v42, %v9973_v12  ;;  %v9997_v2 = vrot.slane %v9983_v44, 3  ;;  %v9999_v5 = vrot.slane %v9985_v15, 2  ;;  %v7678_v9 = vadd.f32 %v17905_v14, %v17903_v59  ;;  %v13226_v44 = vld [vmem:[%s17981_s8 + $0x18] sm:$0xff]  ;;  %v13224_v42 = vld [vmem:[%s17981_s8 + $0x8] sm:$0xff]  ;;  %v13289_v58 = vld [vmem:[%s17980_s7] ss:$0 sm:$0xff] }
 0x636   :  { %v9992_v32 = vsel %vm1650_vm13, %v9991_v46, %v9990_v49  ;;  %v7409_v17 = vadd.f32 %v7406_v31, %v7137_v10  ;;  %v7950_v37 = vadd.f32 %v7949_v53, %v7936_v30  ;;  %v8222_v56 = vadd.f32 %v8221_v60, %v8208_v34  ;;  %v8223_v21 = vpop.f32.mrf.mxu1 }
 0x637   :  { %v9994_v25 = vsel %vm1653_vm14, %v9993_v20, %v9992_v32  ;;  %v10001_v28 = vrot.slane %v9987_v19, 1  ;;  %v10185_v4 = vunpack.c.l.b16 %v10151_v1  ;;  %v13225_v19 = vld [vmem:[%s17981_s8 + $0x10] sm:$0xff]  ;;  %v13223_v20 = vld [vmem:[%s17981_s8] sm:$0xff] }
 0x638   :  { %v9996_v22 = vsel %vm1656_vm15, %v9995_v35, %v9994_v25  ;;  %v7681_v57 = vadd.f32 %v7678_v9, %v7409_v17 }
 0x639   :  { %v9998_v61 = vsel %vm1659_vm0, %v9997_v2, %v9996_v22  ;;  %v10193_v6 = vpack.c.b16 %v10185_v4, %v10185_v4 }
 0x63a   :  { %v10000_v24 = vsel %vm1662_vm1, %v9999_v5, %v9998_v61  ;;  %v7953_v26 = vadd.f32 %v7950_v37, %v7681_v57  ;;  %v8210_v27 = vpop.f32.mrf.mxu3 }
 0x63b   :  { %v10002_v59 = vsel %vm1665_vm2, %v10001_v28, %v10000_v24  ;;  %v10207_v36 = vsel %vm10205_vm3, %v10193_v6, 0  ;;  %v13290_v24 = vld [vmem:[%s17982_s9] ss:$0 sm:$0xff] }
 0x63c   :  { %v10017_v14 = vpack.c.b16 %v10002_v59, %v10002_v59  ;;  %v8225_v16 = vadd.f32 %v8222_v56, %v7953_v26  ;;  %10209 = vmatpush.bf16.msra.mxu3 %v10207_v36 }
 0x63e   :  { %10111 = vmatmul.bf16.vlgmr.msrb.gmra.mxu0 %v10017_v14  ;;  %v8480_v45 = vpop.f32.mrf.mxu2 }
 0x640   :  { %10210 = vmatpush.bf16.msra.mxu3 %v13229_v51 }
 0x641   :  { %v8493_v0 = vpop.f32.mrf.mxu0 }
 0x642   :  { %v8494_v10 = vadd.f32 %v8493_v0, %v8480_v45 }
 0x644   :  { %v8497_v62 = vadd.f32 %v8494_v10, %v8225_v16  ;;  %10211 = vmatpush.bf16.msra.mxu3 %v13228_v8 }
 0x646   :  { %v8482_v63 = vpop.f32.mrf.mxu2 }
 0x648   :  { %10212 = vmatpush.bf16.msra.mxu3 %v13227_v13 }
 0x649   :  { %v8495_v7 = vpop.f32.mrf.mxu0 }
 0x64c   :  { %10213 = vmatpush.bf16.msra.mxu3 %v13226_v44 }
 0x650   :  { %10214 = vmatpush.bf16.msra.mxu3 %v13225_v19 }
 0x651   :  { %v8765_v54 = vpop.f32.mrf.mxu3 }
 0x654   :  { %10215 = vmatpush.bf16.msra.mxu3 %v13224_v42 }
 0x656   :  { %v8752_v18 = vpop.f32.mrf.mxu1 }
 0x657   :  { %v8766_v38 = vadd.f32 %v8765_v54, %v8752_v18 }
 0x658   :  { %10216 = vmatpush.bf16.msra.mxu3 %v13223_v20 }
 0x659   :  { %v8769_v29 = vadd.f32 %v8766_v38, %v8497_v62  ;;  %v8767_v48 = vpop.f32.mrf.mxu3 }
 0x65e   :  { %v8754_v11 = vpop.f32.mrf.mxu1 }
 0x666   :  { %v9037_v47 = vpop.f32.mrf.mxu2 }
 0x66a   :  { %v9024_v40 = vpop.f32.mrf.mxu0 }
 0x66b   :  { %v9038_v23 = vadd.f32 %v9037_v47, %v9024_v40 }
 0x66d   :  { %v9041_v30 = vadd.f32 %v9038_v23, %v8769_v29 }
 0x66e   :  { %v9039_v53 = vpop.f32.mrf.mxu2 }
 0x672   :  { %v9026_v41 = vpop.f32.mrf.mxu0 }
 0x67a   :  { %v9296_v39 = vpop.f32.mrf.mxu3 }
 0x67f   :  { %v9309_v50 = vpop.f32.mrf.mxu1 }
 0x680   :  { %v9310_v60 = vadd.f32 %v9309_v50, %v9296_v39 }
 0x682   :  { %v9298_v55 = vpop.f32.mrf.mxu3  ;;  %v9313_v5 = vadd.f32 %v9310_v60, %v9041_v30 }
 0x687   :  { %v9311_v12 = vpop.f32.mrf.mxu1 }
 0x68f   :  { %v9568_v52 = vpop.f32.mrf.mxu2 }
 0x693   :  { %v9581_v33 = vpop.f32.mrf.mxu0 }
 0x694   :  { %v9582_v2 = vadd.f32 %v9581_v33, %v9568_v52 }
 0x696   :  { %v9585_v17 = vadd.f32 %v9582_v2, %v9313_v5 }
 0x697   :  { %v9570_v3 = vpop.f32.mrf.mxu2 }
 0x69b   :  { %v9583_v15 = vpop.f32.mrf.mxu0 }
 0x6a3   :  { %v9853_v46 = vpop.f32.mrf.mxu3 }
 0x6ab   :  { %v9855_v35 = vpop.f32.mrf.mxu3 }
 0x6ad   :  { %v10125_v31 = vpop.f32.mrf.mxu2 }
 0x6b1   :  { %v9840_v34 = vpop.f32.mrf.mxu1 }
 0x6b2   :  { %v9854_v9 = vadd.f32 %v9853_v46, %v9840_v34 }
 0x6b4   :  { %v9857_v56 = vadd.f32 %v9854_v9, %v9585_v17 }
 0x6b5   :  { %v10127_v49 = vpop.f32.mrf.mxu2 }
 0x6b9   :  { %v9842_v32 = vpop.f32.mrf.mxu1 }
 0x6bb   :  { %v10112_v37 = vpop.f32.mrf.mxu0 }
 0x6bc   :  { %v10126_v43 = vadd.f32 %v10125_v31, %v10112_v37 }
 0x6be   :  { %v10129_v25 = vadd.f32 %v10126_v43, %v9857_v56 }
 0x6c0   :  { %v10134_v28 = vadd.f32 %v13289_v58, %v10129_v25 }
 0x6c2   :  { %13291 = vtanh.f32 %v10134_v28 }
 0x6c3   :  { %v10114_v22 = vpop.f32.mrf.mxu0 }
 0x6c8   :  { %v13292_v57 = vpop.eup %13291 }
 0x6c9   :  { %v10136_v61 = vpack.c.bf16 %v13292_v57, %v13292_v57 }
 0x6cb   :  { %12798 = vmatmul.msk.bf16.vlgmr.msra.gmra.mxu3 %vm10201_vm4, %v10136_v61 }
 0x74e   :  { %v10218_v26 = vpop.f32.mrf.mxu3 }
 0x74f   :  { %v10219_v59 = vadd.f32 %v13290_v24, %v10218_v26 }
 0x751   :  { %10223 = vst.msk [vmem:[%s17983_s10] sm:$0xff] %vm10222_vm5, %v10219_v59 }
 0x756   :  { %v10220_v14 = vpop.f32.mrf.mxu3 }

</bundles_post_ra>
